<compile_context>
chip_gen: v7x
topology: tpu7x:2x2x1
jax: 0.10.0
libtpu: 0.0.40
codegen_flags: <defaults>
</compile_context>

<pallas_src>
import math

import jax
import jax.numpy as jnp
from jax.experimental import pallas as pl
from jax.experimental.pallas import tpu as pltpu

INPUT_DIM = 256
HIDDEN_DIM = 128
OUTPUT_DIM = 64
ADAPT_HIDDEN = 64

H = HIDDEN_DIM
G = 4 * HIDDEN_DIM  # 512 gate lanes per layer


# ----------------------------------------------------------------------------
# LSTM cell on pre-scaled / permuted gates.
# Gate layout (lanes): [0.5*i | 0.5*f | 0.5*o | g] pre-activations.
# sigmoid(x) = 0.5*tanh(0.5*x) + 0.5 (exact), so one tanh covers i,f,o,g.
# ----------------------------------------------------------------------------
def _lstm_cell(gates, c_prev):
    t = jnp.tanh(gates)                       # single EUP dispatch, all 4 gates
    ifo = 0.5 * t[:, : 3 * H] + 0.5           # == sigmoid of original i/f/o
    i = ifo[:, 0:H]
    f = ifo[:, H:2 * H]
    o = ifo[:, 2 * H:3 * H]
    g = t[:, 3 * H:]
    c_new = f * c_prev + i * g
    h_new = o * jnp.tanh(c_new)
    return h_new, c_new


# ----------------------------------------------------------------------------
# Single fused kernel
# ----------------------------------------------------------------------------
def fused_meta_kernel(
    x_ref,                                               # (Ns+Nq, 256) bf16 [support ; query]
    w1_ref, b1_ref, w2_ref, b2_ref, w3_ref, b3_ref,      # base learner (w3/b3 padded to 128)
    wih0x_ref, wih0p_ref, bl0_ref,                       # LSTM layer-0 input projection
    wbig_hbm,                                            # (256, 1024) bf16 in HBM
    bl1_ref,                                             # (1, 512) layer-1 bias
    wa1_ref, ba1_ref, wa2_ref, ba2_ref,                  # adaptation head (128-lane padded)
    sp_adapt_ref, meta_ref, qpred_ref,                   # outputs
    gproj_scr, wbig_vmem, dma_sem,                       # scratch
):
    Ns = meta_ref.shape[0]

    # Kick off the recurrence-weight DMA; hidden behind the batched matmuls below.
    wbig_cp = pltpu.make_async_copy(wbig_hbm, wbig_vmem, dma_sem)
    wbig_cp.start()

    # ---------------- base learner on stacked [support ; query] -------------
    x_all = x_ref[...]                                                    # bf16
    h = jnp.dot(x_all, w1_ref[...], preferred_element_type=jnp.float32) + b1_ref[...]
    h = jnp.maximum(h, 0.0)
    h = jnp.dot(h.astype(jnp.bfloat16), w2_ref[...],
                preferred_element_type=jnp.float32) + b2_ref[...]
    h = jnp.maximum(h, 0.0)
    # (Ns+Nq, 128); predictions in lanes 0:64, zeros in 64:128 (padded w3/b3).
    base_pad = jnp.dot(h.astype(jnp.bfloat16), w3_ref[...],
                       preferred_element_type=jnp.float32) + b3_ref[...]

    # ------------- LSTM layer-0 input projection (batched over time) --------
    # Computed on the full stack then row-sliced (f32 slice at a sublane-aligned
    # boundary); avoids a mid-vreg bf16 row slice and a duplicate cast.
    gp_full = (
        jnp.dot(x_all, wih0x_ref[...], preferred_element_type=jnp.float32)
        + jnp.dot(base_pad.astype(jnp.bfloat16), wih0p_ref[...],
                  preferred_element_type=jnp.float32)
        + bl0_ref[...]
    )                                                                      # (Ns+Nq, 512)
    gproj_scr[...] = gp_full[:Ns]

    # ---------------- interleaved 2-layer LSTM recurrence -------------------
    wbig_cp.wait()
    bl1 = bl1_ref[...]
    zrow = jnp.zeros((1, H), jnp.bfloat16)

    def fused_recurrence_matmul(h0, h1):
        # One M=2, K=256, N=1024 push: row0 -> [h0@whh0 | h0@wih1], row1 -> [h1@whh1 | 0]
        lhs = jnp.concatenate(
            [jnp.concatenate([h0.astype(jnp.bfloat16), zrow], axis=1),
             jnp.concatenate([zrow, h1.astype(jnp.bfloat16)], axis=1)],
            axis=0)                                                        # (2, 256) bf16
        res = jnp.dot(lhs, wbig_vmem[...], preferred_element_type=jnp.float32)  # (2, 1024)
        rec0 = res[0:1, :G]                          # h0 @ whh0
        pre1 = res[0:1, G:] + res[1:2, :G]           # h0 @ wih1 + h1 @ whh1
        return rec0, pre1

    # Prologue: layer-0 step 0 (h_{-1} = c_{-1} = 0 -> no recurrence matmul).
    h0, c0 = _lstm_cell(gproj_scr[pl.ds(0, 1), :], jnp.zeros((1, H), jnp.float32))
    h1 = jnp.zeros((1, H), jnp.float32)
    c1 = jnp.zeros((1, H), jnp.float32)

    # Main loop: iteration t = layer-0 step t + layer-1 step t-1 (independent).
    def step(t, carry):
        h0, c0, h1, c1 = carry
        rec0, pre1 = fused_recurrence_matmul(h0, h1)
        h0n, c0n = _lstm_cell(gproj_scr[pl.ds(t, 1), :] + rec0, c0)
        h1n, c1n = _lstm_cell(pre1 + bl1, c1)
        meta_ref[pl.ds(t - 1, 1), :] = h1n
        return (h0n, c0n, h1n, c1n)

    h0, c0, h1, c1 = jax.lax.fori_loop(1, Ns, step, (h0, c0, h1, c1), unroll=True)

    # Epilogue: layer-1 step Ns-1.
    _, pre1 = fused_recurrence_matmul(h0, h1)
    h1, c1 = _lstm_cell(pre1 + bl1, c1)
    meta_ref[pl.ds(Ns - 1, 1), :] = h1

    # ---------------- adaptation head + mean + query prediction -------------
    meta = meta_ref[...]
    ha = jnp.dot(meta.astype(jnp.bfloat16), wa1_ref[...],
                 preferred_element_type=jnp.float32) + ba1_ref[...]
    ha = jnp.maximum(ha, 0.0)
    # (Ns, 128); adaptation lives in lanes 64:128, zeros in 0:64 (padded wa2/ba2).
    adapt_pad = jnp.dot(ha.astype(jnp.bfloat16), wa2_ref[...],
                        preferred_element_type=jnp.float32) + ba2_ref[...]

    # Lane-dense packed outputs without any lane concatenation.
    sp_adapt_ref[...] = base_pad[:Ns] + adapt_pad          # [support_pred | adaptation]

    mean_pad = jnp.mean(adapt_pad, axis=0, keepdims=True)  # (1,128), real in 64:128
    mean_lo = pltpu.roll(mean_pad, OUTPUT_DIM, 1)          # move mean to lanes 0:64
    qpred_ref[...] = base_pad[Ns:] + mean_lo               # [query_pred | 0]


# ----------------------------------------------------------------------------
# Wrapper
# ----------------------------------------------------------------------------
def meta_learning_forward(params, support_set, query_set):
    Ns = support_set.shape[0]
    Nq = query_set.shape[0]
    # NOTE: Ns and Nq are assumed to be multiples of 8 (pad in the caller if not).
    x_all = jnp.concatenate([support_set, query_set], axis=0).astype(jnp.bfloat16)

    vmem = pl.BlockSpec(memory_space=pltpu.MemorySpace.VMEM)
    anyspace = pl.BlockSpec(memory_space=pl.ANY)

    sp_adapt, meta_feats, qpred = pl.pallas_call(
        fused_meta_kernel,
        out_shape=(
            jax.ShapeDtypeStruct((Ns, 2 * OUTPUT_DIM), jnp.float32),  # [support_pred | adaptation]
            jax.ShapeDtypeStruct((Ns, HIDDEN_DIM), jnp.float32),      # meta_features
            jax.ShapeDtypeStruct((Nq, 2 * OUTPUT_DIM), jnp.float32),  # [query_pred | pad]
        ),
        in_specs=[vmem] * 10 + [anyspace] + [vmem] * 5,
        out_specs=(vmem, vmem, vmem),
        scratch_shapes=[
            pltpu.VMEM((Ns, 4 * HIDDEN_DIM), jnp.float32),              # layer-0 gate pre-acts
            pltpu.VMEM((2 * HIDDEN_DIM, 8 * HIDDEN_DIM), jnp.bfloat16), # fused recurrence weight
            pltpu.SemaphoreType.DMA(()),
        ],
        cost_estimate=pl.CostEstimate(
            flops=20_000_000, transcendentals=12_000, bytes_accessed=1_400_000),
    )(x_all,
      params["w1"], params["b1"], params["w2"], params["b2"],
      params["w3p"], params["b3p"],
      params["wih0x"], params["wih0p"], params["bl0"],
      params["wbig"], params["bl1"],
      params["wa1p"], params["ba1p"], params["wa2p"], params["ba2p"])

    return {
        "support_predictions": sp_adapt[:, :OUTPUT_DIM],
        "query_predictions": qpred[:, :OUTPUT_DIM],
        "adaptation_vector": sp_adapt[:, OUTPUT_DIM:],
        "meta_features": meta_feats,
    }


# ----------------------------------------------------------------------------
# Parameter init (synthetic, PyTorch-style bounds) + kernel-layout preparation.
# Weights are stored (in, out) for x @ W; real PyTorch weights need a transpose
# and the same gate-permutation / packing done in prep_params().
# ----------------------------------------------------------------------------
def init_linear(key, fan_in, fan_out):
    kw, kb = jax.random.split(key)
    bound = 1.0 / math.sqrt(fan_in)
    w = jax.random.uniform(kw, (fan_in, fan_out), jnp.float32, -bound, bound)
    b = jax.random.uniform(kb, (1, fan_out), jnp.float32, -bound, bound)
    return w, b


def init_lstm_layer(key, in_dim, hidden):
    k1, k2, k3, k4 = jax.random.split(key, 4)
    bound = 1.0 / math.sqrt(hidden)
    wih = jax.random.uniform(k1, (in_dim, 4 * hidden), jnp.float32, -bound, bound)
    whh = jax.random.uniform(k2, (hidden, 4 * hidden), jnp.float32, -bound, bound)
    bih = jax.random.uniform(k3, (1, 4 * hidden), jnp.float32, -bound, bound)
    bhh = jax.random.uniform(k4, (1, 4 * hidden), jnp.float32, -bound, bound)
    return wih, whh, bih + bhh                     # fold the two biases


def init_params(key):
    keys = jax.random.split(key, 7)
    w1, b1 = init_linear(keys[0], INPUT_DIM, HIDDEN_DIM)
    w2, b2 = init_linear(keys[1], HIDDEN_DIM, HIDDEN_DIM)
    w3, b3 = init_linear(keys[2], HIDDEN_DIM, OUTPUT_DIM)
    wih0, whh0, bl0 = init_lstm_layer(keys[3], INPUT_DIM + OUTPUT_DIM, HIDDEN_DIM)
    wih1, whh1, bl1 = init_lstm_layer(keys[4], HIDDEN_DIM, HIDDEN_DIM)
    wa1, ba1 = init_linear(keys[5], HIDDEN_DIM, ADAPT_HIDDEN)
    wa2, ba2 = init_linear(keys[6], ADAPT_HIDDEN, OUTPUT_DIM)
    return dict(w1=w1, b1=b1, w2=w2, b2=b2, w3=w3, b3=b3,
                wih0=wih0, whh0=whh0, bl0=bl0,
                wih1=wih1, whh1=whh1, bl1=bl1,
                wa1=wa1, ba1=ba1, wa2=wa2, ba2=ba2)


def _prep_gate_cols(w):
    """Permute PyTorch gate order (i,f,g,o) -> (i,f,o,g) and pre-scale i/f/o by
    0.5 so the kernel can use one tanh per gate vector (sigmoid identity)."""
    i, f, g, o = jnp.split(w, 4, axis=-1)
    return jnp.concatenate([0.5 * i, 0.5 * f, 0.5 * o, g], axis=-1)


def prep_params(raw):
    bf = lambda a: a.astype(jnp.bfloat16)
    zeros = jnp.zeros

    # base learner: pad final layer to 128 output lanes (zeros in 64:128).
    w3p = jnp.concatenate([raw["w3"], zeros((H, H - OUTPUT_DIM), jnp.float32)], axis=1)
    b3p = jnp.concatenate([raw["b3"], zeros((1, H - OUTPUT_DIM), jnp.float32)], axis=1)

    # LSTM: permute/scale gate columns, split layer-0 input projection.
    wih0 = _prep_gate_cols(raw["wih0"])
    whh0 = _prep_gate_cols(raw["whh0"])
    bl0 = _prep_gate_cols(raw["bl0"])
    wih1 = _prep_gate_cols(raw["wih1"])
    whh1 = _prep_gate_cols(raw["whh1"])
    bl1 = _prep_gate_cols(raw["bl1"])

    wih0x = wih0[:INPUT_DIM]                         # multiplies support_set
    # rows 256:320 multiply base(x); pad to 128 rows (base_pad lanes 64:128 are 0)
    wih0p = jnp.concatenate(
        [wih0[INPUT_DIM:], zeros((H - OUTPUT_DIM, 4 * H), jnp.float32)], axis=0)

    # Fused recurrence block: [[whh0 | wih1], [whh1 | 0]]  -> (256, 1024)
    wbig = jnp.concatenate([
        jnp.concatenate([whh0, wih1], axis=1),
        jnp.concatenate([whh1, zeros((H, 4 * H), jnp.float32)], axis=1),
    ], axis=0)

    # adaptation head padded to 128 lanes; wa2 output placed in lanes 64:128.
    wa1p = jnp.concatenate([raw["wa1"], zeros((H, H - ADAPT_HIDDEN), jnp.float32)], axis=1)
    ba1p = jnp.concatenate([raw["ba1"], zeros((1, H - ADAPT_HIDDEN), jnp.float32)], axis=1)
    wa2p = jnp.zeros((H, H), jnp.float32).at[:ADAPT_HIDDEN, OUTPUT_DIM:].set(raw["wa2"])
    ba2p = jnp.concatenate([zeros((1, OUTPUT_DIM), jnp.float32), raw["ba2"]], axis=1)

    return dict(
        w1=bf(raw["w1"]), b1=raw["b1"], w2=bf(raw["w2"]), b2=raw["b2"],
        w3p=bf(w3p), b3p=b3p,
        wih0x=bf(wih0x), wih0p=bf(wih0p), bl0=bl0,
        wbig=bf(wbig), bl1=bl1,
        wa1p=bf(wa1p), ba1p=ba1p, wa2p=bf(wa2p), ba2p=ba2p,
    )


# ----------------------------------------------------------------------------
# Pure-JAX f32 reference (mirrors the PyTorch module exactly) for validation.
# ----------------------------------------------------------------------------
def reference_forward(raw, support_set, query_set):
    def mlp_base(x):
        h = jax.nn.relu(x @ raw["w1"] + raw["b1"])
        h = jax.nn.relu(h @ raw["w2"] + raw["b2"])
        return h @ raw["w3"] + raw["b3"]

    support_pred = mlp_base(support_set)
    meta_in = jnp.concatenate([support_set, support_pred], axis=-1)

    def lstm_layer(xs, wih, whh, bl):
        def step(carry, x):
            h, c = carry
            gates = x @ wih + h @ whh + bl[0]
            i = jax.nn.sigmoid(gates[0:H])
            f = jax.nn.sigmoid(gates[H:2 * H])
            g = jnp.tanh(gates[2 * H:3 * H])
            o = jax.nn.sigmoid(gates[3 * H:4 * H])
            c = f * c + i * g
            h = o * jnp.tanh(c)
            return (h, c), h
        _, hs = jax.lax.scan(step, (jnp.zeros(H), jnp.zeros(H)), xs)
        return hs

    h0_seq = lstm_layer(meta_in, raw["wih0"], raw["whh0"], raw["bl0"])
    meta_out = lstm_layer(h0_seq, raw["wih1"], raw["whh1"], raw["bl1"])

    ha = jax.nn.relu(meta_out @ raw["wa1"] + raw["ba1"])
    adaptation = ha @ raw["wa2"] + raw["ba2"]
    query_pred = mlp_base(query_set) + adaptation.mean(axis=0, keepdims=True)
    return dict(support_predictions=support_pred, query_predictions=query_pred,
                adaptation_vector=adaptation, meta_features=meta_out)


if __name__ == "__main__":
    key = jax.random.PRNGKey(0)
    k_params, k_sup, k_qry = jax.random.split(key, 3)

    raw = init_params(k_params)
    params = prep_params(raw)

    n_support, n_query = 8, 8
    support_set = jax.random.normal(k_sup, (n_support, INPUT_DIM), jnp.float32)
    query_set = jax.random.normal(k_qry, (n_query, INPUT_DIM), jnp.float32)

    forward = jax.jit(meta_learning_forward)
    out = forward(params, support_set, query_set)
    jax.block_until_ready(out)

    assert out["support_predictions"].shape == (n_support, OUTPUT_DIM)
    assert out["query_predictions"].shape == (n_query, OUTPUT_DIM)
    assert out["adaptation_vector"].shape == (n_support, OUTPUT_DIM)
    assert out["meta_features"].shape == (n_support, HIDDEN_DIM)
    for v in out.values():
        assert bool(jnp.all(jnp.isfinite(v)))

    # Tolerance check vs. f32 reference (bf16 matmul weights -> loose threshold).
    ref = reference_forward(raw, support_set, query_set)
    for name in out:
        err = float(jnp.max(jnp.abs(out[name] - ref[name])))
        assert err < 1e-1, f"{name}: max abs err {err}"

    print("KERNEL_OK")
</pallas_src>

<mosaic_0001>
module attributes {stable_mosaic.version = 11 : i64} {
  func.func @fused_meta_kernel(%arg0: memref<16x256xbf16, #tpu.memory_space<vmem>>, %arg1: memref<256x128xbf16, #tpu.memory_space<vmem>>, %arg2: memref<1x128xf32, #tpu.memory_space<vmem>>, %arg3: memref<128x128xbf16, #tpu.memory_space<vmem>>, %arg4: memref<1x128xf32, #tpu.memory_space<vmem>>, %arg5: memref<128x128xbf16, #tpu.memory_space<vmem>>, %arg6: memref<1x128xf32, #tpu.memory_space<vmem>>, %arg7: memref<256x512xbf16, #tpu.memory_space<vmem>>, %arg8: memref<128x512xbf16, #tpu.memory_space<vmem>>, %arg9: memref<1x512xf32, #tpu.memory_space<vmem>>, %arg10: memref<256x1024xbf16, #tpu.memory_space<any>>, %arg11: memref<1x512xf32, #tpu.memory_space<vmem>>, %arg12: memref<128x128xbf16, #tpu.memory_space<vmem>>, %arg13: memref<1x128xf32, #tpu.memory_space<vmem>>, %arg14: memref<128x128xbf16, #tpu.memory_space<vmem>>, %arg15: memref<1x128xf32, #tpu.memory_space<vmem>>, %arg16: memref<8x128xf32, #tpu.memory_space<vmem>>, %arg17: memref<8x128xf32, #tpu.memory_space<vmem>>, %arg18: memref<8x128xf32, #tpu.memory_space<vmem>>, %arg19: memref<8x512xf32, #tpu.memory_space<vmem>>, %arg20: memref<256x1024xbf16, #tpu.memory_space<vmem>>, %arg21: memref<!tpu.dma_semaphore, #tpu.memory_space<semaphore_mem>>) attributes {dimension_semantics = [], scalar_prefetch = 0 : i64, scratch_operands = 3 : i64, tpu.core_type = #tpu.core_type<tc>} {
    tpu.enqueue_dma source(%arg10 : memref<256x1024xbf16, #tpu.memory_space<any>>) target(%arg20 : memref<256x1024xbf16, #tpu.memory_space<vmem>>) target_semaphore(%arg21 : memref<!tpu.dma_semaphore, #tpu.memory_space<semaphore_mem>>)
    %c0 = arith.constant 0 : index
    %c0_0 = arith.constant 0 : index
    %0 = vector.load %arg0[%c0, %c0_0] : memref<16x256xbf16, #tpu.memory_space<vmem>>, vector<16x256xbf16>
    %c0_1 = arith.constant 0 : index
    %c0_2 = arith.constant 0 : index
    %1 = vector.load %arg1[%c0_1, %c0_2] : memref<256x128xbf16, #tpu.memory_space<vmem>>, vector<256x128xbf16>
    %cst = arith.constant dense<0.000000e+00> : vector<16x128xf32>
    %2 = tpu.matmul %0, %1, %cst {dimension_numbers = #tpu.dot_dimension_numbers<[1], [0], [0], [1], [0, 0, 1, 1], [], []>} : vector<16x256xbf16>, vector<256x128xbf16>, vector<16x128xf32> -> vector<16x128xf32>
    %c0_3 = arith.constant 0 : index
    %c0_4 = arith.constant 0 : index
    %3 = vector.load %arg2[%c0_3, %c0_4] : memref<1x128xf32, #tpu.memory_space<vmem>>, vector<1x128xf32>
    %4 = vector.broadcast %3 : vector<1x128xf32> to vector<16x128xf32>
    %5 = arith.addf %2, %4 : vector<16x128xf32>
    %cst_5 = arith.constant 0.000000e+00 : f32
    %6 = vector.broadcast %cst_5 : f32 to vector<16x128xf32>
    %7 = arith.maximumf %5, %6 : vector<16x128xf32>
    %8 = arith.truncf %7 : vector<16x128xf32> to vector<16x128xbf16>
    %c0_6 = arith.constant 0 : index
    %c0_7 = arith.constant 0 : index
    %9 = vector.load %arg3[%c0_6, %c0_7] : memref<128x128xbf16, #tpu.memory_space<vmem>>, vector<128x128xbf16>
    %cst_8 = arith.constant dense<0.000000e+00> : vector<16x128xf32>
    %10 = tpu.matmul %8, %9, %cst_8 {dimension_numbers = #tpu.dot_dimension_numbers<[1], [0], [0], [1], [0, 0, 1, 1], [], []>} : vector<16x128xbf16>, vector<128x128xbf16>, vector<16x128xf32> -> vector<16x128xf32>
    %c0_9 = arith.constant 0 : index
    %c0_10 = arith.constant 0 : index
    %11 = vector.load %arg4[%c0_9, %c0_10] : memref<1x128xf32, #tpu.memory_space<vmem>>, vector<1x128xf32>
    %12 = vector.broadcast %11 : vector<1x128xf32> to vector<16x128xf32>
    %13 = arith.addf %10, %12 : vector<16x128xf32>
    %cst_11 = arith.constant 0.000000e+00 : f32
    %14 = vector.broadcast %cst_11 : f32 to vector<16x128xf32>
    %15 = arith.maximumf %13, %14 : vector<16x128xf32>
    %16 = arith.truncf %15 : vector<16x128xf32> to vector<16x128xbf16>
    %c0_12 = arith.constant 0 : index
    %c0_13 = arith.constant 0 : index
    %17 = vector.load %arg5[%c0_12, %c0_13] : memref<128x128xbf16, #tpu.memory_space<vmem>>, vector<128x128xbf16>
    %cst_14 = arith.constant dense<0.000000e+00> : vector<16x128xf32>
    %18 = tpu.matmul %16, %17, %cst_14 {dimension_numbers = #tpu.dot_dimension_numbers<[1], [0], [0], [1], [0, 0, 1, 1], [], []>} : vector<16x128xbf16>, vector<128x128xbf16>, vector<16x128xf32> -> vector<16x128xf32>
    %c0_15 = arith.constant 0 : index
    %c0_16 = arith.constant 0 : index
    %19 = vector.load %arg6[%c0_15, %c0_16] : memref<1x128xf32, #tpu.memory_space<vmem>>, vector<1x128xf32>
    %20 = vector.broadcast %19 : vector<1x128xf32> to vector<16x128xf32>
    %21 = arith.addf %18, %20 : vector<16x128xf32>
    %c0_17 = arith.constant 0 : index
    %c0_18 = arith.constant 0 : index
    %22 = vector.load %arg7[%c0_17, %c0_18] : memref<256x512xbf16, #tpu.memory_space<vmem>>, vector<256x512xbf16>
    %cst_19 = arith.constant dense<0.000000e+00> : vector<16x512xf32>
    %23 = tpu.matmul %0, %22, %cst_19 {dimension_numbers = #tpu.dot_dimension_numbers<[1], [0], [0], [1], [0, 0, 1, 1], [], []>} : vector<16x256xbf16>, vector<256x512xbf16>, vector<16x512xf32> -> vector<16x512xf32>
    %24 = arith.truncf %21 : vector<16x128xf32> to vector<16x128xbf16>
    %c0_20 = arith.constant 0 : index
    %c0_21 = arith.constant 0 : index
    %25 = vector.load %arg8[%c0_20, %c0_21] : memref<128x512xbf16, #tpu.memory_space<vmem>>, vector<128x512xbf16>
    %cst_22 = arith.constant dense<0.000000e+00> : vector<16x512xf32>
    %26 = tpu.matmul %24, %25, %cst_22 {dimension_numbers = #tpu.dot_dimension_numbers<[1], [0], [0], [1], [0, 0, 1, 1], [], []>} : vector<16x128xbf16>, vector<128x512xbf16>, vector<16x512xf32> -> vector<16x512xf32>
    %27 = arith.addf %23, %26 : vector<16x512xf32>
    %c0_23 = arith.constant 0 : index
    %c0_24 = arith.constant 0 : index
    %28 = vector.load %arg9[%c0_23, %c0_24] : memref<1x512xf32, #tpu.memory_space<vmem>>, vector<1x512xf32>
    %29 = vector.broadcast %28 : vector<1x512xf32> to vector<16x512xf32>
    %30 = arith.addf %27, %29 : vector<16x512xf32>
    %31 = vector.extract_strided_slice %30 {offsets = [0, 0], sizes = [8, 512], strides = [1, 1]} : vector<16x512xf32> to vector<8x512xf32>
    %c0_25 = arith.constant 0 : index
    %c0_26 = arith.constant 0 : index
    %32 = vector.load %arg19[%c0_25, %c0_26] : memref<8x512xf32, #tpu.memory_space<vmem>>, vector<8x512xf32>
    tpu.vector_store %arg19[%c0_25, %c0_26], %31 {strides = array<i32>} : memref<8x512xf32, #tpu.memory_space<vmem>>, vector<8x512xf32>,
    tpu.wait_dma2 semaphore(%arg21 : memref<!tpu.dma_semaphore, #tpu.memory_space<semaphore_mem>>) src(%arg10 : memref<256x1024xbf16, #tpu.memory_space<any>>) dst(%arg20 : memref<256x1024xbf16, #tpu.memory_space<vmem>>)
    %c0_27 = arith.constant 0 : index
    %c0_28 = arith.constant 0 : index
    %33 = vector.load %arg11[%c0_27, %c0_28] : memref<1x512xf32, #tpu.memory_space<vmem>>, vector<1x512xf32>
    %cst_29 = arith.constant 0.000000e+00 : bf16
    %34 = vector.broadcast %cst_29 : bf16 to vector<1x128xbf16>
    %c0_30 = arith.constant 0 : index
    %c0_31 = arith.constant 0 : index
    %35 = vector.load %arg19[%c0_30, %c0_31] : memref<8x512xf32, #tpu.memory_space<vmem>>, vector<1x512xf32>
    %cst_32 = arith.constant 0.000000e+00 : f32
    %36 = vector.broadcast %cst_32 : f32 to vector<1x128xf32>
    %37 = math.tanh %35 : vector<1x512xf32>
    %38 = vector.extract_strided_slice %37 {offsets = [0, 0], sizes = [1, 384], strides = [1, 1]} : vector<1x512xf32> to vector<1x384xf32>
    %cst_33 = arith.constant 5.000000e-01 : f32
    %39 = vector.broadcast %cst_33 : f32 to vector<1x384xf32>
    %40 = arith.mulf %39, %38 : vector<1x384xf32>
    %cst_34 = arith.constant 5.000000e-01 : f32
    %41 = vector.broadcast %cst_34 : f32 to vector<1x384xf32>
    %42 = arith.addf %40, %41 : vector<1x384xf32>
    %43 = vector.extract_strided_slice %42 {offsets = [0, 0], sizes = [1, 128], strides = [1, 1]} : vector<1x384xf32> to vector<1x128xf32>
    %44 = vector.extract_strided_slice %42 {offsets = [0, 128], sizes = [1, 128], strides = [1, 1]} : vector<1x384xf32> to vector<1x128xf32>
    %45 = vector.extract_strided_slice %42 {offsets = [0, 256], sizes = [1, 128], strides = [1, 1]} : vector<1x384xf32> to vector<1x128xf32>
    %46 = vector.extract_strided_slice %37 {offsets = [0, 384], sizes = [1, 128], strides = [1, 1]} : vector<1x512xf32> to vector<1x128xf32>
    %47 = arith.mulf %44, %36 : vector<1x128xf32>
    %48 = arith.mulf %43, %46 : vector<1x128xf32>
    %49 = arith.addf %47, %48 : vector<1x128xf32>
    %50 = math.tanh %49 : vector<1x128xf32>
    %51 = arith.mulf %45, %50 : vector<1x128xf32>
    %cst_35 = arith.constant 0.000000e+00 : f32
    %52 = vector.broadcast %cst_35 : f32 to vector<1x128xf32>
    %cst_36 = arith.constant 0.000000e+00 : f32
    %53 = vector.broadcast %cst_36 : f32 to vector<1x128xf32>
    %c1_i32 = arith.constant 1 : i32
    %54 = arith.truncf %51 : vector<1x128xf32> to vector<1x128xbf16>
    %55 = tpu.concatenate %54, %34 in 1 : vector<1x128xbf16>, vector<1x128xbf16> -> vector<1x256xbf16>
    %56 = arith.truncf %52 : vector<1x128xf32> to vector<1x128xbf16>
    %57 = tpu.concatenate %34, %56 in 1 : vector<1x128xbf16>, vector<1x128xbf16> -> vector<1x256xbf16>
    %58 = tpu.concatenate %55, %57 in 0 : vector<1x256xbf16>, vector<1x256xbf16> -> vector<2x256xbf16>
    %c0_37 = arith.constant 0 : index
    %c0_38 = arith.constant 0 : index
    %59 = vector.load %arg20[%c0_37, %c0_38] : memref<256x1024xbf16, #tpu.memory_space<vmem>>, vector<256x1024xbf16>
    %cst_39 = arith.constant dense<0.000000e+00> : vector<2x1024xf32>
    %60 = tpu.matmul %58, %59, %cst_39 {dimension_numbers = #tpu.dot_dimension_numbers<[1], [0], [0], [1], [0, 0, 1, 1], [], []>} : vector<2x256xbf16>, vector<256x1024xbf16>, vector<2x1024xf32> -> vector<2x1024xf32>
    %61 = vector.extract_strided_slice %60 {offsets = [0, 0], sizes = [1, 512], strides = [1, 1]} : vector<2x1024xf32> to vector<1x512xf32>
    %62 = vector.extract_strided_slice %60 {offsets = [0, 512], sizes = [1, 512], strides = [1, 1]} : vector<2x1024xf32> to vector<1x512xf32>
    %63 = vector.extract_strided_slice %60 {offsets = [1, 0], sizes = [1, 512], strides = [1, 1]} : vector<2x1024xf32> to vector<1x512xf32>
    %64 = arith.addf %62, %63 : vector<1x512xf32>
    %65 = arith.index_cast %c1_i32 : i32 to index
    %c0_40 = arith.constant 0 : index
    %66 = vector.load %arg19[%65, %c0_40] : memref<8x512xf32, #tpu.memory_space<vmem>>, vector<1x512xf32>
    %67 = arith.addf %66, %61 : vector<1x512xf32>
    %68 = math.tanh %67 : vector<1x512xf32>
    %69 = vector.extract_strided_slice %68 {offsets = [0, 0], sizes = [1, 384], strides = [1, 1]} : vector<1x512xf32> to vector<1x384xf32>
    %cst_41 = arith.constant 5.000000e-01 : f32
    %70 = vector.broadcast %cst_41 : f32 to vector<1x384xf32>
    %71 = arith.mulf %70, %69 : vector<1x384xf32>
    %cst_42 = arith.constant 5.000000e-01 : f32
    %72 = vector.broadcast %cst_42 : f32 to vector<1x384xf32>
    %73 = arith.addf %71, %72 : vector<1x384xf32>
    %74 = vector.extract_strided_slice %73 {offsets = [0, 0], sizes = [1, 128], strides = [1, 1]} : vector<1x384xf32> to vector<1x128xf32>
    %75 = vector.extract_strided_slice %73 {offsets = [0, 128], sizes = [1, 128], strides = [1, 1]} : vector<1x384xf32> to vector<1x128xf32>
    %76 = vector.extract_strided_slice %73 {offsets = [0, 256], sizes = [1, 128], strides = [1, 1]} : vector<1x384xf32> to vector<1x128xf32>
    %77 = vector.extract_strided_slice %68 {offsets = [0, 384], sizes = [1, 128], strides = [1, 1]} : vector<1x512xf32> to vector<1x128xf32>
    %78 = arith.mulf %75, %49 : vector<1x128xf32>
    %79 = arith.mulf %74, %77 : vector<1x128xf32>
    %80 = arith.addf %78, %79 : vector<1x128xf32>
    %81 = math.tanh %80 : vector<1x128xf32>
    %82 = arith.mulf %76, %81 : vector<1x128xf32>
    %83 = arith.addf %64, %33 : vector<1x512xf32>
    %84 = math.tanh %83 : vector<1x512xf32>
    %85 = vector.extract_strided_slice %84 {offsets = [0, 0], sizes = [1, 384], strides = [1, 1]} : vector<1x512xf32> to vector<1x384xf32>
    %cst_43 = arith.constant 5.000000e-01 : f32
    %86 = vector.broadcast %cst_43 : f32 to vector<1x384xf32>
    %87 = arith.mulf %86, %85 : vector<1x384xf32>
    %cst_44 = arith.constant 5.000000e-01 : f32
    %88 = vector.broadcast %cst_44 : f32 to vector<1x384xf32>
    %89 = arith.addf %87, %88 : vector<1x384xf32>
    %90 = vector.extract_strided_slice %89 {offsets = [0, 0], sizes = [1, 128], strides = [1, 1]} : vector<1x384xf32> to vector<1x128xf32>
    %91 = vector.extract_strided_slice %89 {offsets = [0, 128], sizes = [1, 128], strides = [1, 1]} : vector<1x384xf32> to vector<1x128xf32>
    %92 = vector.extract_strided_slice %89 {offsets = [0, 256], sizes = [1, 128], strides = [1, 1]} : vector<1x384xf32> to vector<1x128xf32>
    %93 = vector.extract_strided_slice %84 {offsets = [0, 384], sizes = [1, 128], strides = [1, 1]} : vector<1x512xf32> to vector<1x128xf32>
    %94 = arith.mulf %91, %53 : vector<1x128xf32>
    %95 = arith.mulf %90, %93 : vector<1x128xf32>
    %96 = arith.addf %94, %95 : vector<1x128xf32>
    %97 = math.tanh %96 : vector<1x128xf32>
    %98 = arith.mulf %92, %97 : vector<1x128xf32>
    %c1_i32_45 = arith.constant 1 : i32
    %99 = arith.subi %c1_i32, %c1_i32_45 : i32
    %100 = arith.index_cast %99 : i32 to index
    %c0_46 = arith.constant 0 : index
    %101 = vector.load %arg17[%100, %c0_46] : memref<8x128xf32, #tpu.memory_space<vmem>>, vector<1x128xf32>
    tpu.vector_store %arg17[%100, %c0_46], %98 {strides = array<i32>} : memref<8x128xf32, #tpu.memory_space<vmem>>, vector<1x128xf32>,
    %c2_i32 = arith.constant 2 : i32
    %102 = arith.truncf %82 : vector<1x128xf32> to vector<1x128xbf16>
    %103 = tpu.concatenate %102, %34 in 1 : vector<1x128xbf16>, vector<1x128xbf16> -> vector<1x256xbf16>
    %104 = arith.truncf %98 : vector<1x128xf32> to vector<1x128xbf16>
    %105 = tpu.concatenate %34, %104 in 1 : vector<1x128xbf16>, vector<1x128xbf16> -> vector<1x256xbf16>
    %106 = tpu.concatenate %103, %105 in 0 : vector<1x256xbf16>, vector<1x256xbf16> -> vector<2x256xbf16>
    %c0_47 = arith.constant 0 : index
    %c0_48 = arith.constant 0 : index
    %107 = vector.load %arg20[%c0_47, %c0_48] : memref<256x1024xbf16, #tpu.memory_space<vmem>>, vector<256x1024xbf16>
    %cst_49 = arith.constant dense<0.000000e+00> : vector<2x1024xf32>
    %108 = tpu.matmul %106, %107, %cst_49 {dimension_numbers = #tpu.dot_dimension_numbers<[1], [0], [0], [1], [0, 0, 1, 1], [], []>} : vector<2x256xbf16>, vector<256x1024xbf16>, vector<2x1024xf32> -> vector<2x1024xf32>
    %109 = vector.extract_strided_slice %108 {offsets = [0, 0], sizes = [1, 512], strides = [1, 1]} : vector<2x1024xf32> to vector<1x512xf32>
    %110 = vector.extract_strided_slice %108 {offsets = [0, 512], sizes = [1, 512], strides = [1, 1]} : vector<2x1024xf32> to vector<1x512xf32>
    %111 = vector.extract_strided_slice %108 {offsets = [1, 0], sizes = [1, 512], strides = [1, 1]} : vector<2x1024xf32> to vector<1x512xf32>
    %112 = arith.addf %110, %111 : vector<1x512xf32>
    %113 = arith.index_cast %c2_i32 : i32 to index
    %c0_50 = arith.constant 0 : index
    %114 = vector.load %arg19[%113, %c0_50] : memref<8x512xf32, #tpu.memory_space<vmem>>, vector<1x512xf32>
    %115 = arith.addf %114, %109 : vector<1x512xf32>
    %116 = math.tanh %115 : vector<1x512xf32>
    %117 = vector.extract_strided_slice %116 {offsets = [0, 0], sizes = [1, 384], strides = [1, 1]} : vector<1x512xf32> to vector<1x384xf32>
    %cst_51 = arith.constant 5.000000e-01 : f32
    %118 = vector.broadcast %cst_51 : f32 to vector<1x384xf32>
    %119 = arith.mulf %118, %117 : vector<1x384xf32>
    %cst_52 = arith.constant 5.000000e-01 : f32
    %120 = vector.broadcast %cst_52 : f32 to vector<1x384xf32>
    %121 = arith.addf %119, %120 : vector<1x384xf32>
    %122 = vector.extract_strided_slice %121 {offsets = [0, 0], sizes = [1, 128], strides = [1, 1]} : vector<1x384xf32> to vector<1x128xf32>
    %123 = vector.extract_strided_slice %121 {offsets = [0, 128], sizes = [1, 128], strides = [1, 1]} : vector<1x384xf32> to vector<1x128xf32>
    %124 = vector.extract_strided_slice %121 {offsets = [0, 256], sizes = [1, 128], strides = [1, 1]} : vector<1x384xf32> to vector<1x128xf32>
    %125 = vector.extract_strided_slice %116 {offsets = [0, 384], sizes = [1, 128], strides = [1, 1]} : vector<1x512xf32> to vector<1x128xf32>
    %126 = arith.mulf %123, %80 : vector<1x128xf32>
    %127 = arith.mulf %122, %125 : vector<1x128xf32>
    %128 = arith.addf %126, %127 : vector<1x128xf32>
    %129 = math.tanh %128 : vector<1x128xf32>
    %130 = arith.mulf %124, %129 : vector<1x128xf32>
    %131 = arith.addf %112, %33 : vector<1x512xf32>
    %132 = math.tanh %131 : vector<1x512xf32>
    %133 = vector.extract_strided_slice %132 {offsets = [0, 0], sizes = [1, 384], strides = [1, 1]} : vector<1x512xf32> to vector<1x384xf32>
    %cst_53 = arith.constant 5.000000e-01 : f32
    %134 = vector.broadcast %cst_53 : f32 to vector<1x384xf32>
    %135 = arith.mulf %134, %133 : vector<1x384xf32>
    %cst_54 = arith.constant 5.000000e-01 : f32
    %136 = vector.broadcast %cst_54 : f32 to vector<1x384xf32>
    %137 = arith.addf %135, %136 : vector<1x384xf32>
    %138 = vector.extract_strided_slice %137 {offsets = [0, 0], sizes = [1, 128], strides = [1, 1]} : vector<1x384xf32> to vector<1x128xf32>
    %139 = vector.extract_strided_slice %137 {offsets = [0, 128], sizes = [1, 128], strides = [1, 1]} : vector<1x384xf32> to vector<1x128xf32>
    %140 = vector.extract_strided_slice %137 {offsets = [0, 256], sizes = [1, 128], strides = [1, 1]} : vector<1x384xf32> to vector<1x128xf32>
    %141 = vector.extract_strided_slice %132 {offsets = [0, 384], sizes = [1, 128], strides = [1, 1]} : vector<1x512xf32> to vector<1x128xf32>
    %142 = arith.mulf %139, %96 : vector<1x128xf32>
    %143 = arith.mulf %138, %141 : vector<1x128xf32>
    %144 = arith.addf %142, %143 : vector<1x128xf32>
    %145 = math.tanh %144 : vector<1x128xf32>
    %146 = arith.mulf %140, %145 : vector<1x128xf32>
    %c1_i32_55 = arith.constant 1 : i32
    %147 = arith.subi %c2_i32, %c1_i32_55 : i32
    %148 = arith.index_cast %147 : i32 to index
    %c0_56 = arith.constant 0 : index
    %149 = vector.load %arg17[%148, %c0_56] : memref<8x128xf32, #tpu.memory_space<vmem>>, vector<1x128xf32>
    tpu.vector_store %arg17[%148, %c0_56], %146 {strides = array<i32>} : memref<8x128xf32, #tpu.memory_space<vmem>>, vector<1x128xf32>,
    %c3_i32 = arith.constant 3 : i32
    %150 = arith.truncf %130 : vector<1x128xf32> to vector<1x128xbf16>
    %151 = tpu.concatenate %150, %34 in 1 : vector<1x128xbf16>, vector<1x128xbf16> -> vector<1x256xbf16>
    %152 = arith.truncf %146 : vector<1x128xf32> to vector<1x128xbf16>
    %153 = tpu.concatenate %34, %152 in 1 : vector<1x128xbf16>, vector<1x128xbf16> -> vector<1x256xbf16>
    %154 = tpu.concatenate %151, %153 in 0 : vector<1x256xbf16>, vector<1x256xbf16> -> vector<2x256xbf16>
    %c0_57 = arith.constant 0 : index
    %c0_58 = arith.constant 0 : index
    %155 = vector.load %arg20[%c0_57, %c0_58] : memref<256x1024xbf16, #tpu.memory_space<vmem>>, vector<256x1024xbf16>
    %cst_59 = arith.constant dense<0.000000e+00> : vector<2x1024xf32>
    %156 = tpu.matmul %154, %155, %cst_59 {dimension_numbers = #tpu.dot_dimension_numbers<[1], [0], [0], [1], [0, 0, 1, 1], [], []>} : vector<2x256xbf16>, vector<256x1024xbf16>, vector<2x1024xf32> -> vector<2x1024xf32>
    %157 = vector.extract_strided_slice %156 {offsets = [0, 0], sizes = [1, 512], strides = [1, 1]} : vector<2x1024xf32> to vector<1x512xf32>
    %158 = vector.extract_strided_slice %156 {offsets = [0, 512], sizes = [1, 512], strides = [1, 1]} : vector<2x1024xf32> to vector<1x512xf32>
    %159 = vector.extract_strided_slice %156 {offsets = [1, 0], sizes = [1, 512], strides = [1, 1]} : vector<2x1024xf32> to vector<1x512xf32>
    %160 = arith.addf %158, %159 : vector<1x512xf32>
    %161 = arith.index_cast %c3_i32 : i32 to index
    %c0_60 = arith.constant 0 : index
    %162 = vector.load %arg19[%161, %c0_60] : memref<8x512xf32, #tpu.memory_space<vmem>>, vector<1x512xf32>
    %163 = arith.addf %162, %157 : vector<1x512xf32>
    %164 = math.tanh %163 : vector<1x512xf32>
    %165 = vector.extract_strided_slice %164 {offsets = [0, 0], sizes = [1, 384], strides = [1, 1]} : vector<1x512xf32> to vector<1x384xf32>
    %cst_61 = arith.constant 5.000000e-01 : f32
    %166 = vector.broadcast %cst_61 : f32 to vector<1x384xf32>
    %167 = arith.mulf %166, %165 : vector<1x384xf32>
    %cst_62 = arith.constant 5.000000e-01 : f32
    %168 = vector.broadcast %cst_62 : f32 to vector<1x384xf32>
    %169 = arith.addf %167, %168 : vector<1x384xf32>
    %170 = vector.extract_strided_slice %169 {offsets = [0, 0], sizes = [1, 128], strides = [1, 1]} : vector<1x384xf32> to vector<1x128xf32>
    %171 = vector.extract_strided_slice %169 {offsets = [0, 128], sizes = [1, 128], strides = [1, 1]} : vector<1x384xf32> to vector<1x128xf32>
    %172 = vector.extract_strided_slice %169 {offsets = [0, 256], sizes = [1, 128], strides = [1, 1]} : vector<1x384xf32> to vector<1x128xf32>
    %173 = vector.extract_strided_slice %164 {offsets = [0, 384], sizes = [1, 128], strides = [1, 1]} : vector<1x512xf32> to vector<1x128xf32>
    %174 = arith.mulf %171, %128 : vector<1x128xf32>
    %175 = arith.mulf %170, %173 : vector<1x128xf32>
    %176 = arith.addf %174, %175 : vector<1x128xf32>
    %177 = math.tanh %176 : vector<1x128xf32>
    %178 = arith.mulf %172, %177 : vector<1x128xf32>
    %179 = arith.addf %160, %33 : vector<1x512xf32>
    %180 = math.tanh %179 : vector<1x512xf32>
    %181 = vector.extract_strided_slice %180 {offsets = [0, 0], sizes = [1, 384], strides = [1, 1]} : vector<1x512xf32> to vector<1x384xf32>
    %cst_63 = arith.constant 5.000000e-01 : f32
    %182 = vector.broadcast %cst_63 : f32 to vector<1x384xf32>
    %183 = arith.mulf %182, %181 : vector<1x384xf32>
    %cst_64 = arith.constant 5.000000e-01 : f32
    %184 = vector.broadcast %cst_64 : f32 to vector<1x384xf32>
    %185 = arith.addf %183, %184 : vector<1x384xf32>
    %186 = vector.extract_strided_slice %185 {offsets = [0, 0], sizes = [1, 128], strides = [1, 1]} : vector<1x384xf32> to vector<1x128xf32>
    %187 = vector.extract_strided_slice %185 {offsets = [0, 128], sizes = [1, 128], strides = [1, 1]} : vector<1x384xf32> to vector<1x128xf32>
    %188 = vector.extract_strided_slice %185 {offsets = [0, 256], sizes = [1, 128], strides = [1, 1]} : vector<1x384xf32> to vector<1x128xf32>
    %189 = vector.extract_strided_slice %180 {offsets = [0, 384], sizes = [1, 128], strides = [1, 1]} : vector<1x512xf32> to vector<1x128xf32>
    %190 = arith.mulf %187, %144 : vector<1x128xf32>
    %191 = arith.mulf %186, %189 : vector<1x128xf32>
    %192 = arith.addf %190, %191 : vector<1x128xf32>
    %193 = math.tanh %192 : vector<1x128xf32>
    %194 = arith.mulf %188, %193 : vector<1x128xf32>
    %c1_i32_65 = arith.constant 1 : i32
    %195 = arith.subi %c3_i32, %c1_i32_65 : i32
    %196 = arith.index_cast %195 : i32 to index
    %c0_66 = arith.constant 0 : index
    %197 = vector.load %arg17[%196, %c0_66] : memref<8x128xf32, #tpu.memory_space<vmem>>, vector<1x128xf32>
    tpu.vector_store %arg17[%196, %c0_66], %194 {strides = array<i32>} : memref<8x128xf32, #tpu.memory_space<vmem>>, vector<1x128xf32>,
    %c4_i32 = arith.constant 4 : i32
    %198 = arith.truncf %178 : vector<1x128xf32> to vector<1x128xbf16>
    %199 = tpu.concatenate %198, %34 in 1 : vector<1x128xbf16>, vector<1x128xbf16> -> vector<1x256xbf16>
    %200 = arith.truncf %194 : vector<1x128xf32> to vector<1x128xbf16>
    %201 = tpu.concatenate %34, %200 in 1 : vector<1x128xbf16>, vector<1x128xbf16> -> vector<1x256xbf16>
    %202 = tpu.concatenate %199, %201 in 0 : vector<1x256xbf16>, vector<1x256xbf16> -> vector<2x256xbf16>
    %c0_67 = arith.constant 0 : index
    %c0_68 = arith.constant 0 : index
    %203 = vector.load %arg20[%c0_67, %c0_68] : memref<256x1024xbf16, #tpu.memory_space<vmem>>, vector<256x1024xbf16>
    %cst_69 = arith.constant dense<0.000000e+00> : vector<2x1024xf32>
    %204 = tpu.matmul %202, %203, %cst_69 {dimension_numbers = #tpu.dot_dimension_numbers<[1], [0], [0], [1], [0, 0, 1, 1], [], []>} : vector<2x256xbf16>, vector<256x1024xbf16>, vector<2x1024xf32> -> vector<2x1024xf32>
    %205 = vector.extract_strided_slice %204 {offsets = [0, 0], sizes = [1, 512], strides = [1, 1]} : vector<2x1024xf32> to vector<1x512xf32>
    %206 = vector.extract_strided_slice %204 {offsets = [0, 512], sizes = [1, 512], strides = [1, 1]} : vector<2x1024xf32> to vector<1x512xf32>
    %207 = vector.extract_strided_slice %204 {offsets = [1, 0], sizes = [1, 512], strides = [1, 1]} : vector<2x1024xf32> to vector<1x512xf32>
    %208 = arith.addf %206, %207 : vector<1x512xf32>
    %209 = arith.index_cast %c4_i32 : i32 to index
    %c0_70 = arith.constant 0 : index
    %210 = vector.load %arg19[%209, %c0_70] : memref<8x512xf32, #tpu.memory_space<vmem>>, vector<1x512xf32>
    %211 = arith.addf %210, %205 : vector<1x512xf32>
    %212 = math.tanh %211 : vector<1x512xf32>
    %213 = vector.extract_strided_slice %212 {offsets = [0, 0], sizes = [1, 384], strides = [1, 1]} : vector<1x512xf32> to vector<1x384xf32>
    %cst_71 = arith.constant 5.000000e-01 : f32
    %214 = vector.broadcast %cst_71 : f32 to vector<1x384xf32>
    %215 = arith.mulf %214, %213 : vector<1x384xf32>
    %cst_72 = arith.constant 5.000000e-01 : f32
    %216 = vector.broadcast %cst_72 : f32 to vector<1x384xf32>
    %217 = arith.addf %215, %216 : vector<1x384xf32>
    %218 = vector.extract_strided_slice %217 {offsets = [0, 0], sizes = [1, 128], strides = [1, 1]} : vector<1x384xf32> to vector<1x128xf32>
    %219 = vector.extract_strided_slice %217 {offsets = [0, 128], sizes = [1, 128], strides = [1, 1]} : vector<1x384xf32> to vector<1x128xf32>
    %220 = vector.extract_strided_slice %217 {offsets = [0, 256], sizes = [1, 128], strides = [1, 1]} : vector<1x384xf32> to vector<1x128xf32>
    %221 = vector.extract_strided_slice %212 {offsets = [0, 384], sizes = [1, 128], strides = [1, 1]} : vector<1x512xf32> to vector<1x128xf32>
    %222 = arith.mulf %219, %176 : vector<1x128xf32>
    %223 = arith.mulf %218, %221 : vector<1x128xf32>
    %224 = arith.addf %222, %223 : vector<1x128xf32>
    %225 = math.tanh %224 : vector<1x128xf32>
    %226 = arith.mulf %220, %225 : vector<1x128xf32>
    %227 = arith.addf %208, %33 : vector<1x512xf32>
    %228 = math.tanh %227 : vector<1x512xf32>
    %229 = vector.extract_strided_slice %228 {offsets = [0, 0], sizes = [1, 384], strides = [1, 1]} : vector<1x512xf32> to vector<1x384xf32>
    %cst_73 = arith.constant 5.000000e-01 : f32
    %230 = vector.broadcast %cst_73 : f32 to vector<1x384xf32>
    %231 = arith.mulf %230, %229 : vector<1x384xf32>
    %cst_74 = arith.constant 5.000000e-01 : f32
    %232 = vector.broadcast %cst_74 : f32 to vector<1x384xf32>
    %233 = arith.addf %231, %232 : vector<1x384xf32>
    %234 = vector.extract_strided_slice %233 {offsets = [0, 0], sizes = [1, 128], strides = [1, 1]} : vector<1x384xf32> to vector<1x128xf32>
    %235 = vector.extract_strided_slice %233 {offsets = [0, 128], sizes = [1, 128], strides = [1, 1]} : vector<1x384xf32> to vector<1x128xf32>
    %236 = vector.extract_strided_slice %233 {offsets = [0, 256], sizes = [1, 128], strides = [1, 1]} : vector<1x384xf32> to vector<1x128xf32>
    %237 = vector.extract_strided_slice %228 {offsets = [0, 384], sizes = [1, 128], strides = [1, 1]} : vector<1x512xf32> to vector<1x128xf32>
    %238 = arith.mulf %235, %192 : vector<1x128xf32>
    %239 = arith.mulf %234, %237 : vector<1x128xf32>
    %240 = arith.addf %238, %239 : vector<1x128xf32>
    %241 = math.tanh %240 : vector<1x128xf32>
    %242 = arith.mulf %236, %241 : vector<1x128xf32>
    %c1_i32_75 = arith.constant 1 : i32
    %243 = arith.subi %c4_i32, %c1_i32_75 : i32
    %244 = arith.index_cast %243 : i32 to index
    %c0_76 = arith.constant 0 : index
    %245 = vector.load %arg17[%244, %c0_76] : memref<8x128xf32, #tpu.memory_space<vmem>>, vector<1x128xf32>
    tpu.vector_store %arg17[%244, %c0_76], %242 {strides = array<i32>} : memref<8x128xf32, #tpu.memory_space<vmem>>, vector<1x128xf32>,
    %c5_i32 = arith.constant 5 : i32
    %246 = arith.truncf %226 : vector<1x128xf32> to vector<1x128xbf16>
    %247 = tpu.concatenate %246, %34 in 1 : vector<1x128xbf16>, vector<1x128xbf16> -> vector<1x256xbf16>
    %248 = arith.truncf %242 : vector<1x128xf32> to vector<1x128xbf16>
    %249 = tpu.concatenate %34, %248 in 1 : vector<1x128xbf16>, vector<1x128xbf16> -> vector<1x256xbf16>
    %250 = tpu.concatenate %247, %249 in 0 : vector<1x256xbf16>, vector<1x256xbf16> -> vector<2x256xbf16>
    %c0_77 = arith.constant 0 : index
    %c0_78 = arith.constant 0 : index
    %251 = vector.load %arg20[%c0_77, %c0_78] : memref<256x1024xbf16, #tpu.memory_space<vmem>>, vector<256x1024xbf16>
    %cst_79 = arith.constant dense<0.000000e+00> : vector<2x1024xf32>
    %252 = tpu.matmul %250, %251, %cst_79 {dimension_numbers = #tpu.dot_dimension_numbers<[1], [0], [0], [1], [0, 0, 1, 1], [], []>} : vector<2x256xbf16>, vector<256x1024xbf16>, vector<2x1024xf32> -> vector<2x1024xf32>
    %253 = vector.extract_strided_slice %252 {offsets = [0, 0], sizes = [1, 512], strides = [1, 1]} : vector<2x1024xf32> to vector<1x512xf32>
    %254 = vector.extract_strided_slice %252 {offsets = [0, 512], sizes = [1, 512], strides = [1, 1]} : vector<2x1024xf32> to vector<1x512xf32>
    %255 = vector.extract_strided_slice %252 {offsets = [1, 0], sizes = [1, 512], strides = [1, 1]} : vector<2x1024xf32> to vector<1x512xf32>
    %256 = arith.addf %254, %255 : vector<1x512xf32>
    %257 = arith.index_cast %c5_i32 : i32 to index
    %c0_80 = arith.constant 0 : index
    %258 = vector.load %arg19[%257, %c0_80] : memref<8x512xf32, #tpu.memory_space<vmem>>, vector<1x512xf32>
    %259 = arith.addf %258, %253 : vector<1x512xf32>
    %260 = math.tanh %259 : vector<1x512xf32>
    %261 = vector.extract_strided_slice %260 {offsets = [0, 0], sizes = [1, 384], strides = [1, 1]} : vector<1x512xf32> to vector<1x384xf32>
    %cst_81 = arith.constant 5.000000e-01 : f32
    %262 = vector.broadcast %cst_81 : f32 to vector<1x384xf32>
    %263 = arith.mulf %262, %261 : vector<1x384xf32>
    %cst_82 = arith.constant 5.000000e-01 : f32
    %264 = vector.broadcast %cst_82 : f32 to vector<1x384xf32>
    %265 = arith.addf %263, %264 : vector<1x384xf32>
    %266 = vector.extract_strided_slice %265 {offsets = [0, 0], sizes = [1, 128], strides = [1, 1]} : vector<1x384xf32> to vector<1x128xf32>
    %267 = vector.extract_strided_slice %265 {offsets = [0, 128], sizes = [1, 128], strides = [1, 1]} : vector<1x384xf32> to vector<1x128xf32>
    %268 = vector.extract_strided_slice %265 {offsets = [0, 256], sizes = [1, 128], strides = [1, 1]} : vector<1x384xf32> to vector<1x128xf32>
    %269 = vector.extract_strided_slice %260 {offsets = [0, 384], sizes = [1, 128], strides = [1, 1]} : vector<1x512xf32> to vector<1x128xf32>
    %270 = arith.mulf %267, %224 : vector<1x128xf32>
    %271 = arith.mulf %266, %269 : vector<1x128xf32>
    %272 = arith.addf %270, %271 : vector<1x128xf32>
    %273 = math.tanh %272 : vector<1x128xf32>
    %274 = arith.mulf %268, %273 : vector<1x128xf32>
    %275 = arith.addf %256, %33 : vector<1x512xf32>
    %276 = math.tanh %275 : vector<1x512xf32>
    %277 = vector.extract_strided_slice %276 {offsets = [0, 0], sizes = [1, 384], strides = [1, 1]} : vector<1x512xf32> to vector<1x384xf32>
    %cst_83 = arith.constant 5.000000e-01 : f32
    %278 = vector.broadcast %cst_83 : f32 to vector<1x384xf32>
    %279 = arith.mulf %278, %277 : vector<1x384xf32>
    %cst_84 = arith.constant 5.000000e-01 : f32
    %280 = vector.broadcast %cst_84 : f32 to vector<1x384xf32>
    %281 = arith.addf %279, %280 : vector<1x384xf32>
    %282 = vector.extract_strided_slice %281 {offsets = [0, 0], sizes = [1, 128], strides = [1, 1]} : vector<1x384xf32> to vector<1x128xf32>
    %283 = vector.extract_strided_slice %281 {offsets = [0, 128], sizes = [1, 128], strides = [1, 1]} : vector<1x384xf32> to vector<1x128xf32>
    %284 = vector.extract_strided_slice %281 {offsets = [0, 256], sizes = [1, 128], strides = [1, 1]} : vector<1x384xf32> to vector<1x128xf32>
    %285 = vector.extract_strided_slice %276 {offsets = [0, 384], sizes = [1, 128], strides = [1, 1]} : vector<1x512xf32> to vector<1x128xf32>
    %286 = arith.mulf %283, %240 : vector<1x128xf32>
    %287 = arith.mulf %282, %285 : vector<1x128xf32>
    %288 = arith.addf %286, %287 : vector<1x128xf32>
    %289 = math.tanh %288 : vector<1x128xf32>
    %290 = arith.mulf %284, %289 : vector<1x128xf32>
    %c1_i32_85 = arith.constant 1 : i32
    %291 = arith.subi %c5_i32, %c1_i32_85 : i32
    %292 = arith.index_cast %291 : i32 to index
    %c0_86 = arith.constant 0 : index
    %293 = vector.load %arg17[%292, %c0_86] : memref<8x128xf32, #tpu.memory_space<vmem>>, vector<1x128xf32>
    tpu.vector_store %arg17[%292, %c0_86], %290 {strides = array<i32>} : memref<8x128xf32, #tpu.memory_space<vmem>>, vector<1x128xf32>,
    %c6_i32 = arith.constant 6 : i32
    %294 = arith.truncf %274 : vector<1x128xf32> to vector<1x128xbf16>
    %295 = tpu.concatenate %294, %34 in 1 : vector<1x128xbf16>, vector<1x128xbf16> -> vector<1x256xbf16>
    %296 = arith.truncf %290 : vector<1x128xf32> to vector<1x128xbf16>
    %297 = tpu.concatenate %34, %296 in 1 : vector<1x128xbf16>, vector<1x128xbf16> -> vector<1x256xbf16>
    %298 = tpu.concatenate %295, %297 in 0 : vector<1x256xbf16>, vector<1x256xbf16> -> vector<2x256xbf16>
    %c0_87 = arith.constant 0 : index
    %c0_88 = arith.constant 0 : index
    %299 = vector.load %arg20[%c0_87, %c0_88] : memref<256x1024xbf16, #tpu.memory_space<vmem>>, vector<256x1024xbf16>
    %cst_89 = arith.constant dense<0.000000e+00> : vector<2x1024xf32>
    %300 = tpu.matmul %298, %299, %cst_89 {dimension_numbers = #tpu.dot_dimension_numbers<[1], [0], [0], [1], [0, 0, 1, 1], [], []>} : vector<2x256xbf16>, vector<256x1024xbf16>, vector<2x1024xf32> -> vector<2x1024xf32>
    %301 = vector.extract_strided_slice %300 {offsets = [0, 0], sizes = [1, 512], strides = [1, 1]} : vector<2x1024xf32> to vector<1x512xf32>
    %302 = vector.extract_strided_slice %300 {offsets = [0, 512], sizes = [1, 512], strides = [1, 1]} : vector<2x1024xf32> to vector<1x512xf32>
    %303 = vector.extract_strided_slice %300 {offsets = [1, 0], sizes = [1, 512], strides = [1, 1]} : vector<2x1024xf32> to vector<1x512xf32>
    %304 = arith.addf %302, %303 : vector<1x512xf32>
    %305 = arith.index_cast %c6_i32 : i32 to index
    %c0_90 = arith.constant 0 : index
    %306 = vector.load %arg19[%305, %c0_90] : memref<8x512xf32, #tpu.memory_space<vmem>>, vector<1x512xf32>
    %307 = arith.addf %306, %301 : vector<1x512xf32>
    %308 = math.tanh %307 : vector<1x512xf32>
    %309 = vector.extract_strided_slice %308 {offsets = [0, 0], sizes = [1, 384], strides = [1, 1]} : vector<1x512xf32> to vector<1x384xf32>
    %cst_91 = arith.constant 5.000000e-01 : f32
    %310 = vector.broadcast %cst_91 : f32 to vector<1x384xf32>
    %311 = arith.mulf %310, %309 : vector<1x384xf32>
    %cst_92 = arith.constant 5.000000e-01 : f32
    %312 = vector.broadcast %cst_92 : f32 to vector<1x384xf32>
    %313 = arith.addf %311, %312 : vector<1x384xf32>
    %314 = vector.extract_strided_slice %313 {offsets = [0, 0], sizes = [1, 128], strides = [1, 1]} : vector<1x384xf32> to vector<1x128xf32>
    %315 = vector.extract_strided_slice %313 {offsets = [0, 128], sizes = [1, 128], strides = [1, 1]} : vector<1x384xf32> to vector<1x128xf32>
    %316 = vector.extract_strided_slice %313 {offsets = [0, 256], sizes = [1, 128], strides = [1, 1]} : vector<1x384xf32> to vector<1x128xf32>
    %317 = vector.extract_strided_slice %308 {offsets = [0, 384], sizes = [1, 128], strides = [1, 1]} : vector<1x512xf32> to vector<1x128xf32>
    %318 = arith.mulf %315, %272 : vector<1x128xf32>
    %319 = arith.mulf %314, %317 : vector<1x128xf32>
    %320 = arith.addf %318, %319 : vector<1x128xf32>
    %321 = math.tanh %320 : vector<1x128xf32>
    %322 = arith.mulf %316, %321 : vector<1x128xf32>
    %323 = arith.addf %304, %33 : vector<1x512xf32>
    %324 = math.tanh %323 : vector<1x512xf32>
    %325 = vector.extract_strided_slice %324 {offsets = [0, 0], sizes = [1, 384], strides = [1, 1]} : vector<1x512xf32> to vector<1x384xf32>
    %cst_93 = arith.constant 5.000000e-01 : f32
    %326 = vector.broadcast %cst_93 : f32 to vector<1x384xf32>
    %327 = arith.mulf %326, %325 : vector<1x384xf32>
    %cst_94 = arith.constant 5.000000e-01 : f32
    %328 = vector.broadcast %cst_94 : f32 to vector<1x384xf32>
    %329 = arith.addf %327, %328 : vector<1x384xf32>
    %330 = vector.extract_strided_slice %329 {offsets = [0, 0], sizes = [1, 128], strides = [1, 1]} : vector<1x384xf32> to vector<1x128xf32>
    %331 = vector.extract_strided_slice %329 {offsets = [0, 128], sizes = [1, 128], strides = [1, 1]} : vector<1x384xf32> to vector<1x128xf32>
    %332 = vector.extract_strided_slice %329 {offsets = [0, 256], sizes = [1, 128], strides = [1, 1]} : vector<1x384xf32> to vector<1x128xf32>
    %333 = vector.extract_strided_slice %324 {offsets = [0, 384], sizes = [1, 128], strides = [1, 1]} : vector<1x512xf32> to vector<1x128xf32>
    %334 = arith.mulf %331, %288 : vector<1x128xf32>
    %335 = arith.mulf %330, %333 : vector<1x128xf32>
    %336 = arith.addf %334, %335 : vector<1x128xf32>
    %337 = math.tanh %336 : vector<1x128xf32>
    %338 = arith.mulf %332, %337 : vector<1x128xf32>
    %c1_i32_95 = arith.constant 1 : i32
    %339 = arith.subi %c6_i32, %c1_i32_95 : i32
    %340 = arith.index_cast %339 : i32 to index
    %c0_96 = arith.constant 0 : index
    %341 = vector.load %arg17[%340, %c0_96] : memref<8x128xf32, #tpu.memory_space<vmem>>, vector<1x128xf32>
    tpu.vector_store %arg17[%340, %c0_96], %338 {strides = array<i32>} : memref<8x128xf32, #tpu.memory_space<vmem>>, vector<1x128xf32>,
    %c7_i32 = arith.constant 7 : i32
    %342 = arith.truncf %322 : vector<1x128xf32> to vector<1x128xbf16>
    %343 = tpu.concatenate %342, %34 in 1 : vector<1x128xbf16>, vector<1x128xbf16> -> vector<1x256xbf16>
    %344 = arith.truncf %338 : vector<1x128xf32> to vector<1x128xbf16>
    %345 = tpu.concatenate %34, %344 in 1 : vector<1x128xbf16>, vector<1x128xbf16> -> vector<1x256xbf16>
    %346 = tpu.concatenate %343, %345 in 0 : vector<1x256xbf16>, vector<1x256xbf16> -> vector<2x256xbf16>
    %c0_97 = arith.constant 0 : index
    %c0_98 = arith.constant 0 : index
    %347 = vector.load %arg20[%c0_97, %c0_98] : memref<256x1024xbf16, #tpu.memory_space<vmem>>, vector<256x1024xbf16>
    %cst_99 = arith.constant dense<0.000000e+00> : vector<2x1024xf32>
    %348 = tpu.matmul %346, %347, %cst_99 {dimension_numbers = #tpu.dot_dimension_numbers<[1], [0], [0], [1], [0, 0, 1, 1], [], []>} : vector<2x256xbf16>, vector<256x1024xbf16>, vector<2x1024xf32> -> vector<2x1024xf32>
    %349 = vector.extract_strided_slice %348 {offsets = [0, 0], sizes = [1, 512], strides = [1, 1]} : vector<2x1024xf32> to vector<1x512xf32>
    %350 = vector.extract_strided_slice %348 {offsets = [0, 512], sizes = [1, 512], strides = [1, 1]} : vector<2x1024xf32> to vector<1x512xf32>
    %351 = vector.extract_strided_slice %348 {offsets = [1, 0], sizes = [1, 512], strides = [1, 1]} : vector<2x1024xf32> to vector<1x512xf32>
    %352 = arith.addf %350, %351 : vector<1x512xf32>
    %353 = arith.index_cast %c7_i32 : i32 to index
    %c0_100 = arith.constant 0 : index
    %354 = vector.load %arg19[%353, %c0_100] : memref<8x512xf32, #tpu.memory_space<vmem>>, vector<1x512xf32>
    %355 = arith.addf %354, %349 : vector<1x512xf32>
    %356 = math.tanh %355 : vector<1x512xf32>
    %357 = vector.extract_strided_slice %356 {offsets = [0, 0], sizes = [1, 384], strides = [1, 1]} : vector<1x512xf32> to vector<1x384xf32>
    %cst_101 = arith.constant 5.000000e-01 : f32
    %358 = vector.broadcast %cst_101 : f32 to vector<1x384xf32>
    %359 = arith.mulf %358, %357 : vector<1x384xf32>
    %cst_102 = arith.constant 5.000000e-01 : f32
    %360 = vector.broadcast %cst_102 : f32 to vector<1x384xf32>
    %361 = arith.addf %359, %360 : vector<1x384xf32>
    %362 = vector.extract_strided_slice %361 {offsets = [0, 0], sizes = [1, 128], strides = [1, 1]} : vector<1x384xf32> to vector<1x128xf32>
    %363 = vector.extract_strided_slice %361 {offsets = [0, 128], sizes = [1, 128], strides = [1, 1]} : vector<1x384xf32> to vector<1x128xf32>
    %364 = vector.extract_strided_slice %361 {offsets = [0, 256], sizes = [1, 128], strides = [1, 1]} : vector<1x384xf32> to vector<1x128xf32>
    %365 = vector.extract_strided_slice %356 {offsets = [0, 384], sizes = [1, 128], strides = [1, 1]} : vector<1x512xf32> to vector<1x128xf32>
    %366 = arith.mulf %363, %320 : vector<1x128xf32>
    %367 = arith.mulf %362, %365 : vector<1x128xf32>
    %368 = arith.addf %366, %367 : vector<1x128xf32>
    %369 = math.tanh %368 : vector<1x128xf32>
    %370 = arith.mulf %364, %369 : vector<1x128xf32>
    %371 = arith.addf %352, %33 : vector<1x512xf32>
    %372 = math.tanh %371 : vector<1x512xf32>
    %373 = vector.extract_strided_slice %372 {offsets = [0, 0], sizes = [1, 384], strides = [1, 1]} : vector<1x512xf32> to vector<1x384xf32>
    %cst_103 = arith.constant 5.000000e-01 : f32
    %374 = vector.broadcast %cst_103 : f32 to vector<1x384xf32>
    %375 = arith.mulf %374, %373 : vector<1x384xf32>
    %cst_104 = arith.constant 5.000000e-01 : f32
    %376 = vector.broadcast %cst_104 : f32 to vector<1x384xf32>
    %377 = arith.addf %375, %376 : vector<1x384xf32>
    %378 = vector.extract_strided_slice %377 {offsets = [0, 0], sizes = [1, 128], strides = [1, 1]} : vector<1x384xf32> to vector<1x128xf32>
    %379 = vector.extract_strided_slice %377 {offsets = [0, 128], sizes = [1, 128], strides = [1, 1]} : vector<1x384xf32> to vector<1x128xf32>
    %380 = vector.extract_strided_slice %377 {offsets = [0, 256], sizes = [1, 128], strides = [1, 1]} : vector<1x384xf32> to vector<1x128xf32>
    %381 = vector.extract_strided_slice %372 {offsets = [0, 384], sizes = [1, 128], strides = [1, 1]} : vector<1x512xf32> to vector<1x128xf32>
    %382 = arith.mulf %379, %336 : vector<1x128xf32>
    %383 = arith.mulf %378, %381 : vector<1x128xf32>
    %384 = arith.addf %382, %383 : vector<1x128xf32>
    %385 = math.tanh %384 : vector<1x128xf32>
    %386 = arith.mulf %380, %385 : vector<1x128xf32>
    %c1_i32_105 = arith.constant 1 : i32
    %387 = arith.subi %c7_i32, %c1_i32_105 : i32
    %388 = arith.index_cast %387 : i32 to index
    %c0_106 = arith.constant 0 : index
    %389 = vector.load %arg17[%388, %c0_106] : memref<8x128xf32, #tpu.memory_space<vmem>>, vector<1x128xf32>
    tpu.vector_store %arg17[%388, %c0_106], %386 {strides = array<i32>} : memref<8x128xf32, #tpu.memory_space<vmem>>, vector<1x128xf32>,
    %c7_i32_107 = arith.constant 7 : i32
    %390 = arith.truncf %370 : vector<1x128xf32> to vector<1x128xbf16>
    %391 = tpu.concatenate %390, %34 in 1 : vector<1x128xbf16>, vector<1x128xbf16> -> vector<1x256xbf16>
    %392 = arith.truncf %386 : vector<1x128xf32> to vector<1x128xbf16>
    %393 = tpu.concatenate %34, %392 in 1 : vector<1x128xbf16>, vector<1x128xbf16> -> vector<1x256xbf16>
    %394 = tpu.concatenate %391, %393 in 0 : vector<1x256xbf16>, vector<1x256xbf16> -> vector<2x256xbf16>
    %c0_108 = arith.constant 0 : index
    %c0_109 = arith.constant 0 : index
    %395 = vector.load %arg20[%c0_108, %c0_109] : memref<256x1024xbf16, #tpu.memory_space<vmem>>, vector<256x1024xbf16>
    %cst_110 = arith.constant dense<0.000000e+00> : vector<2x1024xf32>
    %396 = tpu.matmul %394, %395, %cst_110 {dimension_numbers = #tpu.dot_dimension_numbers<[1], [0], [0], [1], [0, 0, 1, 1], [], []>} : vector<2x256xbf16>, vector<256x1024xbf16>, vector<2x1024xf32> -> vector<2x1024xf32>
    %397 = vector.extract_strided_slice %396 {offsets = [0, 512], sizes = [1, 512], strides = [1, 1]} : vector<2x1024xf32> to vector<1x512xf32>
    %398 = vector.extract_strided_slice %396 {offsets = [1, 0], sizes = [1, 512], strides = [1, 1]} : vector<2x1024xf32> to vector<1x512xf32>
    %399 = arith.addf %397, %398 : vector<1x512xf32>
    %400 = arith.addf %399, %33 : vector<1x512xf32>
    %401 = math.tanh %400 : vector<1x512xf32>
    %402 = vector.extract_strided_slice %401 {offsets = [0, 0], sizes = [1, 384], strides = [1, 1]} : vector<1x512xf32> to vector<1x384xf32>
    %cst_111 = arith.constant 5.000000e-01 : f32
    %403 = vector.broadcast %cst_111 : f32 to vector<1x384xf32>
    %404 = arith.mulf %403, %402 : vector<1x384xf32>
    %cst_112 = arith.constant 5.000000e-01 : f32
    %405 = vector.broadcast %cst_112 : f32 to vector<1x384xf32>
    %406 = arith.addf %404, %405 : vector<1x384xf32>
    %407 = vector.extract_strided_slice %406 {offsets = [0, 0], sizes = [1, 128], strides = [1, 1]} : vector<1x384xf32> to vector<1x128xf32>
    %408 = vector.extract_strided_slice %406 {offsets = [0, 128], sizes = [1, 128], strides = [1, 1]} : vector<1x384xf32> to vector<1x128xf32>
    %409 = vector.extract_strided_slice %406 {offsets = [0, 256], sizes = [1, 128], strides = [1, 1]} : vector<1x384xf32> to vector<1x128xf32>
    %410 = vector.extract_strided_slice %401 {offsets = [0, 384], sizes = [1, 128], strides = [1, 1]} : vector<1x512xf32> to vector<1x128xf32>
    %411 = arith.mulf %408, %384 : vector<1x128xf32>
    %412 = arith.mulf %407, %410 : vector<1x128xf32>
    %413 = arith.addf %411, %412 : vector<1x128xf32>
    %414 = math.tanh %413 : vector<1x128xf32>
    %415 = arith.mulf %409, %414 : vector<1x128xf32>
    %c7 = arith.constant 7 : index
    %c0_113 = arith.constant 0 : index
    %416 = vector.load %arg17[%c7, %c0_113] : memref<8x128xf32, #tpu.memory_space<vmem>>, vector<1x128xf32>
    tpu.vector_store %arg17[%c7, %c0_113], %415 {strides = array<i32>} : memref<8x128xf32, #tpu.memory_space<vmem>>, vector<1x128xf32>,
    %c0_114 = arith.constant 0 : index
    %c0_115 = arith.constant 0 : index
    %417 = vector.load %arg17[%c0_114, %c0_115] : memref<8x128xf32, #tpu.memory_space<vmem>>, vector<8x128xf32>
    %418 = arith.truncf %417 : vector<8x128xf32> to vector<8x128xbf16>
    %c0_116 = arith.constant 0 : index
    %c0_117 = arith.constant 0 : index
    %419 = vector.load %arg12[%c0_116, %c0_117] : memref<128x128xbf16, #tpu.memory_space<vmem>>, vector<128x128xbf16>
    %cst_118 = arith.constant dense<0.000000e+00> : vector<8x128xf32>
    %420 = tpu.matmul %418, %419, %cst_118 {dimension_numbers = #tpu.dot_dimension_numbers<[1], [0], [0], [1], [0, 0, 1, 1], [], []>} : vector<8x128xbf16>, vector<128x128xbf16>, vector<8x128xf32> -> vector<8x128xf32>
    %c0_119 = arith.constant 0 : index
    %c0_120 = arith.constant 0 : index
    %421 = vector.load %arg13[%c0_119, %c0_120] : memref<1x128xf32, #tpu.memory_space<vmem>>, vector<1x128xf32>
    %422 = vector.broadcast %421 : vector<1x128xf32> to vector<8x128xf32>
    %423 = arith.addf %420, %422 : vector<8x128xf32>
    %cst_121 = arith.constant 0.000000e+00 : f32
    %424 = vector.broadcast %cst_121 : f32 to vector<8x128xf32>
    %425 = arith.maximumf %423, %424 : vector<8x128xf32>
    %426 = arith.truncf %425 : vector<8x128xf32> to vector<8x128xbf16>
    %c0_122 = arith.constant 0 : index
    %c0_123 = arith.constant 0 : index
    %427 = vector.load %arg14[%c0_122, %c0_123] : memref<128x128xbf16, #tpu.memory_space<vmem>>, vector<128x128xbf16>
    %cst_124 = arith.constant dense<0.000000e+00> : vector<8x128xf32>
    %428 = tpu.matmul %426, %427, %cst_124 {dimension_numbers = #tpu.dot_dimension_numbers<[1], [0], [0], [1], [0, 0, 1, 1], [], []>} : vector<8x128xbf16>, vector<128x128xbf16>, vector<8x128xf32> -> vector<8x128xf32>
    %c0_125 = arith.constant 0 : index
    %c0_126 = arith.constant 0 : index
    %429 = vector.load %arg15[%c0_125, %c0_126] : memref<1x128xf32, #tpu.memory_space<vmem>>, vector<1x128xf32>
    %430 = vector.broadcast %429 : vector<1x128xf32> to vector<8x128xf32>
    %431 = arith.addf %428, %430 : vector<8x128xf32>
    %432 = vector.extract_strided_slice %21 {offsets = [0, 0], sizes = [8, 128], strides = [1, 1]} : vector<16x128xf32> to vector<8x128xf32>
    %433 = arith.addf %432, %431 : vector<8x128xf32>
    %c0_127 = arith.constant 0 : index
    %c0_128 = arith.constant 0 : index
    %434 = vector.load %arg16[%c0_127, %c0_128] : memref<8x128xf32, #tpu.memory_space<vmem>>, vector<8x128xf32>
    tpu.vector_store %arg16[%c0_127, %c0_128], %433 {strides = array<i32>} : memref<8x128xf32, #tpu.memory_space<vmem>>, vector<8x128xf32>,
    %cst_129 = arith.constant dense<0.000000e+00> : vector<128xf32>
    %435 = vector.multi_reduction <add>, %431, %cst_129 [0] : vector<8x128xf32> to vector<128xf32>
    %436 = vector.shape_cast %435 : vector<128xf32> to vector<1x128xf32>
    %cst_130 = arith.constant 8.000000e+00 : f32
    %437 = vector.broadcast %cst_130 : f32 to vector<1x128xf32>
    %438 = arith.divf %436, %437 : vector<1x128xf32>
    %c64_i32 = arith.constant 64 : i32
    %439 = tpu.dynamic_rotate %438 by %c64_i32 dim 1 : vector<1x128xf32>, i32 -> vector<1x128xf32>
    %440 = vector.extract_strided_slice %21 {offsets = [8, 0], sizes = [8, 128], strides = [1, 1]} : vector<16x128xf32> to vector<8x128xf32>
    %441 = vector.broadcast %439 : vector<1x128xf32> to vector<8x128xf32>
    %442 = arith.addf %440, %441 : vector<8x128xf32>
    %c0_131 = arith.constant 0 : index
    %c0_132 = arith.constant 0 : index
    %443 = vector.load %arg18[%c0_131, %c0_132] : memref<8x128xf32, #tpu.memory_space<vmem>>, vector<8x128xf32>
    tpu.vector_store %arg18[%c0_131, %c0_132], %442 {strides = array<i32>} : memref<8x128xf32, #tpu.memory_space<vmem>>, vector<8x128xf32>,
    return
  }
}

</mosaic_0001>

<bundles_post_ra>
// kernel: meta_learning_forward.1
= control target key start
LH: loop header
LB: loop body
LE: loop exit
PB: predicated region body
PF: predicated region fallthrough
CT: control target
= control target key end

     0   :  { %s8134_s0 = inlined_call_operand.vmem [shape: bf16[16,256], index: 0, kind: input, shape index: {}]   ;;  %s8135_s1 = inlined_call_operand.hbm [shape: bf16[256,128], index: 1, kind: input, shape index: {}]   ;;  %s8136_s2 = inlined_call_operand.vmem [shape: f32[1,128], index: 2, kind: input, shape index: {}]   ;;  %s8137_s3 = inlined_call_operand.vmem [shape: bf16[128,128], index: 3, kind: input, shape index: {}]   ;;  %s8138_s4 = inlined_call_operand.vmem [shape: f32[1,128], index: 4, kind: input, shape index: {}]   ;;  %s8139_s5 = inlined_call_operand.hbm [shape: bf16[128,128], index: 5, kind: input, shape index: {}]   ;;  %s8140_s6 = inlined_call_operand.vmem [shape: f32[1,128], index: 6, kind: input, shape index: {}]   ;;  %s8141_s7 = inlined_call_operand.hbm [shape: bf16[256,512], index: 7, kind: input, shape index: {}]   ;;  %s8142_s8 = inlined_call_operand.hbm [shape: bf16[128,512], index: 8, kind: input, shape index: {}]   ;;  %s8143_s9 = inlined_call_operand.vmem [shape: f32[1,512], index: 9, kind: input, shape index: {}]   ;;  %s8144_s10 = inlined_call_operand.hbm [shape: bf16[256,1024], index: 10, kind: input, shape index: {}]   ;;  %s8145_s11 = inlined_call_operand.vmem [shape: f32[1,512], index: 11, kind: input, shape index: {}]   ;;  %s8146_s12 = inlined_call_operand.hbm [shape: bf16[128,128], index: 12, kind: input, shape index: {}]   ;;  %s8147_s13 = inlined_call_operand.vmem [shape: f32[1,128], index: 13, kind: input, shape index: {}]   ;;  %s8148_s14 = inlined_call_operand.hbm [shape: bf16[128,128], index: 14, kind: input, shape index: {}]   ;;  %s8149_s15 = inlined_call_operand.vmem [shape: f32[1,128], index: 15, kind: input, shape index: {}]   ;;  %s8150_s16 = inlined_call_operand.vmem [shape: f32[8,128], index: 16, kind: output, shape index: {0}]   ;;  %s8151_s17 = inlined_call_operand.hbm [shape: f32[8,128], index: 17, kind: output, shape index: {1}]   ;;  %s8152_s18 = inlined_call_operand.hbm [shape: f32[8,128], index: 18, kind: output, shape index: {2}]  }
   0x1   :  { %8457 = sst [smem:[#allocation104_spill]] %s8134_s0 }
   0x2   :  { %8458 = sst [smem:[#allocation105_spill]] %s8135_s1 }
   0x3   :  { %8459 = sst [smem:[#allocation106_spill]] %s8136_s2 }
   0x4   :  { %8460 = sst [smem:[#allocation107_spill]] %s8152_s18 }
   0x5   :  { %24 = vsyncpa [#allocation6], 0 }
   0x6   :  { %25 = vsyncpa [#allocation9], 0 }
   0x7   :  { %26 = vsyncpa [#allocation12], 0 }
   0x8   :  { %27 = vsyncpa [#allocation15], 0 }
   0x9   :  { %28 = vsyncpa [#allocation7], 0 }
   0xa   :  { %29 = vsyncpa [#allocation18], 0  ;;  %s5503_s27 = smov [#allocation8]   ;;  %s5313_s0 = scalar_lea.hbm %s8139_s5, 1024 }
   0xb   :  { %s55_s28 = sshll.u32 %s5503_s27, 4  ;;  %p5314_p0 = scmp.ne.s32.totalorder %s8139_s5, %s5313_s0  ;;  %s56_s28 = int_to_ptr.vmem [resolvable:$true] %s55_s28 }
   0xc   :  { %p5317_p1 = scmp.lt.u32.totalorder %s5313_s0, %s8139_s5 }
   0xe   :  { %p5319_p2 = pnand %p5317_p1, %p5314_p0 }
  0x10   :  { %5322 = shalt.err (!%p5319_p2)
}
  0x11   :  { %s5323_s22 = scalar_lea.vmem %s56_s28, 1024  ;;  %p5328_p4 = scmp.lt.s32.totalorder %s56_s28, %s56_s28 }
  0x12   :  { %p5324_p3 = scmp.ne.s32.totalorder %s56_s28, %s5323_s22  ;;  %p5329_p5 = scmp.lt.s32.totalorder %s5323_s22, %s5323_s22 }
  0x14   :  { %p5330_p6 = por %p5329_p5, %p5328_p4 }
  0x16   :  { %p5331_p7 = pnand %p5330_p6, %p5324_p3 }
  0x18   :  { %5334 = shalt.err (!%p5331_p7)
}
  0x19   :  { %s5504_s2 = smov 64   ;;  %s5505_s23 = smov 4  }
  0x1a   :  { %61 = dma.hbm_to_vmem [thread:$0]  %s8139_s5, 1024, %s56_s28, [#allocation9], %s5504_s2, %s5504_s2, %s5505_s23  }
  0x1b   :  { %s5506_s26 = smov [#allocation11]   ;;  %s5507_s29 = smov [#allocation5]  }
  0x1c   :  { %s81_s27 = sshll.u32 %s5506_s26, 4  ;;  %s37_s30 = sshll.u32 %s5507_s29, 4  ;;  %s82_s27 = int_to_ptr.vmem [resolvable:$true] %s81_s27  ;;  %s38_s30 = int_to_ptr.vmem [resolvable:$true] %s37_s30 }
  0x1d   :  { %s5335_s1 = scalar_lea.hbm %s8142_s8, 4096 }
  0x1e   :  { %p5336_p8 = scmp.ne.s32.totalorder %s8142_s8, %s5335_s1  ;;  %p5339_p9 = scmp.lt.u32.totalorder %s5335_s1, %s8142_s8 }
  0x20   :  { %p5341_p10 = pnand %p5339_p9, %p5336_p8 }
  0x22   :  { %5344 = shalt.err (!%p5341_p10)
}
  0x23   :  { %s5345_s5 = scalar_lea.vmem %s82_s27, 4096  ;;  %p5350_p12 = scmp.lt.s32.totalorder %s82_s27, %s82_s27 }
  0x24   :  { %p5346_p11 = scmp.ne.s32.totalorder %s82_s27, %s5345_s5  ;;  %p5351_p13 = scmp.lt.s32.totalorder %s5345_s5, %s5345_s5 }
  0x26   :  { %p5352_p0 = por %p5351_p13, %p5350_p12 }
  0x28   :  { %p5353_p1 = pnand %p5352_p0, %p5346_p11 }
  0x2a   :  { %5356 = shalt.err (!%p5353_p1)
}
  0x2b   :  { %s8156_s28 = smov 256   ;;  %s5509_s24 = smov 16  }
  0x2c   :  { %87 = dma.hbm_to_vmem [thread:$0]  %s8142_s8, 4096, %s82_s27, [#allocation12], %s8156_s28, %s8156_s28, %s5509_s24  }
  0x2d   :  { %s8461_s0 = sld [smem:[#allocation105_spill]] }
  0x33   :  { %s5357_s19 = scalar_lea.hbm %s8461_s0, 2048 }
  0x34   :  { %p5358_p2 = scmp.ne.s32.totalorder %s8461_s0, %s5357_s19  ;;  %p5361_p3 = scmp.lt.u32.totalorder %s5357_s19, %s8461_s0 }
  0x36   :  { %p5363_p4 = pnand %p5361_p3, %p5358_p2 }
  0x38   :  { %5366 = shalt.err (!%p5363_p4)
}
  0x39   :  { %s5367_s5 = scalar_lea.vmem %s38_s30, 2048  ;;  %p5372_p6 = scmp.lt.s32.totalorder %s38_s30, %s38_s30 }
  0x3a   :  { %p5368_p5 = scmp.ne.s32.totalorder %s38_s30, %s5367_s5  ;;  %p5373_p7 = scmp.lt.s32.totalorder %s5367_s5, %s5367_s5 }
  0x3c   :  { %p5374_p8 = por %p5373_p7, %p5372_p6 }
  0x3e   :  { %p5375_p9 = pnand %p5374_p8, %p5368_p5 }
  0x40   :  { %5378 = shalt.err (!%p5375_p9)
}
  0x41   :  { %43 = dma.hbm_to_vmem [thread:$0]  %s8461_s0, 2048, %s38_s30, [#allocation6], %s5504_s2, %s5504_s2, %s5505_s23  }
  0x42   :  { %s5510_s25 = smov [#allocation10]   ;;  %s5511_s18 = smov [#allocation13]  }
  0x43   :  { %s69_s26 = sshll.u32 %s5510_s25, 4  ;;  %s97_s29 = sshll.u32 %s5511_s18, 4  ;;  %s70_s26 = int_to_ptr.vmem [resolvable:$true] %s69_s26  ;;  %s98_s29 = int_to_ptr.vmem [resolvable:$true] %s97_s29 }
  0x44   :  { %s5379_s20 = scalar_lea.hbm %s8141_s7, 8192 }
  0x45   :  { %p5380_p10 = scmp.ne.s32.totalorder %s8141_s7, %s5379_s20  ;;  %p5383_p11 = scmp.lt.u32.totalorder %s5379_s20, %s8141_s7 }
  0x47   :  { %p5385_p12 = pnand %p5383_p11, %p5380_p10 }
  0x49   :  { %5388 = shalt.err (!%p5385_p12)
}
  0x4a   :  { %s5389_s30 = scalar_lea.vmem %s70_s26, 8192  ;;  %p5394_p0 = scmp.lt.s32.totalorder %s70_s26, %s70_s26 }
  0x4b   :  { %p5390_p13 = scmp.ne.s32.totalorder %s70_s26, %s5389_s30  ;;  %p5395_p1 = scmp.lt.s32.totalorder %s5389_s30, %s5389_s30 }
  0x4d   :  { %p5396_p2 = por %p5395_p1, %p5394_p0 }
  0x4f   :  { %p5397_p3 = pnand %p5396_p2, %p5390_p13 }
  0x51   :  { %5400 = shalt.err (!%p5397_p3)
}
  0x52   :  { %s8462_s0 = smov 256   ;;  %s5401_s18 = scalar_lea.hbm %s8146_s12, 1024 }
  0x53   :  { %75 = dma.hbm_to_vmem [thread:$0]  %s8141_s7, 8192, %s70_s26, [#allocation9], %s8462_s0, %s8462_s0, %s5509_s24  }
  0x54   :  { %p5402_p4 = scmp.ne.s32.totalorder %s8146_s12, %s5401_s18  ;;  %p5405_p5 = scmp.lt.u32.totalorder %s5401_s18, %s8146_s12 }
  0x56   :  { %p5407_p6 = pnand %p5405_p5, %p5402_p4 }
  0x58   :  { %5410 = shalt.err (!%p5407_p6)
}
  0x59   :  { %s5411_s22 = scalar_lea.vmem %s98_s29, 1024  ;;  %p5416_p8 = scmp.lt.s32.totalorder %s98_s29, %s98_s29 }
  0x5a   :  { %p5412_p7 = scmp.ne.s32.totalorder %s98_s29, %s5411_s22  ;;  %p5417_p9 = scmp.lt.s32.totalorder %s5411_s22, %s5411_s22 }
  0x5c   :  { %p5418_p10 = por %p5417_p9, %p5416_p8 }
  0x5e   :  { %p5419_p11 = pnand %p5418_p10, %p5412_p7 }
  0x60   :  { %5422 = shalt.err (!%p5419_p11)
}
  0x61   :  { %103 = dma.hbm_to_vmem [thread:$0]  %s8146_s12, 1024, %s98_s29, [#allocation12], %s5504_s2, %s5504_s2, %s5505_s23  }
  0x62   :  { %s5512_s26 = smov [#allocation14]   ;;  %s5423_s8 = scalar_lea.hbm %s8148_s14, 1024 }
  0x63   :  { %s111_s5 = sshll.u32 %s5512_s26, 4  ;;  %p5424_p12 = scmp.ne.s32.totalorder %s8148_s14, %s5423_s8  ;;  %s112_s5 = int_to_ptr.vmem [resolvable:$true] %s111_s5 }
  0x64   :  { %p5427_p13 = scmp.lt.u32.totalorder %s5423_s8, %s8148_s14 }
  0x66   :  { %p5429_p0 = pnand %p5427_p13, %p5424_p12 }
  0x68   :  { %5432 = shalt.err (!%p5429_p0)
}
  0x69   :  { %s5433_s19 = scalar_lea.vmem %s112_s5, 1024  ;;  %p5438_p2 = scmp.lt.s32.totalorder %s112_s5, %s112_s5 }
  0x6a   :  { %p5434_p1 = scmp.ne.s32.totalorder %s112_s5, %s5433_s19  ;;  %p5439_p3 = scmp.lt.s32.totalorder %s5433_s19, %s5433_s19 }
  0x6c   :  { %p5440_p4 = por %p5439_p3, %p5438_p2 }
  0x6e   :  { %p5441_p5 = pnand %p5440_p4, %p5434_p1 }
  0x70   :  { %5444 = shalt.err (!%p5441_p5)
}
  0x71   :  { %117 = dma.hbm_to_vmem [thread:$0]  %s8148_s14, 1024, %s112_s5, [#allocation15], %s5504_s2, %s5504_s2, %s5505_s23  }
  0x72   :  { %5489 = dma.done.wait [#allocation6], 2048  }
  0x73   :  { %5490 = vsyncadd [#allocation6], 4294965248 }
  0x74   :  { %5491 = dma.done.wait [#allocation9], 9216  }
  0x75   :  { %5492 = vsyncadd [#allocation9], 4294958080 }
  0x76   :  { %5493 = dma.done.wait [#allocation12], 5120  }
  0x77   :  { %5494 = vsyncadd [#allocation12], 4294962176 }
  0x78   :  { %5495 = dma.done.wait [#allocation15], 1024  }
  0x79   :  { %5496 = vsyncadd [#allocation15], 4294966272  ;;  %s143_s1 = sld [smem:[#allocation0]]   ;;  %s5513_s20 = smov 1024   ;;  %v8157_v0 = vmov 0.0   ;;  %vm5522_vm0 = vmmov 0  }
  0x7a   :  { %155 = sst [smem:[#allocation20]] %s5513_s20  ;;  %4902 = vmatprep.subr.bf16.mxu1 %v8157_v0  ;;  %s5515_s21 = smov 8   ;;  %4918 = vmatprep.mubr.msk.bf16.mxu1 %vm5522_vm0, %v8157_v0 }
  0x7b   :  { %157 = sst [smem:[#allocation20 + $0x1]] %s5513_s20  ;;  %s5516_s14 = smov 128  }
  0x7c   :  { %159 = sst [smem:[#allocation20 + $0x2]] %s5515_s21  ;;  %s5517_s22 = smov 2  }
  0x7d   :  { %161 = sst [smem:[#allocation20 + $0x3]] %s5504_s2  ;;  %s5518_s7 = smov [#allocation3]  }
  0x7e   :  { %163 = sst [smem:[#allocation20 + $0x4]] %s5516_s14  ;;  %s151_s24 = sshll.u32 %s5518_s7, 4  ;;  %s152_s24 = int_to_ptr.vmem [resolvable:$true] %s151_s24 }
  0x7f   :  { %165 = sst [smem:[#allocation20 + $0x5]] %s5517_s22  ;;  %s4690_s26 = sshll.u32 %s143_s1, 26 }
  0x80   :  { %s5519_s5 = smov 512   ;;  %s4691_s30 = sadd.s32 134217728, %s4690_s26 }
  0x81   :  { %167 = sst [smem:[#allocation20 + $0x6]] %s5519_s5  ;;  %s5520_s0 = smov [#allocation4]  }
  0x82   :  { %169 = sst [smem:[#allocation20 + $0x7]] %s5504_s2  ;;  %s5521_s8 = smov [#allocation19]  }
  0x83   :  { %171 = sst [smem:[#allocation20 + $0x8]] %s5505_s23 }
  0x84   :  { %173 = dma.general %s8144_s10, 16384, %s152_s24, %s5520_s0, %s5521_s8, [#allocation20], %s4691_s30, 0  }
  0x85   :  { %v5006_v1 = vld [vmem:[#allocation5 + $0x40] sm:$0xff]   ;;  %v5008_v3 = vld [vmem:[#allocation5 + $0x48] sm:$0xff]   ;;  %v5010_v5 = vld [vmem:[#allocation5 + $0x50] sm:$0xff]   ;;  %s8463_s28 = sld [smem:[#allocation104_spill]]  ;;  %s8464_s23 = sld [smem:[#allocation106_spill]] }
  0x86   :  { %v5007_v2 = vld [vmem:[#allocation5] sm:$0xff]   ;;  %4844 = vmatprep.subr.bf16.mxu0 %v5006_v1  ;;  %v5009_v4 = vld [vmem:[#allocation5 + $0x8] sm:$0xff]   ;;  %v5011_v6 = vld [vmem:[#allocation5 + $0x10] sm:$0xff]  }
  0x87   :  { %4845 = vmatpush3.bf16.msra.mxu0 %v5007_v2  ;;  %v5012_v7 = vld [vmem:[#allocation5 + $0x58] sm:$0xff]   ;;  %v5014_v9 = vld [vmem:[#allocation5 + $0x60] sm:$0xff]   ;;  %v5016_v11 = vld [vmem:[#allocation5 + $0x68] sm:$0xff]  }
  0x88   :  { %4846 = vmatprep.subr.bf16.mxu0 %v5008_v3  ;;  %v5013_v8 = vld [vmem:[#allocation5 + $0x18] sm:$0xff]   ;;  %v5015_v10 = vld [vmem:[#allocation5 + $0x20] sm:$0xff]   ;;  %v5017_v13 = vld [vmem:[#allocation5 + $0x28] sm:$0xff]  }
  0x89   :  { %v5025_v14 = vld [vmem:[%s8137_s3] sm:$0xff]   ;;  %v5018_v15 = vld [vmem:[#allocation5 + $0x70] sm:$0xff]   ;;  %v5026_v16 = vld [vmem:[%s8137_s3 + $0x8] sm:$0xff]  }
  0x8a   :  { %4903 = vmatpush3.bf16.msra.mxu1 %v5025_v14  ;;  %v5019_v17 = vld [vmem:[#allocation5 + $0x30] sm:$0xff]   ;;  %v5020_v18 = vld [vmem:[#allocation5 + $0x78] sm:$0xff]   ;;  %v5029_v23 = vld [vmem:[%s8137_s3 + $0x20] sm:$0xff]  }
  0x8b   :  { %4847 = vmatpush3.bf16.msra.mxu0 %v5009_v4  ;;  %v5722_v12 = vld [vmem:[%s8463_s28 + $0x4] ss:$8 sps:$4 sm:$0xff]   ;;  %4904 = vmatprep.subr.bf16.mxu1 %v8157_v0  ;;  %v5027_v19 = vld [vmem:[%s8137_s3 + $0x10] sm:$0xff]   ;;  %v5021_v20 = vld [vmem:[#allocation5 + $0x38] sm:$0xff]  }
  0x8c   :  { %4848 = vmatprep.subr.bf16.mxu0 %v5010_v5  ;;  %353 = vmatprep.mubr.bf16.mxu0 %v5722_v12  ;;  %v5028_v21 = vld [vmem:[%s8137_s3 + $0x18] sm:$0xff]   ;;  %v5742_v22 = vld [vmem:[%s8463_s28] ss:$8 sps:$4 sm:$0xff]   ;;  %v5031_v25 = vld [vmem:[%s8137_s3 + $0x30] sm:$0xff]  }
  0x8d   :  { %v5030_v24 = vld [vmem:[%s8137_s3 + $0x28] sm:$0xff]   ;;  %v5032_v26 = vld [vmem:[%s8137_s3 + $0x38] sm:$0xff]   ;;  %v5033_v27 = vld [vmem:[#allocation8] sm:$0xff]  }
  0x8e   :  { %4905 = vmatpush3.bf16.msra.mxu1 %v5026_v16  ;;  %v5034_v28 = vld [vmem:[#allocation8 + $0x8] sm:$0xff]   ;;  %v5035_v29 = vld [vmem:[#allocation8 + $0x10] sm:$0xff]   ;;  %v5036_v30 = vld [vmem:[#allocation8 + $0x18] sm:$0xff]  }
  0x8f   :  { %4849 = vmatpush3.bf16.msra.mxu0 %v5011_v6  ;;  %4906 = vmatprep.subr.bf16.mxu1 %v8157_v0  ;;  %v5037_v31 = vld [vmem:[#allocation8 + $0x20] sm:$0xff]   ;;  %v5038_v32 = vld [vmem:[#allocation8 + $0x28] sm:$0xff]   ;;  %v5039_v45 = vld [vmem:[#allocation8 + $0x30] sm:$0xff]  }
  0x90   :  { %4850 = vmatprep.subr.bf16.mxu0 %v5012_v7  ;;  %v4692_v34 = vld [vmem:[%s8464_s23] ss:$0 sm:$0xff]  ;;  %v5040_v46 = vld [vmem:[#allocation8 + $0x38] sm:$0xff]   ;;  %v5043_v48 = vld [vmem:[#allocation11 + $0x4] ss:$16 sps:$4 sm:$0xff]  }
  0x91   :  { %v5041_v47 = vld [vmem:[#allocation11] ss:$16 sps:$4 sm:$0xff]   ;;  %v5046_v49 = vld [vmem:[#allocation11 + $0xc] ss:$16 sps:$4 sm:$0xff]   ;;  %v5049_v50 = vld [vmem:[#allocation11 + $0x24] ss:$16 sps:$4 sm:$0xff]  }
  0x92   :  { %4907 = vmatpush3.bf16.msra.mxu1 %v5027_v19  ;;  %v5047_v51 = vld [vmem:[#allocation11 + $0x20] ss:$16 sps:$4 sm:$0xff]   ;;  %v5055_v52 = vld [vmem:[#allocation11 + $0x44] ss:$16 sps:$4 sm:$0xff]   ;;  %v5056_v14 = vld [vmem:[#allocation11 + $0x48] ss:$16 sps:$4 sm:$0xff]  }
  0x93   :  { %4851 = vmatpush3.bf16.msra.mxu0 %v5013_v8  ;;  %4908 = vmatprep.subr.bf16.mxu1 %v8157_v0  ;;  %v5053_v53 = vld [vmem:[#allocation11 + $0x40] ss:$16 sps:$4 sm:$0xff]   ;;  %v5061_v54 = vld [vmem:[#allocation11 + $0x64] ss:$16 sps:$4 sm:$0xff]   ;;  %v5044_v8 = vld [vmem:[#allocation11 + $0x8] ss:$16 sps:$4 sm:$0xff]  }
  0x94   :  { %4852 = vmatprep.subr.bf16.mxu0 %v5014_v9  ;;  %v5059_v55 = vld [vmem:[#allocation11 + $0x60] ss:$16 sps:$4 sm:$0xff]   ;;  %v5067_v56 = vld [vmem:[#allocation11 + $0x84] ss:$16 sps:$4 sm:$0xff]   ;;  %v5062_v16 = vld [vmem:[#allocation11 + $0x68] ss:$16 sps:$4 sm:$0xff]  }
  0x95   :  { %v5065_v57 = vld [vmem:[#allocation11 + $0x80] ss:$16 sps:$4 sm:$0xff]   ;;  %v5073_v58 = vld [vmem:[#allocation11 + $0xa4] ss:$16 sps:$4 sm:$0xff]   ;;  %v5076_v19 = vld [vmem:[#allocation11 + $0xac] ss:$16 sps:$4 sm:$0xff]  }
  0x96   :  { %4909 = vmatpush3.bf16.msra.mxu1 %v5028_v21  ;;  %v5071_v59 = vld [vmem:[#allocation11 + $0xa0] ss:$16 sps:$4 sm:$0xff]   ;;  %v5079_v60 = vld [vmem:[#allocation11 + $0xc4] ss:$16 sps:$4 sm:$0xff]   ;;  %v5082_v21 = vld [vmem:[#allocation11 + $0xcc] ss:$16 sps:$4 sm:$0xff]  }
  0x97   :  { %4853 = vmatpush3.bf16.msra.mxu0 %v5015_v10  ;;  %4910 = vmatprep.subr.bf16.mxu1 %v8157_v0  ;;  %v5077_v61 = vld [vmem:[#allocation11 + $0xc0] ss:$16 sps:$4 sm:$0xff]   ;;  %v5052_v10 = vld [vmem:[#allocation11 + $0x2c] ss:$16 sps:$4 sm:$0xff]  }
  0x98   :  { %4854 = vmatprep.subr.bf16.mxu0 %v5016_v11  ;;  %v4711_v62 = vld [vmem:[%s8138_s4] ss:$0 sm:$0xff]  ;;  %v5050_v11 = vld [vmem:[#allocation11 + $0x28] ss:$16 sps:$4 sm:$0xff]  }
  0x9a   :  { %4911 = vmatpush3.bf16.msra.mxu1 %v5029_v23  ;;  %v5080_v23 = vld [vmem:[#allocation11 + $0xc8] ss:$16 sps:$4 sm:$0xff]  }
  0x9b   :  { %4855 = vmatpush3.bf16.msra.mxu0 %v5017_v13  ;;  %4912 = vmatprep.subr.bf16.mxu1 %v8157_v0  ;;  %v5058_v13 = vld [vmem:[#allocation11 + $0x4c] ss:$16 sps:$4 sm:$0xff]  }
  0x9c   :  { %4856 = vmatprep.subr.bf16.mxu0 %v5018_v15  ;;  %v5064_v15 = vld [vmem:[#allocation11 + $0x6c] ss:$16 sps:$4 sm:$0xff]  }
  0x9e   :  { %4913 = vmatpush3.bf16.msra.mxu1 %v5030_v24  ;;  %v5085_v24 = vld [vmem:[#allocation11 + $0xe4] ss:$16 sps:$4 sm:$0xff]  }
  0x9f   :  { %4857 = vmatpush3.bf16.msra.mxu0 %v5019_v17  ;;  %4914 = vmatprep.subr.bf16.mxu1 %v8157_v0  ;;  %v5070_v17 = vld [vmem:[#allocation11 + $0x8c] ss:$16 sps:$4 sm:$0xff]  }
  0xa0   :  { %4858 = vmatprep.subr.bf16.mxu0 %v5020_v18  ;;  %v5068_v18 = vld [vmem:[#allocation11 + $0x88] ss:$16 sps:$4 sm:$0xff]  }
  0xa2   :  { %4915 = vmatpush3.bf16.msra.mxu1 %v5031_v25  ;;  %v5088_v25 = vld [vmem:[#allocation11 + $0xec] ss:$16 sps:$4 sm:$0xff]  }
  0xa3   :  { %4859 = vmatpush3.bf16.msra.mxu0 %v5021_v20  ;;  %4916 = vmatprep.subr.bf16.mxu1 %v8157_v0  ;;  %v5074_v20 = vld [vmem:[#allocation11 + $0xa8] ss:$16 sps:$4 sm:$0xff]  }
  0xa4   :  { %4922 = vmatprep.subr.bf16.mxu0 %v8157_v0 }
  0xa6   :  { %354 = vmatmul.mubr.bf16.vlgmr.msra.gmra.mrb[0].mxu0 %v5742_v22  ;;  %4917 = vmatpush3.bf16.msra.mxu1 %v5032_v26  ;;  %v5083_v26 = vld [vmem:[#allocation11 + $0xe0] ss:$16 sps:$4 sm:$0xff]  }
  0xa7   :  { %4938 = vmatprep.mubr.msk.bf16.mxu0 %vm5522_vm0, %v8157_v0  ;;  %4923 = vmatpush3.bf16.msra.mxu0 %v5033_v27  ;;  %v5086_v27 = vld [vmem:[#allocation11 + $0xe8] ss:$16 sps:$4 sm:$0xff]  }
  0xa8   :  { %4924 = vmatprep.subr.bf16.mxu0 %v8157_v0  ;;  %849 = vmatprep.subr.bf16.mxu1 %v5043_v48  ;;  %v5104_v48 = vld [vmem:[#allocation10 + $0x48] ss:$16 sps:$4 sm:$0xff]  }
  0xab   :  { %4925 = vmatpush3.bf16.msra.mxu0 %v5034_v28  ;;  %v5091_v28 = vld [vmem:[#allocation10 + $0x4] ss:$16 sps:$4 sm:$0xff]  }
  0xac   :  { %4926 = vmatprep.subr.bf16.mxu0 %v8157_v0 }
  0xaf   :  { %4927 = vmatpush3.bf16.msra.mxu0 %v5035_v29  ;;  %v5094_v29 = vld [vmem:[#allocation10 + $0xc] ss:$16 sps:$4 sm:$0xff]  }
  0xb0   :  { %4928 = vmatprep.subr.bf16.mxu0 %v8157_v0 }
  0xb3   :  { %4929 = vmatpush3.bf16.msra.mxu0 %v5036_v30  ;;  %v8162_v30 = vmov 0  }
  0xb4   :  { %4930 = vmatprep.subr.bf16.mxu0 %v8157_v0 }
  0xb7   :  { %4931 = vmatpush3.bf16.msra.mxu0 %v5037_v31  ;;  %v4720_v31 = vld [vmem:[%s8140_s6] ss:$0 sm:$0xff] }
  0xb8   :  { %4932 = vmatprep.subr.bf16.mxu0 %v8157_v0 }
  0xbb   :  { %4933 = vmatpush3.bf16.msra.mxu0 %v5038_v32 }
  0xbc   :  { %4934 = vmatprep.subr.bf16.mxu0 %v8157_v0 }
  0xbf   :  { %4935 = vmatpush3.bf16.msra.mxu0 %v5039_v45  ;;  %v5103_v45 = vld [vmem:[#allocation10 + $0x44] ss:$16 sps:$4 sm:$0xff]  }
  0xc0   :  { %4936 = vmatprep.subr.bf16.mxu0 %v8157_v0 }
  0xc3   :  { %4937 = vmatpush3.bf16.msra.mxu0 %v5040_v46  ;;  %v5106_v46 = vld [vmem:[#allocation10 + $0x4c] ss:$16 sps:$4 sm:$0xff]  }
  0xc4   :  { %890 = vmatprep.subr.bf16.mxu0 %v5046_v49  ;;  %v5109_v49 = vld [vmem:[#allocation10 + $0x64] ss:$16 sps:$4 sm:$0xff]  }
 0x179   :  { %v4860_v33 = vpop.f32.mrb[0].mxu0 }
 0x17a   :  { %v4861_v35 = vpop.f32.mrb[1].mxu0 }
 0x17b   :  { %v4862_v36 = vadd.f32 %v4861_v35, %v4860_v33  ;;  %v4863_v37 = vpop.f32.mrb[2].mxu0 }
 0x17c   :  { %v4864_v38 = vpop.f32.mrb[3].mxu0 }
 0x17d   :  { %v356_v39 = vadd.f32 %v4862_v36, %v4692_v34  ;;  %v4865_v40 = vadd.f32 %v4864_v38, %v4863_v37  ;;  %v5089_v38 = vld [vmem:[#allocation10] ss:$16 sps:$4 sm:$0xff]  }
 0x17f   :  { %v359_v41 = vadd.f32 %v4865_v40, %v4692_v34  ;;  %v362_v42 = vmax.f32 %v356_v39, 0.0  ;;  %v5092_v39 = vld [vmem:[#allocation10 + $0x8] ss:$16 sps:$4 sm:$0xff]  }
 0x181   :  { %v363_v43 = vmax.f32 %v359_v41, 0.0  ;;  %v5097_v41 = vld [vmem:[#allocation10 + $0x24] ss:$16 sps:$4 sm:$0xff]  }
 0x183   :  { %v364_v44 = vpack.c.bf16 %v363_v43, %v362_v42  ;;  %v5100_v42 = vld [vmem:[#allocation10 + $0x2c] ss:$16 sps:$4 sm:$0xff]   ;;  %v5095_v43 = vld [vmem:[#allocation10 + $0x20] ss:$16 sps:$4 sm:$0xff]  }
 0x185   :  { %4919 = vmatmul.mubr.bf16.vlgmr.msra.gmra.mrb[0].mxu1 %v364_v44  ;;  %v5098_v44 = vld [vmem:[#allocation10 + $0x28] ss:$16 sps:$4 sm:$0xff]  }
 0x186   :  { %850 = vmatpush1.bf16.msra.mxu1 %v5041_v47  ;;  %881 = vmatprep.mubr.bf16.mxu1 %v8162_v30  ;;  %v5101_v47 = vld [vmem:[#allocation10 + $0x40] ss:$16 sps:$4 sm:$0xff]  }
 0x187   :  { %851 = vmatprep.subr.bf16.mxu1 %v5049_v50  ;;  %v5112_v50 = vld [vmem:[#allocation10 + $0x6c] ss:$16 sps:$4 sm:$0xff]  }
 0x18a   :  { %852 = vmatpush1.bf16.msra.mxu1 %v5047_v51  ;;  %v5107_v51 = vld [vmem:[#allocation10 + $0x60] ss:$16 sps:$4 sm:$0xff]  }
 0x18b   :  { %853 = vmatprep.subr.bf16.mxu1 %v5055_v52  ;;  %v5110_v52 = vld [vmem:[#allocation10 + $0x68] ss:$16 sps:$4 sm:$0xff]  }
 0x18e   :  { %854 = vmatpush1.bf16.msra.mxu1 %v5053_v53  ;;  %v5115_v53 = vld [vmem:[#allocation10 + $0x84] ss:$16 sps:$4 sm:$0xff]  }
 0x18f   :  { %855 = vmatprep.subr.bf16.mxu1 %v5061_v54  ;;  %v5118_v54 = vld [vmem:[#allocation10 + $0x8c] ss:$16 sps:$4 sm:$0xff]  }
 0x192   :  { %856 = vmatpush1.bf16.msra.mxu1 %v5059_v55  ;;  %v5113_v55 = vld [vmem:[#allocation10 + $0x80] ss:$16 sps:$4 sm:$0xff]  }
 0x193   :  { %857 = vmatprep.subr.bf16.mxu1 %v5067_v56  ;;  %v5121_v56 = vld [vmem:[#allocation10 + $0xa4] ss:$16 sps:$4 sm:$0xff]  }
 0x196   :  { %858 = vmatpush1.bf16.msra.mxu1 %v5065_v57  ;;  %v5124_v57 = vld [vmem:[#allocation10 + $0xac] ss:$16 sps:$4 sm:$0xff]  }
 0x197   :  { %859 = vmatprep.subr.bf16.mxu1 %v5073_v58  ;;  %v5119_v58 = vld [vmem:[#allocation10 + $0xa0] ss:$16 sps:$4 sm:$0xff]  }
 0x19a   :  { %860 = vmatpush1.bf16.msra.mxu1 %v5071_v59  ;;  %v5122_v59 = vld [vmem:[#allocation10 + $0xa8] ss:$16 sps:$4 sm:$0xff]  }
 0x19b   :  { %861 = vmatprep.subr.bf16.mxu1 %v5079_v60  ;;  %v5127_v60 = vld [vmem:[#allocation10 + $0xc4] ss:$16 sps:$4 sm:$0xff]  }
 0x19e   :  { %862 = vmatpush1.bf16.msra.mxu1 %v5077_v61  ;;  %v5130_v61 = vld [vmem:[#allocation10 + $0xcc] ss:$16 sps:$4 sm:$0xff]  }
 0x19f   :  { %863 = vmatprep.subr.bf16.mxu1 %v5085_v24  ;;  %v5166_v24 = vld [vmem:[#allocation10 + $0x18c] ss:$16 sps:$4 sm:$0xff]  }
 0x1a2   :  { %864 = vmatpush1.bf16.msra.mxu1 %v5083_v26  ;;  %v5164_v26 = vld [vmem:[#allocation10 + $0x188] ss:$16 sps:$4 sm:$0xff]  }
 0x1a3   :  { %1251 = vmatprep.subr.bf16.mxu1 %v5091_v28  ;;  %v5172_v28 = vld [vmem:[#allocation10 + $0x1ac] ss:$16 sps:$4 sm:$0xff]  }
 0x258   :  { %v470_v63 = vpop.f32.mrb[0].mxu1 }
 0x259   :  { %v471_v1 = vadd.f32 %v4711_v62, %v470_v63  ;;  %v4920_v2 = vpop.f32.mrb[1].mxu1  ;;  %v5128_v63 = vld [vmem:[#allocation10 + $0xc8] ss:$16 sps:$4 sm:$0xff]  }
 0x25a   :  { %v473_v3 = vpop.f32.mrb[2].mxu1  ;;  %v5136_v2 = vld [vmem:[#allocation10 + $0xec] ss:$16 sps:$4 sm:$0xff]  }
 0x25b   :  { %v474_v4 = vadd.f32 %v4711_v62, %v473_v3  ;;  %v4921_v5 = vpop.f32.mrb[3].mxu1  ;;  %v477_v6 = vmax.f32 %v471_v1, 0.0  ;;  %v5125_v62 = vld [vmem:[#allocation10 + $0xc0] ss:$16 sps:$4 sm:$0xff]   ;;  %v5133_v1 = vld [vmem:[#allocation10 + $0xe4] ss:$16 sps:$4 sm:$0xff]  }
 0x25c   :  { %v5131_v3 = vld [vmem:[#allocation10 + $0xe0] ss:$16 sps:$4 sm:$0xff]   ;;  %v5139_v5 = vld [vmem:[#allocation10 + $0x104] ss:$16 sps:$4 sm:$0xff]  }
 0x25d   :  { %v478_v7 = vmax.f32 %v474_v4, 0.0  ;;  %v5134_v4 = vld [vmem:[#allocation10 + $0xe8] ss:$16 sps:$4 sm:$0xff]  }
 0x25f   :  { %v479_v9 = vpack.c.bf16 %v478_v7, %v477_v6  ;;  %v5142_v6 = vld [vmem:[#allocation10 + $0x10c] ss:$16 sps:$4 sm:$0xff]   ;;  %v5137_v7 = vld [vmem:[#allocation10 + $0x100] ss:$16 sps:$4 sm:$0xff]  }
 0x261   :  { %4939 = vmatmul.mubr.bf16.vlgmr.msra.gmra.mrb[4].mxu0 %v479_v9  ;;  %v5145_v9 = vld [vmem:[#allocation10 + $0x124] ss:$16 sps:$4 sm:$0xff]  }
 0x262   :  { %891 = vmatpush1.bf16.msra.mxu0 %v5044_v8  ;;  %922 = vmatprep.mubr.bf16.mxu0 %v8162_v30  ;;  %v5140_v8 = vld [vmem:[#allocation10 + $0x108] ss:$16 sps:$4 sm:$0xff]  }
 0x263   :  { %892 = vmatprep.subr.bf16.mxu0 %v5052_v10  ;;  %v5148_v10 = vld [vmem:[#allocation10 + $0x12c] ss:$16 sps:$4 sm:$0xff]  }
 0x266   :  { %893 = vmatpush1.bf16.msra.mxu0 %v5050_v11  ;;  %v5143_v11 = vld [vmem:[#allocation10 + $0x120] ss:$16 sps:$4 sm:$0xff]  }
 0x267   :  { %894 = vmatprep.subr.bf16.mxu0 %v5058_v13  ;;  %v5146_v13 = vld [vmem:[#allocation10 + $0x128] ss:$16 sps:$4 sm:$0xff]  }
 0x26a   :  { %895 = vmatpush1.bf16.msra.mxu0 %v5056_v14  ;;  %v5151_v14 = vld [vmem:[#allocation10 + $0x144] ss:$16 sps:$4 sm:$0xff]  }
 0x26b   :  { %896 = vmatprep.subr.bf16.mxu0 %v5064_v15  ;;  %v5154_v15 = vld [vmem:[#allocation10 + $0x14c] ss:$16 sps:$4 sm:$0xff]  }
 0x26e   :  { %897 = vmatpush1.bf16.msra.mxu0 %v5062_v16  ;;  %v5149_v16 = vld [vmem:[#allocation10 + $0x140] ss:$16 sps:$4 sm:$0xff]  }
 0x26f   :  { %898 = vmatprep.subr.bf16.mxu0 %v5070_v17  ;;  %v5152_v17 = vld [vmem:[#allocation10 + $0x148] ss:$16 sps:$4 sm:$0xff]  }
 0x272   :  { %899 = vmatpush1.bf16.msra.mxu0 %v5068_v18  ;;  %v5157_v18 = vld [vmem:[#allocation10 + $0x164] ss:$16 sps:$4 sm:$0xff]  }
 0x273   :  { %900 = vmatprep.subr.bf16.mxu0 %v5076_v19  ;;  %v5160_v19 = vld [vmem:[#allocation10 + $0x16c] ss:$16 sps:$4 sm:$0xff]  }
 0x276   :  { %901 = vmatpush1.bf16.msra.mxu0 %v5074_v20  ;;  %v5155_v20 = vld [vmem:[#allocation10 + $0x160] ss:$16 sps:$4 sm:$0xff]  }
 0x277   :  { %902 = vmatprep.subr.bf16.mxu0 %v5082_v21  ;;  %v5158_v21 = vld [vmem:[#allocation10 + $0x168] ss:$16 sps:$4 sm:$0xff]  }
 0x27a   :  { %903 = vmatpush1.bf16.msra.mxu0 %v5080_v23  ;;  %v5163_v23 = vld [vmem:[#allocation10 + $0x184] ss:$16 sps:$4 sm:$0xff]  }
 0x27b   :  { %904 = vmatprep.subr.bf16.mxu0 %v5088_v25  ;;  %v5161_v25 = vld [vmem:[#allocation10 + $0x180] ss:$16 sps:$4 sm:$0xff]  }
 0x27e   :  { %905 = vmatpush1.bf16.msra.mxu0 %v5086_v27  ;;  %v5169_v27 = vld [vmem:[#allocation10 + $0x1a4] ss:$16 sps:$4 sm:$0xff]  }
 0x27f   :  { %1292 = vmatprep.subr.bf16.mxu0 %v5094_v29  ;;  %v5167_v29 = vld [vmem:[#allocation10 + $0x1a0] ss:$16 sps:$4 sm:$0xff]  }
 0x334   :  { %v585_v32 = vpop.f32.mrb[4].mxu0 }
 0x335   :  { %v4940_v33 = vpop.f32.mrb[5].mxu0  ;;  %v5785_v35 = vadd.f32 %v4720_v31, %v585_v32  ;;  %v5175_v32 = vld [vmem:[#allocation10 + $0x1c4] ss:$16 sps:$4 sm:$0xff]  }
 0x336   :  { %v588_v34 = vpop.f32.mrb[6].mxu0  ;;  %v5178_v33 = vld [vmem:[#allocation10 + $0x1cc] ss:$16 sps:$4 sm:$0xff]  }
 0x337   :  { %8465 = vst [vmem:[#allocation28_spill] sm:$0xff] %v5785_v35  ;;  %v5787_v36 = vadd.f32 %v4720_v31, %v588_v34  ;;  %v4941_v37 = vpop.f32.mrb[7].mxu0  ;;  %v5170_v31 = vld [vmem:[#allocation10 + $0x1a8] ss:$16 sps:$4 sm:$0xff]   ;;  %v5173_v34 = vld [vmem:[#allocation10 + $0x1c0] ss:$16 sps:$4 sm:$0xff]  }
 0x338   :  { %v5176_v37 = vld [vmem:[#allocation10 + $0x1c8] ss:$16 sps:$4 sm:$0xff]  }
 0x339   :  { %8466 = vst [vmem:[#allocation29_spill] sm:$0xff] %v5787_v36  ;;  %v656_v40 = vpack.c.bf16 %v5787_v36, %v5785_v35 }
 0x33b   :  { %882 = vmatmul.mubr.bf16.vlgmr.msra.gmra.mrb[4].mxu1 %v656_v40  ;;  %923 = vmatmul.mubr.bf16.vlgmr.msra.gmra.mrb[8].mxu0 %v656_v40  ;;  %v5179_v40 = vld [vmem:[#allocation10 + $0x1e0] ss:$16 sps:$4 sm:$0xff]  }
 0x33c   :  { %1252 = vmatpush1.bf16.msra.mxu1 %v5089_v38  ;;  %1293 = vmatpush1.bf16.msra.mxu0 %v5092_v39  ;;  %v5181_v38 = vld [vmem:[#allocation10 + $0x1e4] ss:$16 sps:$4 sm:$0xff]   ;;  %v5184_v39 = vld [vmem:[#allocation10 + $0x1ec] ss:$16 sps:$4 sm:$0xff]  }
 0x33d   :  { %1253 = vmatprep.subr.bf16.mxu1 %v5097_v41  ;;  %1294 = vmatprep.subr.bf16.mxu0 %v5100_v42  ;;  %v5182_v41 = vld [vmem:[#allocation10 + $0x1e8] ss:$16 sps:$4 sm:$0xff]  }
 0x33e   :  { %1283 = vmatprep.mubr.bf16.mxu1 %v5722_v12  ;;  %1324 = vmatprep.mubr.bf16.mxu0 %v5722_v12  ;;  %v5116_v12 = vld [vmem:[#allocation10 + $0x88] ss:$16 sps:$4 sm:$0xff]  }
 0x340   :  { %1254 = vmatpush1.bf16.msra.mxu1 %v5095_v43  ;;  %1295 = vmatpush1.bf16.msra.mxu0 %v5098_v44 }
 0x341   :  { %1255 = vmatprep.subr.bf16.mxu1 %v5103_v45  ;;  %1296 = vmatprep.subr.bf16.mxu0 %v5106_v46 }
 0x344   :  { %1256 = vmatpush1.bf16.msra.mxu1 %v5101_v47  ;;  %1297 = vmatpush1.bf16.msra.mxu0 %v5104_v48 }
 0x345   :  { %1257 = vmatprep.subr.bf16.mxu1 %v5109_v49  ;;  %1298 = vmatprep.subr.bf16.mxu0 %v5112_v50  ;;  %v1335_v50 = vlaneseq }
 0x348   :  { %1258 = vmatpush1.bf16.msra.mxu1 %v5107_v51  ;;  %1299 = vmatpush1.bf16.msra.mxu0 %v5110_v52  ;;  %v5795_v51 = vshrl.u32 %v1335_v50, 7 }
 0x349   :  { %1259 = vmatprep.subr.bf16.mxu1 %v5115_v53  ;;  %1300 = vmatprep.subr.bf16.mxu0 %v5118_v54 }
 0x34a   :  { %8467 = vst [vmem:[#allocation30_spill] sm:$0xff] %v5795_v51  ;;  %v5798_v52 = vsub.s32 0, %v5795_v51  ;;  %v8159_v53 = vsub.s32 2, %v5795_v51  ;;  %v8161_v54 = vsub.s32 1, %v5795_v51 }
 0x34c   :  { %1260 = vmatpush1.bf16.msra.mxu1 %v5113_v55  ;;  %1301 = vmatpush1.bf16.msra.mxu0 %v5116_v12  ;;  %8468 = vst [vmem:[#allocation31_spill] sm:$0xff] %v5798_v52  ;;  %v8160_v55 = vsub.s32 3, %v5795_v51 }
 0x34d   :  { %1261 = vmatprep.subr.bf16.mxu1 %v5121_v56  ;;  %1302 = vmatprep.subr.bf16.mxu0 %v5124_v57 }
 0x350   :  { %1262 = vmatpush1.bf16.msra.mxu1 %v5119_v58  ;;  %1303 = vmatpush1.bf16.msra.mxu0 %v5122_v59 }
 0x351   :  { %1263 = vmatprep.subr.bf16.mxu1 %v5127_v60  ;;  %1304 = vmatprep.subr.bf16.mxu0 %v5130_v61 }
 0x354   :  { %1264 = vmatpush1.bf16.msra.mxu1 %v5125_v62  ;;  %1305 = vmatpush1.bf16.msra.mxu0 %v5128_v63 }
 0x355   :  { %1265 = vmatprep.subr.bf16.mxu1 %v5133_v1  ;;  %1306 = vmatprep.subr.bf16.mxu0 %v5136_v2 }
 0x358   :  { %1266 = vmatpush1.bf16.msra.mxu1 %v5131_v3  ;;  %1307 = vmatpush1.bf16.msra.mxu0 %v5134_v4 }
 0x359   :  { %1267 = vmatprep.subr.bf16.mxu1 %v5139_v5  ;;  %1308 = vmatprep.subr.bf16.mxu0 %v5142_v6 }
 0x35c   :  { %1268 = vmatpush1.bf16.msra.mxu1 %v5137_v7  ;;  %1309 = vmatpush1.bf16.msra.mxu0 %v5140_v8 }
 0x35d   :  { %1269 = vmatprep.subr.bf16.mxu1 %v5145_v9  ;;  %1310 = vmatprep.subr.bf16.mxu0 %v5148_v10 }
 0x360   :  { %1270 = vmatpush1.bf16.msra.mxu1 %v5143_v11  ;;  %1311 = vmatpush1.bf16.msra.mxu0 %v5146_v13 }
 0x361   :  { %1271 = vmatprep.subr.bf16.mxu1 %v5151_v14  ;;  %1312 = vmatprep.subr.bf16.mxu0 %v5154_v15 }
 0x364   :  { %1272 = vmatpush1.bf16.msra.mxu1 %v5149_v16  ;;  %1313 = vmatpush1.bf16.msra.mxu0 %v5152_v17 }
 0x365   :  { %1273 = vmatprep.subr.bf16.mxu1 %v5157_v18  ;;  %1314 = vmatprep.subr.bf16.mxu0 %v5160_v19 }
 0x368   :  { %1274 = vmatpush1.bf16.msra.mxu1 %v5155_v20  ;;  %1315 = vmatpush1.bf16.msra.mxu0 %v5158_v21 }
 0x369   :  { %1275 = vmatprep.subr.bf16.mxu1 %v5163_v23  ;;  %1316 = vmatprep.subr.bf16.mxu0 %v5166_v24 }
 0x36c   :  { %1276 = vmatpush1.bf16.msra.mxu1 %v5161_v25  ;;  %1317 = vmatpush1.bf16.msra.mxu0 %v5164_v26 }
 0x36d   :  { %1277 = vmatprep.subr.bf16.mxu1 %v5169_v27  ;;  %1318 = vmatprep.subr.bf16.mxu0 %v5172_v28 }
 0x370   :  { %1278 = vmatpush1.bf16.msra.mxu1 %v5167_v29  ;;  %1319 = vmatpush1.bf16.msra.mxu0 %v5170_v31 }
 0x371   :  { %1279 = vmatprep.subr.bf16.mxu1 %v5175_v32  ;;  %1320 = vmatprep.subr.bf16.mxu0 %v5178_v33 }
 0x374   :  { %1280 = vmatpush1.bf16.msra.mxu1 %v5173_v34  ;;  %1321 = vmatpush1.bf16.msra.mxu0 %v5176_v37 }
 0x375   :  { %1281 = vmatprep.subr.bf16.mxu1 %v5181_v38  ;;  %1322 = vmatprep.subr.bf16.mxu0 %v5184_v39 }
 0x378   :  { %1282 = vmatpush1.bf16.msra.mxu1 %v5179_v40  ;;  %1323 = vmatpush1.bf16.msra.mxu0 %v5182_v41 }
 0x37b   :  { %1284 = vmatmul.mubr.bf16.vlgmr.msra.gmra.mrb[8].mxu1 %v5742_v22  ;;  %1325 = vmatmul.mubr.bf16.vlgmr.msra.gmra.mrb[12].mxu0 %v5742_v22  ;;  %v1333_v22 = vld [vmem:[%s8143_s9] sm:$0xf] }
 0x37c   :  { %v1338_v12 = vrot.slane %v1333_v22, %v5798_v52  ;;  %v1346_v56 = vrot.slane %v1333_v22, %v8159_v53  ;;  %v1342_v59 = vrot.slane %v1333_v22, %v8161_v54  ;;  %v1350_v60 = vrot.slane %v1333_v22, %v8160_v55 }
 0x40e   :  { %v883_v42 = vpop.f32.mrb[4].mxu1  ;;  %v924_v43 = vpop.f32.mrb[8].mxu0 }
 0x40f   :  { %v885_v44 = vpop.f32.mrb[5].mxu1  ;;  %v926_v45 = vpop.f32.mrb[9].mxu0 }
 0x410   :  { %v887_v46 = vpop.f32.mrb[6].mxu1  ;;  %v928_v47 = vpop.f32.mrb[10].mxu0 }
 0x411   :  { %v888_v48 = vpop.f32.mrb[7].mxu1  ;;  %v929_v49 = vpop.f32.mrb[11].mxu0 }
 0x44e   :  { %v1285_v57 = vpop.f32.mrb[8].mxu1  ;;  %v1326_v58 = vpop.f32.mrb[12].mxu0 }
 0x44f   :  { %v1286_v61 = vadd.f32 %v1285_v57, %v883_v42  ;;  %v1327_v62 = vadd.f32 %v1326_v58, %v924_v43  ;;  %v1287_v63 = vpop.f32.mrb[9].mxu1  ;;  %v1328_v1 = vpop.f32.mrb[13].mxu0 }
 0x450   :  { %v1288_v2 = vadd.f32 %v1287_v63, %v885_v44  ;;  %v1329_v3 = vadd.f32 %v1328_v1, %v926_v45  ;;  %v1289_v4 = vpop.f32.mrb[10].mxu1  ;;  %v1330_v5 = vpop.f32.mrb[14].mxu0 }
 0x451   :  { %v1355_v6 = vadd.f32 %v1338_v12, %v1286_v61  ;;  %v1357_v7 = vadd.f32 %v1346_v56, %v1327_v62  ;;  %v1290_v8 = vpop.f32.mrb[11].mxu1  ;;  %v1331_v9 = vpop.f32.mrb[15].mxu0 }
 0x452   :  { %v1356_v10 = vadd.f32 %v1342_v59, %v1288_v2  ;;  %v1358_v11 = vadd.f32 %v1350_v60, %v1329_v3 }
 0x453   :  { %1359 = vst [vmem:[#allocation2] sm:$0xff] %v1355_v6  ;;  %1361 = vst [vmem:[#allocation2 + $0x10] sm:$0xff] %v1357_v7 }
 0x454   :  { %1360 = vst [vmem:[#allocation2 + $0x8] sm:$0xff] %v1356_v10  ;;  %1362 = vst [vmem:[#allocation2 + $0x18] sm:$0xff] %v1358_v11 }
 0x455   :  { %5497 = dma.done.wait [#allocation4], 16384 }
 0x456   :  { %5498 = vsyncadd [#allocation4], 4294950912  ;;  %1555 = vmatprep.mubr.bf16.mxu1 %v8162_v30  ;;  %1596 = vmatprep.mubr.bf16.mxu0 %v8162_v30  ;;  %v5815_v13 = vld [vmem:[#allocation3 + $0x8] sm:$0xff]  ;;  %v5817_v14 = vld [vmem:[#allocation3 + $0x18] sm:$0xff]  ;;  %vm1390_vm1 = vcmask 1040384   ;;  %s5525_s22 = smov [#allocation16]  }
 0x457   :  { %v5819_v15 = vld [vmem:[#allocation3] sm:$0xff]  ;;  %1523 = vmatprep.subr.bf16.mxu1 %v5815_v13  ;;  %1564 = vmatprep.subr.bf16.mxu0 %v5817_v14  ;;  %v5823_v16 = vld [vmem:[#allocation3 + $0x10] sm:$0xff]  ;;  %v5825_v17 = vld [vmem:[#allocation3 + $0x48] sm:$0xff]  ;;  %vm1391_vm2 = vsmask.f32 256  ;;  %s4656_s7 = sshll.u32 %s5525_s22, 4  ;;  %s4657_s7 = int_to_ptr.vmem [resolvable:$true] %s4656_s7 }
 0x458   :  { %v5827_v18 = vld [vmem:[#allocation3 + $0x58] sm:$0xff]  ;;  %1524 = vmatpush1.bf16.msra.mxu1 %v5819_v15  ;;  %1565 = vmatpush1.bf16.msra.mxu0 %v5823_v16  ;;  %v5833_v19 = vld [vmem:[#allocation3 + $0x40] sm:$0xff]  ;;  %v5835_v20 = vld [vmem:[#allocation3 + $0x50] sm:$0xff]  ;;  %s5445_s24 = scalar_lea.vmem %s4657_s7, 128  ;;  %p5450_p7 = scmp.lt.s32.totalorder %s4657_s7, %s4657_s7 }
 0x459   :  { %1525 = vmatprep.subr.bf16.mxu1 %v5825_v17  ;;  %1566 = vmatprep.subr.bf16.mxu0 %v5827_v18  ;;  %v5837_v21 = vld [vmem:[#allocation3 + $0x88] sm:$0xff]  ;;  %v5839_v23 = vld [vmem:[#allocation3 + $0x98] sm:$0xff]  ;;  %v5845_v24 = vld [vmem:[#allocation3 + $0x80] sm:$0xff]  ;;  %p5446_p6 = scmp.ne.s32.totalorder %s4657_s7, %s5445_s24  ;;  %p5451_p8 = scmp.lt.s32.totalorder %s5445_s24, %s5445_s24 }
 0x45a   :  { %v5847_v25 = vld [vmem:[#allocation3 + $0x90] sm:$0xff]  ;;  %v5849_v26 = vld [vmem:[#allocation3 + $0xc8] sm:$0xff]  ;;  %v5851_v27 = vld [vmem:[#allocation3 + $0xd8] sm:$0xff] }
 0x45b   :  { %v5857_v28 = vld [vmem:[#allocation3 + $0xc0] sm:$0xff]  ;;  %v5859_v29 = vld [vmem:[#allocation3 + $0xd0] sm:$0xff]  ;;  %v5861_v31 = vld [vmem:[#allocation3 + $0x108] sm:$0xff]  ;;  %p5452_p9 = por %p5451_p8, %p5450_p7 }
 0x45c   :  { %1526 = vmatpush1.bf16.msra.mxu1 %v5833_v19  ;;  %1567 = vmatpush1.bf16.msra.mxu0 %v5835_v20  ;;  %v5863_v32 = vld [vmem:[#allocation3 + $0x118] sm:$0xff]  ;;  %v5869_v33 = vld [vmem:[#allocation3 + $0x100] sm:$0xff]  ;;  %v5871_v34 = vld [vmem:[#allocation3 + $0x110] sm:$0xff] }
 0x45d   :  { %1527 = vmatprep.subr.bf16.mxu1 %v5837_v21  ;;  %1568 = vmatprep.subr.bf16.mxu0 %v5839_v23  ;;  %v5873_v37 = vld [vmem:[#allocation3 + $0x148] sm:$0xff]  ;;  %v5875_v38 = vld [vmem:[#allocation3 + $0x158] sm:$0xff]  ;;  %v5881_v39 = vld [vmem:[#allocation3 + $0x140] sm:$0xff]  ;;  %p5453_p10 = pnand %p5452_p9, %p5446_p6 }
 0x45e   :  { %v5883_v40 = vld [vmem:[#allocation3 + $0x150] sm:$0xff]  ;;  %v5885_v41 = vld [vmem:[#allocation3 + $0x188] sm:$0xff]  ;;  %v5887_v42 = vld [vmem:[#allocation3 + $0x198] sm:$0xff] }
 0x45f   :  { %v1368_v43 = vld [vmem:[#allocation2] ss:$8 sm:$0xf]  ;;  %vm6008_vm3 = vmand %vm1390_vm1, %vm1391_vm2 }
 0x460   :  { %1528 = vmatpush1.bf16.msra.mxu1 %v5845_v24  ;;  %1569 = vmatpush1.bf16.msra.mxu0 %v5847_v25  ;;  %5201 = vtanh.f32 %v1368_v43  ;;  %v5893_v44 = vld [vmem:[#allocation3 + $0x180] sm:$0xff]  ;;  %v5895_v45 = vld [vmem:[#allocation3 + $0x190] sm:$0xff]  ;;  %v5897_v46 = vld [vmem:[#allocation3 + $0x1c8] sm:$0xff] }
 0x461   :  { %1529 = vmatprep.subr.bf16.mxu1 %v5849_v26  ;;  %1570 = vmatprep.subr.bf16.mxu0 %v5851_v27  ;;  %v5899_v47 = vld [vmem:[#allocation3 + $0x1d8] sm:$0xff]  ;;  %v5905_v48 = vld [vmem:[#allocation3 + $0x1c0] sm:$0xff]  ;;  %v5907_v49 = vld [vmem:[#allocation3 + $0x1d0] sm:$0xff] }
 0x462   :  { %v5909_v50 = vld [vmem:[#allocation3 + $0x208] sm:$0xff]  ;;  %v5911_v22 = vld [vmem:[#allocation3 + $0x218] sm:$0xff]  ;;  %v5917_v12 = vld [vmem:[#allocation3 + $0x200] sm:$0xff] }
 0x463   :  { %v5919_v56 = vld [vmem:[#allocation3 + $0x210] sm:$0xff]  ;;  %v5921_v58 = vld [vmem:[#allocation3 + $0x248] sm:$0xff]  ;;  %v5923_v59 = vld [vmem:[#allocation3 + $0x258] sm:$0xff] }
 0x464   :  { %1530 = vmatpush1.bf16.msra.mxu1 %v5857_v28  ;;  %1571 = vmatpush1.bf16.msra.mxu0 %v5859_v29  ;;  %v5929_v62 = vld [vmem:[#allocation3 + $0x240] sm:$0xff]  ;;  %v5931_v63 = vld [vmem:[#allocation3 + $0x250] sm:$0xff]  ;;  %v5933_v2 = vld [vmem:[#allocation3 + $0x288] sm:$0xff] }
 0x465   :  { %1531 = vmatprep.subr.bf16.mxu1 %v5861_v31  ;;  %1572 = vmatprep.subr.bf16.mxu0 %v5863_v32  ;;  %v5935_v3 = vld [vmem:[#allocation3 + $0x298] sm:$0xff]  ;;  %v5941_v6 = vld [vmem:[#allocation3 + $0x280] sm:$0xff]  ;;  %v5943_v7 = vld [vmem:[#allocation3 + $0x290] sm:$0xff] }
 0x466   :  { %v5945_v9 = vld [vmem:[#allocation3 + $0x2c8] sm:$0xff]  ;;  %v5947_v10 = vld [vmem:[#allocation3 + $0x2d8] sm:$0xff]  ;;  %v5949_v11 = vld [vmem:[#allocation3 + $0x2c0] sm:$0xff] }
 0x467   :  { %v5972_v53 = vld [vmem:[#allocation3 + $0x358] sm:$0xff]  ;;  %v5978_v55 = vld [vmem:[#allocation3 + $0x350] sm:$0xff]  ;;  %v5982_v54 = vld [vmem:[#allocation3 + $0x388] sm:$0xff] }
 0x468   :  { %1532 = vmatpush1.bf16.msra.mxu1 %v5869_v33  ;;  %1573 = vmatpush1.bf16.msra.mxu0 %v5871_v34  ;;  %8472 = vst [vmem:[#allocation35_spill] sm:$0xff] %v5978_v55  ;;  %8473 = vst [vmem:[#allocation36_spill] sm:$0xff] %v5982_v54  ;;  %v5984_v30 = vld [vmem:[#allocation3 + $0x398] sm:$0xff]  ;;  %v5994_v52 = vld [vmem:[#allocation3 + $0x390] sm:$0xff] }
 0x469   :  { %1533 = vmatprep.subr.bf16.mxu1 %v5873_v37  ;;  %1574 = vmatprep.subr.bf16.mxu0 %v5875_v38  ;;  %8474 = vst [vmem:[#allocation37_spill] sm:$0xff] %v5984_v30  ;;  %8476 = vst [vmem:[#allocation39_spill] sm:$0xff] %v5994_v52  ;;  %v5996_v51 = vld [vmem:[#allocation3 + $0x3c8] sm:$0xff] }
 0x46a   :  { %v5202_v57 = vpop.eup %5201  ;;  %8477 = vst [vmem:[#allocation40_spill] sm:$0xff] %v5996_v51 }
 0x46b   :  { %v1370_v60 = vmul.f32 0.5, %v5202_v57  ;;  %v1377_v61 = vrot.slane %v5202_v57, 3  ;;  %v5955_v57 = vld [vmem:[#allocation3 + $0x2d0] sm:$0xff] }
 0x46c   :  { %1534 = vmatpush1.bf16.msra.mxu1 %v5881_v39  ;;  %1575 = vmatpush1.bf16.msra.mxu0 %v5883_v40 }
 0x46d   :  { %1535 = vmatprep.subr.bf16.mxu1 %v5885_v41  ;;  %1576 = vmatprep.subr.bf16.mxu0 %v5887_v42  ;;  %v1371_v1 = vadd.f32 0.5, %v1370_v60  ;;  %v5957_v60 = vld [vmem:[#allocation3 + $0x308] sm:$0xff] }
 0x46f   :  { %v1373_v4 = vrot.slane %v1371_v1, 1  ;;  %v1379_v5 = vmul.f32 %v1377_v61, %v1371_v1  ;;  %v5959_v61 = vld [vmem:[#allocation3 + $0x318] sm:$0xff]  ;;  %v1382_v0 = vrot.slane %v1371_v1, 2  ;;  %v5976_v1 = vld [vmem:[#allocation3 + $0x340] sm:$0xff] }
 0x470   :  { %1536 = vmatpush1.bf16.msra.mxu1 %v5893_v44  ;;  %1577 = vmatpush1.bf16.msra.mxu0 %v5895_v45  ;;  %8471 = vst [vmem:[#allocation34_spill] sm:$0xff] %v5976_v1 }
 0x471   :  { %1537 = vmatprep.subr.bf16.mxu1 %v5897_v46  ;;  %1578 = vmatprep.subr.bf16.mxu0 %v5899_v47  ;;  %v1375_v8 = vmul.f32 0.0, %v1373_v4  ;;  %v5964_v4 = vld [vmem:[#allocation3 + $0x300] sm:$0xff] }
 0x473   :  { %v5951_v43 = vadd.f32 %v1379_v5, %v1375_v8  ;;  %v5966_v5 = vld [vmem:[#allocation3 + $0x310] sm:$0xff]  ;;  %v5970_v8 = vld [vmem:[#allocation3 + $0x348] sm:$0xff] }
 0x474   :  { %1538 = vmatpush1.bf16.msra.mxu1 %v5905_v48  ;;  %1579 = vmatpush1.bf16.msra.mxu0 %v5907_v49  ;;  %8470 = vst [vmem:[#allocation33_spill] sm:$0xff] %v5966_v5 }
 0x475   :  { %1539 = vmatprep.subr.bf16.mxu1 %v5909_v50  ;;  %1580 = vmatprep.subr.bf16.mxu0 %v5911_v22  ;;  %8469 = vst [vmem:[#allocation32_spill] sm:$0xff] %v5951_v43  ;;  %5203 = vtanh.f32 %v5951_v43  ;;  %v5992_v43 = vld [vmem:[#allocation3 + $0x380] sm:$0xff] }
 0x476   :  { %8475 = vst [vmem:[#allocation38_spill] sm:$0xff] %v5992_v43 }
 0x478   :  { %1540 = vmatpush1.bf16.msra.mxu1 %v5917_v12  ;;  %1581 = vmatpush1.bf16.msra.mxu0 %v5919_v56 }
 0x479   :  { %1541 = vmatprep.subr.bf16.mxu1 %v5921_v58  ;;  %1582 = vmatprep.subr.bf16.mxu0 %v5923_v59 }
 0x47c   :  { %1542 = vmatpush1.bf16.msra.mxu1 %v5929_v62  ;;  %1583 = vmatpush1.bf16.msra.mxu0 %v5931_v63 }
 0x47d   :  { %1543 = vmatprep.subr.bf16.mxu1 %v5933_v2  ;;  %1584 = vmatprep.subr.bf16.mxu0 %v5935_v3 }
 0x47f   :  { %v5204_v36 = vpop.eup %5203 }
 0x480   :  { %1544 = vmatpush1.bf16.msra.mxu1 %v5941_v6  ;;  %1585 = vmatpush1.bf16.msra.mxu0 %v5943_v7  ;;  %v1384_v35 = vmul.f32 %v5204_v36, %v1382_v0  ;;  %v6004_v0 = vld [vmem:[#allocation3 + $0x3c0] sm:$0xff]  ;;  %v6006_v36 = vld [vmem:[#allocation3 + $0x3d0] sm:$0xff] }
 0x481   :  { %1545 = vmatprep.subr.bf16.mxu1 %v5945_v9  ;;  %1586 = vmatprep.subr.bf16.mxu0 %v5947_v10  ;;  %8479 = vst [vmem:[#allocation42_spill] sm:$0xff] %v6006_v36 }
 0x484   :  { %1546 = vmatpush1.bf16.msra.mxu1 %v5949_v11  ;;  %1587 = vmatpush1.bf16.msra.mxu0 %v5955_v57 }
 0x485   :  { %1547 = vmatprep.subr.bf16.mxu1 %v5957_v60  ;;  %1588 = vmatprep.subr.bf16.mxu0 %v5959_v61 }
 0x488   :  { %1548 = vmatpush1.bf16.msra.mxu1 %v5964_v4  ;;  %1589 = vmatpush1.bf16.msra.mxu0 %v5966_v5  ;;  %v5998_v5 = vld [vmem:[#allocation3 + $0x3d8] sm:$0xff] }
 0x489   :  { %1549 = vmatprep.subr.bf16.mxu1 %v5970_v8  ;;  %1590 = vmatprep.subr.bf16.mxu0 %v5972_v53  ;;  %8478 = vst [vmem:[#allocation41_spill] sm:$0xff] %v5998_v5 }
 0x48c   :  { %1550 = vmatpush1.bf16.msra.mxu1 %v5976_v1  ;;  %1591 = vmatpush1.bf16.msra.mxu0 %v5978_v55  ;;  %v1385_v55 = vpack.c.bf16 %v1384_v35, %v1384_v35  ;;  %v6014_v1 = vld [vmem:[#allocation3 + $0x38] sm:$0xff] }
 0x48d   :  { %1551 = vmatprep.subr.bf16.mxu1 %v5982_v54  ;;  %1592 = vmatprep.subr.bf16.mxu0 %v5984_v30  ;;  %v8480_v30 = vmov 0  ;;  %v6012_v54 = vld [vmem:[#allocation3 + $0x28] sm:$0xff]  ;;  %8484 = vst [vmem:[#allocation45_spill] sm:$0xff] %v6014_v1 }
 0x48e   :  { %v8481_v30 = vsel %vm6008_vm3, 4294967295, %v8480_v30  ;;  %8483 = vst [vmem:[#allocation44_spill] sm:$0xff] %v6012_v54  ;;  %v6020_v35 = vsel %vm6008_vm3, %v1385_v55, 0  ;;  %v6038_v55 = vld [vmem:[#allocation3 + $0x60] sm:$0xff] }
 0x48f   :  { %8482 = vst [vmem:[#allocation43_spill] sm:$0xff] %v8481_v30  ;;  %v6040_v30 = vld [vmem:[#allocation3 + $0x70] sm:$0xff] }
 0x490   :  { %1552 = vmatpush1.bf16.msra.mxu1 %v5992_v43  ;;  %1593 = vmatpush1.bf16.msra.mxu0 %v5994_v52  ;;  %v6028_v52 = vld [vmem:[#allocation3 + $0x68] sm:$0xff]  ;;  %v6030_v43 = vld [vmem:[#allocation3 + $0x78] sm:$0xff]  ;;  %8489 = vst [vmem:[#allocation50_spill] sm:$0xff] %v6040_v30 }
 0x491   :  { %1553 = vmatprep.subr.bf16.mxu1 %v5996_v51  ;;  %1594 = vmatprep.subr.bf16.mxu0 %v5998_v5  ;;  %v6024_v5 = vld [vmem:[#allocation3 + $0x20] sm:$0xff]  ;;  %v6026_v51 = vld [vmem:[#allocation3 + $0x30] sm:$0xff]  ;;  %8487 = vst [vmem:[#allocation48_spill] sm:$0xff] %v6028_v52  ;;  %8488 = vst [vmem:[#allocation49_spill] sm:$0xff] %v6030_v43 }
 0x492   :  { %8485 = vst [vmem:[#allocation46_spill] sm:$0xff] %v6024_v5  ;;  %8486 = vst [vmem:[#allocation47_spill] sm:$0xff] %v6026_v51 }
 0x494   :  { %1554 = vmatpush1.bf16.msra.mxu1 %v6004_v0  ;;  %1595 = vmatpush1.bf16.msra.mxu0 %v6006_v36  ;;  %v8492_v36 = vmov 0  }
 0x495   :  { %1605 = vmatprep.subr.bf16.mxu1 %v6012_v54  ;;  %1646 = vmatprep.subr.bf16.mxu0 %v6014_v1  ;;  %v6042_v1 = vld [vmem:[#allocation3 + $0xa8] sm:$0xff]  ;;  %v6044_v54 = vld [vmem:[#allocation3 + $0xb8] sm:$0xff] }
 0x496   :  { %8490 = vst [vmem:[#allocation51_spill] sm:$0xff] %v6042_v1  ;;  %8491 = vst [vmem:[#allocation52_spill] sm:$0xff] %v6044_v54 }
 0x497   :  { %1556 = vmatmul.mubr.bf16.vlgmr.msra.gmra.mrb[12].mxu1 %v6020_v35  ;;  %1597 = vmatmul.mubr.bf16.vlgmr.msra.gmra.mrb[16].mxu0 %v6020_v35 }
 0x498   :  { %1606 = vmatpush1.bf16.msra.mxu1 %v6024_v5  ;;  %1647 = vmatpush1.bf16.msra.mxu0 %v6026_v51  ;;  %v6056_v51 = vld [vmem:[#allocation3 + $0xe8] sm:$0xff]  ;;  %v6058_v5 = vld [vmem:[#allocation3 + $0xf8] sm:$0xff] }
 0x499   :  { %1607 = vmatprep.subr.bf16.mxu1 %v6028_v52  ;;  %1648 = vmatprep.subr.bf16.mxu0 %v6030_v43  ;;  %v6052_v43 = vld [vmem:[#allocation3 + $0xa0] sm:$0xff]  ;;  %v6054_v52 = vld [vmem:[#allocation3 + $0xb0] sm:$0xff]  ;;  %8495 = vst [vmem:[#allocation55_spill] sm:$0xff] %v6056_v51  ;;  %8496 = vst [vmem:[#allocation56_spill] sm:$0xff] %v6058_v5 }
 0x49a   :  { %1637 = vmatprep.mubr.bf16.mxu1 %v8492_v36  ;;  %1678 = vmatprep.mubr.bf16.mxu0 %v8492_v36  ;;  %8493 = vst [vmem:[#allocation53_spill] sm:$0xff] %v6052_v43  ;;  %8494 = vst [vmem:[#allocation54_spill] sm:$0xff] %v6054_v52  ;;  %v6064_v36 = vld [vmem:[#allocation3 + $0xe0] sm:$0xff] }
 0x49b   :  { %8497 = vst [vmem:[#allocation57_spill] sm:$0xff] %v6064_v36 }
 0x49c   :  { %1608 = vmatpush1.bf16.msra.mxu1 %v6038_v55  ;;  %1649 = vmatpush1.bf16.msra.mxu0 %v6040_v30  ;;  %v6070_v30 = vld [vmem:[#allocation3 + $0x138] sm:$0xff] }
 0x49d   :  { %1609 = vmatprep.subr.bf16.mxu1 %v6042_v1  ;;  %1650 = vmatprep.subr.bf16.mxu0 %v6044_v54  ;;  %v6066_v1 = vld [vmem:[#allocation3 + $0xf0] sm:$0xff]  ;;  %v6068_v54 = vld [vmem:[#allocation3 + $0x128] sm:$0xff]  ;;  %8500 = vst [vmem:[#allocation60_spill] sm:$0xff] %v6070_v30 }
 0x49e   :  { %8498 = vst [vmem:[#allocation58_spill] sm:$0xff] %v6066_v1  ;;  %8499 = vst [vmem:[#allocation59_spill] sm:$0xff] %v6068_v54 }
 0x4a0   :  { %1610 = vmatpush1.bf16.msra.mxu1 %v6052_v43  ;;  %1651 = vmatpush1.bf16.msra.mxu0 %v6054_v52  ;;  %v6076_v52 = vld [vmem:[#allocation3 + $0x120] sm:$0xff]  ;;  %v6082_v43 = vld [vmem:[#allocation3 + $0x178] sm:$0xff] }
 0x4a1   :  { %1611 = vmatprep.subr.bf16.mxu1 %v6056_v51  ;;  %1652 = vmatprep.subr.bf16.mxu0 %v6058_v5  ;;  %8501 = vst [vmem:[#allocation61_spill] sm:$0xff] %v6076_v52  ;;  %v6078_v51 = vld [vmem:[#allocation3 + $0x130] sm:$0xff]  ;;  %v6080_v5 = vld [vmem:[#allocation3 + $0x168] sm:$0xff]  ;;  %8504 = vst [vmem:[#allocation64_spill] sm:$0xff] %v6082_v43 }
 0x4a2   :  { %8502 = vst [vmem:[#allocation62_spill] sm:$0xff] %v6078_v51  ;;  %8503 = vst [vmem:[#allocation63_spill] sm:$0xff] %v6080_v5 }
 0x4a4   :  { %1612 = vmatpush1.bf16.msra.mxu1 %v6064_v36  ;;  %1653 = vmatpush1.bf16.msra.mxu0 %v6066_v1  ;;  %v6088_v1 = vld [vmem:[#allocation3 + $0x160] sm:$0xff]  ;;  %v6094_v36 = vld [vmem:[#allocation3 + $0x1b8] sm:$0xff] }
 0x4a5   :  { %1613 = vmatprep.subr.bf16.mxu1 %v6068_v54  ;;  %1654 = vmatprep.subr.bf16.mxu0 %v6070_v30  ;;  %8505 = vst [vmem:[#allocation65_spill] sm:$0xff] %v6088_v1  ;;  %v6090_v54 = vld [vmem:[#allocation3 + $0x170] sm:$0xff]  ;;  %v6092_v30 = vld [vmem:[#allocation3 + $0x1a8] sm:$0xff]  ;;  %8508 = vst [vmem:[#allocation68_spill] sm:$0xff] %v6094_v36 }
 0x4a6   :  { %8506 = vst [vmem:[#allocation66_spill] sm:$0xff] %v6090_v54  ;;  %8507 = vst [vmem:[#allocation67_spill] sm:$0xff] %v6092_v30 }
 0x4a8   :  { %1614 = vmatpush1.bf16.msra.mxu1 %v6076_v52  ;;  %1655 = vmatpush1.bf16.msra.mxu0 %v6078_v51  ;;  %v6100_v51 = vld [vmem:[#allocation3 + $0x1a0] sm:$0xff]  ;;  %v6106_v52 = vld [vmem:[#allocation3 + $0x1f8] sm:$0xff] }
 0x4a9   :  { %1615 = vmatprep.subr.bf16.mxu1 %v6080_v5  ;;  %1656 = vmatprep.subr.bf16.mxu0 %v6082_v43  ;;  %8509 = vst [vmem:[#allocation69_spill] sm:$0xff] %v6100_v51  ;;  %v6102_v5 = vld [vmem:[#allocation3 + $0x1b0] sm:$0xff]  ;;  %v6104_v43 = vld [vmem:[#allocation3 + $0x1e8] sm:$0xff]  ;;  %8512 = vst [vmem:[#allocation72_spill] sm:$0xff] %v6106_v52 }
 0x4aa   :  { %8510 = vst [vmem:[#allocation70_spill] sm:$0xff] %v6102_v5  ;;  %8511 = vst [vmem:[#allocation71_spill] sm:$0xff] %v6104_v43 }
 0x4ac   :  { %1616 = vmatpush1.bf16.msra.mxu1 %v6088_v1  ;;  %1657 = vmatpush1.bf16.msra.mxu0 %v6090_v54  ;;  %v6112_v54 = vld [vmem:[#allocation3 + $0x1e0] sm:$0xff]  ;;  %v6118_v1 = vld [vmem:[#allocation3 + $0x238] sm:$0xff] }
 0x4ad   :  { %1617 = vmatprep.subr.bf16.mxu1 %v6092_v30  ;;  %1658 = vmatprep.subr.bf16.mxu0 %v6094_v36  ;;  %8513 = vst [vmem:[#allocation73_spill] sm:$0xff] %v6112_v54  ;;  %v6114_v30 = vld [vmem:[#allocation3 + $0x1f0] sm:$0xff]  ;;  %v6116_v36 = vld [vmem:[#allocation3 + $0x228] sm:$0xff]  ;;  %8516 = vst [vmem:[#allocation76_spill] sm:$0xff] %v6118_v1 }
 0x4ae   :  { %8514 = vst [vmem:[#allocation74_spill] sm:$0xff] %v6114_v30  ;;  %8515 = vst [vmem:[#allocation75_spill] sm:$0xff] %v6116_v36 }
 0x4b0   :  { %1618 = vmatpush1.bf16.msra.mxu1 %v6100_v51  ;;  %1659 = vmatpush1.bf16.msra.mxu0 %v6102_v5  ;;  %v6124_v5 = vld [vmem:[#allocation3 + $0x220] sm:$0xff]  ;;  %v6130_v51 = vld [vmem:[#allocation3 + $0x278] sm:$0xff] }
 0x4b1   :  { %1619 = vmatprep.subr.bf16.mxu1 %v6104_v43  ;;  %1660 = vmatprep.subr.bf16.mxu0 %v6106_v52  ;;  %8517 = vst [vmem:[#allocation77_spill] sm:$0xff] %v6124_v5  ;;  %v6126_v43 = vld [vmem:[#allocation3 + $0x230] sm:$0xff]  ;;  %v6128_v52 = vld [vmem:[#allocation3 + $0x268] sm:$0xff]  ;;  %8520 = vst [vmem:[#allocation80_spill] sm:$0xff] %v6130_v51 }
 0x4b2   :  { %8518 = vst [vmem:[#allocation78_spill] sm:$0xff] %v6126_v43  ;;  %8519 = vst [vmem:[#allocation79_spill] sm:$0xff] %v6128_v52 }
 0x4b4   :  { %1620 = vmatpush1.bf16.msra.mxu1 %v6112_v54  ;;  %1661 = vmatpush1.bf16.msra.mxu0 %v6114_v30  ;;  %v6136_v30 = vld [vmem:[#allocation3 + $0x260] sm:$0xff]  ;;  %v6142_v54 = vld [vmem:[#allocation3 + $0x2b8] sm:$0xff] }
 0x4b5   :  { %1621 = vmatprep.subr.bf16.mxu1 %v6116_v36  ;;  %1662 = vmatprep.subr.bf16.mxu0 %v6118_v1  ;;  %8521 = vst [vmem:[#allocation81_spill] sm:$0xff] %v6136_v30  ;;  %v6138_v36 = vld [vmem:[#allocation3 + $0x270] sm:$0xff]  ;;  %v6140_v1 = vld [vmem:[#allocation3 + $0x2a8] sm:$0xff]  ;;  %8524 = vst [vmem:[#allocation84_spill] sm:$0xff] %v6142_v54 }
 0x4b6   :  { %8522 = vst [vmem:[#allocation82_spill] sm:$0xff] %v6138_v36  ;;  %8523 = vst [vmem:[#allocation83_spill] sm:$0xff] %v6140_v1 }
 0x4b8   :  { %1622 = vmatpush1.bf16.msra.mxu1 %v6124_v5  ;;  %1663 = vmatpush1.bf16.msra.mxu0 %v6126_v43  ;;  %v6148_v43 = vld [vmem:[#allocation3 + $0x2a0] sm:$0xff]  ;;  %v6154_v5 = vld [vmem:[#allocation3 + $0x2f8] sm:$0xff] }
 0x4b9   :  { %1623 = vmatprep.subr.bf16.mxu1 %v6128_v52  ;;  %1664 = vmatprep.subr.bf16.mxu0 %v6130_v51  ;;  %8525 = vst [vmem:[#allocation85_spill] sm:$0xff] %v6148_v43  ;;  %v6150_v52 = vld [vmem:[#allocation3 + $0x2b0] sm:$0xff]  ;;  %v6152_v51 = vld [vmem:[#allocation3 + $0x2e8] sm:$0xff]  ;;  %8528 = vst [vmem:[#allocation88_spill] sm:$0xff] %v6154_v5 }
 0x4ba   :  { %8526 = vst [vmem:[#allocation86_spill] sm:$0xff] %v6150_v52  ;;  %8527 = vst [vmem:[#allocation87_spill] sm:$0xff] %v6152_v51 }
 0x4bc   :  { %1624 = vmatpush1.bf16.msra.mxu1 %v6136_v30  ;;  %1665 = vmatpush1.bf16.msra.mxu0 %v6138_v36  ;;  %v6160_v36 = vld [vmem:[#allocation3 + $0x2e0] sm:$0xff]  ;;  %v6166_v30 = vld [vmem:[#allocation3 + $0x338] sm:$0xff] }
 0x4bd   :  { %1625 = vmatprep.subr.bf16.mxu1 %v6140_v1  ;;  %1666 = vmatprep.subr.bf16.mxu0 %v6142_v54  ;;  %8529 = vst [vmem:[#allocation89_spill] sm:$0xff] %v6160_v36  ;;  %v6162_v1 = vld [vmem:[#allocation3 + $0x2f0] sm:$0xff]  ;;  %v6164_v54 = vld [vmem:[#allocation3 + $0x328] sm:$0xff]  ;;  %8532 = vst [vmem:[#allocation92_spill] sm:$0xff] %v6166_v30 }
 0x4be   :  { %8530 = vst [vmem:[#allocation90_spill] sm:$0xff] %v6162_v1  ;;  %8531 = vst [vmem:[#allocation91_spill] sm:$0xff] %v6164_v54 }
 0x4c0   :  { %1626 = vmatpush1.bf16.msra.mxu1 %v6148_v43  ;;  %1667 = vmatpush1.bf16.msra.mxu0 %v6150_v52  ;;  %v6172_v52 = vld [vmem:[#allocation3 + $0x320] sm:$0xff]  ;;  %v6178_v43 = vld [vmem:[#allocation3 + $0x378] sm:$0xff] }
 0x4c1   :  { %1627 = vmatprep.subr.bf16.mxu1 %v6152_v51  ;;  %1668 = vmatprep.subr.bf16.mxu0 %v6154_v5  ;;  %8533 = vst [vmem:[#allocation93_spill] sm:$0xff] %v6172_v52  ;;  %v6174_v51 = vld [vmem:[#allocation3 + $0x330] sm:$0xff]  ;;  %v6176_v5 = vld [vmem:[#allocation3 + $0x368] sm:$0xff]  ;;  %8536 = vst [vmem:[#allocation96_spill] sm:$0xff] %v6178_v43 }
 0x4c2   :  { %8534 = vst [vmem:[#allocation94_spill] sm:$0xff] %v6174_v51  ;;  %8535 = vst [vmem:[#allocation95_spill] sm:$0xff] %v6176_v5 }
 0x4c4   :  { %1628 = vmatpush1.bf16.msra.mxu1 %v6160_v36  ;;  %1669 = vmatpush1.bf16.msra.mxu0 %v6162_v1  ;;  %v6184_v1 = vld [vmem:[#allocation3 + $0x360] sm:$0xff]  ;;  %v6190_v36 = vld [vmem:[#allocation3 + $0x3b8] sm:$0xff] }
 0x4c5   :  { %1629 = vmatprep.subr.bf16.mxu1 %v6164_v54  ;;  %1670 = vmatprep.subr.bf16.mxu0 %v6166_v30  ;;  %v6186_v54 = vld [vmem:[#allocation3 + $0x370] sm:$0xff]  ;;  %v6188_v30 = vld [vmem:[#allocation3 + $0x3a8] sm:$0xff] }
 0x4c6   :  { %8537 = vst [vmem:[#allocation97_spill] sm:$0xff] %v6186_v54  ;;  %8538 = vst [vmem:[#allocation98_spill] sm:$0xff] %v6188_v30 }
 0x4c8   :  { %1630 = vmatpush1.bf16.msra.mxu1 %v6172_v52  ;;  %1671 = vmatpush1.bf16.msra.mxu0 %v6174_v51  ;;  %v6196_v51 = vld [vmem:[#allocation3 + $0x3a0] sm:$0xff]  ;;  %v6202_v52 = vld [vmem:[#allocation3 + $0x3f8] sm:$0xff] }
 0x4c9   :  { %1631 = vmatprep.subr.bf16.mxu1 %v6176_v5  ;;  %1672 = vmatprep.subr.bf16.mxu0 %v6178_v43  ;;  %v6198_v5 = vld [vmem:[#allocation3 + $0x3b0] sm:$0xff]  ;;  %v6200_v43 = vld [vmem:[#allocation3 + $0x3e8] sm:$0xff] }
 0x4cc   :  { %1632 = vmatpush1.bf16.msra.mxu1 %v6184_v1  ;;  %1673 = vmatpush1.bf16.msra.mxu0 %v6186_v54  ;;  %v6208_v54 = vld [vmem:[#allocation3 + $0x3e0] sm:$0xff] }
 0x4cd   :  { %1633 = vmatprep.subr.bf16.mxu1 %v6188_v30  ;;  %1674 = vmatprep.subr.bf16.mxu0 %v6190_v36  ;;  %v6210_v30 = vld [vmem:[#allocation3 + $0x3f0] sm:$0xff] }
 0x4d0   :  { %1634 = vmatpush1.bf16.msra.mxu1 %v6196_v51  ;;  %1675 = vmatpush1.bf16.msra.mxu0 %v6198_v5 }
 0x4d1   :  { %1635 = vmatprep.subr.bf16.mxu1 %v6200_v43  ;;  %1676 = vmatprep.subr.bf16.mxu0 %v6202_v52 }
 0x4d4   :  { %1636 = vmatpush1.bf16.msra.mxu1 %v6208_v54  ;;  %1677 = vmatpush1.bf16.msra.mxu0 %v6210_v30 }
 0x4d5   :  { %1924 = vmatprep.subr.bf16.mxu1 %v5815_v13  ;;  %1965 = vmatprep.subr.bf16.mxu0 %v5817_v14  ;;  %v8539_v13 = vld [vmem:[#allocation33_spill] sm:$0xff]  ;;  %v8540_v14 = vld [vmem:[#allocation34_spill] sm:$0xff] }
 0x4d7   :  { %1638 = vmatmul.mubr.bf16.vlgmr.msra.gmra.mrb[16].mxu1 %v6020_v35  ;;  %1679 = vmatmul.mubr.bf16.vlgmr.msra.gmra.mrb[20].mxu0 %v6020_v35 }
 0x4d8   :  { %1925 = vmatpush1.bf16.msra.mxu1 %v5819_v15  ;;  %1966 = vmatpush1.bf16.msra.mxu0 %v5823_v16  ;;  %v8541_v15 = vld [vmem:[#allocation35_spill] sm:$0xff]  ;;  %v8542_v16 = vld [vmem:[#allocation36_spill] sm:$0xff] }
 0x4d9   :  { %1926 = vmatprep.subr.bf16.mxu1 %v5825_v17  ;;  %1967 = vmatprep.subr.bf16.mxu0 %v5827_v18  ;;  %v8543_v17 = vld [vmem:[#allocation37_spill] sm:$0xff]  ;;  %v8544_v18 = vld [vmem:[#allocation38_spill] sm:$0xff] }
 0x4dc   :  { %1927 = vmatpush1.bf16.msra.mxu1 %v5833_v19  ;;  %1968 = vmatpush1.bf16.msra.mxu0 %v5835_v20  ;;  %v8545_v19 = vld [vmem:[#allocation39_spill] sm:$0xff]  ;;  %v8546_v20 = vld [vmem:[#allocation40_spill] sm:$0xff] }
 0x4dd   :  { %1928 = vmatprep.subr.bf16.mxu1 %v5837_v21  ;;  %1969 = vmatprep.subr.bf16.mxu0 %v5839_v23  ;;  %v8547_v21 = vld [vmem:[#allocation41_spill] sm:$0xff]  ;;  %v8548_v23 = vld [vmem:[#allocation42_spill] sm:$0xff] }
 0x4e0   :  { %1929 = vmatpush1.bf16.msra.mxu1 %v5845_v24  ;;  %1970 = vmatpush1.bf16.msra.mxu0 %v5847_v25  ;;  %v8550_v24 = vld [vmem:[#allocation45_spill] sm:$0xff]  ;;  %v5524_v25 = vmov 1966171168  }
 0x4e1   :  { %1930 = vmatprep.subr.bf16.mxu1 %v5849_v26  ;;  %1971 = vmatprep.subr.bf16.mxu0 %v5851_v27  ;;  %v1708_v26 = vunpack.c.l.s4 %v5524_v25  ;;  %v8556_v25 = vld [vmem:[#allocation32_spill] sm:$0xff] }
 0x4e3   :  { %v1709_v27 = vunpack.c.0.s8 %v1708_v26 }
 0x4e4   :  { %1931 = vmatpush1.bf16.msra.mxu1 %v5857_v28  ;;  %1972 = vmatpush1.bf16.msra.mxu0 %v5859_v29 }
 0x4e5   :  { %1932 = vmatprep.subr.bf16.mxu1 %v5861_v31  ;;  %1973 = vmatprep.subr.bf16.mxu0 %v5863_v32  ;;  %v8551_v31 = vld [vmem:[#allocation30_spill] sm:$0xff] }
 0x4e6   :  { %v6283_v32 = vsub.s32 %v1709_v27, %v8551_v31 }
 0x4e8   :  { %1933 = vmatpush1.bf16.msra.mxu1 %v5869_v33  ;;  %1974 = vmatpush1.bf16.msra.mxu0 %v5871_v34 }
 0x4e9   :  { %1934 = vmatprep.subr.bf16.mxu1 %v5873_v37  ;;  %1975 = vmatprep.subr.bf16.mxu0 %v5875_v38 }
 0x4ec   :  { %1935 = vmatpush1.bf16.msra.mxu1 %v5881_v39  ;;  %1976 = vmatpush1.bf16.msra.mxu0 %v5883_v40 }
 0x4ed   :  { %1936 = vmatprep.subr.bf16.mxu1 %v5885_v41  ;;  %1977 = vmatprep.subr.bf16.mxu0 %v5887_v42 }
 0x4f0   :  { %1937 = vmatpush1.bf16.msra.mxu1 %v5893_v44  ;;  %1978 = vmatpush1.bf16.msra.mxu0 %v5895_v45 }
 0x4f1   :  { %1938 = vmatprep.subr.bf16.mxu1 %v5897_v46  ;;  %1979 = vmatprep.subr.bf16.mxu0 %v5899_v47 }
 0x4f4   :  { %1939 = vmatpush1.bf16.msra.mxu1 %v5905_v48  ;;  %1980 = vmatpush1.bf16.msra.mxu0 %v5907_v49  ;;  %v1704_v48 = vld [vmem:[#allocation2 + $0x1] ss:$8 sm:$0xf] }
 0x4f5   :  { %1940 = vmatprep.subr.bf16.mxu1 %v5909_v50  ;;  %1981 = vmatprep.subr.bf16.mxu0 %v5911_v22  ;;  %v1367_v50 = vld [vmem:[%s8145_s11] sm:$0xf] }
 0x4f8   :  { %1941 = vmatpush1.bf16.msra.mxu1 %v5917_v12  ;;  %1982 = vmatpush1.bf16.msra.mxu0 %v5919_v56  ;;  %v8552_v56 = vld [vmem:[#allocation31_spill] sm:$0xff] }
 0x4f9   :  { %1942 = vmatprep.subr.bf16.mxu1 %v5921_v58  ;;  %1983 = vmatprep.subr.bf16.mxu0 %v5923_v59  ;;  %v6292_v58 = vrot.slane %v1367_v50, %v8552_v56  ;;  %v6553_v56 = vld [vmem:[#allocation3 + $0x350] sm:$0xff] }
 0x4fc   :  { %1943 = vmatpush1.bf16.msra.mxu1 %v5929_v62  ;;  %1984 = vmatpush1.bf16.msra.mxu0 %v5931_v63 }
 0x4fd   :  { %1944 = vmatprep.subr.bf16.mxu1 %v5933_v2  ;;  %1985 = vmatprep.subr.bf16.mxu0 %v5935_v3 }
 0x500   :  { %1945 = vmatpush1.bf16.msra.mxu1 %v5941_v6  ;;  %1986 = vmatpush1.bf16.msra.mxu0 %v5943_v7  ;;  %v8553_v6 = vsub.s32 1, %v8551_v31 }
 0x501   :  { %1946 = vmatprep.subr.bf16.mxu1 %v5945_v9  ;;  %1987 = vmatprep.subr.bf16.mxu0 %v5947_v10 }
 0x502   :  { %v6296_v7 = vrot.slane %v1367_v50, %v8553_v6  ;;  %v8558_v6 = vld [vmem:[#allocation46_spill] sm:$0xff] }
 0x504   :  { %1947 = vmatpush1.bf16.msra.mxu1 %v5949_v11  ;;  %1988 = vmatpush1.bf16.msra.mxu0 %v5955_v57 }
 0x505   :  { %1948 = vmatprep.subr.bf16.mxu1 %v5957_v60  ;;  %1989 = vmatprep.subr.bf16.mxu0 %v5959_v61  ;;  %v8554_v60 = vsub.s32 3, %v8551_v31 }
 0x507   :  { %v6300_v61 = vrot.slane %v1367_v50, %v8554_v60  ;;  %v8563_v60 = vld [vmem:[#allocation51_spill] sm:$0xff] }
 0x508   :  { %1949 = vmatpush1.bf16.msra.mxu1 %v5964_v4  ;;  %1990 = vmatpush1.bf16.msra.mxu0 %v8539_v13 }
 0x509   :  { %1950 = vmatprep.subr.bf16.mxu1 %v5970_v8  ;;  %1991 = vmatprep.subr.bf16.mxu0 %v5972_v53  ;;  %v8549_v53 = vld [vmem:[#allocation44_spill] sm:$0xff] }
 0x50c   :  { %1951 = vmatpush1.bf16.msra.mxu1 %v8540_v14  ;;  %1992 = vmatpush1.bf16.msra.mxu0 %v8541_v15 }
 0x50d   :  { %1952 = vmatprep.subr.bf16.mxu1 %v8542_v16  ;;  %1993 = vmatprep.subr.bf16.mxu0 %v8543_v17 }
 0x510   :  { %1953 = vmatpush1.bf16.msra.mxu1 %v8544_v18  ;;  %1994 = vmatpush1.bf16.msra.mxu0 %v8545_v19 }
 0x511   :  { %1954 = vmatprep.subr.bf16.mxu1 %v8546_v20  ;;  %1995 = vmatprep.subr.bf16.mxu0 %v8547_v21  ;;  %v8555_v20 = vsub.s32 2, %v8551_v31 }
 0x513   :  { %v6307_v21 = vrot.slane %v1367_v50, %v8555_v20  ;;  %v8576_v20 = vld [vmem:[#allocation64_spill] sm:$0xff] }
 0x514   :  { %1955 = vmatpush1.bf16.msra.mxu1 %v6004_v0  ;;  %1996 = vmatpush1.bf16.msra.mxu0 %v8548_v23 }
 0x515   :  { %2006 = vmatprep.subr.bf16.mxu1 %v8549_v53  ;;  %2047 = vmatprep.subr.bf16.mxu0 %v8550_v24 }
 0x56a   :  { %v1557_v28 = vpop.f32.mrb[12].mxu1  ;;  %v1598_v29 = vpop.f32.mrb[16].mxu0 }
 0x56b   :  { %v1559_v33 = vpop.f32.mrb[13].mxu1  ;;  %v1600_v34 = vpop.f32.mrb[17].mxu0  ;;  %v1691_v22 = vrot.slane %v1557_v28, 1  ;;  %v1693_v12 = vrot.slane %v1598_v29, 1 }
 0x56c   :  { %v1705_v37 = vcombine.low %v1557_v28, %v1559_v33  ;;  %v1706_v38 = vcombine.low %v1598_v29, %v1600_v34  ;;  %v1561_v39 = vpop.f32.mrb[14].mxu1  ;;  %v1602_v40 = vpop.f32.mrb[18].mxu0  ;;  %v1692_v62 = vrot.slane %v1559_v33, 1  ;;  %v1694_v63 = vrot.slane %v1600_v34, 1 }
 0x56d   :  { %v1562_v41 = vpop.f32.mrb[15].mxu1  ;;  %v1603_v42 = vpop.f32.mrb[19].mxu0 }
 0x56e   :  { %v1713_v44 = vrot.slane %v1705_v37, %v6283_v32  ;;  %v1720_v45 = vrot.slane %v1706_v38, %v6283_v32 }
 0x570   :  { %v1721_v46 = vcombine.low %v1713_v44, %v1720_v45 }
 0x572   :  { %v1728_v47 = vrot.slane %v1721_v46, %v6283_v32 }
 0x574   :  { %v1730_v49 = vadd.f32 %v1728_v47, %v1704_v48 }
 0x576   :  { %5205 = vtanh.f32 %v1730_v49 }
 0x580   :  { %v5206_v59 = vpop.eup %5205 }
 0x581   :  { %v1732_v16 = vmul.f32 0.5, %v5206_v59  ;;  %v1739_v27 = vrot.slane %v5206_v59, 3 }
 0x583   :  { %v1733_v19 = vadd.f32 0.5, %v1732_v16  ;;  %v8571_v16 = vld [vmem:[#allocation59_spill] sm:$0xff] }
 0x585   :  { %v1735_v23 = vrot.slane %v1733_v19, 1  ;;  %v1741_v33 = vmul.f32 %v1739_v27, %v1733_v19  ;;  %v1744_v47 = vrot.slane %v1733_v19, 2  ;;  %v8575_v19 = vld [vmem:[#allocation63_spill] sm:$0xff]  ;;  %v8582_v27 = vld [vmem:[#allocation70_spill] sm:$0xff] }
 0x587   :  { %v1737_v26 = vmul.f32 %v1735_v23, %v8556_v25  ;;  %v8577_v23 = vld [vmem:[#allocation65_spill] sm:$0xff]  ;;  %v8580_v25 = vld [vmem:[#allocation68_spill] sm:$0xff] }
 0x589   :  { %v6311_v39 = vadd.f32 %v1741_v33, %v1737_v26  ;;  %v8581_v26 = vld [vmem:[#allocation69_spill] sm:$0xff] }
 0x58a   :  { %v8585_v33 = vld [vmem:[#allocation73_spill] sm:$0xff] }
 0x5aa   :  { %v1639_v2 = vpop.f32.mrb[16].mxu1  ;;  %v1680_v3 = vpop.f32.mrb[20].mxu0 }
 0x5ab   :  { %v1699_v9 = vadd.f32 %v1691_v22, %v1639_v2  ;;  %v1701_v10 = vadd.f32 %v1693_v12, %v1680_v3  ;;  %v1641_v11 = vpop.f32.mrb[17].mxu1  ;;  %v1682_v57 = vpop.f32.mrb[21].mxu0 }
 0x5ac   :  { %v1700_v4 = vadd.f32 %v1692_v62, %v1641_v11  ;;  %v1702_v8 = vadd.f32 %v1694_v63, %v1682_v57  ;;  %v1643_v0 = vpop.f32.mrb[18].mxu1  ;;  %v1684_v35 = vpop.f32.mrb[22].mxu0  ;;  %v8561_v11 = vld [vmem:[#allocation49_spill] sm:$0xff]  ;;  %v8562_v57 = vld [vmem:[#allocation50_spill] sm:$0xff] }
 0x5ad   :  { %v1768_v13 = vadd.f32 %v6292_v58, %v1699_v9  ;;  %v1644_v14 = vpop.f32.mrb[19].mxu1  ;;  %v1685_v15 = vpop.f32.mrb[23].mxu0  ;;  %v1770_v53 = vadd.f32 %v6307_v21, %v1701_v10  ;;  %v8559_v9 = vld [vmem:[#allocation47_spill] sm:$0xff]  ;;  %v8560_v10 = vld [vmem:[#allocation48_spill] sm:$0xff]  ;;  %v8566_v0 = vld [vmem:[#allocation54_spill] sm:$0xff] }
 0x5ae   :  { %v1769_v17 = vadd.f32 %v6296_v7, %v1700_v4  ;;  %v1771_v18 = vadd.f32 %v6300_v61, %v1702_v8  ;;  %v8564_v4 = vld [vmem:[#allocation52_spill] sm:$0xff]  ;;  %v8565_v8 = vld [vmem:[#allocation53_spill] sm:$0xff]  ;;  %v8567_v35 = vld [vmem:[#allocation55_spill] sm:$0xff]  ;;  %8634 = vst [vmem:[#allocation54_spill] sm:$0xff] %v6553_v56 }
 0x5af   :  { %5207 = vtanh.f32 %v1768_v13  ;;  %v8568_v13 = vld [vmem:[#allocation56_spill] sm:$0xff]  ;;  %v8569_v14 = vld [vmem:[#allocation57_spill] sm:$0xff]  ;;  %v8570_v15 = vld [vmem:[#allocation58_spill] sm:$0xff] }
 0x5b0   :  { %5209 = vtanh.f32 %v1769_v17  ;;  %v8573_v17 = vld [vmem:[#allocation61_spill] sm:$0xff] }
 0x5b1   :  { %5211 = vtanh.f32 %v1771_v18  ;;  %v8574_v18 = vld [vmem:[#allocation62_spill] sm:$0xff] }
 0x5b2   :  { %5213 = vtanh.f32 %v1770_v53  ;;  %v8578_v53 = vld [vmem:[#allocation66_spill] sm:$0xff] }
 0x5b3   :  { %5215 = vtanh.f32 %v6311_v39 }
 0x5b9   :  { %v5208_v24 = vpop.eup %5207 }
 0x5ba   :  { %v1776_v28 = vmul.f32 0.5, %v5208_v24  ;;  %v5210_v29 = vpop.eup %5209  ;;  %v8579_v24 = vld [vmem:[#allocation67_spill] sm:$0xff] }
 0x5bb   :  { %v1777_v37 = vmul.f32 0.5, %v5210_v29  ;;  %v5212_v38 = vpop.eup %5211  ;;  %v8584_v29 = vld [vmem:[#allocation72_spill] sm:$0xff] }
 0x5bc   :  { %v1779_v34 = vadd.f32 0.5, %v1776_v28  ;;  %v5214_v44 = vpop.eup %5213  ;;  %v8583_v28 = vld [vmem:[#allocation71_spill] sm:$0xff] }
 0x5bd   :  { %v1780_v40 = vadd.f32 0.5, %v1777_v37  ;;  %v1778_v45 = vmul.f32 0.5, %v5214_v44  ;;  %v5216_v46 = vpop.eup %5215  ;;  %v8587_v37 = vld [vmem:[#allocation75_spill] sm:$0xff]  ;;  %v8592_v44 = vld [vmem:[#allocation80_spill] sm:$0xff] }
 0x5be   :  { %v1783_v31 = vmul.f32 %v5212_v38, %v1779_v34  ;;  %v1746_v50 = vmul.f32 %v5216_v46, %v1744_v47  ;;  %v8586_v34 = vld [vmem:[#allocation74_spill] sm:$0xff]  ;;  %v8588_v38 = vld [vmem:[#allocation76_spill] sm:$0xff]  ;;  %v8595_v47 = vld [vmem:[#allocation83_spill] sm:$0xff] }
 0x5bf   :  { %v1782_v41 = vmul.f32 0.0, %v1780_v40  ;;  %v1781_v48 = vadd.f32 0.5, %v1778_v45  ;;  %v8589_v40 = vld [vmem:[#allocation77_spill] sm:$0xff]  ;;  %v8594_v46 = vld [vmem:[#allocation82_spill] sm:$0xff] }
 0x5c0   :  { %v1788_v59 = vpack.c.bf16 %v1746_v50, %v1746_v50  ;;  %v8593_v45 = vld [vmem:[#allocation81_spill] sm:$0xff]  ;;  %v8598_v50 = vld [vmem:[#allocation86_spill] sm:$0xff] }
 0x5c1   :  { %v6314_v42 = vadd.f32 %v1783_v31, %v1782_v41  ;;  %v8590_v31 = vld [vmem:[#allocation78_spill] sm:$0xff]  ;;  %v8591_v41 = vld [vmem:[#allocation79_spill] sm:$0xff] }
 0x5c2   :  { %v6321_v3 = vsel %vm6008_vm3, %v1788_v59, 0  ;;  %v8601_v59 = vld [vmem:[#allocation89_spill] sm:$0xff] }
 0x5c3   :  { %5217 = vtanh.f32 %v6314_v42 }
 0x5cd   :  { %v5218_v49 = vpop.eup %5217 }
 0x5ce   :  { %v1786_v22 = vmul.f32 %v5218_v49, %v1781_v48  ;;  %v8596_v48 = vld [vmem:[#allocation84_spill] sm:$0xff]  ;;  %v8597_v49 = vld [vmem:[#allocation85_spill] sm:$0xff] }
 0x5d0   :  { %1787 = vst [vmem:[#allocation16] sm:$0x1] %v1786_v22  ;;  %v1789_v12 = vpack.c.bf16 %v1786_v22, %v1786_v22  ;;  %v8599_v22 = vld [vmem:[#allocation87_spill] sm:$0xff] }
 0x5d2   :  { %v1791_v62 = vshll.u32 %v1789_v12, 16  ;;  %v8600_v12 = vld [vmem:[#allocation88_spill] sm:$0xff] }
 0x5d4   :  { %v1795_v2 = vsel %vm6008_vm3, 0, %v1791_v62  ;;  %v8602_v62 = vld [vmem:[#allocation90_spill] sm:$0xff] }
 0x5d5   :  { %1956 = vmatprep.mubr.bf16.mxu1 %v1795_v2  ;;  %1997 = vmatprep.mubr.bf16.mxu0 %v1795_v2 }
 0x5d6   :  { %1957 = vmatmul.mubr.bf16.vlgmr.msra.gmra.mrb[20].mxu1 %v6321_v3  ;;  %1998 = vmatmul.mubr.bf16.vlgmr.msra.gmra.mrb[24].mxu0 %v6321_v3 }
 0x5d7   :  { %2007 = vmatpush1.bf16.msra.mxu1 %v8558_v6  ;;  %2048 = vmatpush1.bf16.msra.mxu0 %v8559_v9  ;;  %v8604_v6 = vld [vmem:[#allocation92_spill] sm:$0xff]  ;;  %v8605_v9 = vld [vmem:[#allocation93_spill] sm:$0xff] }
 0x5d8   :  { %2038 = vmatprep.mubr.bf16.mxu1 %v1795_v2  ;;  %2079 = vmatprep.mubr.bf16.mxu0 %v1795_v2  ;;  %v8603_v2 = vld [vmem:[#allocation91_spill] sm:$0xff] }
 0x5d9   :  { %2008 = vmatprep.subr.bf16.mxu1 %v8560_v10  ;;  %2049 = vmatprep.subr.bf16.mxu0 %v8561_v11  ;;  %v8606_v10 = vld [vmem:[#allocation94_spill] sm:$0xff]  ;;  %v8607_v11 = vld [vmem:[#allocation95_spill] sm:$0xff] }
 0x5db   :  { %2009 = vmatpush1.bf16.msra.mxu1 %v6038_v55  ;;  %2050 = vmatpush1.bf16.msra.mxu0 %v8562_v57  ;;  %v8572_v55 = vld [vmem:[#allocation60_spill] sm:$0xff] }
 0x5dc   :  { %2010 = vmatprep.subr.bf16.mxu1 %v8563_v60  ;;  %2051 = vmatprep.subr.bf16.mxu0 %v8564_v4  ;;  %v8608_v57 = vld [vmem:[#allocation96_spill] sm:$0xff]  ;;  %v8609_v60 = vld [vmem:[#allocation97_spill] sm:$0xff]  ;;  %v8610_v4 = vld [vmem:[#allocation98_spill] sm:$0xff] }
 0x5df   :  { %2011 = vmatpush1.bf16.msra.mxu1 %v8565_v8  ;;  %2052 = vmatpush1.bf16.msra.mxu0 %v8566_v0  ;;  %v6391_v8 = vld [vmem:[#allocation3 + $0x18] sm:$0xff]  ;;  %v6419_v0 = vld [vmem:[#allocation3 + $0x80] sm:$0xff] }
 0x5e0   :  { %2012 = vmatprep.subr.bf16.mxu1 %v8567_v35  ;;  %2053 = vmatprep.subr.bf16.mxu0 %v8568_v13  ;;  %v6421_v35 = vld [vmem:[#allocation3 + $0x90] sm:$0xff]  ;;  %v6423_v13 = vld [vmem:[#allocation3 + $0xc8] sm:$0xff] }
 0x5e3   :  { %2013 = vmatpush1.bf16.msra.mxu1 %v8569_v14  ;;  %2054 = vmatpush1.bf16.msra.mxu0 %v8570_v15  ;;  %v6425_v14 = vld [vmem:[#allocation3 + $0xd8] sm:$0xff]  ;;  %v6431_v15 = vld [vmem:[#allocation3 + $0xc0] sm:$0xff] }
 0x5e4   :  { %2014 = vmatprep.subr.bf16.mxu1 %v8571_v16  ;;  %2055 = vmatprep.subr.bf16.mxu0 %v8572_v55  ;;  %v6433_v16 = vld [vmem:[#allocation3 + $0xd0] sm:$0xff]  ;;  %v6435_v55 = vld [vmem:[#allocation3 + $0x108] sm:$0xff] }
 0x5e7   :  { %2015 = vmatpush1.bf16.msra.mxu1 %v8573_v17  ;;  %2056 = vmatpush1.bf16.msra.mxu0 %v8574_v18  ;;  %v6437_v17 = vld [vmem:[#allocation3 + $0x118] sm:$0xff]  ;;  %v6443_v18 = vld [vmem:[#allocation3 + $0x100] sm:$0xff] }
 0x5e8   :  { %2016 = vmatprep.subr.bf16.mxu1 %v8575_v19  ;;  %2057 = vmatprep.subr.bf16.mxu0 %v8576_v20  ;;  %v6445_v19 = vld [vmem:[#allocation3 + $0x110] sm:$0xff]  ;;  %v6447_v20 = vld [vmem:[#allocation3 + $0x148] sm:$0xff] }
 0x5eb   :  { %2017 = vmatpush1.bf16.msra.mxu1 %v8577_v23  ;;  %2058 = vmatpush1.bf16.msra.mxu0 %v8578_v53  ;;  %v6449_v23 = vld [vmem:[#allocation3 + $0x158] sm:$0xff]  ;;  %v6455_v53 = vld [vmem:[#allocation3 + $0x140] sm:$0xff] }
 0x5ec   :  { %2018 = vmatprep.subr.bf16.mxu1 %v8579_v24  ;;  %2059 = vmatprep.subr.bf16.mxu0 %v8580_v25  ;;  %v6457_v24 = vld [vmem:[#allocation3 + $0x150] sm:$0xff]  ;;  %v6461_v25 = vld [vmem:[#allocation3 + $0x188] sm:$0xff] }
 0x5ef   :  { %2019 = vmatpush1.bf16.msra.mxu1 %v8581_v26  ;;  %2060 = vmatpush1.bf16.msra.mxu0 %v8582_v27  ;;  %v6463_v26 = vld [vmem:[#allocation3 + $0x198] sm:$0xff]  ;;  %v6467_v27 = vld [vmem:[#allocation3 + $0x180] sm:$0xff] }
 0x5f0   :  { %2020 = vmatprep.subr.bf16.mxu1 %v8583_v28  ;;  %2061 = vmatprep.subr.bf16.mxu0 %v8584_v29  ;;  %v6469_v28 = vld [vmem:[#allocation3 + $0x190] sm:$0xff]  ;;  %v6473_v29 = vld [vmem:[#allocation3 + $0x1c8] sm:$0xff] }
 0x5f3   :  { %2021 = vmatpush1.bf16.msra.mxu1 %v8585_v33  ;;  %2062 = vmatpush1.bf16.msra.mxu0 %v8586_v34  ;;  %v6475_v33 = vld [vmem:[#allocation3 + $0x1d8] sm:$0xff]  ;;  %v6479_v34 = vld [vmem:[#allocation3 + $0x1c0] sm:$0xff] }
 0x5f4   :  { %2022 = vmatprep.subr.bf16.mxu1 %v8587_v37  ;;  %2063 = vmatprep.subr.bf16.mxu0 %v8588_v38  ;;  %v6481_v37 = vld [vmem:[#allocation3 + $0x1d0] sm:$0xff]  ;;  %v6485_v38 = vld [vmem:[#allocation3 + $0x208] sm:$0xff] }
 0x5f5   :  { %8611 = vst [vmem:[#allocation33_spill] sm:$0xff] %v6485_v38 }
 0x5f7   :  { %2023 = vmatpush1.bf16.msra.mxu1 %v8589_v40  ;;  %2064 = vmatpush1.bf16.msra.mxu0 %v8590_v31  ;;  %v6487_v40 = vld [vmem:[#allocation3 + $0x218] sm:$0xff]  ;;  %v6491_v31 = vld [vmem:[#allocation3 + $0x200] sm:$0xff] }
 0x5f8   :  { %2024 = vmatprep.subr.bf16.mxu1 %v8591_v41  ;;  %2065 = vmatprep.subr.bf16.mxu0 %v8592_v44  ;;  %8612 = vst [vmem:[#allocation34_spill] sm:$0xff] %v6487_v40  ;;  %8613 = vst [vmem:[#allocation35_spill] sm:$0xff] %v6491_v31  ;;  %v6493_v41 = vld [vmem:[#allocation3 + $0x210] sm:$0xff]  ;;  %v6497_v44 = vld [vmem:[#allocation3 + $0x248] sm:$0xff] }
 0x5f9   :  { %8614 = vst [vmem:[#allocation36_spill] sm:$0xff] %v6493_v41  ;;  %8615 = vst [vmem:[#allocation37_spill] sm:$0xff] %v6497_v44 }
 0x5fb   :  { %2025 = vmatpush1.bf16.msra.mxu1 %v8593_v45  ;;  %2066 = vmatpush1.bf16.msra.mxu0 %v8594_v46  ;;  %v6499_v45 = vld [vmem:[#allocation3 + $0x258] sm:$0xff]  ;;  %v6503_v46 = vld [vmem:[#allocation3 + $0x240] sm:$0xff] }
 0x5fc   :  { %2026 = vmatprep.subr.bf16.mxu1 %v8595_v47  ;;  %2067 = vmatprep.subr.bf16.mxu0 %v8596_v48  ;;  %8616 = vst [vmem:[#allocation38_spill] sm:$0xff] %v6499_v45  ;;  %8617 = vst [vmem:[#allocation39_spill] sm:$0xff] %v6503_v46  ;;  %v6505_v47 = vld [vmem:[#allocation3 + $0x250] sm:$0xff]  ;;  %v6509_v48 = vld [vmem:[#allocation3 + $0x288] sm:$0xff] }
 0x5fd   :  { %8618 = vst [vmem:[#allocation40_spill] sm:$0xff] %v6505_v47  ;;  %8619 = vst [vmem:[#allocation41_spill] sm:$0xff] %v6509_v48 }
 0x5ff   :  { %2027 = vmatpush1.bf16.msra.mxu1 %v8597_v49  ;;  %2068 = vmatpush1.bf16.msra.mxu0 %v8598_v50  ;;  %v6511_v49 = vld [vmem:[#allocation3 + $0x298] sm:$0xff]  ;;  %v6515_v50 = vld [vmem:[#allocation3 + $0x280] sm:$0xff] }
 0x600   :  { %2028 = vmatprep.subr.bf16.mxu1 %v8599_v22  ;;  %2069 = vmatprep.subr.bf16.mxu0 %v8600_v12  ;;  %8620 = vst [vmem:[#allocation42_spill] sm:$0xff] %v6511_v49  ;;  %8621 = vst [vmem:[#allocation44_spill] sm:$0xff] %v6515_v50  ;;  %v6517_v22 = vld [vmem:[#allocation3 + $0x290] sm:$0xff]  ;;  %v6521_v12 = vld [vmem:[#allocation3 + $0x2c8] sm:$0xff] }
 0x601   :  { %8622 = vst [vmem:[#allocation45_spill] sm:$0xff] %v6517_v22  ;;  %8623 = vst [vmem:[#allocation30_spill] sm:$0xff] %v6521_v12 }
 0x603   :  { %2029 = vmatpush1.bf16.msra.mxu1 %v8601_v59  ;;  %2070 = vmatpush1.bf16.msra.mxu0 %v8602_v62  ;;  %v6523_v59 = vld [vmem:[#allocation3 + $0x2d8] sm:$0xff]  ;;  %v6527_v62 = vld [vmem:[#allocation3 + $0x2c0] sm:$0xff] }
 0x604   :  { %2030 = vmatprep.subr.bf16.mxu1 %v8603_v2  ;;  %2071 = vmatprep.subr.bf16.mxu0 %v8604_v6  ;;  %8624 = vst [vmem:[#allocation32_spill] sm:$0xff] %v6523_v59  ;;  %8625 = vst [vmem:[#allocation43_spill] sm:$0xff] %v6527_v62  ;;  %v6529_v2 = vld [vmem:[#allocation3 + $0x2d0] sm:$0xff]  ;;  %v6533_v6 = vld [vmem:[#allocation3 + $0x308] sm:$0xff] }
 0x605   :  { %8626 = vst [vmem:[#allocation46_spill] sm:$0xff] %v6529_v2  ;;  %8627 = vst [vmem:[#allocation47_spill] sm:$0xff] %v6533_v6 }
 0x607   :  { %2031 = vmatpush1.bf16.msra.mxu1 %v8605_v9  ;;  %2072 = vmatpush1.bf16.msra.mxu0 %v8606_v10  ;;  %v6535_v9 = vld [vmem:[#allocation3 + $0x318] sm:$0xff]  ;;  %v6539_v10 = vld [vmem:[#allocation3 + $0x300] sm:$0xff] }
 0x608   :  { %2032 = vmatprep.subr.bf16.mxu1 %v8607_v11  ;;  %2073 = vmatprep.subr.bf16.mxu0 %v8608_v57  ;;  %8628 = vst [vmem:[#allocation48_spill] sm:$0xff] %v6535_v9  ;;  %8629 = vst [vmem:[#allocation49_spill] sm:$0xff] %v6539_v10  ;;  %v6541_v11 = vld [vmem:[#allocation3 + $0x310] sm:$0xff]  ;;  %v6543_v57 = vld [vmem:[#allocation3 + $0x348] sm:$0xff] }
 0x609   :  { %8630 = vst [vmem:[#allocation50_spill] sm:$0xff] %v6541_v11  ;;  %8631 = vst [vmem:[#allocation51_spill] sm:$0xff] %v6543_v57 }
 0x60b   :  { %2033 = vmatpush1.bf16.msra.mxu1 %v6184_v1  ;;  %2074 = vmatpush1.bf16.msra.mxu0 %v8609_v60  ;;  %v6389_v1 = vld [vmem:[#allocation3 + $0x8] sm:$0xff]  ;;  %v6545_v60 = vld [vmem:[#allocation3 + $0x358] sm:$0xff] }
 0x60c   :  { %2034 = vmatprep.subr.bf16.mxu1 %v8610_v4  ;;  %2075 = vmatprep.subr.bf16.mxu0 %v6190_v36  ;;  %v6393_v36 = vld [vmem:[#allocation3] sm:$0xff]  ;;  %8632 = vst [vmem:[#allocation52_spill] sm:$0xff] %v6545_v60 }
 0x60d   :  { %v6551_v4 = vld [vmem:[#allocation3 + $0x340] sm:$0xff] }
 0x60e   :  { %8633 = vst [vmem:[#allocation53_spill] sm:$0xff] %v6551_v4 }
 0x60f   :  { %2035 = vmatpush1.bf16.msra.mxu1 %v6196_v51  ;;  %2076 = vmatpush1.bf16.msra.mxu0 %v6198_v5  ;;  %v6397_v51 = vld [vmem:[#allocation3 + $0x10] sm:$0xff]  ;;  %v6411_v5 = vld [vmem:[#allocation3 + $0x88] sm:$0xff] }
 0x610   :  { %2036 = vmatprep.subr.bf16.mxu1 %v6200_v43  ;;  %2077 = vmatprep.subr.bf16.mxu0 %v6202_v52  ;;  %v6399_v52 = vld [vmem:[#allocation3 + $0x48] sm:$0xff]  ;;  %v6409_v43 = vld [vmem:[#allocation3 + $0x50] sm:$0xff] }
 0x613   :  { %2037 = vmatpush1.bf16.msra.mxu1 %v6208_v54  ;;  %2078 = vmatpush1.bf16.msra.mxu0 %v6210_v30  ;;  %v6401_v54 = vld [vmem:[#allocation3 + $0x58] sm:$0xff]  ;;  %v6407_v30 = vld [vmem:[#allocation3 + $0x40] sm:$0xff] }
 0x614   :  { %2304 = vmatprep.subr.bf16.mxu1 %v6389_v1  ;;  %2345 = vmatprep.subr.bf16.mxu0 %v6391_v8 }
 0x616   :  { %2039 = vmatmul.mubr.bf16.vlgmr.msra.gmra.mrb[24].mxu1 %v6321_v3  ;;  %2080 = vmatmul.mubr.bf16.vlgmr.msra.gmra.mrb[28].mxu0 %v6321_v3  ;;  %v6413_v3 = vld [vmem:[#allocation3 + $0x98] sm:$0xff] }
 0x617   :  { %2305 = vmatpush1.bf16.msra.mxu1 %v6393_v36  ;;  %2346 = vmatpush1.bf16.msra.mxu0 %v6397_v51 }
 0x618   :  { %2306 = vmatprep.subr.bf16.mxu1 %v6399_v52  ;;  %2347 = vmatprep.subr.bf16.mxu0 %v6401_v54 }
 0x61b   :  { %2307 = vmatpush1.bf16.msra.mxu1 %v6407_v30  ;;  %2348 = vmatpush1.bf16.msra.mxu0 %v6409_v43 }
 0x61c   :  { %2308 = vmatprep.subr.bf16.mxu1 %v6411_v5  ;;  %2349 = vmatprep.subr.bf16.mxu0 %v6413_v3 }
 0x61f   :  { %2309 = vmatpush1.bf16.msra.mxu1 %v6419_v0  ;;  %2350 = vmatpush1.bf16.msra.mxu0 %v6421_v35 }
 0x620   :  { %2310 = vmatprep.subr.bf16.mxu1 %v6423_v13  ;;  %2351 = vmatprep.subr.bf16.mxu0 %v6425_v14 }
 0x623   :  { %2311 = vmatpush1.bf16.msra.mxu1 %v6431_v15  ;;  %2352 = vmatpush1.bf16.msra.mxu0 %v6433_v16 }
 0x624   :  { %2312 = vmatprep.subr.bf16.mxu1 %v6435_v55  ;;  %2353 = vmatprep.subr.bf16.mxu0 %v6437_v17 }
 0x627   :  { %2313 = vmatpush1.bf16.msra.mxu1 %v6443_v18  ;;  %2354 = vmatpush1.bf16.msra.mxu0 %v6445_v19 }
 0x628   :  { %2314 = vmatprep.subr.bf16.mxu1 %v6447_v20  ;;  %2355 = vmatprep.subr.bf16.mxu0 %v6449_v23 }
 0x62b   :  { %2315 = vmatpush1.bf16.msra.mxu1 %v6455_v53  ;;  %2356 = vmatpush1.bf16.msra.mxu0 %v6457_v24 }
 0x62c   :  { %2316 = vmatprep.subr.bf16.mxu1 %v6461_v25  ;;  %2357 = vmatprep.subr.bf16.mxu0 %v6463_v26 }
 0x62f   :  { %2317 = vmatpush1.bf16.msra.mxu1 %v6467_v27  ;;  %2358 = vmatpush1.bf16.msra.mxu0 %v6469_v28 }
 0x630   :  { %2318 = vmatprep.subr.bf16.mxu1 %v6473_v29  ;;  %2359 = vmatprep.subr.bf16.mxu0 %v6475_v33 }
 0x633   :  { %2319 = vmatpush1.bf16.msra.mxu1 %v6479_v34  ;;  %2360 = vmatpush1.bf16.msra.mxu0 %v6481_v37 }
 0x634   :  { %2320 = vmatprep.subr.bf16.mxu1 %v6485_v38  ;;  %2361 = vmatprep.subr.bf16.mxu0 %v6487_v40 }
 0x637   :  { %2321 = vmatpush1.bf16.msra.mxu1 %v6491_v31  ;;  %2362 = vmatpush1.bf16.msra.mxu0 %v6493_v41 }
 0x638   :  { %2322 = vmatprep.subr.bf16.mxu1 %v6497_v44  ;;  %2363 = vmatprep.subr.bf16.mxu0 %v6499_v45 }
 0x63b   :  { %2323 = vmatpush1.bf16.msra.mxu1 %v6503_v46  ;;  %2364 = vmatpush1.bf16.msra.mxu0 %v6505_v47 }
 0x63c   :  { %2324 = vmatprep.subr.bf16.mxu1 %v6509_v48  ;;  %2365 = vmatprep.subr.bf16.mxu0 %v6511_v49 }
 0x63f   :  { %2325 = vmatpush1.bf16.msra.mxu1 %v6515_v50  ;;  %2366 = vmatpush1.bf16.msra.mxu0 %v6517_v22 }
 0x640   :  { %2326 = vmatprep.subr.bf16.mxu1 %v6521_v12  ;;  %2367 = vmatprep.subr.bf16.mxu0 %v6523_v59 }
 0x643   :  { %2327 = vmatpush1.bf16.msra.mxu1 %v6527_v62  ;;  %2368 = vmatpush1.bf16.msra.mxu0 %v6529_v2 }
 0x644   :  { %2328 = vmatprep.subr.bf16.mxu1 %v6533_v6  ;;  %2369 = vmatprep.subr.bf16.mxu0 %v6535_v9  ;;  %v6555_v9 = vld [vmem:[#allocation3 + $0x388] sm:$0xff]  ;;  %v6557_v6 = vld [vmem:[#allocation3 + $0x398] sm:$0xff] }
 0x645   :  { %8635 = vst [vmem:[#allocation55_spill] sm:$0xff] %v6555_v9  ;;  %8636 = vst [vmem:[#allocation56_spill] sm:$0xff] %v6557_v6 }
 0x647   :  { %2329 = vmatpush1.bf16.msra.mxu1 %v6539_v10  ;;  %2370 = vmatpush1.bf16.msra.mxu0 %v6541_v11  ;;  %v6563_v11 = vld [vmem:[#allocation3 + $0x380] sm:$0xff]  ;;  %v6569_v10 = vld [vmem:[#allocation3 + $0x3d8] sm:$0xff] }
 0x648   :  { %2330 = vmatprep.subr.bf16.mxu1 %v6543_v57  ;;  %2371 = vmatprep.subr.bf16.mxu0 %v6545_v60  ;;  %8637 = vst [vmem:[#allocation57_spill] sm:$0xff] %v6563_v11  ;;  %v6565_v57 = vld [vmem:[#allocation3 + $0x390] sm:$0xff]  ;;  %v6567_v60 = vld [vmem:[#allocation3 + $0x3c8] sm:$0xff]  ;;  %8640 = vst [vmem:[#allocation60_spill] sm:$0xff] %v6569_v10 }
 0x649   :  { %8638 = vst [vmem:[#allocation58_spill] sm:$0xff] %v6565_v57  ;;  %8639 = vst [vmem:[#allocation59_spill] sm:$0xff] %v6567_v60 }
 0x64b   :  { %2331 = vmatpush1.bf16.msra.mxu1 %v6551_v4  ;;  %2372 = vmatpush1.bf16.msra.mxu0 %v6553_v56  ;;  %v6575_v56 = vld [vmem:[#allocation3 + $0x3c0] sm:$0xff]  ;;  %v6583_v4 = vld [vmem:[#allocation3 + $0x38] sm:$0xff] }
 0x64c   :  { %2332 = vmatprep.subr.bf16.mxu1 %v6555_v9  ;;  %2373 = vmatprep.subr.bf16.mxu0 %v6557_v6  ;;  %8641 = vst [vmem:[#allocation61_spill] sm:$0xff] %v6575_v56  ;;  %v6577_v9 = vld [vmem:[#allocation3 + $0x3d0] sm:$0xff]  ;;  %v6581_v6 = vld [vmem:[#allocation3 + $0x28] sm:$0xff]  ;;  %8644 = vst [vmem:[#allocation64_spill] sm:$0xff] %v6583_v4 }
 0x64d   :  { %8642 = vst [vmem:[#allocation62_spill] sm:$0xff] %v6577_v9  ;;  %8643 = vst [vmem:[#allocation63_spill] sm:$0xff] %v6581_v6 }
 0x64f   :  { %2333 = vmatpush1.bf16.msra.mxu1 %v6563_v11  ;;  %2374 = vmatpush1.bf16.msra.mxu0 %v6565_v57 }
 0x650   :  { %2334 = vmatprep.subr.bf16.mxu1 %v6567_v60  ;;  %2375 = vmatprep.subr.bf16.mxu0 %v6569_v10 }
 0x653   :  { %2335 = vmatpush1.bf16.msra.mxu1 %v6575_v56  ;;  %2376 = vmatpush1.bf16.msra.mxu0 %v6577_v9 }
 0x654   :  { %2386 = vmatprep.subr.bf16.mxu1 %v6581_v6  ;;  %2427 = vmatprep.subr.bf16.mxu0 %v6583_v4  ;;  %v2105_v6 = vld [vmem:[#allocation2 + $0x2] ss:$8 sm:$0xf] }
 0x6a9   :  { %v1958_v57 = vpop.f32.mrb[20].mxu1  ;;  %v1999_v60 = vpop.f32.mrb[24].mxu0 }
 0x6aa   :  { %v1960_v11 = vpop.f32.mrb[21].mxu1  ;;  %v2001_v10 = vpop.f32.mrb[25].mxu0  ;;  %v2092_v4 = vrot.slane %v1958_v57, 1  ;;  %v2094_v46 = vrot.slane %v1999_v60, 1 }
 0x6ab   :  { %v2106_v2 = vcombine.low %v1958_v57, %v1960_v11  ;;  %v2107_v62 = vcombine.low %v1999_v60, %v2001_v10  ;;  %v1962_v59 = vpop.f32.mrb[22].mxu1  ;;  %v2003_v12 = vpop.f32.mrb[26].mxu0  ;;  %v2093_v44 = vrot.slane %v1960_v11, 1  ;;  %v2095_v41 = vrot.slane %v2001_v10, 1 }
 0x6ac   :  { %v1963_v22 = vpop.f32.mrb[23].mxu1  ;;  %v2004_v56 = vpop.f32.mrb[27].mxu0 }
 0x6ad   :  { %v2114_v9 = vrot.slane %v2106_v2, %v6283_v32  ;;  %v2121_v50 = vrot.slane %v2107_v62, %v6283_v32 }
 0x6af   :  { %v2122_v49 = vcombine.low %v2114_v9, %v2121_v50 }
 0x6b1   :  { %v2129_v48 = vrot.slane %v2122_v49, %v6283_v32 }
 0x6b3   :  { %v2131_v47 = vadd.f32 %v2129_v48, %v2105_v6 }
 0x6b5   :  { %5219 = vtanh.f32 %v2131_v47 }
 0x6bf   :  { %v5220_v45 = vpop.eup %5219 }
 0x6c0   :  { %v2133_v47 = vmul.f32 0.5, %v5220_v45 }
 0x6c2   :  { %v2134_v11 = vadd.f32 0.5, %v2133_v47 }
 0x6e9   :  { %v2040_v31 = vpop.f32.mrb[24].mxu1  ;;  %v2081_v59 = vpop.f32.mrb[28].mxu0 }
 0x6ea   :  { %v2100_v12 = vadd.f32 %v2092_v4, %v2040_v31  ;;  %v2102_v22 = vadd.f32 %v2094_v46, %v2081_v59  ;;  %v2042_v56 = vpop.f32.mrb[25].mxu1  ;;  %v2083_v40 = vpop.f32.mrb[29].mxu0  ;;  %v2136_v31 = vrot.slane %v2134_v11, 1 }
 0x6eb   :  { %v2101_v2 = vadd.f32 %v2093_v44, %v2042_v56  ;;  %v2103_v38 = vadd.f32 %v2095_v41, %v2083_v40  ;;  %v2044_v62 = vpop.f32.mrb[26].mxu1  ;;  %v2085_v50 = vpop.f32.mrb[30].mxu0  ;;  %v2140_v41 = vrot.slane %v5220_v45, 3 }
 0x6ec   :  { %v2148_v49 = vadd.f32 %v2100_v12, %v6292_v58  ;;  %v2045_v9 = vpop.f32.mrb[27].mxu1  ;;  %v2086_v48 = vpop.f32.mrb[31].mxu0  ;;  %v2150_v46 = vadd.f32 %v2102_v22, %v6307_v21  ;;  %v2138_v40 = vmul.f32 %v2136_v31, %v6311_v39 }
 0x6ed   :  { %v2149_v6 = vadd.f32 %v2101_v2, %v6296_v7  ;;  %v2151_v10 = vadd.f32 %v2103_v38, %v6300_v61  ;;  %v2142_v4 = vmul.f32 %v2140_v41, %v2134_v11  ;;  %v2145_v9 = vrot.slane %v2134_v11, 2  ;;  %v6606_v41 = vld [vmem:[#allocation3 + $0x30] sm:$0xff] }
 0x6ee   :  { %5221 = vtanh.f32 %v2148_v49 }
 0x6ef   :  { %5223 = vtanh.f32 %v2149_v6  ;;  %v6595_v2 = vadd.f32 %v2142_v4, %v2138_v40  ;;  %v6604_v40 = vld [vmem:[#allocation3 + $0x20] sm:$0xff] }
 0x6f0   :  { %5225 = vtanh.f32 %v2151_v10  ;;  %v6620_v4 = vld [vmem:[#allocation3 + $0x60] sm:$0xff] }
 0x6f1   :  { %5227 = vtanh.f32 %v2150_v46 }
 0x6f2   :  { %5229 = vtanh.f32 %v6595_v2 }
 0x6f8   :  { %v5222_v44 = vpop.eup %5221 }
 0x6f9   :  { %v2156_v57 = vmul.f32 0.5, %v5222_v44  ;;  %v5224_v60 = vpop.eup %5223 }
 0x6fa   :  { %v2157_v12 = vmul.f32 0.5, %v5224_v60  ;;  %v5226_v56 = vpop.eup %5225  ;;  %v6616_v60 = vld [vmem:[#allocation3 + $0x78] sm:$0xff] }
 0x6fb   :  { %v2159_v59 = vadd.f32 0.5, %v2156_v57  ;;  %v5228_v39 = vpop.eup %5227  ;;  %v6614_v57 = vld [vmem:[#allocation3 + $0x68] sm:$0xff] }
 0x6fc   :  { %v2160_v38 = vadd.f32 0.5, %v2157_v12  ;;  %v2158_v45 = vmul.f32 0.5, %v5228_v39  ;;  %v5230_v49 = vpop.eup %5229  ;;  %v6626_v12 = vld [vmem:[#allocation3 + $0xa8] sm:$0xff]  ;;  %v6640_v39 = vld [vmem:[#allocation3 + $0xf8] sm:$0xff] }
 0x6fd   :  { %v2163_v62 = vmul.f32 %v5226_v56, %v2159_v59  ;;  %v2147_v6 = vmul.f32 %v5230_v49, %v2145_v9  ;;  %v6622_v59 = vld [vmem:[#allocation3 + $0x70] sm:$0xff]  ;;  %v6628_v56 = vld [vmem:[#allocation3 + $0xb8] sm:$0xff]  ;;  %v6650_v9 = vld [vmem:[#allocation3 + $0x128] sm:$0xff] }
 0x6fe   :  { %v2162_v50 = vmul.f32 %v2160_v38, %v6314_v42  ;;  %v2161_v48 = vadd.f32 0.5, %v2158_v45  ;;  %v6634_v38 = vld [vmem:[#allocation3 + $0xa0] sm:$0xff]  ;;  %v6648_v49 = vld [vmem:[#allocation3 + $0xf0] sm:$0xff] }
 0x6ff   :  { %v2168_v46 = vpack.c.bf16 %v2147_v6, %v2147_v6  ;;  %v6646_v45 = vld [vmem:[#allocation3 + $0xe0] sm:$0xff]  ;;  %v6660_v6 = vld [vmem:[#allocation3 + $0x130] sm:$0xff] }
 0x700   :  { %v6599_v22 = vadd.f32 %v2163_v62, %v2162_v50  ;;  %v6636_v62 = vld [vmem:[#allocation3 + $0xb0] sm:$0xff]  ;;  %v6638_v50 = vld [vmem:[#allocation3 + $0xe8] sm:$0xff]  ;;  %8647 = vst [vmem:[#allocation67_spill] sm:$0xff] %v6660_v6 }
 0x701   :  { %v6610_v11 = vsel %vm6008_vm3, %v2168_v46, 0  ;;  %v6670_v46 = vld [vmem:[#allocation3 + $0x160] sm:$0xff] }
 0x702   :  { %5231 = vtanh.f32 %v6599_v22  ;;  %8650 = vst [vmem:[#allocation70_spill] sm:$0xff] %v6670_v46 }
 0x70c   :  { %v5232_v47 = vpop.eup %5231 }
 0x70d   :  { %v2166_v10 = vmul.f32 %v5232_v47, %v2161_v48  ;;  %v6652_v48 = vld [vmem:[#allocation3 + $0x138] sm:$0xff]  ;;  %v6658_v47 = vld [vmem:[#allocation3 + $0x120] sm:$0xff] }
 0x70e   :  { %8645 = vst [vmem:[#allocation65_spill] sm:$0xff] %v6652_v48  ;;  %8646 = vst [vmem:[#allocation66_spill] sm:$0xff] %v6658_v47 }
 0x70f   :  { %2167 = vst [vmem:[#allocation16 + $0x1] sm:$0x1] %v2166_v10  ;;  %v2169_v31 = vpack.c.bf16 %v2166_v10, %v2166_v10  ;;  %v6662_v10 = vld [vmem:[#allocation3 + $0x168] sm:$0xff] }
 0x710   :  { %8648 = vst [vmem:[#allocation68_spill] sm:$0xff] %v6662_v10 }
 0x711   :  { %v2171_v44 = vshll.u32 %v2169_v31, 16  ;;  %v6664_v31 = vld [vmem:[#allocation3 + $0x178] sm:$0xff] }
 0x712   :  { %8649 = vst [vmem:[#allocation69_spill] sm:$0xff] %v6664_v31 }
 0x713   :  { %v2175_v42 = vsel %vm6008_vm3, 0, %v2171_v44  ;;  %v6672_v44 = vld [vmem:[#allocation3 + $0x170] sm:$0xff] }
 0x714   :  { %2336 = vmatprep.mubr.bf16.mxu1 %v2175_v42  ;;  %2377 = vmatprep.mubr.bf16.mxu0 %v2175_v42  ;;  %8651 = vst [vmem:[#allocation71_spill] sm:$0xff] %v6672_v44 }
 0x715   :  { %2337 = vmatmul.mubr.bf16.vlgmr.msra.gmra.mrb[28].mxu1 %v6610_v11  ;;  %2378 = vmatmul.mubr.bf16.vlgmr.msra.gmra.mrb[32].mxu0 %v6610_v11 }
 0x716   :  { %2387 = vmatpush1.bf16.msra.mxu1 %v6604_v40  ;;  %2428 = vmatpush1.bf16.msra.mxu0 %v6606_v41 }
 0x717   :  { %2418 = vmatprep.mubr.bf16.mxu1 %v2175_v42  ;;  %2459 = vmatprep.mubr.bf16.mxu0 %v2175_v42  ;;  %v6674_v42 = vld [vmem:[#allocation3 + $0x1a8] sm:$0xff] }
 0x718   :  { %2388 = vmatprep.subr.bf16.mxu1 %v6614_v57  ;;  %2429 = vmatprep.subr.bf16.mxu0 %v6616_v60  ;;  %8652 = vst [vmem:[#allocation72_spill] sm:$0xff] %v6674_v42 }
 0x71a   :  { %2389 = vmatpush1.bf16.msra.mxu1 %v6620_v4  ;;  %2430 = vmatpush1.bf16.msra.mxu0 %v6622_v59 }
 0x71b   :  { %2390 = vmatprep.subr.bf16.mxu1 %v6626_v12  ;;  %2431 = vmatprep.subr.bf16.mxu0 %v6628_v56 }
 0x71e   :  { %2391 = vmatpush1.bf16.msra.mxu1 %v6634_v38  ;;  %2432 = vmatpush1.bf16.msra.mxu0 %v6636_v62 }
 0x71f   :  { %2392 = vmatprep.subr.bf16.mxu1 %v6638_v50  ;;  %2433 = vmatprep.subr.bf16.mxu0 %v6640_v39 }
 0x722   :  { %2393 = vmatpush1.bf16.msra.mxu1 %v6646_v45  ;;  %2434 = vmatpush1.bf16.msra.mxu0 %v6648_v49 }
 0x723   :  { %2394 = vmatprep.subr.bf16.mxu1 %v6650_v9  ;;  %2435 = vmatprep.subr.bf16.mxu0 %v6652_v48  ;;  %v6676_v48 = vld [vmem:[#allocation3 + $0x1b8] sm:$0xff] }
 0x724   :  { %8653 = vst [vmem:[#allocation73_spill] sm:$0xff] %v6676_v48 }
 0x726   :  { %2395 = vmatpush1.bf16.msra.mxu1 %v6658_v47  ;;  %2436 = vmatpush1.bf16.msra.mxu0 %v6660_v6  ;;  %v6682_v6 = vld [vmem:[#allocation3 + $0x1a0] sm:$0xff]  ;;  %v6688_v47 = vld [vmem:[#allocation3 + $0x1f8] sm:$0xff] }
 0x727   :  { %2396 = vmatprep.subr.bf16.mxu1 %v6662_v10  ;;  %2437 = vmatprep.subr.bf16.mxu0 %v6664_v31  ;;  %8654 = vst [vmem:[#allocation74_spill] sm:$0xff] %v6682_v6  ;;  %v6684_v10 = vld [vmem:[#allocation3 + $0x1b0] sm:$0xff]  ;;  %v6686_v31 = vld [vmem:[#allocation3 + $0x1e8] sm:$0xff]  ;;  %8657 = vst [vmem:[#allocation77_spill] sm:$0xff] %v6688_v47 }
 0x728   :  { %8655 = vst [vmem:[#allocation75_spill] sm:$0xff] %v6684_v10  ;;  %8656 = vst [vmem:[#allocation76_spill] sm:$0xff] %v6686_v31 }
 0x72a   :  { %2397 = vmatpush1.bf16.msra.mxu1 %v6670_v46  ;;  %2438 = vmatpush1.bf16.msra.mxu0 %v6672_v44  ;;  %v6694_v44 = vld [vmem:[#allocation3 + $0x1e0] sm:$0xff]  ;;  %v6700_v46 = vld [vmem:[#allocation3 + $0x238] sm:$0xff] }
 0x72b   :  { %2398 = vmatprep.subr.bf16.mxu1 %v6674_v42  ;;  %2439 = vmatprep.subr.bf16.mxu0 %v6676_v48  ;;  %8658 = vst [vmem:[#allocation78_spill] sm:$0xff] %v6694_v44  ;;  %v6696_v42 = vld [vmem:[#allocation3 + $0x1f0] sm:$0xff]  ;;  %v6698_v48 = vld [vmem:[#allocation3 + $0x228] sm:$0xff]  ;;  %8661 = vst [vmem:[#allocation81_spill] sm:$0xff] %v6700_v46 }
 0x72c   :  { %8659 = vst [vmem:[#allocation79_spill] sm:$0xff] %v6696_v42  ;;  %8660 = vst [vmem:[#allocation80_spill] sm:$0xff] %v6698_v48 }
 0x72e   :  { %2399 = vmatpush1.bf16.msra.mxu1 %v6682_v6  ;;  %2440 = vmatpush1.bf16.msra.mxu0 %v6684_v10  ;;  %v6706_v10 = vld [vmem:[#allocation3 + $0x220] sm:$0xff]  ;;  %v6712_v6 = vld [vmem:[#allocation3 + $0x278] sm:$0xff] }
 0x72f   :  { %2400 = vmatprep.subr.bf16.mxu1 %v6686_v31  ;;  %2441 = vmatprep.subr.bf16.mxu0 %v6688_v47  ;;  %8662 = vst [vmem:[#allocation82_spill] sm:$0xff] %v6706_v10  ;;  %v6708_v31 = vld [vmem:[#allocation3 + $0x230] sm:$0xff]  ;;  %v6710_v47 = vld [vmem:[#allocation3 + $0x268] sm:$0xff]  ;;  %8665 = vst [vmem:[#allocation85_spill] sm:$0xff] %v6712_v6 }
 0x730   :  { %8663 = vst [vmem:[#allocation83_spill] sm:$0xff] %v6708_v31  ;;  %8664 = vst [vmem:[#allocation84_spill] sm:$0xff] %v6710_v47 }
 0x732   :  { %2401 = vmatpush1.bf16.msra.mxu1 %v6694_v44  ;;  %2442 = vmatpush1.bf16.msra.mxu0 %v6696_v42  ;;  %v6718_v42 = vld [vmem:[#allocation3 + $0x260] sm:$0xff]  ;;  %v6724_v44 = vld [vmem:[#allocation3 + $0x2b8] sm:$0xff] }
 0x733   :  { %2402 = vmatprep.subr.bf16.mxu1 %v6698_v48  ;;  %2443 = vmatprep.subr.bf16.mxu0 %v6700_v46  ;;  %8666 = vst [vmem:[#allocation86_spill] sm:$0xff] %v6718_v42  ;;  %v6720_v48 = vld [vmem:[#allocation3 + $0x270] sm:$0xff]  ;;  %v6722_v46 = vld [vmem:[#allocation3 + $0x2a8] sm:$0xff]  ;;  %8669 = vst [vmem:[#allocation89_spill] sm:$0xff] %v6724_v44 }
 0x734   :  { %8667 = vst [vmem:[#allocation87_spill] sm:$0xff] %v6720_v48  ;;  %8668 = vst [vmem:[#allocation88_spill] sm:$0xff] %v6722_v46 }
 0x736   :  { %2403 = vmatpush1.bf16.msra.mxu1 %v6706_v10  ;;  %2444 = vmatpush1.bf16.msra.mxu0 %v6708_v31  ;;  %v6730_v31 = vld [vmem:[#allocation3 + $0x2a0] sm:$0xff]  ;;  %v6736_v10 = vld [vmem:[#allocation3 + $0x2f8] sm:$0xff] }
 0x737   :  { %2404 = vmatprep.subr.bf16.mxu1 %v6710_v47  ;;  %2445 = vmatprep.subr.bf16.mxu0 %v6712_v6  ;;  %8670 = vst [vmem:[#allocation90_spill] sm:$0xff] %v6730_v31  ;;  %v6732_v47 = vld [vmem:[#allocation3 + $0x2b0] sm:$0xff]  ;;  %v6734_v6 = vld [vmem:[#allocation3 + $0x2e8] sm:$0xff]  ;;  %8673 = vst [vmem:[#allocation93_spill] sm:$0xff] %v6736_v10 }
 0x738   :  { %8671 = vst [vmem:[#allocation91_spill] sm:$0xff] %v6732_v47  ;;  %8672 = vst [vmem:[#allocation92_spill] sm:$0xff] %v6734_v6 }
 0x73a   :  { %2405 = vmatpush1.bf16.msra.mxu1 %v6718_v42  ;;  %2446 = vmatpush1.bf16.msra.mxu0 %v6720_v48  ;;  %v6742_v48 = vld [vmem:[#allocation3 + $0x2e0] sm:$0xff]  ;;  %v6748_v42 = vld [vmem:[#allocation3 + $0x338] sm:$0xff] }
 0x73b   :  { %2406 = vmatprep.subr.bf16.mxu1 %v6722_v46  ;;  %2447 = vmatprep.subr.bf16.mxu0 %v6724_v44  ;;  %8674 = vst [vmem:[#allocation94_spill] sm:$0xff] %v6742_v48  ;;  %v6744_v46 = vld [vmem:[#allocation3 + $0x2f0] sm:$0xff]  ;;  %v6746_v44 = vld [vmem:[#allocation3 + $0x328] sm:$0xff]  ;;  %8677 = vst [vmem:[#allocation97_spill] sm:$0xff] %v6748_v42 }
 0x73c   :  { %8675 = vst [vmem:[#allocation95_spill] sm:$0xff] %v6744_v46  ;;  %8676 = vst [vmem:[#allocation96_spill] sm:$0xff] %v6746_v44 }
 0x73e   :  { %2407 = vmatpush1.bf16.msra.mxu1 %v6730_v31  ;;  %2448 = vmatpush1.bf16.msra.mxu0 %v6732_v47  ;;  %v6754_v47 = vld [vmem:[#allocation3 + $0x320] sm:$0xff]  ;;  %v6760_v31 = vld [vmem:[#allocation3 + $0x378] sm:$0xff] }
 0x73f   :  { %2408 = vmatprep.subr.bf16.mxu1 %v6734_v6  ;;  %2449 = vmatprep.subr.bf16.mxu0 %v6736_v10  ;;  %8678 = vst [vmem:[#allocation98_spill] sm:$0xff] %v6754_v47  ;;  %v6756_v6 = vld [vmem:[#allocation3 + $0x330] sm:$0xff]  ;;  %v6758_v10 = vld [vmem:[#allocation3 + $0x368] sm:$0xff]  ;;  %8681 = vst [vmem:[#allocation101_spill] sm:$0xff] %v6760_v31 }
 0x740   :  { %8679 = vst [vmem:[#allocation99_spill] sm:$0xff] %v6756_v6  ;;  %8680 = vst [vmem:[#allocation100_spill] sm:$0xff] %v6758_v10 }
 0x742   :  { %2409 = vmatpush1.bf16.msra.mxu1 %v6742_v48  ;;  %2450 = vmatpush1.bf16.msra.mxu0 %v6744_v46  ;;  %v6766_v46 = vld [vmem:[#allocation3 + $0x360] sm:$0xff]  ;;  %v6772_v48 = vld [vmem:[#allocation3 + $0x3b8] sm:$0xff] }
 0x743   :  { %2410 = vmatprep.subr.bf16.mxu1 %v6746_v44  ;;  %2451 = vmatprep.subr.bf16.mxu0 %v6748_v42  ;;  %v6768_v44 = vld [vmem:[#allocation3 + $0x370] sm:$0xff]  ;;  %v6770_v42 = vld [vmem:[#allocation3 + $0x3a8] sm:$0xff] }
 0x744   :  { %8682 = vst [vmem:[#allocation102_spill] sm:$0xff] %v6768_v44  ;;  %8683 = vst [vmem:[#allocation103_spill] sm:$0xff] %v6770_v42 }
 0x746   :  { %2411 = vmatpush1.bf16.msra.mxu1 %v6754_v47  ;;  %2452 = vmatpush1.bf16.msra.mxu0 %v6756_v6  ;;  %v6778_v6 = vld [vmem:[#allocation3 + $0x3a0] sm:$0xff]  ;;  %v6784_v47 = vld [vmem:[#allocation3 + $0x3f8] sm:$0xff] }
 0x747   :  { %2412 = vmatprep.subr.bf16.mxu1 %v6758_v10  ;;  %2453 = vmatprep.subr.bf16.mxu0 %v6760_v31  ;;  %v6780_v10 = vld [vmem:[#allocation3 + $0x3b0] sm:$0xff]  ;;  %v6782_v31 = vld [vmem:[#allocation3 + $0x3e8] sm:$0xff] }
 0x74a   :  { %2413 = vmatpush1.bf16.msra.mxu1 %v6766_v46  ;;  %2454 = vmatpush1.bf16.msra.mxu0 %v6768_v44  ;;  %v6790_v44 = vld [vmem:[#allocation3 + $0x3e0] sm:$0xff] }
 0x74b   :  { %2414 = vmatprep.subr.bf16.mxu1 %v6770_v42  ;;  %2455 = vmatprep.subr.bf16.mxu0 %v6772_v48  ;;  %v6792_v42 = vld [vmem:[#allocation3 + $0x3f0] sm:$0xff] }
 0x74e   :  { %2415 = vmatpush1.bf16.msra.mxu1 %v6778_v6  ;;  %2456 = vmatpush1.bf16.msra.mxu0 %v6780_v10 }
 0x74f   :  { %2416 = vmatprep.subr.bf16.mxu1 %v6782_v31  ;;  %2457 = vmatprep.subr.bf16.mxu0 %v6784_v47 }
 0x752   :  { %2417 = vmatpush1.bf16.msra.mxu1 %v6790_v44  ;;  %2458 = vmatpush1.bf16.msra.mxu0 %v6792_v42 }
 0x753   :  { %2684 = vmatprep.subr.bf16.mxu1 %v6389_v1  ;;  %2725 = vmatprep.subr.bf16.mxu0 %v6391_v8  ;;  %v8684_v1 = vld [vmem:[#allocation33_spill] sm:$0xff]  ;;  %v8685_v8 = vld [vmem:[#allocation34_spill] sm:$0xff] }
 0x755   :  { %2419 = vmatmul.mubr.bf16.vlgmr.msra.gmra.mrb[32].mxu1 %v6610_v11  ;;  %2460 = vmatmul.mubr.bf16.vlgmr.msra.gmra.mrb[36].mxu0 %v6610_v11  ;;  %v8716_v11 = vld [vmem:[#allocation63_spill] sm:$0xff] }
 0x756   :  { %2685 = vmatpush1.bf16.msra.mxu1 %v6393_v36  ;;  %2726 = vmatpush1.bf16.msra.mxu0 %v6397_v51  ;;  %v8686_v36 = vld [vmem:[#allocation35_spill] sm:$0xff]  ;;  %v8687_v51 = vld [vmem:[#allocation36_spill] sm:$0xff] }
 0x757   :  { %2686 = vmatprep.subr.bf16.mxu1 %v6399_v52  ;;  %2727 = vmatprep.subr.bf16.mxu0 %v6401_v54  ;;  %v8688_v52 = vld [vmem:[#allocation37_spill] sm:$0xff]  ;;  %v8689_v54 = vld [vmem:[#allocation38_spill] sm:$0xff] }
 0x75a   :  { %2687 = vmatpush1.bf16.msra.mxu1 %v6407_v30  ;;  %2728 = vmatpush1.bf16.msra.mxu0 %v6409_v43  ;;  %v8690_v30 = vld [vmem:[#allocation39_spill] sm:$0xff]  ;;  %v8691_v43 = vld [vmem:[#allocation40_spill] sm:$0xff] }
 0x75b   :  { %2688 = vmatprep.subr.bf16.mxu1 %v6411_v5  ;;  %2729 = vmatprep.subr.bf16.mxu0 %v6413_v3  ;;  %v8692_v5 = vld [vmem:[#allocation41_spill] sm:$0xff]  ;;  %v8693_v3 = vld [vmem:[#allocation42_spill] sm:$0xff] }
 0x75e   :  { %2689 = vmatpush1.bf16.msra.mxu1 %v6419_v0  ;;  %2730 = vmatpush1.bf16.msra.mxu0 %v6421_v35  ;;  %v8694_v0 = vld [vmem:[#allocation44_spill] sm:$0xff]  ;;  %v8695_v35 = vld [vmem:[#allocation45_spill] sm:$0xff] }
 0x75f   :  { %2690 = vmatprep.subr.bf16.mxu1 %v6423_v13  ;;  %2731 = vmatprep.subr.bf16.mxu0 %v6425_v14  ;;  %v8696_v13 = vld [vmem:[#allocation30_spill] sm:$0xff]  ;;  %v8697_v14 = vld [vmem:[#allocation32_spill] sm:$0xff] }
 0x762   :  { %2691 = vmatpush1.bf16.msra.mxu1 %v6431_v15  ;;  %2732 = vmatpush1.bf16.msra.mxu0 %v6433_v16  ;;  %v8698_v15 = vld [vmem:[#allocation43_spill] sm:$0xff]  ;;  %v8699_v16 = vld [vmem:[#allocation46_spill] sm:$0xff] }
 0x763   :  { %2692 = vmatprep.subr.bf16.mxu1 %v6435_v55  ;;  %2733 = vmatprep.subr.bf16.mxu0 %v6437_v17  ;;  %v8700_v55 = vld [vmem:[#allocation47_spill] sm:$0xff]  ;;  %v8701_v17 = vld [vmem:[#allocation48_spill] sm:$0xff] }
 0x766   :  { %2693 = vmatpush1.bf16.msra.mxu1 %v6443_v18  ;;  %2734 = vmatpush1.bf16.msra.mxu0 %v6445_v19  ;;  %v8702_v18 = vld [vmem:[#allocation49_spill] sm:$0xff]  ;;  %v8703_v19 = vld [vmem:[#allocation50_spill] sm:$0xff] }
 0x767   :  { %2694 = vmatprep.subr.bf16.mxu1 %v6447_v20  ;;  %2735 = vmatprep.subr.bf16.mxu0 %v6449_v23  ;;  %v8704_v20 = vld [vmem:[#allocation51_spill] sm:$0xff]  ;;  %v8705_v23 = vld [vmem:[#allocation52_spill] sm:$0xff] }
 0x76a   :  { %2695 = vmatpush1.bf16.msra.mxu1 %v6455_v53  ;;  %2736 = vmatpush1.bf16.msra.mxu0 %v6457_v24  ;;  %v8706_v53 = vld [vmem:[#allocation53_spill] sm:$0xff]  ;;  %v8707_v24 = vld [vmem:[#allocation54_spill] sm:$0xff] }
 0x76b   :  { %2696 = vmatprep.subr.bf16.mxu1 %v6461_v25  ;;  %2737 = vmatprep.subr.bf16.mxu0 %v6463_v26  ;;  %v8708_v25 = vld [vmem:[#allocation55_spill] sm:$0xff]  ;;  %v8709_v26 = vld [vmem:[#allocation56_spill] sm:$0xff] }
 0x76e   :  { %2697 = vmatpush1.bf16.msra.mxu1 %v6467_v27  ;;  %2738 = vmatpush1.bf16.msra.mxu0 %v6469_v28  ;;  %v8710_v27 = vld [vmem:[#allocation57_spill] sm:$0xff]  ;;  %v8711_v28 = vld [vmem:[#allocation58_spill] sm:$0xff] }
 0x76f   :  { %2698 = vmatprep.subr.bf16.mxu1 %v6473_v29  ;;  %2739 = vmatprep.subr.bf16.mxu0 %v6475_v33  ;;  %v8712_v29 = vld [vmem:[#allocation59_spill] sm:$0xff]  ;;  %v8713_v33 = vld [vmem:[#allocation60_spill] sm:$0xff] }
 0x772   :  { %2699 = vmatpush1.bf16.msra.mxu1 %v6479_v34  ;;  %2740 = vmatpush1.bf16.msra.mxu0 %v6481_v37  ;;  %v8714_v34 = vld [vmem:[#allocation61_spill] sm:$0xff]  ;;  %v8715_v37 = vld [vmem:[#allocation62_spill] sm:$0xff] }
 0x773   :  { %2700 = vmatprep.subr.bf16.mxu1 %v8684_v1  ;;  %2741 = vmatprep.subr.bf16.mxu0 %v8685_v8  ;;  %v8717_v1 = vld [vmem:[#allocation64_spill] sm:$0xff] }
 0x776   :  { %2701 = vmatpush1.bf16.msra.mxu1 %v8686_v36  ;;  %2742 = vmatpush1.bf16.msra.mxu0 %v8687_v51 }
 0x777   :  { %2702 = vmatprep.subr.bf16.mxu1 %v8688_v52  ;;  %2743 = vmatprep.subr.bf16.mxu0 %v8689_v54 }
 0x77a   :  { %2703 = vmatpush1.bf16.msra.mxu1 %v8690_v30  ;;  %2744 = vmatpush1.bf16.msra.mxu0 %v8691_v43 }
 0x77b   :  { %2704 = vmatprep.subr.bf16.mxu1 %v8692_v5  ;;  %2745 = vmatprep.subr.bf16.mxu0 %v8693_v3 }
 0x77e   :  { %2705 = vmatpush1.bf16.msra.mxu1 %v8694_v0  ;;  %2746 = vmatpush1.bf16.msra.mxu0 %v8695_v35 }
 0x77f   :  { %2706 = vmatprep.subr.bf16.mxu1 %v8696_v13  ;;  %2747 = vmatprep.subr.bf16.mxu0 %v8697_v14 }
 0x782   :  { %2707 = vmatpush1.bf16.msra.mxu1 %v8698_v15  ;;  %2748 = vmatpush1.bf16.msra.mxu0 %v8699_v16  ;;  %v2485_v16 = vld [vmem:[#allocation2 + $0x3] ss:$8 sm:$0xf] }
 0x783   :  { %2708 = vmatprep.subr.bf16.mxu1 %v8700_v55  ;;  %2749 = vmatprep.subr.bf16.mxu0 %v8701_v17 }
 0x786   :  { %2709 = vmatpush1.bf16.msra.mxu1 %v8702_v18  ;;  %2750 = vmatpush1.bf16.msra.mxu0 %v8703_v19 }
 0x787   :  { %2710 = vmatprep.subr.bf16.mxu1 %v8704_v20  ;;  %2751 = vmatprep.subr.bf16.mxu0 %v8705_v23 }
 0x78a   :  { %2711 = vmatpush1.bf16.msra.mxu1 %v8706_v53  ;;  %2752 = vmatpush1.bf16.msra.mxu0 %v8707_v24 }
 0x78b   :  { %2712 = vmatprep.subr.bf16.mxu1 %v8708_v25  ;;  %2753 = vmatprep.subr.bf16.mxu0 %v8709_v26 }
 0x78e   :  { %2713 = vmatpush1.bf16.msra.mxu1 %v8710_v27  ;;  %2754 = vmatpush1.bf16.msra.mxu0 %v8711_v28 }
 0x78f   :  { %2714 = vmatprep.subr.bf16.mxu1 %v8712_v29  ;;  %2755 = vmatprep.subr.bf16.mxu0 %v8713_v33 }
 0x792   :  { %2715 = vmatpush1.bf16.msra.mxu1 %v8714_v34  ;;  %2756 = vmatpush1.bf16.msra.mxu0 %v8715_v37 }
 0x793   :  { %2766 = vmatprep.subr.bf16.mxu1 %v8716_v11  ;;  %2807 = vmatprep.subr.bf16.mxu0 %v8717_v1 }
 0x7e8   :  { %v2338_v8 = vpop.f32.mrb[28].mxu1  ;;  %v2379_v36 = vpop.f32.mrb[32].mxu0 }
 0x7e9   :  { %v2340_v51 = vpop.f32.mrb[29].mxu1  ;;  %v2381_v52 = vpop.f32.mrb[33].mxu0  ;;  %v2472_v17 = vrot.slane %v2338_v8, 1  ;;  %v2474_v18 = vrot.slane %v2379_v36, 1 }
 0x7ea   :  { %v2486_v54 = vcombine.low %v2338_v8, %v2340_v51  ;;  %v2487_v30 = vcombine.low %v2379_v36, %v2381_v52  ;;  %v2342_v43 = vpop.f32.mrb[30].mxu1  ;;  %v2383_v5 = vpop.f32.mrb[34].mxu0  ;;  %v2473_v20 = vrot.slane %v2340_v51, 1  ;;  %v2475_v23 = vrot.slane %v2381_v52, 1 }
 0x7eb   :  { %v2343_v3 = vpop.f32.mrb[31].mxu1  ;;  %v2384_v0 = vpop.f32.mrb[35].mxu0 }
 0x7ec   :  { %v2494_v35 = vrot.slane %v2486_v54, %v6283_v32  ;;  %v2501_v13 = vrot.slane %v2487_v30, %v6283_v32 }
 0x7ee   :  { %v2502_v14 = vcombine.low %v2494_v35, %v2501_v13 }
 0x7f0   :  { %v2509_v15 = vrot.slane %v2502_v14, %v6283_v32 }
 0x7f2   :  { %v2511_v55 = vadd.f32 %v2509_v15, %v2485_v16 }
 0x7f4   :  { %5233 = vtanh.f32 %v2511_v55 }
 0x7fe   :  { %v5234_v19 = vpop.eup %5233 }
 0x7ff   :  { %v2513_v30 = vmul.f32 0.5, %v5234_v19  ;;  %v2520_v0 = vrot.slane %v5234_v19, 3 }
 0x801   :  { %v2514_v51 = vadd.f32 0.5, %v2513_v30  ;;  %v8735_v30 = vld [vmem:[#allocation82_spill] sm:$0xff] }
 0x803   :  { %v2516_v52 = vrot.slane %v2514_v51, 1  ;;  %v2522_v14 = vmul.f32 %v2520_v0, %v2514_v51  ;;  %v8743_v0 = vld [vmem:[#allocation90_spill] sm:$0xff] }
 0x805   :  { %v2518_v3 = vmul.f32 %v2516_v52, %v6595_v2  ;;  %v8739_v52 = vld [vmem:[#allocation86_spill] sm:$0xff] }
 0x828   :  { %v2420_v53 = vpop.f32.mrb[32].mxu1  ;;  %v2461_v24 = vpop.f32.mrb[36].mxu0 }
 0x829   :  { %v2480_v25 = vadd.f32 %v2472_v17, %v2420_v53  ;;  %v2482_v26 = vadd.f32 %v2474_v18, %v2461_v24  ;;  %v2422_v27 = vpop.f32.mrb[33].mxu1  ;;  %v2463_v28 = vpop.f32.mrb[37].mxu0  ;;  %v6872_v17 = vadd.f32 %v2522_v14, %v2518_v3  ;;  %v8742_v3 = vld [vmem:[#allocation89_spill] sm:$0xff] }
 0x82a   :  { %v2481_v29 = vadd.f32 %v2473_v20, %v2422_v27  ;;  %v2483_v33 = vadd.f32 %v2475_v23, %v2463_v28  ;;  %v2424_v34 = vpop.f32.mrb[34].mxu1  ;;  %v2465_v37 = vpop.f32.mrb[38].mxu0  ;;  %v8746_v14 = vld [vmem:[#allocation93_spill] sm:$0xff] }
 0x82b   :  { %v2528_v11 = vadd.f32 %v2480_v25, %v6292_v58  ;;  %v2425_v1 = vpop.f32.mrb[35].mxu1  ;;  %v2466_v54 = vpop.f32.mrb[39].mxu0  ;;  %v2530_v43 = vadd.f32 %v2482_v26, %v6307_v21  ;;  %v2525_v25 = vrot.slane %v2514_v51, 2  ;;  %v8738_v51 = vld [vmem:[#allocation85_spill] sm:$0xff] }
 0x82c   :  { %v2529_v8 = vadd.f32 %v2481_v29, %v6296_v7  ;;  %v2531_v36 = vadd.f32 %v2483_v33, %v6300_v61  ;;  %v8733_v1 = vld [vmem:[#allocation80_spill] sm:$0xff]  ;;  %v8734_v54 = vld [vmem:[#allocation81_spill] sm:$0xff] }
 0x82d   :  { %5235 = vtanh.f32 %v2528_v11 }
 0x82e   :  { %5237 = vtanh.f32 %v2529_v8  ;;  %v8736_v8 = vld [vmem:[#allocation83_spill] sm:$0xff] }
 0x82f   :  { %5239 = vtanh.f32 %v2531_v36  ;;  %v8737_v36 = vld [vmem:[#allocation84_spill] sm:$0xff] }
 0x830   :  { %5241 = vtanh.f32 %v2530_v43  ;;  %v8740_v43 = vld [vmem:[#allocation87_spill] sm:$0xff] }
 0x831   :  { %5243 = vtanh.f32 %v6872_v17 }
 0x837   :  { %v5236_v5 = vpop.eup %5235 }
 0x838   :  { %v2536_v35 = vmul.f32 0.5, %v5236_v5  ;;  %v5238_v13 = vpop.eup %5237  ;;  %v8741_v5 = vld [vmem:[#allocation88_spill] sm:$0xff] }
 0x839   :  { %v2537_v16 = vmul.f32 0.5, %v5238_v13  ;;  %v5240_v55 = vpop.eup %5239  ;;  %v8745_v13 = vld [vmem:[#allocation92_spill] sm:$0xff] }
 0x83a   :  { %v2539_v15 = vadd.f32 0.5, %v2536_v35  ;;  %v5242_v2 = vpop.eup %5241  ;;  %v8744_v35 = vld [vmem:[#allocation91_spill] sm:$0xff] }
 0x83b   :  { %v2540_v18 = vadd.f32 0.5, %v2537_v16  ;;  %v2538_v19 = vmul.f32 0.5, %v5242_v2  ;;  %v5244_v24 = vpop.eup %5243  ;;  %v8748_v16 = vld [vmem:[#allocation95_spill] sm:$0xff]  ;;  %v8753_v2 = vld [vmem:[#allocation100_spill] sm:$0xff] }
 0x83c   :  { %v2543_v20 = vmul.f32 %v5240_v55, %v2539_v15  ;;  %v2527_v28 = vmul.f32 %v5244_v24, %v2525_v25  ;;  %v8747_v15 = vld [vmem:[#allocation94_spill] sm:$0xff]  ;;  %v8749_v55 = vld [vmem:[#allocation96_spill] sm:$0xff]  ;;  %v8756_v25 = vld [vmem:[#allocation103_spill] sm:$0xff] }
 0x83d   :  { %v2542_v23 = vmul.f32 %v2540_v18, %v6599_v22  ;;  %v2541_v26 = vadd.f32 0.5, %v2538_v19  ;;  %v8750_v18 = vld [vmem:[#allocation97_spill] sm:$0xff]  ;;  %v8755_v24 = vld [vmem:[#allocation102_spill] sm:$0xff] }
 0x83e   :  { %v2548_v34 = vpack.c.bf16 %v2527_v28, %v2527_v28  ;;  %v8754_v19 = vld [vmem:[#allocation101_spill] sm:$0xff]  ;;  %v6981_v28 = vld [vmem:[#allocation3 + $0x80] sm:$0xff] }
 0x83f   :  { %v6876_v53 = vadd.f32 %v2543_v20, %v2542_v23  ;;  %v8751_v20 = vld [vmem:[#allocation98_spill] sm:$0xff]  ;;  %v8752_v23 = vld [vmem:[#allocation99_spill] sm:$0xff] }
 0x840   :  { %v6883_v11 = vsel %vm6008_vm3, %v2548_v34, 0  ;;  %v6987_v34 = vld [vmem:[#allocation3 + $0xd8] sm:$0xff] }
 0x841   :  { %5245 = vtanh.f32 %v6876_v53 }
 0x84b   :  { %v5246_v27 = vpop.eup %5245 }
 0x84c   :  { %v2546_v29 = vmul.f32 %v5246_v27, %v2541_v26  ;;  %v6953_v26 = vld [vmem:[#allocation3 + $0x18] sm:$0xff] }
 0x84d   :  { %v6975_v27 = vld [vmem:[#allocation3 + $0x98] sm:$0xff] }
 0x84e   :  { %2547 = vst [vmem:[#allocation16 + $0x2] sm:$0x1] %v2546_v29  ;;  %v2549_v33 = vpack.c.bf16 %v2546_v29, %v2546_v29  ;;  %v6983_v29 = vld [vmem:[#allocation3 + $0x90] sm:$0xff] }
 0x850   :  { %v2551_v37 = vshll.u32 %v2549_v33, 16  ;;  %v6985_v33 = vld [vmem:[#allocation3 + $0xc8] sm:$0xff] }
 0x852   :  { %v2555_v22 = vsel %vm6008_vm3, 0, %v2551_v37  ;;  %v6993_v37 = vld [vmem:[#allocation3 + $0xc0] sm:$0xff] }
 0x853   :  { %2716 = vmatprep.mubr.bf16.mxu1 %v2555_v22  ;;  %2757 = vmatprep.mubr.bf16.mxu0 %v2555_v22 }
 0x854   :  { %2717 = vmatmul.mubr.bf16.vlgmr.msra.gmra.mrb[36].mxu1 %v6883_v11  ;;  %2758 = vmatmul.mubr.bf16.vlgmr.msra.gmra.mrb[40].mxu0 %v6883_v11 }
 0x855   :  { %2767 = vmatpush1.bf16.msra.mxu1 %v6604_v40  ;;  %2808 = vmatpush1.bf16.msra.mxu0 %v6606_v41  ;;  %v8718_v40 = vld [vmem:[#allocation65_spill] sm:$0xff]  ;;  %v8719_v41 = vld [vmem:[#allocation66_spill] sm:$0xff] }
 0x856   :  { %2798 = vmatprep.mubr.bf16.mxu1 %v2555_v22  ;;  %2839 = vmatprep.mubr.bf16.mxu0 %v2555_v22  ;;  %v6995_v22 = vld [vmem:[#allocation3 + $0xd0] sm:$0xff] }
 0x857   :  { %2768 = vmatprep.subr.bf16.mxu1 %v6614_v57  ;;  %2809 = vmatprep.subr.bf16.mxu0 %v6616_v60  ;;  %v8720_v57 = vld [vmem:[#allocation67_spill] sm:$0xff]  ;;  %v8721_v60 = vld [vmem:[#allocation68_spill] sm:$0xff] }
 0x859   :  { %2769 = vmatpush1.bf16.msra.mxu1 %v6620_v4  ;;  %2810 = vmatpush1.bf16.msra.mxu0 %v6622_v59  ;;  %v8722_v4 = vld [vmem:[#allocation69_spill] sm:$0xff]  ;;  %v8723_v59 = vld [vmem:[#allocation70_spill] sm:$0xff] }
 0x85a   :  { %2770 = vmatprep.subr.bf16.mxu1 %v6626_v12  ;;  %2811 = vmatprep.subr.bf16.mxu0 %v6628_v56  ;;  %v8724_v12 = vld [vmem:[#allocation71_spill] sm:$0xff]  ;;  %v8725_v56 = vld [vmem:[#allocation72_spill] sm:$0xff] }
 0x85d   :  { %2771 = vmatpush1.bf16.msra.mxu1 %v6634_v38  ;;  %2812 = vmatpush1.bf16.msra.mxu0 %v6636_v62  ;;  %v8726_v38 = vld [vmem:[#allocation73_spill] sm:$0xff]  ;;  %v8727_v62 = vld [vmem:[#allocation74_spill] sm:$0xff] }
 0x85e   :  { %2772 = vmatprep.subr.bf16.mxu1 %v6638_v50  ;;  %2813 = vmatprep.subr.bf16.mxu0 %v6640_v39  ;;  %v8728_v50 = vld [vmem:[#allocation75_spill] sm:$0xff]  ;;  %v8729_v39 = vld [vmem:[#allocation76_spill] sm:$0xff] }
 0x861   :  { %2773 = vmatpush1.bf16.msra.mxu1 %v6646_v45  ;;  %2814 = vmatpush1.bf16.msra.mxu0 %v6648_v49  ;;  %v8730_v45 = vld [vmem:[#allocation77_spill] sm:$0xff]  ;;  %v8731_v49 = vld [vmem:[#allocation78_spill] sm:$0xff] }
 0x862   :  { %2774 = vmatprep.subr.bf16.mxu1 %v6650_v9  ;;  %2815 = vmatprep.subr.bf16.mxu0 %v8718_v40  ;;  %v8732_v9 = vld [vmem:[#allocation79_spill] sm:$0xff]  ;;  %v6999_v40 = vld [vmem:[#allocation3 + $0x118] sm:$0xff] }
 0x865   :  { %2775 = vmatpush1.bf16.msra.mxu1 %v8719_v41  ;;  %2816 = vmatpush1.bf16.msra.mxu0 %v8720_v57  ;;  %v7005_v41 = vld [vmem:[#allocation3 + $0x100] sm:$0xff]  ;;  %v7007_v57 = vld [vmem:[#allocation3 + $0x110] sm:$0xff] }
 0x866   :  { %2776 = vmatprep.subr.bf16.mxu1 %v8721_v60  ;;  %2817 = vmatprep.subr.bf16.mxu0 %v8722_v4  ;;  %v7009_v60 = vld [vmem:[#allocation3 + $0x148] sm:$0xff]  ;;  %v7011_v4 = vld [vmem:[#allocation3 + $0x158] sm:$0xff] }
 0x869   :  { %2777 = vmatpush1.bf16.msra.mxu1 %v8723_v59  ;;  %2818 = vmatpush1.bf16.msra.mxu0 %v8724_v12  ;;  %v7017_v59 = vld [vmem:[#allocation3 + $0x140] sm:$0xff]  ;;  %v7019_v12 = vld [vmem:[#allocation3 + $0x150] sm:$0xff] }
 0x86a   :  { %2778 = vmatprep.subr.bf16.mxu1 %v8725_v56  ;;  %2819 = vmatprep.subr.bf16.mxu0 %v8726_v38  ;;  %v7023_v56 = vld [vmem:[#allocation3 + $0x188] sm:$0xff]  ;;  %v7025_v38 = vld [vmem:[#allocation3 + $0x198] sm:$0xff] }
 0x86d   :  { %2779 = vmatpush1.bf16.msra.mxu1 %v8727_v62  ;;  %2820 = vmatpush1.bf16.msra.mxu0 %v8728_v50  ;;  %v7029_v62 = vld [vmem:[#allocation3 + $0x180] sm:$0xff]  ;;  %v7031_v50 = vld [vmem:[#allocation3 + $0x190] sm:$0xff] }
 0x86e   :  { %2780 = vmatprep.subr.bf16.mxu1 %v8729_v39  ;;  %2821 = vmatprep.subr.bf16.mxu0 %v8730_v45  ;;  %v7035_v39 = vld [vmem:[#allocation3 + $0x1c8] sm:$0xff]  ;;  %v7037_v45 = vld [vmem:[#allocation3 + $0x1d8] sm:$0xff] }
 0x871   :  { %2781 = vmatpush1.bf16.msra.mxu1 %v8731_v49  ;;  %2822 = vmatpush1.bf16.msra.mxu0 %v8732_v9  ;;  %v7041_v49 = vld [vmem:[#allocation3 + $0x1c0] sm:$0xff]  ;;  %v7043_v9 = vld [vmem:[#allocation3 + $0x1d0] sm:$0xff] }
 0x872   :  { %2782 = vmatprep.subr.bf16.mxu1 %v8733_v1  ;;  %2823 = vmatprep.subr.bf16.mxu0 %v8734_v54  ;;  %v7047_v1 = vld [vmem:[#allocation3 + $0x208] sm:$0xff]  ;;  %v7049_v54 = vld [vmem:[#allocation3 + $0x218] sm:$0xff] }
 0x873   :  { %8757 = vst [vmem:[#allocation33_spill] sm:$0xff] %v7047_v1  ;;  %8758 = vst [vmem:[#allocation34_spill] sm:$0xff] %v7049_v54 }
 0x875   :  { %2783 = vmatpush1.bf16.msra.mxu1 %v8735_v30  ;;  %2824 = vmatpush1.bf16.msra.mxu0 %v8736_v8  ;;  %v7053_v30 = vld [vmem:[#allocation3 + $0x200] sm:$0xff]  ;;  %v7055_v8 = vld [vmem:[#allocation3 + $0x210] sm:$0xff] }
 0x876   :  { %2784 = vmatprep.subr.bf16.mxu1 %v8737_v36  ;;  %2825 = vmatprep.subr.bf16.mxu0 %v8738_v51  ;;  %8759 = vst [vmem:[#allocation35_spill] sm:$0xff] %v7053_v30  ;;  %8760 = vst [vmem:[#allocation36_spill] sm:$0xff] %v7055_v8  ;;  %v7059_v36 = vld [vmem:[#allocation3 + $0x248] sm:$0xff]  ;;  %v7061_v51 = vld [vmem:[#allocation3 + $0x258] sm:$0xff] }
 0x877   :  { %8761 = vst [vmem:[#allocation37_spill] sm:$0xff] %v7059_v36  ;;  %8762 = vst [vmem:[#allocation38_spill] sm:$0xff] %v7061_v51 }
 0x879   :  { %2785 = vmatpush1.bf16.msra.mxu1 %v8739_v52  ;;  %2826 = vmatpush1.bf16.msra.mxu0 %v8740_v43  ;;  %v7065_v52 = vld [vmem:[#allocation3 + $0x240] sm:$0xff]  ;;  %v7067_v43 = vld [vmem:[#allocation3 + $0x250] sm:$0xff] }
 0x87a   :  { %2786 = vmatprep.subr.bf16.mxu1 %v8741_v5  ;;  %2827 = vmatprep.subr.bf16.mxu0 %v8742_v3  ;;  %8763 = vst [vmem:[#allocation39_spill] sm:$0xff] %v7065_v52  ;;  %8764 = vst [vmem:[#allocation40_spill] sm:$0xff] %v7067_v43  ;;  %v7071_v5 = vld [vmem:[#allocation3 + $0x288] sm:$0xff]  ;;  %v7073_v3 = vld [vmem:[#allocation3 + $0x298] sm:$0xff] }
 0x87b   :  { %8765 = vst [vmem:[#allocation41_spill] sm:$0xff] %v7071_v5  ;;  %8766 = vst [vmem:[#allocation42_spill] sm:$0xff] %v7073_v3 }
 0x87d   :  { %2787 = vmatpush1.bf16.msra.mxu1 %v8743_v0  ;;  %2828 = vmatpush1.bf16.msra.mxu0 %v8744_v35  ;;  %v7077_v0 = vld [vmem:[#allocation3 + $0x280] sm:$0xff]  ;;  %v7079_v35 = vld [vmem:[#allocation3 + $0x290] sm:$0xff] }
 0x87e   :  { %2788 = vmatprep.subr.bf16.mxu1 %v8745_v13  ;;  %2829 = vmatprep.subr.bf16.mxu0 %v8746_v14  ;;  %8767 = vst [vmem:[#allocation44_spill] sm:$0xff] %v7077_v0  ;;  %8768 = vst [vmem:[#allocation45_spill] sm:$0xff] %v7079_v35  ;;  %v7083_v13 = vld [vmem:[#allocation3 + $0x2c8] sm:$0xff]  ;;  %v7085_v14 = vld [vmem:[#allocation3 + $0x2d8] sm:$0xff] }
 0x87f   :  { %8769 = vst [vmem:[#allocation30_spill] sm:$0xff] %v7083_v13  ;;  %8770 = vst [vmem:[#allocation32_spill] sm:$0xff] %v7085_v14 }
 0x881   :  { %2789 = vmatpush1.bf16.msra.mxu1 %v8747_v15  ;;  %2830 = vmatpush1.bf16.msra.mxu0 %v8748_v16  ;;  %v7089_v15 = vld [vmem:[#allocation3 + $0x2c0] sm:$0xff]  ;;  %v7091_v16 = vld [vmem:[#allocation3 + $0x2d0] sm:$0xff] }
 0x882   :  { %2790 = vmatprep.subr.bf16.mxu1 %v8749_v55  ;;  %2831 = vmatprep.subr.bf16.mxu0 %v8750_v18  ;;  %8771 = vst [vmem:[#allocation43_spill] sm:$0xff] %v7089_v15  ;;  %8772 = vst [vmem:[#allocation46_spill] sm:$0xff] %v7091_v16  ;;  %v7095_v55 = vld [vmem:[#allocation3 + $0x308] sm:$0xff]  ;;  %v7097_v18 = vld [vmem:[#allocation3 + $0x318] sm:$0xff] }
 0x883   :  { %8773 = vst [vmem:[#allocation47_spill] sm:$0xff] %v7095_v55  ;;  %8774 = vst [vmem:[#allocation48_spill] sm:$0xff] %v7097_v18 }
 0x885   :  { %2791 = vmatpush1.bf16.msra.mxu1 %v8751_v20  ;;  %2832 = vmatpush1.bf16.msra.mxu0 %v8752_v23  ;;  %v7101_v20 = vld [vmem:[#allocation3 + $0x300] sm:$0xff]  ;;  %v7103_v23 = vld [vmem:[#allocation3 + $0x310] sm:$0xff] }
 0x886   :  { %2792 = vmatprep.subr.bf16.mxu1 %v8753_v2  ;;  %2833 = vmatprep.subr.bf16.mxu0 %v8754_v19  ;;  %8775 = vst [vmem:[#allocation49_spill] sm:$0xff] %v7101_v20  ;;  %8776 = vst [vmem:[#allocation50_spill] sm:$0xff] %v7103_v23  ;;  %v7105_v2 = vld [vmem:[#allocation3 + $0x348] sm:$0xff]  ;;  %v7107_v19 = vld [vmem:[#allocation3 + $0x358] sm:$0xff] }
 0x887   :  { %8777 = vst [vmem:[#allocation51_spill] sm:$0xff] %v7105_v2  ;;  %8778 = vst [vmem:[#allocation52_spill] sm:$0xff] %v7107_v19 }
 0x889   :  { %2793 = vmatpush1.bf16.msra.mxu1 %v6766_v46  ;;  %2834 = vmatpush1.bf16.msra.mxu0 %v8755_v24  ;;  %v6951_v46 = vld [vmem:[#allocation3 + $0x8] sm:$0xff]  ;;  %v7113_v24 = vld [vmem:[#allocation3 + $0x340] sm:$0xff] }
 0x88a   :  { %2794 = vmatprep.subr.bf16.mxu1 %v8756_v25  ;;  %2835 = vmatprep.subr.bf16.mxu0 %v6772_v48  ;;  %v6955_v48 = vld [vmem:[#allocation3] sm:$0xff]  ;;  %8779 = vst [vmem:[#allocation53_spill] sm:$0xff] %v7113_v24  ;;  %v7115_v25 = vld [vmem:[#allocation3 + $0x350] sm:$0xff] }
 0x88b   :  { %8780 = vst [vmem:[#allocation54_spill] sm:$0xff] %v7115_v25 }
 0x88d   :  { %2795 = vmatpush1.bf16.msra.mxu1 %v6778_v6  ;;  %2836 = vmatpush1.bf16.msra.mxu0 %v6780_v10  ;;  %v6959_v6 = vld [vmem:[#allocation3 + $0x10] sm:$0xff]  ;;  %v6963_v10 = vld [vmem:[#allocation3 + $0x58] sm:$0xff] }
 0x88e   :  { %2796 = vmatprep.subr.bf16.mxu1 %v6782_v31  ;;  %2837 = vmatprep.subr.bf16.mxu0 %v6784_v47  ;;  %v6961_v47 = vld [vmem:[#allocation3 + $0x48] sm:$0xff]  ;;  %v6969_v31 = vld [vmem:[#allocation3 + $0x40] sm:$0xff] }
 0x891   :  { %2797 = vmatpush1.bf16.msra.mxu1 %v6790_v44  ;;  %2838 = vmatpush1.bf16.msra.mxu0 %v6792_v42  ;;  %v6971_v44 = vld [vmem:[#allocation3 + $0x50] sm:$0xff]  ;;  %v6973_v42 = vld [vmem:[#allocation3 + $0x88] sm:$0xff] }
 0x892   :  { %3064 = vmatprep.subr.bf16.mxu1 %v6951_v46  ;;  %3105 = vmatprep.subr.bf16.mxu0 %v6953_v26 }
 0x894   :  { %2799 = vmatmul.mubr.bf16.vlgmr.msra.gmra.mrb[40].mxu1 %v6883_v11  ;;  %2840 = vmatmul.mubr.bf16.vlgmr.msra.gmra.mrb[44].mxu0 %v6883_v11  ;;  %v6997_v11 = vld [vmem:[#allocation3 + $0x108] sm:$0xff] }
 0x895   :  { %3065 = vmatpush1.bf16.msra.mxu1 %v6955_v48  ;;  %3106 = vmatpush1.bf16.msra.mxu0 %v6959_v6 }
 0x896   :  { %3066 = vmatprep.subr.bf16.mxu1 %v6961_v47  ;;  %3107 = vmatprep.subr.bf16.mxu0 %v6963_v10 }
 0x899   :  { %3067 = vmatpush1.bf16.msra.mxu1 %v6969_v31  ;;  %3108 = vmatpush1.bf16.msra.mxu0 %v6971_v44 }
 0x89a   :  { %3068 = vmatprep.subr.bf16.mxu1 %v6973_v42  ;;  %3109 = vmatprep.subr.bf16.mxu0 %v6975_v27 }
 0x89d   :  { %3069 = vmatpush1.bf16.msra.mxu1 %v6981_v28  ;;  %3110 = vmatpush1.bf16.msra.mxu0 %v6983_v29 }
 0x89e   :  { %3070 = vmatprep.subr.bf16.mxu1 %v6985_v33  ;;  %3111 = vmatprep.subr.bf16.mxu0 %v6987_v34 }
 0x8a1   :  { %3071 = vmatpush1.bf16.msra.mxu1 %v6993_v37  ;;  %3112 = vmatpush1.bf16.msra.mxu0 %v6995_v22 }
 0x8a2   :  { %3072 = vmatprep.subr.bf16.mxu1 %v6997_v11  ;;  %3113 = vmatprep.subr.bf16.mxu0 %v6999_v40 }
 0x8a5   :  { %3073 = vmatpush1.bf16.msra.mxu1 %v7005_v41  ;;  %3114 = vmatpush1.bf16.msra.mxu0 %v7007_v57 }
 0x8a6   :  { %3074 = vmatprep.subr.bf16.mxu1 %v7009_v60  ;;  %3115 = vmatprep.subr.bf16.mxu0 %v7011_v4 }
 0x8a9   :  { %3075 = vmatpush1.bf16.msra.mxu1 %v7017_v59  ;;  %3116 = vmatpush1.bf16.msra.mxu0 %v7019_v12 }
 0x8aa   :  { %3076 = vmatprep.subr.bf16.mxu1 %v7023_v56  ;;  %3117 = vmatprep.subr.bf16.mxu0 %v7025_v38 }
 0x8ad   :  { %3077 = vmatpush1.bf16.msra.mxu1 %v7029_v62  ;;  %3118 = vmatpush1.bf16.msra.mxu0 %v7031_v50 }
 0x8ae   :  { %3078 = vmatprep.subr.bf16.mxu1 %v7035_v39  ;;  %3119 = vmatprep.subr.bf16.mxu0 %v7037_v45 }
 0x8b1   :  { %3079 = vmatpush1.bf16.msra.mxu1 %v7041_v49  ;;  %3120 = vmatpush1.bf16.msra.mxu0 %v7043_v9 }
 0x8b2   :  { %3080 = vmatprep.subr.bf16.mxu1 %v7047_v1  ;;  %3121 = vmatprep.subr.bf16.mxu0 %v7049_v54 }
 0x8b5   :  { %3081 = vmatpush1.bf16.msra.mxu1 %v7053_v30  ;;  %3122 = vmatpush1.bf16.msra.mxu0 %v7055_v8 }
 0x8b6   :  { %3082 = vmatprep.subr.bf16.mxu1 %v7059_v36  ;;  %3123 = vmatprep.subr.bf16.mxu0 %v7061_v51 }
 0x8b9   :  { %3083 = vmatpush1.bf16.msra.mxu1 %v7065_v52  ;;  %3124 = vmatpush1.bf16.msra.mxu0 %v7067_v43 }
 0x8ba   :  { %3084 = vmatprep.subr.bf16.mxu1 %v7071_v5  ;;  %3125 = vmatprep.subr.bf16.mxu0 %v7073_v3 }
 0x8bd   :  { %3085 = vmatpush1.bf16.msra.mxu1 %v7077_v0  ;;  %3126 = vmatpush1.bf16.msra.mxu0 %v7079_v35 }
 0x8be   :  { %3086 = vmatprep.subr.bf16.mxu1 %v7083_v13  ;;  %3127 = vmatprep.subr.bf16.mxu0 %v7085_v14 }
 0x8c1   :  { %3087 = vmatpush1.bf16.msra.mxu1 %v7089_v15  ;;  %3128 = vmatpush1.bf16.msra.mxu0 %v7091_v16 }
 0x8c2   :  { %3088 = vmatprep.subr.bf16.mxu1 %v7095_v55  ;;  %3129 = vmatprep.subr.bf16.mxu0 %v7097_v18  ;;  %v7117_v18 = vld [vmem:[#allocation3 + $0x388] sm:$0xff]  ;;  %v7119_v55 = vld [vmem:[#allocation3 + $0x398] sm:$0xff] }
 0x8c3   :  { %8781 = vst [vmem:[#allocation55_spill] sm:$0xff] %v7117_v18  ;;  %8782 = vst [vmem:[#allocation56_spill] sm:$0xff] %v7119_v55 }
 0x8c5   :  { %3089 = vmatpush1.bf16.msra.mxu1 %v7101_v20  ;;  %3130 = vmatpush1.bf16.msra.mxu0 %v7103_v23  ;;  %v7125_v23 = vld [vmem:[#allocation3 + $0x380] sm:$0xff]  ;;  %v7131_v20 = vld [vmem:[#allocation3 + $0x3d8] sm:$0xff] }
 0x8c6   :  { %3090 = vmatprep.subr.bf16.mxu1 %v7105_v2  ;;  %3131 = vmatprep.subr.bf16.mxu0 %v7107_v19  ;;  %8783 = vst [vmem:[#allocation57_spill] sm:$0xff] %v7125_v23  ;;  %v7127_v2 = vld [vmem:[#allocation3 + $0x390] sm:$0xff]  ;;  %v7129_v19 = vld [vmem:[#allocation3 + $0x3c8] sm:$0xff]  ;;  %8786 = vst [vmem:[#allocation60_spill] sm:$0xff] %v7131_v20 }
 0x8c7   :  { %8784 = vst [vmem:[#allocation58_spill] sm:$0xff] %v7127_v2  ;;  %8785 = vst [vmem:[#allocation59_spill] sm:$0xff] %v7129_v19 }
 0x8c9   :  { %3091 = vmatpush1.bf16.msra.mxu1 %v7113_v24  ;;  %3132 = vmatpush1.bf16.msra.mxu0 %v7115_v25  ;;  %v7137_v25 = vld [vmem:[#allocation3 + $0x3c0] sm:$0xff]  ;;  %v7145_v24 = vld [vmem:[#allocation3 + $0x38] sm:$0xff] }
 0x8ca   :  { %3092 = vmatprep.subr.bf16.mxu1 %v7117_v18  ;;  %3133 = vmatprep.subr.bf16.mxu0 %v7119_v55  ;;  %8787 = vst [vmem:[#allocation61_spill] sm:$0xff] %v7137_v25  ;;  %v7139_v18 = vld [vmem:[#allocation3 + $0x3d0] sm:$0xff]  ;;  %v7143_v55 = vld [vmem:[#allocation3 + $0x28] sm:$0xff]  ;;  %8790 = vst [vmem:[#allocation64_spill] sm:$0xff] %v7145_v24 }
 0x8cb   :  { %8788 = vst [vmem:[#allocation62_spill] sm:$0xff] %v7139_v18  ;;  %8789 = vst [vmem:[#allocation63_spill] sm:$0xff] %v7143_v55 }
 0x8cd   :  { %3093 = vmatpush1.bf16.msra.mxu1 %v7125_v23  ;;  %3134 = vmatpush1.bf16.msra.mxu0 %v7127_v2 }
 0x8ce   :  { %3094 = vmatprep.subr.bf16.mxu1 %v7129_v19  ;;  %3135 = vmatprep.subr.bf16.mxu0 %v7131_v20 }
 0x8d1   :  { %3095 = vmatpush1.bf16.msra.mxu1 %v7137_v25  ;;  %3136 = vmatpush1.bf16.msra.mxu0 %v7139_v18 }
 0x8d2   :  { %3146 = vmatprep.subr.bf16.mxu1 %v7143_v55  ;;  %3187 = vmatprep.subr.bf16.mxu0 %v7145_v24  ;;  %v2865_v55 = vld [vmem:[#allocation2 + $0x4] ss:$8 sm:$0xf] }
 0x927   :  { %v2718_v2 = vpop.f32.mrb[36].mxu1  ;;  %v2759_v19 = vpop.f32.mrb[40].mxu0 }
 0x928   :  { %v2720_v23 = vpop.f32.mrb[37].mxu1  ;;  %v2761_v20 = vpop.f32.mrb[41].mxu0  ;;  %v2852_v24 = vrot.slane %v2718_v2, 1  ;;  %v2854_v52 = vrot.slane %v2759_v19, 1 }
 0x929   :  { %v2866_v16 = vcombine.low %v2718_v2, %v2720_v23  ;;  %v2867_v15 = vcombine.low %v2759_v19, %v2761_v20  ;;  %v2722_v14 = vpop.f32.mrb[38].mxu1  ;;  %v2763_v13 = vpop.f32.mrb[42].mxu0  ;;  %v2853_v36 = vrot.slane %v2720_v23, 1  ;;  %v2855_v8 = vrot.slane %v2761_v20, 1 }
 0x92a   :  { %v2723_v35 = vpop.f32.mrb[39].mxu1  ;;  %v2764_v25 = vpop.f32.mrb[43].mxu0 }
 0x92b   :  { %v2874_v18 = vrot.slane %v2866_v16, %v6283_v32  ;;  %v2881_v0 = vrot.slane %v2867_v15, %v6283_v32 }
 0x92d   :  { %v2882_v3 = vcombine.low %v2874_v18, %v2881_v0 }
 0x92f   :  { %v2889_v5 = vrot.slane %v2882_v3, %v6283_v32 }
 0x931   :  { %v2891_v43 = vadd.f32 %v2889_v5, %v2865_v55 }
 0x933   :  { %5247 = vtanh.f32 %v2891_v43 }
 0x93d   :  { %v5248_v51 = vpop.eup %5247 }
 0x93e   :  { %v2893_v43 = vmul.f32 0.5, %v5248_v51 }
 0x940   :  { %v2894_v23 = vadd.f32 0.5, %v2893_v43 }
 0x967   :  { %v2800_v30 = vpop.f32.mrb[40].mxu1  ;;  %v2841_v14 = vpop.f32.mrb[44].mxu0 }
 0x968   :  { %v2860_v13 = vadd.f32 %v2852_v24, %v2800_v30  ;;  %v2862_v35 = vadd.f32 %v2854_v52, %v2841_v14  ;;  %v2802_v25 = vpop.f32.mrb[41].mxu1  ;;  %v2843_v54 = vpop.f32.mrb[45].mxu0  ;;  %v2896_v30 = vrot.slane %v2894_v23, 1 }
 0x969   :  { %v2861_v16 = vadd.f32 %v2853_v36, %v2802_v25  ;;  %v2863_v1 = vadd.f32 %v2855_v8, %v2843_v54  ;;  %v2804_v15 = vpop.f32.mrb[42].mxu1  ;;  %v2845_v0 = vpop.f32.mrb[46].mxu0  ;;  %v2900_v8 = vrot.slane %v5248_v51, 3 }
 0x96a   :  { %v2908_v3 = vadd.f32 %v2860_v13, %v6292_v58  ;;  %v2805_v18 = vpop.f32.mrb[43].mxu1  ;;  %v2846_v5 = vpop.f32.mrb[47].mxu0  ;;  %v2910_v52 = vadd.f32 %v2862_v35, %v6307_v21  ;;  %v2898_v54 = vmul.f32 %v2896_v30, %v6872_v17 }
 0x96b   :  { %v2909_v55 = vadd.f32 %v2861_v16, %v6296_v7  ;;  %v2911_v20 = vadd.f32 %v2863_v1, %v6300_v61  ;;  %v2902_v24 = vmul.f32 %v2900_v8, %v2894_v23  ;;  %v2905_v18 = vrot.slane %v2894_v23, 2  ;;  %v7168_v8 = vld [vmem:[#allocation3 + $0x30] sm:$0xff] }
 0x96c   :  { %5249 = vtanh.f32 %v2908_v3 }
 0x96d   :  { %5251 = vtanh.f32 %v2909_v55  ;;  %v7157_v16 = vadd.f32 %v2902_v24, %v2898_v54  ;;  %v7166_v54 = vld [vmem:[#allocation3 + $0x20] sm:$0xff] }
 0x96e   :  { %5253 = vtanh.f32 %v2911_v20  ;;  %v7182_v24 = vld [vmem:[#allocation3 + $0x60] sm:$0xff] }
 0x96f   :  { %5255 = vtanh.f32 %v2910_v52 }
 0x970   :  { %5257 = vtanh.f32 %v7157_v16 }
 0x976   :  { %v5250_v36 = vpop.eup %5249 }
 0x977   :  { %v2916_v2 = vmul.f32 0.5, %v5250_v36  ;;  %v5252_v19 = vpop.eup %5251 }
 0x978   :  { %v2917_v13 = vmul.f32 0.5, %v5252_v19  ;;  %v5254_v25 = vpop.eup %5253  ;;  %v7178_v19 = vld [vmem:[#allocation3 + $0x78] sm:$0xff] }
 0x979   :  { %v2919_v14 = vadd.f32 0.5, %v2916_v2  ;;  %v5256_v17 = vpop.eup %5255  ;;  %v7176_v2 = vld [vmem:[#allocation3 + $0x68] sm:$0xff] }
 0x97a   :  { %v2920_v1 = vadd.f32 0.5, %v2917_v13  ;;  %v2918_v51 = vmul.f32 0.5, %v5256_v17  ;;  %v5258_v3 = vpop.eup %5257  ;;  %v7188_v13 = vld [vmem:[#allocation3 + $0xa8] sm:$0xff]  ;;  %v7202_v17 = vld [vmem:[#allocation3 + $0xf8] sm:$0xff] }
 0x97b   :  { %v2923_v15 = vmul.f32 %v5254_v25, %v2919_v14  ;;  %v2907_v55 = vmul.f32 %v5258_v3, %v2905_v18  ;;  %v7184_v14 = vld [vmem:[#allocation3 + $0x70] sm:$0xff]  ;;  %v7190_v25 = vld [vmem:[#allocation3 + $0xb8] sm:$0xff]  ;;  %v7212_v18 = vld [vmem:[#allocation3 + $0x128] sm:$0xff] }
 0x97c   :  { %v2922_v0 = vmul.f32 %v2920_v1, %v6876_v53  ;;  %v2921_v5 = vadd.f32 0.5, %v2918_v51  ;;  %v7196_v1 = vld [vmem:[#allocation3 + $0xa0] sm:$0xff]  ;;  %v7210_v3 = vld [vmem:[#allocation3 + $0xf0] sm:$0xff] }
 0x97d   :  { %v2928_v52 = vpack.c.bf16 %v2907_v55, %v2907_v55  ;;  %v7208_v51 = vld [vmem:[#allocation3 + $0xe0] sm:$0xff]  ;;  %v7222_v55 = vld [vmem:[#allocation3 + $0x130] sm:$0xff] }
 0x97e   :  { %v7161_v35 = vadd.f32 %v2923_v15, %v2922_v0  ;;  %v7198_v15 = vld [vmem:[#allocation3 + $0xb0] sm:$0xff]  ;;  %v7200_v0 = vld [vmem:[#allocation3 + $0xe8] sm:$0xff]  ;;  %8793 = vst [vmem:[#allocation67_spill] sm:$0xff] %v7222_v55 }
 0x97f   :  { %v7172_v23 = vsel %vm6008_vm3, %v2928_v52, 0  ;;  %v7232_v52 = vld [vmem:[#allocation3 + $0x160] sm:$0xff] }
 0x980   :  { %5259 = vtanh.f32 %v7161_v35  ;;  %8796 = vst [vmem:[#allocation70_spill] sm:$0xff] %v7232_v52 }
 0x98a   :  { %v5260_v43 = vpop.eup %5259 }
 0x98b   :  { %v2926_v20 = vmul.f32 %v5260_v43, %v2921_v5  ;;  %v7214_v5 = vld [vmem:[#allocation3 + $0x138] sm:$0xff]  ;;  %v7220_v43 = vld [vmem:[#allocation3 + $0x120] sm:$0xff] }
 0x98c   :  { %8791 = vst [vmem:[#allocation65_spill] sm:$0xff] %v7214_v5  ;;  %8792 = vst [vmem:[#allocation66_spill] sm:$0xff] %v7220_v43 }
 0x98d   :  { %2927 = vst [vmem:[#allocation16 + $0x3] sm:$0x1] %v2926_v20  ;;  %v2929_v30 = vpack.c.bf16 %v2926_v20, %v2926_v20  ;;  %v7224_v20 = vld [vmem:[#allocation3 + $0x168] sm:$0xff] }
 0x98e   :  { %8794 = vst [vmem:[#allocation68_spill] sm:$0xff] %v7224_v20 }
 0x98f   :  { %v2931_v36 = vshll.u32 %v2929_v30, 16  ;;  %v7226_v30 = vld [vmem:[#allocation3 + $0x178] sm:$0xff] }
 0x990   :  { %8795 = vst [vmem:[#allocation69_spill] sm:$0xff] %v7226_v30 }
 0x991   :  { %v2935_v53 = vsel %vm6008_vm3, 0, %v2931_v36  ;;  %v7234_v36 = vld [vmem:[#allocation3 + $0x170] sm:$0xff] }
 0x992   :  { %3096 = vmatprep.mubr.bf16.mxu1 %v2935_v53  ;;  %3137 = vmatprep.mubr.bf16.mxu0 %v2935_v53  ;;  %8797 = vst [vmem:[#allocation71_spill] sm:$0xff] %v7234_v36 }
 0x993   :  { %3097 = vmatmul.mubr.bf16.vlgmr.msra.gmra.mrb[44].mxu1 %v7172_v23  ;;  %3138 = vmatmul.mubr.bf16.vlgmr.msra.gmra.mrb[48].mxu0 %v7172_v23 }
 0x994   :  { %3147 = vmatpush1.bf16.msra.mxu1 %v7166_v54  ;;  %3188 = vmatpush1.bf16.msra.mxu0 %v7168_v8 }
 0x995   :  { %3178 = vmatprep.mubr.bf16.mxu1 %v2935_v53  ;;  %3219 = vmatprep.mubr.bf16.mxu0 %v2935_v53  ;;  %v7236_v53 = vld [vmem:[#allocation3 + $0x1a8] sm:$0xff] }
 0x996   :  { %3148 = vmatprep.subr.bf16.mxu1 %v7176_v2  ;;  %3189 = vmatprep.subr.bf16.mxu0 %v7178_v19  ;;  %8798 = vst [vmem:[#allocation72_spill] sm:$0xff] %v7236_v53 }
 0x998   :  { %3149 = vmatpush1.bf16.msra.mxu1 %v7182_v24  ;;  %3190 = vmatpush1.bf16.msra.mxu0 %v7184_v14 }
 0x999   :  { %3150 = vmatprep.subr.bf16.mxu1 %v7188_v13  ;;  %3191 = vmatprep.subr.bf16.mxu0 %v7190_v25 }
 0x99c   :  { %3151 = vmatpush1.bf16.msra.mxu1 %v7196_v1  ;;  %3192 = vmatpush1.bf16.msra.mxu0 %v7198_v15 }
 0x99d   :  { %3152 = vmatprep.subr.bf16.mxu1 %v7200_v0  ;;  %3193 = vmatprep.subr.bf16.mxu0 %v7202_v17 }
 0x9a0   :  { %3153 = vmatpush1.bf16.msra.mxu1 %v7208_v51  ;;  %3194 = vmatpush1.bf16.msra.mxu0 %v7210_v3 }
 0x9a1   :  { %3154 = vmatprep.subr.bf16.mxu1 %v7212_v18  ;;  %3195 = vmatprep.subr.bf16.mxu0 %v7214_v5  ;;  %v7238_v5 = vld [vmem:[#allocation3 + $0x1b8] sm:$0xff] }
 0x9a2   :  { %8799 = vst [vmem:[#allocation73_spill] sm:$0xff] %v7238_v5 }
 0x9a4   :  { %3155 = vmatpush1.bf16.msra.mxu1 %v7220_v43  ;;  %3196 = vmatpush1.bf16.msra.mxu0 %v7222_v55  ;;  %v7244_v55 = vld [vmem:[#allocation3 + $0x1a0] sm:$0xff]  ;;  %v7250_v43 = vld [vmem:[#allocation3 + $0x1f8] sm:$0xff] }
 0x9a5   :  { %3156 = vmatprep.subr.bf16.mxu1 %v7224_v20  ;;  %3197 = vmatprep.subr.bf16.mxu0 %v7226_v30  ;;  %8800 = vst [vmem:[#allocation74_spill] sm:$0xff] %v7244_v55  ;;  %v7246_v20 = vld [vmem:[#allocation3 + $0x1b0] sm:$0xff]  ;;  %v7248_v30 = vld [vmem:[#allocation3 + $0x1e8] sm:$0xff]  ;;  %8803 = vst [vmem:[#allocation77_spill] sm:$0xff] %v7250_v43 }
 0x9a6   :  { %8801 = vst [vmem:[#allocation75_spill] sm:$0xff] %v7246_v20  ;;  %8802 = vst [vmem:[#allocation76_spill] sm:$0xff] %v7248_v30 }
 0x9a8   :  { %3157 = vmatpush1.bf16.msra.mxu1 %v7232_v52  ;;  %3198 = vmatpush1.bf16.msra.mxu0 %v7234_v36  ;;  %v7256_v36 = vld [vmem:[#allocation3 + $0x1e0] sm:$0xff]  ;;  %v7262_v52 = vld [vmem:[#allocation3 + $0x238] sm:$0xff] }
 0x9a9   :  { %3158 = vmatprep.subr.bf16.mxu1 %v7236_v53  ;;  %3199 = vmatprep.subr.bf16.mxu0 %v7238_v5  ;;  %8804 = vst [vmem:[#allocation78_spill] sm:$0xff] %v7256_v36  ;;  %v7258_v53 = vld [vmem:[#allocation3 + $0x1f0] sm:$0xff]  ;;  %v7260_v5 = vld [vmem:[#allocation3 + $0x228] sm:$0xff]  ;;  %8807 = vst [vmem:[#allocation81_spill] sm:$0xff] %v7262_v52 }
 0x9aa   :  { %8805 = vst [vmem:[#allocation79_spill] sm:$0xff] %v7258_v53  ;;  %8806 = vst [vmem:[#allocation80_spill] sm:$0xff] %v7260_v5 }
 0x9ac   :  { %3159 = vmatpush1.bf16.msra.mxu1 %v7244_v55  ;;  %3200 = vmatpush1.bf16.msra.mxu0 %v7246_v20  ;;  %v7268_v20 = vld [vmem:[#allocation3 + $0x220] sm:$0xff]  ;;  %v7274_v55 = vld [vmem:[#allocation3 + $0x278] sm:$0xff] }
 0x9ad   :  { %3160 = vmatprep.subr.bf16.mxu1 %v7248_v30  ;;  %3201 = vmatprep.subr.bf16.mxu0 %v7250_v43  ;;  %8808 = vst [vmem:[#allocation82_spill] sm:$0xff] %v7268_v20  ;;  %v7270_v30 = vld [vmem:[#allocation3 + $0x230] sm:$0xff]  ;;  %v7272_v43 = vld [vmem:[#allocation3 + $0x268] sm:$0xff]  ;;  %8811 = vst [vmem:[#allocation85_spill] sm:$0xff] %v7274_v55 }
 0x9ae   :  { %8809 = vst [vmem:[#allocation83_spill] sm:$0xff] %v7270_v30  ;;  %8810 = vst [vmem:[#allocation84_spill] sm:$0xff] %v7272_v43 }
 0x9b0   :  { %3161 = vmatpush1.bf16.msra.mxu1 %v7256_v36  ;;  %3202 = vmatpush1.bf16.msra.mxu0 %v7258_v53  ;;  %v7280_v53 = vld [vmem:[#allocation3 + $0x260] sm:$0xff]  ;;  %v7286_v36 = vld [vmem:[#allocation3 + $0x2b8] sm:$0xff] }
 0x9b1   :  { %3162 = vmatprep.subr.bf16.mxu1 %v7260_v5  ;;  %3203 = vmatprep.subr.bf16.mxu0 %v7262_v52  ;;  %8812 = vst [vmem:[#allocation86_spill] sm:$0xff] %v7280_v53  ;;  %v7282_v5 = vld [vmem:[#allocation3 + $0x270] sm:$0xff]  ;;  %v7284_v52 = vld [vmem:[#allocation3 + $0x2a8] sm:$0xff]  ;;  %8815 = vst [vmem:[#allocation89_spill] sm:$0xff] %v7286_v36 }
 0x9b2   :  { %8813 = vst [vmem:[#allocation87_spill] sm:$0xff] %v7282_v5  ;;  %8814 = vst [vmem:[#allocation88_spill] sm:$0xff] %v7284_v52 }
 0x9b4   :  { %3163 = vmatpush1.bf16.msra.mxu1 %v7268_v20  ;;  %3204 = vmatpush1.bf16.msra.mxu0 %v7270_v30  ;;  %v7292_v30 = vld [vmem:[#allocation3 + $0x2a0] sm:$0xff]  ;;  %v7298_v20 = vld [vmem:[#allocation3 + $0x2f8] sm:$0xff] }
 0x9b5   :  { %3164 = vmatprep.subr.bf16.mxu1 %v7272_v43  ;;  %3205 = vmatprep.subr.bf16.mxu0 %v7274_v55  ;;  %8816 = vst [vmem:[#allocation90_spill] sm:$0xff] %v7292_v30  ;;  %v7294_v43 = vld [vmem:[#allocation3 + $0x2b0] sm:$0xff]  ;;  %v7296_v55 = vld [vmem:[#allocation3 + $0x2e8] sm:$0xff]  ;;  %8819 = vst [vmem:[#allocation93_spill] sm:$0xff] %v7298_v20 }
 0x9b6   :  { %8817 = vst [vmem:[#allocation91_spill] sm:$0xff] %v7294_v43  ;;  %8818 = vst [vmem:[#allocation92_spill] sm:$0xff] %v7296_v55 }
 0x9b8   :  { %3165 = vmatpush1.bf16.msra.mxu1 %v7280_v53  ;;  %3206 = vmatpush1.bf16.msra.mxu0 %v7282_v5  ;;  %v7304_v5 = vld [vmem:[#allocation3 + $0x2e0] sm:$0xff]  ;;  %v7310_v53 = vld [vmem:[#allocation3 + $0x338] sm:$0xff] }
 0x9b9   :  { %3166 = vmatprep.subr.bf16.mxu1 %v7284_v52  ;;  %3207 = vmatprep.subr.bf16.mxu0 %v7286_v36  ;;  %8820 = vst [vmem:[#allocation94_spill] sm:$0xff] %v7304_v5  ;;  %v7306_v52 = vld [vmem:[#allocation3 + $0x2f0] sm:$0xff]  ;;  %v7308_v36 = vld [vmem:[#allocation3 + $0x328] sm:$0xff]  ;;  %8823 = vst [vmem:[#allocation97_spill] sm:$0xff] %v7310_v53 }
 0x9ba   :  { %8821 = vst [vmem:[#allocation95_spill] sm:$0xff] %v7306_v52  ;;  %8822 = vst [vmem:[#allocation96_spill] sm:$0xff] %v7308_v36 }
 0x9bc   :  { %3167 = vmatpush1.bf16.msra.mxu1 %v7292_v30  ;;  %3208 = vmatpush1.bf16.msra.mxu0 %v7294_v43  ;;  %v7316_v43 = vld [vmem:[#allocation3 + $0x320] sm:$0xff]  ;;  %v7322_v30 = vld [vmem:[#allocation3 + $0x378] sm:$0xff] }
 0x9bd   :  { %3168 = vmatprep.subr.bf16.mxu1 %v7296_v55  ;;  %3209 = vmatprep.subr.bf16.mxu0 %v7298_v20  ;;  %8824 = vst [vmem:[#allocation98_spill] sm:$0xff] %v7316_v43  ;;  %v7318_v55 = vld [vmem:[#allocation3 + $0x330] sm:$0xff]  ;;  %v7320_v20 = vld [vmem:[#allocation3 + $0x368] sm:$0xff]  ;;  %8827 = vst [vmem:[#allocation101_spill] sm:$0xff] %v7322_v30 }
 0x9be   :  { %8825 = vst [vmem:[#allocation99_spill] sm:$0xff] %v7318_v55  ;;  %8826 = vst [vmem:[#allocation100_spill] sm:$0xff] %v7320_v20 }
 0x9c0   :  { %3169 = vmatpush1.bf16.msra.mxu1 %v7304_v5  ;;  %3210 = vmatpush1.bf16.msra.mxu0 %v7306_v52  ;;  %v7328_v52 = vld [vmem:[#allocation3 + $0x360] sm:$0xff]  ;;  %v7334_v5 = vld [vmem:[#allocation3 + $0x3b8] sm:$0xff] }
 0x9c1   :  { %3170 = vmatprep.subr.bf16.mxu1 %v7308_v36  ;;  %3211 = vmatprep.subr.bf16.mxu0 %v7310_v53  ;;  %v7330_v36 = vld [vmem:[#allocation3 + $0x370] sm:$0xff]  ;;  %v7332_v53 = vld [vmem:[#allocation3 + $0x3a8] sm:$0xff] }
 0x9c2   :  { %8828 = vst [vmem:[#allocation102_spill] sm:$0xff] %v7330_v36  ;;  %8829 = vst [vmem:[#allocation103_spill] sm:$0xff] %v7332_v53 }
 0x9c4   :  { %3171 = vmatpush1.bf16.msra.mxu1 %v7316_v43  ;;  %3212 = vmatpush1.bf16.msra.mxu0 %v7318_v55  ;;  %v7340_v55 = vld [vmem:[#allocation3 + $0x3a0] sm:$0xff]  ;;  %v7346_v43 = vld [vmem:[#allocation3 + $0x3f8] sm:$0xff] }
 0x9c5   :  { %3172 = vmatprep.subr.bf16.mxu1 %v7320_v20  ;;  %3213 = vmatprep.subr.bf16.mxu0 %v7322_v30  ;;  %v7342_v20 = vld [vmem:[#allocation3 + $0x3b0] sm:$0xff]  ;;  %v7344_v30 = vld [vmem:[#allocation3 + $0x3e8] sm:$0xff] }
 0x9c8   :  { %3173 = vmatpush1.bf16.msra.mxu1 %v7328_v52  ;;  %3214 = vmatpush1.bf16.msra.mxu0 %v7330_v36  ;;  %v7352_v36 = vld [vmem:[#allocation3 + $0x3e0] sm:$0xff] }
 0x9c9   :  { %3174 = vmatprep.subr.bf16.mxu1 %v7332_v53  ;;  %3215 = vmatprep.subr.bf16.mxu0 %v7334_v5  ;;  %v7354_v53 = vld [vmem:[#allocation3 + $0x3f0] sm:$0xff] }
 0x9cc   :  { %3175 = vmatpush1.bf16.msra.mxu1 %v7340_v55  ;;  %3216 = vmatpush1.bf16.msra.mxu0 %v7342_v20 }
 0x9cd   :  { %3176 = vmatprep.subr.bf16.mxu1 %v7344_v30  ;;  %3217 = vmatprep.subr.bf16.mxu0 %v7346_v43 }
 0x9d0   :  { %3177 = vmatpush1.bf16.msra.mxu1 %v7352_v36  ;;  %3218 = vmatpush1.bf16.msra.mxu0 %v7354_v53 }
 0x9d1   :  { %3444 = vmatprep.subr.bf16.mxu1 %v6951_v46  ;;  %3485 = vmatprep.subr.bf16.mxu0 %v6953_v26  ;;  %v8830_v46 = vld [vmem:[#allocation33_spill] sm:$0xff]  ;;  %v8831_v26 = vld [vmem:[#allocation34_spill] sm:$0xff] }
 0x9d3   :  { %3179 = vmatmul.mubr.bf16.vlgmr.msra.gmra.mrb[48].mxu1 %v7172_v23  ;;  %3220 = vmatmul.mubr.bf16.vlgmr.msra.gmra.mrb[52].mxu0 %v7172_v23  ;;  %v8862_v23 = vld [vmem:[#allocation63_spill] sm:$0xff] }
 0x9d4   :  { %3445 = vmatpush1.bf16.msra.mxu1 %v6955_v48  ;;  %3486 = vmatpush1.bf16.msra.mxu0 %v6959_v6  ;;  %v8832_v48 = vld [vmem:[#allocation35_spill] sm:$0xff]  ;;  %v8833_v6 = vld [vmem:[#allocation36_spill] sm:$0xff] }
 0x9d5   :  { %3446 = vmatprep.subr.bf16.mxu1 %v6961_v47  ;;  %3487 = vmatprep.subr.bf16.mxu0 %v6963_v10  ;;  %v8834_v47 = vld [vmem:[#allocation37_spill] sm:$0xff]  ;;  %v8835_v10 = vld [vmem:[#allocation38_spill] sm:$0xff] }
 0x9d8   :  { %3447 = vmatpush1.bf16.msra.mxu1 %v6969_v31  ;;  %3488 = vmatpush1.bf16.msra.mxu0 %v6971_v44  ;;  %v8836_v31 = vld [vmem:[#allocation39_spill] sm:$0xff]  ;;  %v8837_v44 = vld [vmem:[#allocation40_spill] sm:$0xff] }
 0x9d9   :  { %3448 = vmatprep.subr.bf16.mxu1 %v6973_v42  ;;  %3489 = vmatprep.subr.bf16.mxu0 %v6975_v27  ;;  %v8838_v42 = vld [vmem:[#allocation41_spill] sm:$0xff]  ;;  %v8839_v27 = vld [vmem:[#allocation42_spill] sm:$0xff] }
 0x9dc   :  { %3449 = vmatpush1.bf16.msra.mxu1 %v6981_v28  ;;  %3490 = vmatpush1.bf16.msra.mxu0 %v6983_v29  ;;  %v8840_v28 = vld [vmem:[#allocation44_spill] sm:$0xff]  ;;  %v8841_v29 = vld [vmem:[#allocation45_spill] sm:$0xff] }
 0x9dd   :  { %3450 = vmatprep.subr.bf16.mxu1 %v6985_v33  ;;  %3491 = vmatprep.subr.bf16.mxu0 %v6987_v34  ;;  %v8842_v33 = vld [vmem:[#allocation30_spill] sm:$0xff]  ;;  %v8843_v34 = vld [vmem:[#allocation32_spill] sm:$0xff] }
 0x9e0   :  { %3451 = vmatpush1.bf16.msra.mxu1 %v6993_v37  ;;  %3492 = vmatpush1.bf16.msra.mxu0 %v6995_v22  ;;  %v8844_v37 = vld [vmem:[#allocation43_spill] sm:$0xff]  ;;  %v8845_v22 = vld [vmem:[#allocation46_spill] sm:$0xff] }
 0x9e1   :  { %3452 = vmatprep.subr.bf16.mxu1 %v6997_v11  ;;  %3493 = vmatprep.subr.bf16.mxu0 %v6999_v40  ;;  %v8846_v11 = vld [vmem:[#allocation47_spill] sm:$0xff]  ;;  %v8847_v40 = vld [vmem:[#allocation48_spill] sm:$0xff] }
 0x9e4   :  { %3453 = vmatpush1.bf16.msra.mxu1 %v7005_v41  ;;  %3494 = vmatpush1.bf16.msra.mxu0 %v7007_v57  ;;  %v8848_v41 = vld [vmem:[#allocation49_spill] sm:$0xff]  ;;  %v8849_v57 = vld [vmem:[#allocation50_spill] sm:$0xff] }
 0x9e5   :  { %3454 = vmatprep.subr.bf16.mxu1 %v7009_v60  ;;  %3495 = vmatprep.subr.bf16.mxu0 %v7011_v4  ;;  %v8850_v60 = vld [vmem:[#allocation51_spill] sm:$0xff]  ;;  %v8851_v4 = vld [vmem:[#allocation52_spill] sm:$0xff] }
 0x9e8   :  { %3455 = vmatpush1.bf16.msra.mxu1 %v7017_v59  ;;  %3496 = vmatpush1.bf16.msra.mxu0 %v7019_v12  ;;  %v8852_v59 = vld [vmem:[#allocation53_spill] sm:$0xff]  ;;  %v8853_v12 = vld [vmem:[#allocation54_spill] sm:$0xff] }
 0x9e9   :  { %3456 = vmatprep.subr.bf16.mxu1 %v7023_v56  ;;  %3497 = vmatprep.subr.bf16.mxu0 %v7025_v38  ;;  %v8854_v56 = vld [vmem:[#allocation55_spill] sm:$0xff]  ;;  %v8855_v38 = vld [vmem:[#allocation56_spill] sm:$0xff] }
 0x9ec   :  { %3457 = vmatpush1.bf16.msra.mxu1 %v7029_v62  ;;  %3498 = vmatpush1.bf16.msra.mxu0 %v7031_v50  ;;  %v8856_v62 = vld [vmem:[#allocation57_spill] sm:$0xff]  ;;  %v8857_v50 = vld [vmem:[#allocation58_spill] sm:$0xff] }
 0x9ed   :  { %3458 = vmatprep.subr.bf16.mxu1 %v7035_v39  ;;  %3499 = vmatprep.subr.bf16.mxu0 %v7037_v45  ;;  %v8858_v39 = vld [vmem:[#allocation59_spill] sm:$0xff]  ;;  %v8859_v45 = vld [vmem:[#allocation60_spill] sm:$0xff] }
 0x9f0   :  { %3459 = vmatpush1.bf16.msra.mxu1 %v7041_v49  ;;  %3500 = vmatpush1.bf16.msra.mxu0 %v7043_v9  ;;  %v8860_v49 = vld [vmem:[#allocation61_spill] sm:$0xff]  ;;  %v8861_v9 = vld [vmem:[#allocation62_spill] sm:$0xff] }
 0x9f1   :  { %3460 = vmatprep.subr.bf16.mxu1 %v8830_v46  ;;  %3501 = vmatprep.subr.bf16.mxu0 %v8831_v26  ;;  %v8863_v46 = vld [vmem:[#allocation64_spill] sm:$0xff] }
 0x9f4   :  { %3461 = vmatpush1.bf16.msra.mxu1 %v8832_v48  ;;  %3502 = vmatpush1.bf16.msra.mxu0 %v8833_v6 }
 0x9f5   :  { %3462 = vmatprep.subr.bf16.mxu1 %v8834_v47  ;;  %3503 = vmatprep.subr.bf16.mxu0 %v8835_v10 }
 0x9f8   :  { %3463 = vmatpush1.bf16.msra.mxu1 %v8836_v31  ;;  %3504 = vmatpush1.bf16.msra.mxu0 %v8837_v44 }
 0x9f9   :  { %3464 = vmatprep.subr.bf16.mxu1 %v8838_v42  ;;  %3505 = vmatprep.subr.bf16.mxu0 %v8839_v27 }
 0x9fc   :  { %3465 = vmatpush1.bf16.msra.mxu1 %v8840_v28  ;;  %3506 = vmatpush1.bf16.msra.mxu0 %v8841_v29 }
 0x9fd   :  { %3466 = vmatprep.subr.bf16.mxu1 %v8842_v33  ;;  %3507 = vmatprep.subr.bf16.mxu0 %v8843_v34 }
 0xa00   :  { %3467 = vmatpush1.bf16.msra.mxu1 %v8844_v37  ;;  %3508 = vmatpush1.bf16.msra.mxu0 %v8845_v22  ;;  %v3245_v22 = vld [vmem:[#allocation2 + $0x5] ss:$8 sm:$0xf] }
 0xa01   :  { %3468 = vmatprep.subr.bf16.mxu1 %v8846_v11  ;;  %3509 = vmatprep.subr.bf16.mxu0 %v8847_v40 }
 0xa04   :  { %3469 = vmatpush1.bf16.msra.mxu1 %v8848_v41  ;;  %3510 = vmatpush1.bf16.msra.mxu0 %v8849_v57 }
 0xa05   :  { %3470 = vmatprep.subr.bf16.mxu1 %v8850_v60  ;;  %3511 = vmatprep.subr.bf16.mxu0 %v8851_v4 }
 0xa08   :  { %3471 = vmatpush1.bf16.msra.mxu1 %v8852_v59  ;;  %3512 = vmatpush1.bf16.msra.mxu0 %v8853_v12 }
 0xa09   :  { %3472 = vmatprep.subr.bf16.mxu1 %v8854_v56  ;;  %3513 = vmatprep.subr.bf16.mxu0 %v8855_v38 }
 0xa0c   :  { %3473 = vmatpush1.bf16.msra.mxu1 %v8856_v62  ;;  %3514 = vmatpush1.bf16.msra.mxu0 %v8857_v50 }
 0xa0d   :  { %3474 = vmatprep.subr.bf16.mxu1 %v8858_v39  ;;  %3515 = vmatprep.subr.bf16.mxu0 %v8859_v45 }
 0xa10   :  { %3475 = vmatpush1.bf16.msra.mxu1 %v8860_v49  ;;  %3516 = vmatpush1.bf16.msra.mxu0 %v8861_v9 }
 0xa11   :  { %3526 = vmatprep.subr.bf16.mxu1 %v8862_v23  ;;  %3567 = vmatprep.subr.bf16.mxu0 %v8863_v46 }
 0xa66   :  { %v3098_v26 = vpop.f32.mrb[44].mxu1  ;;  %v3139_v48 = vpop.f32.mrb[48].mxu0 }
 0xa67   :  { %v3100_v6 = vpop.f32.mrb[45].mxu1  ;;  %v3141_v47 = vpop.f32.mrb[49].mxu0  ;;  %v3232_v40 = vrot.slane %v3098_v26, 1  ;;  %v3234_v41 = vrot.slane %v3139_v48, 1 }
 0xa68   :  { %v3246_v10 = vcombine.low %v3098_v26, %v3100_v6  ;;  %v3247_v31 = vcombine.low %v3139_v48, %v3141_v47  ;;  %v3102_v44 = vpop.f32.mrb[46].mxu1  ;;  %v3143_v42 = vpop.f32.mrb[50].mxu0  ;;  %v3233_v60 = vrot.slane %v3100_v6, 1  ;;  %v3235_v4 = vrot.slane %v3141_v47, 1 }
 0xa69   :  { %v3103_v27 = vpop.f32.mrb[47].mxu1  ;;  %v3144_v28 = vpop.f32.mrb[51].mxu0 }
 0xa6a   :  { %v3254_v29 = vrot.slane %v3246_v10, %v6283_v32  ;;  %v3261_v33 = vrot.slane %v3247_v31, %v6283_v32 }
 0xa6c   :  { %v3262_v34 = vcombine.low %v3254_v29, %v3261_v33 }
 0xa6e   :  { %v3269_v37 = vrot.slane %v3262_v34, %v6283_v32 }
 0xa70   :  { %v3271_v11 = vadd.f32 %v3269_v37, %v3245_v22 }
 0xa72   :  { %5261 = vtanh.f32 %v3271_v11 }
 0xa7c   :  { %v5262_v57 = vpop.eup %5261 }
 0xa7d   :  { %v3273_v31 = vmul.f32 0.5, %v5262_v57  ;;  %v3280_v28 = vrot.slane %v5262_v57, 3 }
 0xa7f   :  { %v3274_v6 = vadd.f32 0.5, %v3273_v31  ;;  %v8881_v31 = vld [vmem:[#allocation82_spill] sm:$0xff] }
 0xa81   :  { %v3276_v47 = vrot.slane %v3274_v6, 1  ;;  %v3282_v34 = vmul.f32 %v3280_v28, %v3274_v6  ;;  %v8889_v28 = vld [vmem:[#allocation90_spill] sm:$0xff] }
 0xa83   :  { %v3278_v27 = vmul.f32 %v3276_v47, %v7157_v16  ;;  %v8885_v47 = vld [vmem:[#allocation86_spill] sm:$0xff] }
 0xaa6   :  { %v3180_v59 = vpop.f32.mrb[48].mxu1  ;;  %v3221_v12 = vpop.f32.mrb[52].mxu0 }
 0xaa7   :  { %v3240_v56 = vadd.f32 %v3232_v40, %v3180_v59  ;;  %v3242_v38 = vadd.f32 %v3234_v41, %v3221_v12  ;;  %v3182_v62 = vpop.f32.mrb[49].mxu1  ;;  %v3223_v50 = vpop.f32.mrb[53].mxu0  ;;  %v7434_v40 = vadd.f32 %v3282_v34, %v3278_v27  ;;  %v8888_v27 = vld [vmem:[#allocation89_spill] sm:$0xff] }
 0xaa8   :  { %v3241_v39 = vadd.f32 %v3233_v60, %v3182_v62  ;;  %v3243_v45 = vadd.f32 %v3235_v4, %v3223_v50  ;;  %v3184_v49 = vpop.f32.mrb[50].mxu1  ;;  %v3225_v9 = vpop.f32.mrb[54].mxu0  ;;  %v8892_v34 = vld [vmem:[#allocation93_spill] sm:$0xff] }
 0xaa9   :  { %v3288_v23 = vadd.f32 %v3240_v56, %v6292_v58  ;;  %v3185_v46 = vpop.f32.mrb[51].mxu1  ;;  %v3226_v10 = vpop.f32.mrb[55].mxu0  ;;  %v3290_v44 = vadd.f32 %v3242_v38, %v6307_v21  ;;  %v3285_v56 = vrot.slane %v3274_v6, 2  ;;  %v8884_v6 = vld [vmem:[#allocation85_spill] sm:$0xff] }
 0xaaa   :  { %v3289_v26 = vadd.f32 %v3241_v39, %v6296_v7  ;;  %v3291_v48 = vadd.f32 %v3243_v45, %v6300_v61  ;;  %v8879_v46 = vld [vmem:[#allocation80_spill] sm:$0xff]  ;;  %v8880_v10 = vld [vmem:[#allocation81_spill] sm:$0xff] }
 0xaab   :  { %5263 = vtanh.f32 %v3288_v23 }
 0xaac   :  { %5265 = vtanh.f32 %v3289_v26  ;;  %v8882_v26 = vld [vmem:[#allocation83_spill] sm:$0xff] }
 0xaad   :  { %5267 = vtanh.f32 %v3291_v48  ;;  %v8883_v48 = vld [vmem:[#allocation84_spill] sm:$0xff] }
 0xaae   :  { %5269 = vtanh.f32 %v3290_v44  ;;  %v8886_v44 = vld [vmem:[#allocation87_spill] sm:$0xff] }
 0xaaf   :  { %5271 = vtanh.f32 %v7434_v40 }
 0xab5   :  { %v5264_v42 = vpop.eup %5263 }
 0xab6   :  { %v3296_v29 = vmul.f32 0.5, %v5264_v42  ;;  %v5266_v33 = vpop.eup %5265  ;;  %v8887_v42 = vld [vmem:[#allocation88_spill] sm:$0xff] }
 0xab7   :  { %v3297_v22 = vmul.f32 0.5, %v5266_v33  ;;  %v5268_v11 = vpop.eup %5267  ;;  %v8891_v33 = vld [vmem:[#allocation92_spill] sm:$0xff] }
 0xab8   :  { %v3299_v37 = vadd.f32 0.5, %v3296_v29  ;;  %v5270_v16 = vpop.eup %5269  ;;  %v8890_v29 = vld [vmem:[#allocation91_spill] sm:$0xff] }
 0xab9   :  { %v3300_v41 = vadd.f32 0.5, %v3297_v22  ;;  %v3298_v57 = vmul.f32 0.5, %v5270_v16  ;;  %v5272_v12 = vpop.eup %5271  ;;  %v8894_v22 = vld [vmem:[#allocation95_spill] sm:$0xff]  ;;  %v8899_v16 = vld [vmem:[#allocation100_spill] sm:$0xff] }
 0xaba   :  { %v3303_v60 = vmul.f32 %v5268_v11, %v3299_v37  ;;  %v3287_v50 = vmul.f32 %v5272_v12, %v3285_v56  ;;  %v8893_v37 = vld [vmem:[#allocation94_spill] sm:$0xff]  ;;  %v8895_v11 = vld [vmem:[#allocation96_spill] sm:$0xff]  ;;  %v8902_v56 = vld [vmem:[#allocation103_spill] sm:$0xff] }
 0xabb   :  { %v3302_v4 = vmul.f32 %v3300_v41, %v7161_v35  ;;  %v3301_v38 = vadd.f32 0.5, %v3298_v57  ;;  %v8896_v41 = vld [vmem:[#allocation97_spill] sm:$0xff]  ;;  %v8901_v12 = vld [vmem:[#allocation102_spill] sm:$0xff] }
 0xabc   :  { %v3308_v49 = vpack.c.bf16 %v3287_v50, %v3287_v50  ;;  %v8900_v57 = vld [vmem:[#allocation101_spill] sm:$0xff]  ;;  %v7543_v50 = vld [vmem:[#allocation3 + $0x80] sm:$0xff] }
 0xabd   :  { %v7438_v59 = vadd.f32 %v3303_v60, %v3302_v4  ;;  %v8897_v60 = vld [vmem:[#allocation98_spill] sm:$0xff]  ;;  %v8898_v4 = vld [vmem:[#allocation99_spill] sm:$0xff] }
 0xabe   :  { %v7445_v23 = vsel %vm6008_vm3, %v3308_v49, 0  ;;  %v7549_v49 = vld [vmem:[#allocation3 + $0xd8] sm:$0xff] }
 0xabf   :  { %5273 = vtanh.f32 %v7438_v59 }
 0xac9   :  { %v5274_v62 = vpop.eup %5273 }
 0xaca   :  { %v3306_v39 = vmul.f32 %v5274_v62, %v3301_v38  ;;  %v7515_v38 = vld [vmem:[#allocation3 + $0x18] sm:$0xff] }
 0xacb   :  { %v7537_v62 = vld [vmem:[#allocation3 + $0x98] sm:$0xff] }
 0xacc   :  { %3307 = vst [vmem:[#allocation16 + $0x4] sm:$0x1] %v3306_v39  ;;  %v3309_v45 = vpack.c.bf16 %v3306_v39, %v3306_v39  ;;  %v7545_v39 = vld [vmem:[#allocation3 + $0x90] sm:$0xff] }
 0xace   :  { %v3311_v9 = vshll.u32 %v3309_v45, 16  ;;  %v7547_v45 = vld [vmem:[#allocation3 + $0xc8] sm:$0xff] }
 0xad0   :  { %v3315_v35 = vsel %vm6008_vm3, 0, %v3311_v9  ;;  %v7555_v9 = vld [vmem:[#allocation3 + $0xc0] sm:$0xff] }
 0xad1   :  { %3476 = vmatprep.mubr.bf16.mxu1 %v3315_v35  ;;  %3517 = vmatprep.mubr.bf16.mxu0 %v3315_v35 }
 0xad2   :  { %3477 = vmatmul.mubr.bf16.vlgmr.msra.gmra.mrb[52].mxu1 %v7445_v23  ;;  %3518 = vmatmul.mubr.bf16.vlgmr.msra.gmra.mrb[56].mxu0 %v7445_v23 }
 0xad3   :  { %3527 = vmatpush1.bf16.msra.mxu1 %v7166_v54  ;;  %3568 = vmatpush1.bf16.msra.mxu0 %v7168_v8  ;;  %v8864_v54 = vld [vmem:[#allocation65_spill] sm:$0xff]  ;;  %v8865_v8 = vld [vmem:[#allocation66_spill] sm:$0xff] }
 0xad4   :  { %3558 = vmatprep.mubr.bf16.mxu1 %v3315_v35  ;;  %3599 = vmatprep.mubr.bf16.mxu0 %v3315_v35  ;;  %v7557_v35 = vld [vmem:[#allocation3 + $0xd0] sm:$0xff] }
 0xad5   :  { %3528 = vmatprep.subr.bf16.mxu1 %v7176_v2  ;;  %3569 = vmatprep.subr.bf16.mxu0 %v7178_v19  ;;  %v8866_v2 = vld [vmem:[#allocation67_spill] sm:$0xff]  ;;  %v8867_v19 = vld [vmem:[#allocation68_spill] sm:$0xff] }
 0xad7   :  { %3529 = vmatpush1.bf16.msra.mxu1 %v7182_v24  ;;  %3570 = vmatpush1.bf16.msra.mxu0 %v7184_v14  ;;  %v8868_v24 = vld [vmem:[#allocation69_spill] sm:$0xff]  ;;  %v8869_v14 = vld [vmem:[#allocation70_spill] sm:$0xff] }
 0xad8   :  { %3530 = vmatprep.subr.bf16.mxu1 %v7188_v13  ;;  %3571 = vmatprep.subr.bf16.mxu0 %v7190_v25  ;;  %v8870_v13 = vld [vmem:[#allocation71_spill] sm:$0xff]  ;;  %v8871_v25 = vld [vmem:[#allocation72_spill] sm:$0xff] }
 0xadb   :  { %3531 = vmatpush1.bf16.msra.mxu1 %v7196_v1  ;;  %3572 = vmatpush1.bf16.msra.mxu0 %v7198_v15  ;;  %v8872_v1 = vld [vmem:[#allocation73_spill] sm:$0xff]  ;;  %v8873_v15 = vld [vmem:[#allocation74_spill] sm:$0xff] }
 0xadc   :  { %3532 = vmatprep.subr.bf16.mxu1 %v7200_v0  ;;  %3573 = vmatprep.subr.bf16.mxu0 %v7202_v17  ;;  %v8874_v0 = vld [vmem:[#allocation75_spill] sm:$0xff]  ;;  %v8875_v17 = vld [vmem:[#allocation76_spill] sm:$0xff] }
 0xadf   :  { %3533 = vmatpush1.bf16.msra.mxu1 %v7208_v51  ;;  %3574 = vmatpush1.bf16.msra.mxu0 %v7210_v3  ;;  %v8876_v51 = vld [vmem:[#allocation77_spill] sm:$0xff]  ;;  %v8877_v3 = vld [vmem:[#allocation78_spill] sm:$0xff] }
 0xae0   :  { %3534 = vmatprep.subr.bf16.mxu1 %v7212_v18  ;;  %3575 = vmatprep.subr.bf16.mxu0 %v8864_v54  ;;  %v8878_v18 = vld [vmem:[#allocation79_spill] sm:$0xff]  ;;  %v7561_v54 = vld [vmem:[#allocation3 + $0x118] sm:$0xff] }
 0xae3   :  { %3535 = vmatpush1.bf16.msra.mxu1 %v8865_v8  ;;  %3576 = vmatpush1.bf16.msra.mxu0 %v8866_v2  ;;  %v7567_v8 = vld [vmem:[#allocation3 + $0x100] sm:$0xff]  ;;  %v7569_v2 = vld [vmem:[#allocation3 + $0x110] sm:$0xff] }
 0xae4   :  { %3536 = vmatprep.subr.bf16.mxu1 %v8867_v19  ;;  %3577 = vmatprep.subr.bf16.mxu0 %v8868_v24  ;;  %v7571_v19 = vld [vmem:[#allocation3 + $0x148] sm:$0xff]  ;;  %v7573_v24 = vld [vmem:[#allocation3 + $0x158] sm:$0xff] }
 0xae7   :  { %3537 = vmatpush1.bf16.msra.mxu1 %v8869_v14  ;;  %3578 = vmatpush1.bf16.msra.mxu0 %v8870_v13  ;;  %v7579_v14 = vld [vmem:[#allocation3 + $0x140] sm:$0xff]  ;;  %v7581_v13 = vld [vmem:[#allocation3 + $0x150] sm:$0xff] }
 0xae8   :  { %3538 = vmatprep.subr.bf16.mxu1 %v8871_v25  ;;  %3579 = vmatprep.subr.bf16.mxu0 %v8872_v1  ;;  %v7585_v25 = vld [vmem:[#allocation3 + $0x188] sm:$0xff]  ;;  %v7587_v1 = vld [vmem:[#allocation3 + $0x198] sm:$0xff] }
 0xaeb   :  { %3539 = vmatpush1.bf16.msra.mxu1 %v8873_v15  ;;  %3580 = vmatpush1.bf16.msra.mxu0 %v8874_v0  ;;  %v7591_v15 = vld [vmem:[#allocation3 + $0x180] sm:$0xff]  ;;  %v7593_v0 = vld [vmem:[#allocation3 + $0x190] sm:$0xff] }
 0xaec   :  { %3540 = vmatprep.subr.bf16.mxu1 %v8875_v17  ;;  %3581 = vmatprep.subr.bf16.mxu0 %v8876_v51  ;;  %v7597_v17 = vld [vmem:[#allocation3 + $0x1c8] sm:$0xff]  ;;  %v7599_v51 = vld [vmem:[#allocation3 + $0x1d8] sm:$0xff] }
 0xaef   :  { %3541 = vmatpush1.bf16.msra.mxu1 %v8877_v3  ;;  %3582 = vmatpush1.bf16.msra.mxu0 %v8878_v18  ;;  %v7603_v3 = vld [vmem:[#allocation3 + $0x1c0] sm:$0xff]  ;;  %v7605_v18 = vld [vmem:[#allocation3 + $0x1d0] sm:$0xff] }
 0xaf0   :  { %3542 = vmatprep.subr.bf16.mxu1 %v8879_v46  ;;  %3583 = vmatprep.subr.bf16.mxu0 %v8880_v10  ;;  %v7609_v46 = vld [vmem:[#allocation3 + $0x208] sm:$0xff]  ;;  %v7611_v10 = vld [vmem:[#allocation3 + $0x218] sm:$0xff] }
 0xaf1   :  { %8903 = vst [vmem:[#allocation33_spill] sm:$0xff] %v7609_v46  ;;  %8904 = vst [vmem:[#allocation34_spill] sm:$0xff] %v7611_v10 }
 0xaf3   :  { %3543 = vmatpush1.bf16.msra.mxu1 %v8881_v31  ;;  %3584 = vmatpush1.bf16.msra.mxu0 %v8882_v26  ;;  %v7615_v31 = vld [vmem:[#allocation3 + $0x200] sm:$0xff]  ;;  %v7617_v26 = vld [vmem:[#allocation3 + $0x210] sm:$0xff] }
 0xaf4   :  { %3544 = vmatprep.subr.bf16.mxu1 %v8883_v48  ;;  %3585 = vmatprep.subr.bf16.mxu0 %v8884_v6  ;;  %8905 = vst [vmem:[#allocation35_spill] sm:$0xff] %v7615_v31  ;;  %8906 = vst [vmem:[#allocation36_spill] sm:$0xff] %v7617_v26  ;;  %v7621_v48 = vld [vmem:[#allocation3 + $0x248] sm:$0xff]  ;;  %v7623_v6 = vld [vmem:[#allocation3 + $0x258] sm:$0xff] }
 0xaf5   :  { %8907 = vst [vmem:[#allocation37_spill] sm:$0xff] %v7621_v48  ;;  %8908 = vst [vmem:[#allocation38_spill] sm:$0xff] %v7623_v6 }
 0xaf7   :  { %3545 = vmatpush1.bf16.msra.mxu1 %v8885_v47  ;;  %3586 = vmatpush1.bf16.msra.mxu0 %v8886_v44  ;;  %v7627_v47 = vld [vmem:[#allocation3 + $0x240] sm:$0xff]  ;;  %v7629_v44 = vld [vmem:[#allocation3 + $0x250] sm:$0xff] }
 0xaf8   :  { %3546 = vmatprep.subr.bf16.mxu1 %v8887_v42  ;;  %3587 = vmatprep.subr.bf16.mxu0 %v8888_v27  ;;  %8909 = vst [vmem:[#allocation39_spill] sm:$0xff] %v7627_v47  ;;  %8910 = vst [vmem:[#allocation40_spill] sm:$0xff] %v7629_v44  ;;  %v7633_v42 = vld [vmem:[#allocation3 + $0x288] sm:$0xff]  ;;  %v7635_v27 = vld [vmem:[#allocation3 + $0x298] sm:$0xff] }
 0xaf9   :  { %8911 = vst [vmem:[#allocation41_spill] sm:$0xff] %v7633_v42  ;;  %8912 = vst [vmem:[#allocation42_spill] sm:$0xff] %v7635_v27 }
 0xafb   :  { %3547 = vmatpush1.bf16.msra.mxu1 %v8889_v28  ;;  %3588 = vmatpush1.bf16.msra.mxu0 %v8890_v29  ;;  %v7639_v28 = vld [vmem:[#allocation3 + $0x280] sm:$0xff]  ;;  %v7641_v29 = vld [vmem:[#allocation3 + $0x290] sm:$0xff] }
 0xafc   :  { %3548 = vmatprep.subr.bf16.mxu1 %v8891_v33  ;;  %3589 = vmatprep.subr.bf16.mxu0 %v8892_v34  ;;  %8913 = vst [vmem:[#allocation44_spill] sm:$0xff] %v7639_v28  ;;  %8914 = vst [vmem:[#allocation45_spill] sm:$0xff] %v7641_v29  ;;  %v7645_v33 = vld [vmem:[#allocation3 + $0x2c8] sm:$0xff]  ;;  %v7647_v34 = vld [vmem:[#allocation3 + $0x2d8] sm:$0xff] }
 0xafd   :  { %8915 = vst [vmem:[#allocation30_spill] sm:$0xff] %v7645_v33  ;;  %8916 = vst [vmem:[#allocation32_spill] sm:$0xff] %v7647_v34 }
 0xaff   :  { %3549 = vmatpush1.bf16.msra.mxu1 %v8893_v37  ;;  %3590 = vmatpush1.bf16.msra.mxu0 %v8894_v22  ;;  %v7651_v37 = vld [vmem:[#allocation3 + $0x2c0] sm:$0xff]  ;;  %v7653_v22 = vld [vmem:[#allocation3 + $0x2d0] sm:$0xff] }
 0xb00   :  { %3550 = vmatprep.subr.bf16.mxu1 %v8895_v11  ;;  %3591 = vmatprep.subr.bf16.mxu0 %v8896_v41  ;;  %8917 = vst [vmem:[#allocation43_spill] sm:$0xff] %v7651_v37  ;;  %8918 = vst [vmem:[#allocation46_spill] sm:$0xff] %v7653_v22  ;;  %v7657_v11 = vld [vmem:[#allocation3 + $0x308] sm:$0xff]  ;;  %v7659_v41 = vld [vmem:[#allocation3 + $0x318] sm:$0xff] }
 0xb01   :  { %8919 = vst [vmem:[#allocation47_spill] sm:$0xff] %v7657_v11  ;;  %8920 = vst [vmem:[#allocation48_spill] sm:$0xff] %v7659_v41 }
 0xb03   :  { %3551 = vmatpush1.bf16.msra.mxu1 %v8897_v60  ;;  %3592 = vmatpush1.bf16.msra.mxu0 %v8898_v4  ;;  %v7663_v60 = vld [vmem:[#allocation3 + $0x300] sm:$0xff]  ;;  %v7665_v4 = vld [vmem:[#allocation3 + $0x310] sm:$0xff] }
 0xb04   :  { %3552 = vmatprep.subr.bf16.mxu1 %v8899_v16  ;;  %3593 = vmatprep.subr.bf16.mxu0 %v8900_v57  ;;  %8921 = vst [vmem:[#allocation49_spill] sm:$0xff] %v7663_v60  ;;  %8922 = vst [vmem:[#allocation50_spill] sm:$0xff] %v7665_v4  ;;  %v7667_v16 = vld [vmem:[#allocation3 + $0x348] sm:$0xff]  ;;  %v7669_v57 = vld [vmem:[#allocation3 + $0x358] sm:$0xff] }
 0xb05   :  { %8923 = vst [vmem:[#allocation51_spill] sm:$0xff] %v7667_v16  ;;  %8924 = vst [vmem:[#allocation52_spill] sm:$0xff] %v7669_v57 }
 0xb07   :  { %3553 = vmatpush1.bf16.msra.mxu1 %v7328_v52  ;;  %3594 = vmatpush1.bf16.msra.mxu0 %v8901_v12  ;;  %v7513_v52 = vld [vmem:[#allocation3 + $0x8] sm:$0xff]  ;;  %v7675_v12 = vld [vmem:[#allocation3 + $0x340] sm:$0xff] }
 0xb08   :  { %3554 = vmatprep.subr.bf16.mxu1 %v8902_v56  ;;  %3595 = vmatprep.subr.bf16.mxu0 %v7334_v5  ;;  %v7517_v5 = vld [vmem:[#allocation3] sm:$0xff]  ;;  %8925 = vst [vmem:[#allocation53_spill] sm:$0xff] %v7675_v12  ;;  %v7677_v56 = vld [vmem:[#allocation3 + $0x350] sm:$0xff] }
 0xb09   :  { %8926 = vst [vmem:[#allocation54_spill] sm:$0xff] %v7677_v56 }
 0xb0b   :  { %3555 = vmatpush1.bf16.msra.mxu1 %v7340_v55  ;;  %3596 = vmatpush1.bf16.msra.mxu0 %v7342_v20  ;;  %v7521_v55 = vld [vmem:[#allocation3 + $0x10] sm:$0xff]  ;;  %v7525_v20 = vld [vmem:[#allocation3 + $0x58] sm:$0xff] }
 0xb0c   :  { %3556 = vmatprep.subr.bf16.mxu1 %v7344_v30  ;;  %3597 = vmatprep.subr.bf16.mxu0 %v7346_v43  ;;  %v7523_v43 = vld [vmem:[#allocation3 + $0x48] sm:$0xff]  ;;  %v7531_v30 = vld [vmem:[#allocation3 + $0x40] sm:$0xff] }
 0xb0f   :  { %3557 = vmatpush1.bf16.msra.mxu1 %v7352_v36  ;;  %3598 = vmatpush1.bf16.msra.mxu0 %v7354_v53  ;;  %v7533_v36 = vld [vmem:[#allocation3 + $0x50] sm:$0xff]  ;;  %v7535_v53 = vld [vmem:[#allocation3 + $0x88] sm:$0xff] }
 0xb10   :  { %3824 = vmatprep.subr.bf16.mxu1 %v7513_v52  ;;  %3865 = vmatprep.subr.bf16.mxu0 %v7515_v38 }
 0xb12   :  { %3559 = vmatmul.mubr.bf16.vlgmr.msra.gmra.mrb[56].mxu1 %v7445_v23  ;;  %3600 = vmatmul.mubr.bf16.vlgmr.msra.gmra.mrb[60].mxu0 %v7445_v23  ;;  %v7559_v23 = vld [vmem:[#allocation3 + $0x108] sm:$0xff] }
 0xb13   :  { %3825 = vmatpush1.bf16.msra.mxu1 %v7517_v5  ;;  %3866 = vmatpush1.bf16.msra.mxu0 %v7521_v55 }
 0xb14   :  { %3826 = vmatprep.subr.bf16.mxu1 %v7523_v43  ;;  %3867 = vmatprep.subr.bf16.mxu0 %v7525_v20 }
 0xb17   :  { %3827 = vmatpush1.bf16.msra.mxu1 %v7531_v30  ;;  %3868 = vmatpush1.bf16.msra.mxu0 %v7533_v36 }
 0xb18   :  { %3828 = vmatprep.subr.bf16.mxu1 %v7535_v53  ;;  %3869 = vmatprep.subr.bf16.mxu0 %v7537_v62 }
 0xb1b   :  { %3829 = vmatpush1.bf16.msra.mxu1 %v7543_v50  ;;  %3870 = vmatpush1.bf16.msra.mxu0 %v7545_v39 }
 0xb1c   :  { %3830 = vmatprep.subr.bf16.mxu1 %v7547_v45  ;;  %3871 = vmatprep.subr.bf16.mxu0 %v7549_v49 }
 0xb1f   :  { %3831 = vmatpush1.bf16.msra.mxu1 %v7555_v9  ;;  %3872 = vmatpush1.bf16.msra.mxu0 %v7557_v35 }
 0xb20   :  { %3832 = vmatprep.subr.bf16.mxu1 %v7559_v23  ;;  %3873 = vmatprep.subr.bf16.mxu0 %v7561_v54 }
 0xb23   :  { %3833 = vmatpush1.bf16.msra.mxu1 %v7567_v8  ;;  %3874 = vmatpush1.bf16.msra.mxu0 %v7569_v2 }
 0xb24   :  { %3834 = vmatprep.subr.bf16.mxu1 %v7571_v19  ;;  %3875 = vmatprep.subr.bf16.mxu0 %v7573_v24 }
 0xb27   :  { %3835 = vmatpush1.bf16.msra.mxu1 %v7579_v14  ;;  %3876 = vmatpush1.bf16.msra.mxu0 %v7581_v13 }
 0xb28   :  { %3836 = vmatprep.subr.bf16.mxu1 %v7585_v25  ;;  %3877 = vmatprep.subr.bf16.mxu0 %v7587_v1 }
 0xb2b   :  { %3837 = vmatpush1.bf16.msra.mxu1 %v7591_v15  ;;  %3878 = vmatpush1.bf16.msra.mxu0 %v7593_v0 }
 0xb2c   :  { %3838 = vmatprep.subr.bf16.mxu1 %v7597_v17  ;;  %3879 = vmatprep.subr.bf16.mxu0 %v7599_v51 }
 0xb2f   :  { %3839 = vmatpush1.bf16.msra.mxu1 %v7603_v3  ;;  %3880 = vmatpush1.bf16.msra.mxu0 %v7605_v18 }
 0xb30   :  { %3840 = vmatprep.subr.bf16.mxu1 %v7609_v46  ;;  %3881 = vmatprep.subr.bf16.mxu0 %v7611_v10 }
 0xb33   :  { %3841 = vmatpush1.bf16.msra.mxu1 %v7615_v31  ;;  %3882 = vmatpush1.bf16.msra.mxu0 %v7617_v26 }
 0xb34   :  { %3842 = vmatprep.subr.bf16.mxu1 %v7621_v48  ;;  %3883 = vmatprep.subr.bf16.mxu0 %v7623_v6 }
 0xb37   :  { %3843 = vmatpush1.bf16.msra.mxu1 %v7627_v47  ;;  %3884 = vmatpush1.bf16.msra.mxu0 %v7629_v44 }
 0xb38   :  { %3844 = vmatprep.subr.bf16.mxu1 %v7633_v42  ;;  %3885 = vmatprep.subr.bf16.mxu0 %v7635_v27 }
 0xb3b   :  { %3845 = vmatpush1.bf16.msra.mxu1 %v7639_v28  ;;  %3886 = vmatpush1.bf16.msra.mxu0 %v7641_v29 }
 0xb3c   :  { %3846 = vmatprep.subr.bf16.mxu1 %v7645_v33  ;;  %3887 = vmatprep.subr.bf16.mxu0 %v7647_v34 }
 0xb3f   :  { %3847 = vmatpush1.bf16.msra.mxu1 %v7651_v37  ;;  %3888 = vmatpush1.bf16.msra.mxu0 %v7653_v22 }
 0xb40   :  { %3848 = vmatprep.subr.bf16.mxu1 %v7657_v11  ;;  %3889 = vmatprep.subr.bf16.mxu0 %v7659_v41  ;;  %v7679_v41 = vld [vmem:[#allocation3 + $0x388] sm:$0xff]  ;;  %v7681_v11 = vld [vmem:[#allocation3 + $0x398] sm:$0xff] }
 0xb41   :  { %8927 = vst [vmem:[#allocation55_spill] sm:$0xff] %v7679_v41  ;;  %8928 = vst [vmem:[#allocation56_spill] sm:$0xff] %v7681_v11 }
 0xb43   :  { %3849 = vmatpush1.bf16.msra.mxu1 %v7663_v60  ;;  %3890 = vmatpush1.bf16.msra.mxu0 %v7665_v4  ;;  %v7687_v4 = vld [vmem:[#allocation3 + $0x380] sm:$0xff]  ;;  %v7693_v60 = vld [vmem:[#allocation3 + $0x3d8] sm:$0xff] }
 0xb44   :  { %3850 = vmatprep.subr.bf16.mxu1 %v7667_v16  ;;  %3891 = vmatprep.subr.bf16.mxu0 %v7669_v57  ;;  %8929 = vst [vmem:[#allocation57_spill] sm:$0xff] %v7687_v4  ;;  %v7689_v16 = vld [vmem:[#allocation3 + $0x390] sm:$0xff]  ;;  %v7691_v57 = vld [vmem:[#allocation3 + $0x3c8] sm:$0xff]  ;;  %8932 = vst [vmem:[#allocation60_spill] sm:$0xff] %v7693_v60 }
 0xb45   :  { %8930 = vst [vmem:[#allocation58_spill] sm:$0xff] %v7689_v16  ;;  %8931 = vst [vmem:[#allocation59_spill] sm:$0xff] %v7691_v57 }
 0xb47   :  { %3851 = vmatpush1.bf16.msra.mxu1 %v7675_v12  ;;  %3892 = vmatpush1.bf16.msra.mxu0 %v7677_v56  ;;  %v7699_v56 = vld [vmem:[#allocation3 + $0x3c0] sm:$0xff]  ;;  %v7707_v12 = vld [vmem:[#allocation3 + $0x38] sm:$0xff] }
 0xb48   :  { %3852 = vmatprep.subr.bf16.mxu1 %v7679_v41  ;;  %3893 = vmatprep.subr.bf16.mxu0 %v7681_v11  ;;  %8933 = vst [vmem:[#allocation61_spill] sm:$0xff] %v7699_v56  ;;  %v7701_v41 = vld [vmem:[#allocation3 + $0x3d0] sm:$0xff]  ;;  %v7705_v11 = vld [vmem:[#allocation3 + $0x28] sm:$0xff]  ;;  %8936 = vst [vmem:[#allocation64_spill] sm:$0xff] %v7707_v12 }
 0xb49   :  { %8934 = vst [vmem:[#allocation62_spill] sm:$0xff] %v7701_v41  ;;  %8935 = vst [vmem:[#allocation63_spill] sm:$0xff] %v7705_v11 }
 0xb4b   :  { %3853 = vmatpush1.bf16.msra.mxu1 %v7687_v4  ;;  %3894 = vmatpush1.bf16.msra.mxu0 %v7689_v16 }
 0xb4c   :  { %3854 = vmatprep.subr.bf16.mxu1 %v7691_v57  ;;  %3895 = vmatprep.subr.bf16.mxu0 %v7693_v60 }
 0xb4f   :  { %3855 = vmatpush1.bf16.msra.mxu1 %v7699_v56  ;;  %3896 = vmatpush1.bf16.msra.mxu0 %v7701_v41 }
 0xb50   :  { %3906 = vmatprep.subr.bf16.mxu1 %v7705_v11  ;;  %3947 = vmatprep.subr.bf16.mxu0 %v7707_v12  ;;  %v3625_v11 = vld [vmem:[#allocation2 + $0x6] ss:$8 sm:$0xf] }
 0xba5   :  { %v3478_v16 = vpop.f32.mrb[52].mxu1  ;;  %v3519_v57 = vpop.f32.mrb[56].mxu0 }
 0xba6   :  { %v3480_v4 = vpop.f32.mrb[53].mxu1  ;;  %v3521_v60 = vpop.f32.mrb[57].mxu0  ;;  %v3612_v12 = vrot.slane %v3478_v16, 1  ;;  %v3614_v47 = vrot.slane %v3519_v57, 1 }
 0xba7   :  { %v3626_v22 = vcombine.low %v3478_v16, %v3480_v4  ;;  %v3627_v37 = vcombine.low %v3519_v57, %v3521_v60  ;;  %v3482_v34 = vpop.f32.mrb[54].mxu1  ;;  %v3523_v33 = vpop.f32.mrb[58].mxu0  ;;  %v3613_v48 = vrot.slane %v3480_v4, 1  ;;  %v3615_v26 = vrot.slane %v3521_v60, 1 }
 0xba8   :  { %v3483_v29 = vpop.f32.mrb[55].mxu1  ;;  %v3524_v56 = vpop.f32.mrb[59].mxu0 }
 0xba9   :  { %v3634_v41 = vrot.slane %v3626_v22, %v6283_v32  ;;  %v3641_v28 = vrot.slane %v3627_v37, %v6283_v32 }
 0xbab   :  { %v3642_v27 = vcombine.low %v3634_v41, %v3641_v28 }
 0xbad   :  { %v3649_v42 = vrot.slane %v3642_v27, %v6283_v32 }
 0xbaf   :  { %v3651_v44 = vadd.f32 %v3649_v42, %v3625_v11 }
 0xbb1   :  { %5275 = vtanh.f32 %v3651_v44 }
 0xbbb   :  { %v5276_v6 = vpop.eup %5275 }
 0xbbc   :  { %v3653_v44 = vmul.f32 0.5, %v5276_v6 }
 0xbbe   :  { %v3654_v4 = vadd.f32 0.5, %v3653_v44 }
 0xbe5   :  { %v3560_v31 = vpop.f32.mrb[56].mxu1  ;;  %v3601_v34 = vpop.f32.mrb[60].mxu0 }
 0xbe6   :  { %v3620_v33 = vadd.f32 %v3612_v12, %v3560_v31  ;;  %v3622_v29 = vadd.f32 %v3614_v47, %v3601_v34  ;;  %v3562_v56 = vpop.f32.mrb[57].mxu1  ;;  %v3603_v10 = vpop.f32.mrb[61].mxu0  ;;  %v3656_v31 = vrot.slane %v3654_v4, 1 }
 0xbe7   :  { %v3621_v22 = vadd.f32 %v3613_v48, %v3562_v56  ;;  %v3623_v46 = vadd.f32 %v3615_v26, %v3603_v10  ;;  %v3564_v37 = vpop.f32.mrb[58].mxu1  ;;  %v3605_v28 = vpop.f32.mrb[62].mxu0  ;;  %v3660_v26 = vrot.slane %v5276_v6, 3 }
 0xbe8   :  { %v3668_v27 = vadd.f32 %v3620_v33, %v6292_v58  ;;  %v3565_v41 = vpop.f32.mrb[59].mxu1  ;;  %v3606_v42 = vpop.f32.mrb[63].mxu0  ;;  %v3670_v47 = vadd.f32 %v3622_v29, %v6307_v21  ;;  %v3658_v10 = vmul.f32 %v3656_v31, %v7434_v40 }
 0xbe9   :  { %v3669_v11 = vadd.f32 %v3621_v22, %v6296_v7  ;;  %v3671_v60 = vadd.f32 %v3623_v46, %v6300_v61  ;;  %v3662_v12 = vmul.f32 %v3660_v26, %v3654_v4  ;;  %v3665_v41 = vrot.slane %v3654_v4, 2  ;;  %v7730_v26 = vld [vmem:[#allocation3 + $0x30] sm:$0xff] }
 0xbea   :  { %5277 = vtanh.f32 %v3668_v27 }
 0xbeb   :  { %5279 = vtanh.f32 %v3669_v11  ;;  %v7719_v22 = vadd.f32 %v3662_v12, %v3658_v10  ;;  %v7728_v10 = vld [vmem:[#allocation3 + $0x20] sm:$0xff] }
 0xbec   :  { %5281 = vtanh.f32 %v3671_v60  ;;  %v7744_v12 = vld [vmem:[#allocation3 + $0x60] sm:$0xff] }
 0xbed   :  { %5283 = vtanh.f32 %v3670_v47 }
 0xbee   :  { %5285 = vtanh.f32 %v7719_v22 }
 0xbf4   :  { %v5278_v48 = vpop.eup %5277 }
 0xbf5   :  { %v3676_v16 = vmul.f32 0.5, %v5278_v48  ;;  %v5280_v57 = vpop.eup %5279 }
 0xbf6   :  { %v3677_v33 = vmul.f32 0.5, %v5280_v57  ;;  %v5282_v56 = vpop.eup %5281  ;;  %v7740_v57 = vld [vmem:[#allocation3 + $0x78] sm:$0xff] }
 0xbf7   :  { %v3679_v34 = vadd.f32 0.5, %v3676_v16  ;;  %v5284_v40 = vpop.eup %5283  ;;  %v7738_v16 = vld [vmem:[#allocation3 + $0x68] sm:$0xff] }
 0xbf8   :  { %v3680_v46 = vadd.f32 0.5, %v3677_v33  ;;  %v3678_v6 = vmul.f32 0.5, %v5284_v40  ;;  %v5286_v27 = vpop.eup %5285  ;;  %v7750_v33 = vld [vmem:[#allocation3 + $0xa8] sm:$0xff]  ;;  %v7764_v40 = vld [vmem:[#allocation3 + $0xf8] sm:$0xff] }
 0xbf9   :  { %v3683_v37 = vmul.f32 %v5282_v56, %v3679_v34  ;;  %v3667_v11 = vmul.f32 %v5286_v27, %v3665_v41  ;;  %v7746_v34 = vld [vmem:[#allocation3 + $0x70] sm:$0xff]  ;;  %v7752_v56 = vld [vmem:[#allocation3 + $0xb8] sm:$0xff]  ;;  %v7774_v41 = vld [vmem:[#allocation3 + $0x128] sm:$0xff] }
 0xbfa   :  { %v3682_v28 = vmul.f32 %v3680_v46, %v7438_v59  ;;  %v3681_v42 = vadd.f32 0.5, %v3678_v6  ;;  %v7758_v46 = vld [vmem:[#allocation3 + $0xa0] sm:$0xff]  ;;  %v7772_v27 = vld [vmem:[#allocation3 + $0xf0] sm:$0xff] }
 0xbfb   :  { %v3688_v47 = vpack.c.bf16 %v3667_v11, %v3667_v11  ;;  %v7770_v6 = vld [vmem:[#allocation3 + $0xe0] sm:$0xff]  ;;  %v7784_v11 = vld [vmem:[#allocation3 + $0x130] sm:$0xff] }
 0xbfc   :  { %v7723_v29 = vadd.f32 %v3683_v37, %v3682_v28  ;;  %v7760_v37 = vld [vmem:[#allocation3 + $0xb0] sm:$0xff]  ;;  %v7762_v28 = vld [vmem:[#allocation3 + $0xe8] sm:$0xff]  ;;  %8939 = vst [vmem:[#allocation67_spill] sm:$0xff] %v7784_v11 }
 0xbfd   :  { %v7734_v4 = vsel %vm6008_vm3, %v3688_v47, 0  ;;  %v7794_v47 = vld [vmem:[#allocation3 + $0x160] sm:$0xff] }
 0xbfe   :  { %5287 = vtanh.f32 %v7723_v29  ;;  %8942 = vst [vmem:[#allocation70_spill] sm:$0xff] %v7794_v47 }
 0xc08   :  { %v5288_v44 = vpop.eup %5287 }
 0xc09   :  { %v3686_v60 = vmul.f32 %v5288_v44, %v3681_v42  ;;  %v7776_v42 = vld [vmem:[#allocation3 + $0x138] sm:$0xff]  ;;  %v7782_v44 = vld [vmem:[#allocation3 + $0x120] sm:$0xff] }
 0xc0a   :  { %8937 = vst [vmem:[#allocation65_spill] sm:$0xff] %v7776_v42  ;;  %8938 = vst [vmem:[#allocation66_spill] sm:$0xff] %v7782_v44 }
 0xc0b   :  { %3687 = vst [vmem:[#allocation16 + $0x5] sm:$0x1] %v3686_v60  ;;  %v3689_v31 = vpack.c.bf16 %v3686_v60, %v3686_v60  ;;  %v7786_v60 = vld [vmem:[#allocation3 + $0x168] sm:$0xff] }
 0xc0c   :  { %8940 = vst [vmem:[#allocation68_spill] sm:$0xff] %v7786_v60 }
 0xc0d   :  { %v3691_v48 = vshll.u32 %v3689_v31, 16  ;;  %v7788_v31 = vld [vmem:[#allocation3 + $0x178] sm:$0xff] }
 0xc0e   :  { %8941 = vst [vmem:[#allocation69_spill] sm:$0xff] %v7788_v31 }
 0xc0f   :  { %v3695_v59 = vsel %vm6008_vm3, 0, %v3691_v48  ;;  %v7796_v48 = vld [vmem:[#allocation3 + $0x170] sm:$0xff] }
 0xc10   :  { %3856 = vmatprep.mubr.bf16.mxu1 %v3695_v59  ;;  %3897 = vmatprep.mubr.bf16.mxu0 %v3695_v59  ;;  %8943 = vst [vmem:[#allocation71_spill] sm:$0xff] %v7796_v48 }
 0xc11   :  { %3857 = vmatmul.mubr.bf16.vlgmr.msra.gmra.mrb[60].mxu1 %v7734_v4  ;;  %3898 = vmatmul.mubr.bf16.vlgmr.msra.gmra.mrb[64].mxu0 %v7734_v4  ;;  %v9010_v63 = vld [vmem:[#allocation65_spill] sm:$0xff] }
 0xc12   :  { %3907 = vmatpush1.bf16.msra.mxu1 %v7728_v10  ;;  %3948 = vmatpush1.bf16.msra.mxu0 %v7730_v26 }
 0xc13   :  { %3938 = vmatprep.mubr.bf16.mxu1 %v3695_v59  ;;  %3979 = vmatprep.mubr.bf16.mxu0 %v3695_v59  ;;  %v7798_v59 = vld [vmem:[#allocation3 + $0x1a8] sm:$0xff] }
 0xc14   :  { %3908 = vmatprep.subr.bf16.mxu1 %v7738_v16  ;;  %3949 = vmatprep.subr.bf16.mxu0 %v7740_v57  ;;  %8944 = vst [vmem:[#allocation72_spill] sm:$0xff] %v7798_v59 }
 0xc16   :  { %3909 = vmatpush1.bf16.msra.mxu1 %v7744_v12  ;;  %3950 = vmatpush1.bf16.msra.mxu0 %v7746_v34 }
 0xc17   :  { %3910 = vmatprep.subr.bf16.mxu1 %v7750_v33  ;;  %3951 = vmatprep.subr.bf16.mxu0 %v7752_v56 }
 0xc1a   :  { %3911 = vmatpush1.bf16.msra.mxu1 %v7758_v46  ;;  %3952 = vmatpush1.bf16.msra.mxu0 %v7760_v37 }
 0xc1b   :  { %3912 = vmatprep.subr.bf16.mxu1 %v7762_v28  ;;  %3953 = vmatprep.subr.bf16.mxu0 %v7764_v40 }
 0xc1e   :  { %3913 = vmatpush1.bf16.msra.mxu1 %v7770_v6  ;;  %3954 = vmatpush1.bf16.msra.mxu0 %v7772_v27 }
 0xc1f   :  { %3914 = vmatprep.subr.bf16.mxu1 %v7774_v41  ;;  %3955 = vmatprep.subr.bf16.mxu0 %v7776_v42  ;;  %v7800_v42 = vld [vmem:[#allocation3 + $0x1b8] sm:$0xff] }
 0xc20   :  { %8945 = vst [vmem:[#allocation73_spill] sm:$0xff] %v7800_v42 }
 0xc22   :  { %3915 = vmatpush1.bf16.msra.mxu1 %v7782_v44  ;;  %3956 = vmatpush1.bf16.msra.mxu0 %v7784_v11  ;;  %v7806_v11 = vld [vmem:[#allocation3 + $0x1a0] sm:$0xff]  ;;  %v7812_v44 = vld [vmem:[#allocation3 + $0x1f8] sm:$0xff] }
 0xc23   :  { %3916 = vmatprep.subr.bf16.mxu1 %v7786_v60  ;;  %3957 = vmatprep.subr.bf16.mxu0 %v7788_v31  ;;  %8946 = vst [vmem:[#allocation74_spill] sm:$0xff] %v7806_v11  ;;  %v7808_v60 = vld [vmem:[#allocation3 + $0x1b0] sm:$0xff]  ;;  %v7810_v31 = vld [vmem:[#allocation3 + $0x1e8] sm:$0xff]  ;;  %8949 = vst [vmem:[#allocation77_spill] sm:$0xff] %v7812_v44 }
 0xc24   :  { %8947 = vst [vmem:[#allocation75_spill] sm:$0xff] %v7808_v60  ;;  %8948 = vst [vmem:[#allocation76_spill] sm:$0xff] %v7810_v31 }
 0xc26   :  { %3917 = vmatpush1.bf16.msra.mxu1 %v7794_v47  ;;  %3958 = vmatpush1.bf16.msra.mxu0 %v7796_v48  ;;  %v7818_v48 = vld [vmem:[#allocation3 + $0x1e0] sm:$0xff]  ;;  %v7824_v47 = vld [vmem:[#allocation3 + $0x238] sm:$0xff] }
 0xc27   :  { %3918 = vmatprep.subr.bf16.mxu1 %v7798_v59  ;;  %3959 = vmatprep.subr.bf16.mxu0 %v7800_v42  ;;  %8950 = vst [vmem:[#allocation78_spill] sm:$0xff] %v7818_v48  ;;  %v7820_v59 = vld [vmem:[#allocation3 + $0x1f0] sm:$0xff]  ;;  %v7822_v42 = vld [vmem:[#allocation3 + $0x228] sm:$0xff]  ;;  %8953 = vst [vmem:[#allocation81_spill] sm:$0xff] %v7824_v47 }
 0xc28   :  { %8951 = vst [vmem:[#allocation79_spill] sm:$0xff] %v7820_v59  ;;  %8952 = vst [vmem:[#allocation80_spill] sm:$0xff] %v7822_v42 }
 0xc2a   :  { %3919 = vmatpush1.bf16.msra.mxu1 %v7806_v11  ;;  %3960 = vmatpush1.bf16.msra.mxu0 %v7808_v60  ;;  %v7830_v60 = vld [vmem:[#allocation3 + $0x220] sm:$0xff]  ;;  %v7836_v11 = vld [vmem:[#allocation3 + $0x278] sm:$0xff] }
 0xc2b   :  { %3920 = vmatprep.subr.bf16.mxu1 %v7810_v31  ;;  %3961 = vmatprep.subr.bf16.mxu0 %v7812_v44  ;;  %8954 = vst [vmem:[#allocation82_spill] sm:$0xff] %v7830_v60  ;;  %v7832_v31 = vld [vmem:[#allocation3 + $0x230] sm:$0xff]  ;;  %v7834_v44 = vld [vmem:[#allocation3 + $0x268] sm:$0xff]  ;;  %8957 = vst [vmem:[#allocation85_spill] sm:$0xff] %v7836_v11 }
 0xc2c   :  { %8955 = vst [vmem:[#allocation83_spill] sm:$0xff] %v7832_v31  ;;  %8956 = vst [vmem:[#allocation84_spill] sm:$0xff] %v7834_v44 }
 0xc2e   :  { %3921 = vmatpush1.bf16.msra.mxu1 %v7818_v48  ;;  %3962 = vmatpush1.bf16.msra.mxu0 %v7820_v59  ;;  %v7842_v59 = vld [vmem:[#allocation3 + $0x260] sm:$0xff]  ;;  %v7848_v48 = vld [vmem:[#allocation3 + $0x2b8] sm:$0xff] }
 0xc2f   :  { %3922 = vmatprep.subr.bf16.mxu1 %v7822_v42  ;;  %3963 = vmatprep.subr.bf16.mxu0 %v7824_v47  ;;  %8958 = vst [vmem:[#allocation86_spill] sm:$0xff] %v7842_v59  ;;  %v7844_v42 = vld [vmem:[#allocation3 + $0x270] sm:$0xff]  ;;  %v7846_v47 = vld [vmem:[#allocation3 + $0x2a8] sm:$0xff]  ;;  %8961 = vst [vmem:[#allocation89_spill] sm:$0xff] %v7848_v48 }
 0xc30   :  { %8959 = vst [vmem:[#allocation87_spill] sm:$0xff] %v7844_v42  ;;  %8960 = vst [vmem:[#allocation88_spill] sm:$0xff] %v7846_v47 }
 0xc32   :  { %3923 = vmatpush1.bf16.msra.mxu1 %v7830_v60  ;;  %3964 = vmatpush1.bf16.msra.mxu0 %v7832_v31  ;;  %v7854_v31 = vld [vmem:[#allocation3 + $0x2a0] sm:$0xff]  ;;  %v7860_v60 = vld [vmem:[#allocation3 + $0x2f8] sm:$0xff] }
 0xc33   :  { %3924 = vmatprep.subr.bf16.mxu1 %v7834_v44  ;;  %3965 = vmatprep.subr.bf16.mxu0 %v7836_v11  ;;  %8962 = vst [vmem:[#allocation90_spill] sm:$0xff] %v7854_v31  ;;  %v7856_v44 = vld [vmem:[#allocation3 + $0x2b0] sm:$0xff]  ;;  %v7858_v11 = vld [vmem:[#allocation3 + $0x2e8] sm:$0xff]  ;;  %8965 = vst [vmem:[#allocation93_spill] sm:$0xff] %v7860_v60 }
 0xc34   :  { %8963 = vst [vmem:[#allocation91_spill] sm:$0xff] %v7856_v44  ;;  %8964 = vst [vmem:[#allocation92_spill] sm:$0xff] %v7858_v11 }
 0xc36   :  { %3925 = vmatpush1.bf16.msra.mxu1 %v7842_v59  ;;  %3966 = vmatpush1.bf16.msra.mxu0 %v7844_v42  ;;  %v7866_v42 = vld [vmem:[#allocation3 + $0x2e0] sm:$0xff]  ;;  %v7872_v59 = vld [vmem:[#allocation3 + $0x338] sm:$0xff] }
 0xc37   :  { %3926 = vmatprep.subr.bf16.mxu1 %v7846_v47  ;;  %3967 = vmatprep.subr.bf16.mxu0 %v7848_v48  ;;  %8966 = vst [vmem:[#allocation94_spill] sm:$0xff] %v7866_v42  ;;  %v7868_v47 = vld [vmem:[#allocation3 + $0x2f0] sm:$0xff]  ;;  %v7870_v48 = vld [vmem:[#allocation3 + $0x328] sm:$0xff]  ;;  %8969 = vst [vmem:[#allocation97_spill] sm:$0xff] %v7872_v59 }
 0xc38   :  { %8967 = vst [vmem:[#allocation95_spill] sm:$0xff] %v7868_v47  ;;  %8968 = vst [vmem:[#allocation96_spill] sm:$0xff] %v7870_v48 }
 0xc3a   :  { %3927 = vmatpush1.bf16.msra.mxu1 %v7854_v31  ;;  %3968 = vmatpush1.bf16.msra.mxu0 %v7856_v44  ;;  %v7878_v44 = vld [vmem:[#allocation3 + $0x320] sm:$0xff]  ;;  %v7884_v31 = vld [vmem:[#allocation3 + $0x378] sm:$0xff] }
 0xc3b   :  { %3928 = vmatprep.subr.bf16.mxu1 %v7858_v11  ;;  %3969 = vmatprep.subr.bf16.mxu0 %v7860_v60  ;;  %8970 = vst [vmem:[#allocation98_spill] sm:$0xff] %v7878_v44  ;;  %v7880_v11 = vld [vmem:[#allocation3 + $0x330] sm:$0xff]  ;;  %v7882_v60 = vld [vmem:[#allocation3 + $0x368] sm:$0xff]  ;;  %8973 = vst [vmem:[#allocation101_spill] sm:$0xff] %v7884_v31 }
 0xc3c   :  { %8971 = vst [vmem:[#allocation99_spill] sm:$0xff] %v7880_v11  ;;  %8972 = vst [vmem:[#allocation100_spill] sm:$0xff] %v7882_v60 }
 0xc3e   :  { %3929 = vmatpush1.bf16.msra.mxu1 %v7866_v42  ;;  %3970 = vmatpush1.bf16.msra.mxu0 %v7868_v47  ;;  %v7890_v47 = vld [vmem:[#allocation3 + $0x360] sm:$0xff]  ;;  %v7896_v42 = vld [vmem:[#allocation3 + $0x3b8] sm:$0xff] }
 0xc3f   :  { %3930 = vmatprep.subr.bf16.mxu1 %v7870_v48  ;;  %3971 = vmatprep.subr.bf16.mxu0 %v7872_v59  ;;  %v7892_v48 = vld [vmem:[#allocation3 + $0x370] sm:$0xff]  ;;  %v7894_v59 = vld [vmem:[#allocation3 + $0x3a8] sm:$0xff] }
 0xc40   :  { %8974 = vst [vmem:[#allocation102_spill] sm:$0xff] %v7892_v48  ;;  %8975 = vst [vmem:[#allocation103_spill] sm:$0xff] %v7894_v59 }
 0xc42   :  { %3931 = vmatpush1.bf16.msra.mxu1 %v7878_v44  ;;  %3972 = vmatpush1.bf16.msra.mxu0 %v7880_v11  ;;  %v7902_v11 = vld [vmem:[#allocation3 + $0x3a0] sm:$0xff]  ;;  %v7908_v44 = vld [vmem:[#allocation3 + $0x3f8] sm:$0xff] }
 0xc43   :  { %3932 = vmatprep.subr.bf16.mxu1 %v7882_v60  ;;  %3973 = vmatprep.subr.bf16.mxu0 %v7884_v31  ;;  %v7904_v60 = vld [vmem:[#allocation3 + $0x3b0] sm:$0xff]  ;;  %v7906_v31 = vld [vmem:[#allocation3 + $0x3e8] sm:$0xff] }
 0xc46   :  { %3933 = vmatpush1.bf16.msra.mxu1 %v7890_v47  ;;  %3974 = vmatpush1.bf16.msra.mxu0 %v7892_v48  ;;  %v7914_v48 = vld [vmem:[#allocation3 + $0x3e0] sm:$0xff] }
 0xc47   :  { %3934 = vmatprep.subr.bf16.mxu1 %v7894_v59  ;;  %3975 = vmatprep.subr.bf16.mxu0 %v7896_v42  ;;  %v7916_v59 = vld [vmem:[#allocation3 + $0x3f0] sm:$0xff] }
 0xc4a   :  { %3935 = vmatpush1.bf16.msra.mxu1 %v7902_v11  ;;  %3976 = vmatpush1.bf16.msra.mxu0 %v7904_v60 }
 0xc4b   :  { %3936 = vmatprep.subr.bf16.mxu1 %v7906_v31  ;;  %3977 = vmatprep.subr.bf16.mxu0 %v7908_v44 }
 0xc4e   :  { %3937 = vmatpush1.bf16.msra.mxu1 %v7914_v48  ;;  %3978 = vmatpush1.bf16.msra.mxu0 %v7916_v59 }
 0xc4f   :  { %4204 = vmatprep.subr.bf16.mxu1 %v7513_v52  ;;  %4245 = vmatprep.subr.bf16.mxu0 %v7515_v38  ;;  %v8976_v52 = vld [vmem:[#allocation33_spill] sm:$0xff]  ;;  %v8977_v38 = vld [vmem:[#allocation34_spill] sm:$0xff] }
 0xc51   :  { %3939 = vmatmul.mubr.bf16.vlgmr.msra.gmra.mrb[64].mxu1 %v7734_v4  ;;  %3980 = vmatmul.mubr.bf16.vlgmr.msra.gmra.mrb[68].mxu0 %v7734_v4  ;;  %v9008_v4 = vld [vmem:[#allocation63_spill] sm:$0xff] }
 0xc52   :  { %4205 = vmatpush1.bf16.msra.mxu1 %v7517_v5  ;;  %4246 = vmatpush1.bf16.msra.mxu0 %v7521_v55  ;;  %v8978_v5 = vld [vmem:[#allocation35_spill] sm:$0xff]  ;;  %v8979_v55 = vld [vmem:[#allocation36_spill] sm:$0xff] }
 0xc53   :  { %4206 = vmatprep.subr.bf16.mxu1 %v7523_v43  ;;  %4247 = vmatprep.subr.bf16.mxu0 %v7525_v20  ;;  %v8980_v43 = vld [vmem:[#allocation37_spill] sm:$0xff]  ;;  %v8981_v20 = vld [vmem:[#allocation38_spill] sm:$0xff] }
 0xc56   :  { %4207 = vmatpush1.bf16.msra.mxu1 %v7531_v30  ;;  %4248 = vmatpush1.bf16.msra.mxu0 %v7533_v36  ;;  %v8982_v30 = vld [vmem:[#allocation39_spill] sm:$0xff]  ;;  %v8983_v36 = vld [vmem:[#allocation40_spill] sm:$0xff] }
 0xc57   :  { %4208 = vmatprep.subr.bf16.mxu1 %v7535_v53  ;;  %4249 = vmatprep.subr.bf16.mxu0 %v7537_v62  ;;  %v8984_v53 = vld [vmem:[#allocation41_spill] sm:$0xff]  ;;  %v8985_v62 = vld [vmem:[#allocation42_spill] sm:$0xff] }
 0xc5a   :  { %4209 = vmatpush1.bf16.msra.mxu1 %v7543_v50  ;;  %4250 = vmatpush1.bf16.msra.mxu0 %v7545_v39  ;;  %v8986_v50 = vld [vmem:[#allocation44_spill] sm:$0xff]  ;;  %v8987_v39 = vld [vmem:[#allocation45_spill] sm:$0xff] }
 0xc5b   :  { %4210 = vmatprep.subr.bf16.mxu1 %v7547_v45  ;;  %4251 = vmatprep.subr.bf16.mxu0 %v7549_v49  ;;  %v8988_v45 = vld [vmem:[#allocation30_spill] sm:$0xff]  ;;  %v8989_v49 = vld [vmem:[#allocation32_spill] sm:$0xff] }
 0xc5e   :  { %4211 = vmatpush1.bf16.msra.mxu1 %v7555_v9  ;;  %4252 = vmatpush1.bf16.msra.mxu0 %v7557_v35  ;;  %v8990_v9 = vld [vmem:[#allocation43_spill] sm:$0xff]  ;;  %v8991_v35 = vld [vmem:[#allocation46_spill] sm:$0xff] }
 0xc5f   :  { %4212 = vmatprep.subr.bf16.mxu1 %v7559_v23  ;;  %4253 = vmatprep.subr.bf16.mxu0 %v7561_v54  ;;  %v8992_v23 = vld [vmem:[#allocation47_spill] sm:$0xff]  ;;  %v8993_v54 = vld [vmem:[#allocation48_spill] sm:$0xff] }
 0xc62   :  { %4213 = vmatpush1.bf16.msra.mxu1 %v7567_v8  ;;  %4254 = vmatpush1.bf16.msra.mxu0 %v7569_v2  ;;  %v8994_v8 = vld [vmem:[#allocation49_spill] sm:$0xff]  ;;  %v8995_v2 = vld [vmem:[#allocation50_spill] sm:$0xff] }
 0xc63   :  { %4214 = vmatprep.subr.bf16.mxu1 %v7571_v19  ;;  %4255 = vmatprep.subr.bf16.mxu0 %v7573_v24  ;;  %v8996_v19 = vld [vmem:[#allocation51_spill] sm:$0xff]  ;;  %v8997_v24 = vld [vmem:[#allocation52_spill] sm:$0xff] }
 0xc66   :  { %4215 = vmatpush1.bf16.msra.mxu1 %v7579_v14  ;;  %4256 = vmatpush1.bf16.msra.mxu0 %v7581_v13  ;;  %v8998_v14 = vld [vmem:[#allocation53_spill] sm:$0xff]  ;;  %v8999_v13 = vld [vmem:[#allocation54_spill] sm:$0xff] }
 0xc67   :  { %4216 = vmatprep.subr.bf16.mxu1 %v7585_v25  ;;  %4257 = vmatprep.subr.bf16.mxu0 %v7587_v1  ;;  %v9000_v25 = vld [vmem:[#allocation55_spill] sm:$0xff]  ;;  %v9001_v1 = vld [vmem:[#allocation56_spill] sm:$0xff] }
 0xc6a   :  { %4217 = vmatpush1.bf16.msra.mxu1 %v7591_v15  ;;  %4258 = vmatpush1.bf16.msra.mxu0 %v7593_v0  ;;  %v9002_v15 = vld [vmem:[#allocation57_spill] sm:$0xff]  ;;  %v9003_v0 = vld [vmem:[#allocation58_spill] sm:$0xff] }
 0xc6b   :  { %4218 = vmatprep.subr.bf16.mxu1 %v7597_v17  ;;  %4259 = vmatprep.subr.bf16.mxu0 %v7599_v51  ;;  %v9004_v17 = vld [vmem:[#allocation59_spill] sm:$0xff]  ;;  %v9005_v51 = vld [vmem:[#allocation60_spill] sm:$0xff] }
 0xc6e   :  { %4219 = vmatpush1.bf16.msra.mxu1 %v7603_v3  ;;  %4260 = vmatpush1.bf16.msra.mxu0 %v7605_v18  ;;  %v9006_v3 = vld [vmem:[#allocation61_spill] sm:$0xff]  ;;  %v9007_v18 = vld [vmem:[#allocation62_spill] sm:$0xff] }
 0xc6f   :  { %4220 = vmatprep.subr.bf16.mxu1 %v8976_v52  ;;  %4261 = vmatprep.subr.bf16.mxu0 %v8977_v38  ;;  %v9009_v52 = vld [vmem:[#allocation64_spill] sm:$0xff] }
 0xc72   :  { %4221 = vmatpush1.bf16.msra.mxu1 %v8978_v5  ;;  %4262 = vmatpush1.bf16.msra.mxu0 %v8979_v55 }
 0xc73   :  { %4222 = vmatprep.subr.bf16.mxu1 %v8980_v43  ;;  %4263 = vmatprep.subr.bf16.mxu0 %v8981_v20 }
 0xc76   :  { %4223 = vmatpush1.bf16.msra.mxu1 %v8982_v30  ;;  %4264 = vmatpush1.bf16.msra.mxu0 %v8983_v36 }
 0xc77   :  { %4224 = vmatprep.subr.bf16.mxu1 %v8984_v53  ;;  %4265 = vmatprep.subr.bf16.mxu0 %v8985_v62 }
 0xc7a   :  { %4225 = vmatpush1.bf16.msra.mxu1 %v8986_v50  ;;  %4266 = vmatpush1.bf16.msra.mxu0 %v8987_v39 }
 0xc7b   :  { %4226 = vmatprep.subr.bf16.mxu1 %v8988_v45  ;;  %4267 = vmatprep.subr.bf16.mxu0 %v8989_v49 }
 0xc7e   :  { %4227 = vmatpush1.bf16.msra.mxu1 %v8990_v9  ;;  %4268 = vmatpush1.bf16.msra.mxu0 %v8991_v35  ;;  %v4005_v35 = vld [vmem:[#allocation2 + $0x7] ss:$8 sm:$0xf] }
 0xc7f   :  { %4228 = vmatprep.subr.bf16.mxu1 %v8992_v23  ;;  %4269 = vmatprep.subr.bf16.mxu0 %v8993_v54 }
 0xc82   :  { %4229 = vmatpush1.bf16.msra.mxu1 %v8994_v8  ;;  %4270 = vmatpush1.bf16.msra.mxu0 %v8995_v2 }
 0xc83   :  { %4230 = vmatprep.subr.bf16.mxu1 %v8996_v19  ;;  %4271 = vmatprep.subr.bf16.mxu0 %v8997_v24 }
 0xc86   :  { %4231 = vmatpush1.bf16.msra.mxu1 %v8998_v14  ;;  %4272 = vmatpush1.bf16.msra.mxu0 %v8999_v13 }
 0xc87   :  { %4232 = vmatprep.subr.bf16.mxu1 %v9000_v25  ;;  %4273 = vmatprep.subr.bf16.mxu0 %v9001_v1 }
 0xc8a   :  { %4233 = vmatpush1.bf16.msra.mxu1 %v9002_v15  ;;  %4274 = vmatpush1.bf16.msra.mxu0 %v9003_v0 }
 0xc8b   :  { %4234 = vmatprep.subr.bf16.mxu1 %v9004_v17  ;;  %4275 = vmatprep.subr.bf16.mxu0 %v9005_v51 }
 0xc8e   :  { %4235 = vmatpush1.bf16.msra.mxu1 %v9006_v3  ;;  %4276 = vmatpush1.bf16.msra.mxu0 %v9007_v18 }
 0xc8f   :  { %4286 = vmatprep.subr.bf16.mxu1 %v9008_v4  ;;  %4327 = vmatprep.subr.bf16.mxu0 %v9009_v52 }
 0xce4   :  { %v3858_v38 = vpop.f32.mrb[60].mxu1  ;;  %v3899_v5 = vpop.f32.mrb[64].mxu0 }
 0xce5   :  { %v3860_v55 = vpop.f32.mrb[61].mxu1  ;;  %v3901_v43 = vpop.f32.mrb[65].mxu0  ;;  %v3992_v54 = vrot.slane %v3858_v38, 1  ;;  %v3994_v8 = vrot.slane %v3899_v5, 1 }
 0xce6   :  { %v4006_v20 = vcombine.low %v3858_v38, %v3860_v55  ;;  %v4007_v30 = vcombine.low %v3899_v5, %v3901_v43  ;;  %v3862_v36 = vpop.f32.mrb[62].mxu1  ;;  %v3903_v53 = vpop.f32.mrb[66].mxu0  ;;  %v3993_v19 = vrot.slane %v3860_v55, 1  ;;  %v3995_v24 = vrot.slane %v3901_v43, 1 }
 0xce7   :  { %v3863_v62 = vpop.f32.mrb[63].mxu1  ;;  %v3904_v50 = vpop.f32.mrb[67].mxu0 }
 0xce8   :  { %v4014_v39 = vrot.slane %v4006_v20, %v6283_v32  ;;  %v4021_v45 = vrot.slane %v4007_v30, %v6283_v32 }
 0xcea   :  { %v4022_v49 = vcombine.low %v4014_v39, %v4021_v45 }
 0xcec   :  { %v4029_v9 = vrot.slane %v4022_v49, %v6283_v32 }
 0xcee   :  { %v4031_v23 = vadd.f32 %v4029_v9, %v4005_v35 }
 0xcf0   :  { %5289 = vtanh.f32 %v4031_v23 }
 0xcfa   :  { %v5290_v2 = vpop.eup %5289 }
 0xcfb   :  { %v4033_v20 = vmul.f32 0.5, %v5290_v2  ;;  %v4040_v62 = vrot.slane %v5290_v2, 3 }
 0xcfd   :  { %v4034_v55 = vadd.f32 0.5, %v4033_v20  ;;  %v9029_v20 = vld [vmem:[#allocation84_spill] sm:$0xff] }
 0xcff   :  { %v4036_v43 = vrot.slane %v4034_v55, 1  ;;  %v4042_v45 = vmul.f32 %v4040_v62, %v4034_v55  ;;  %v9037_v62 = vld [vmem:[#allocation92_spill] sm:$0xff] }
 0xd01   :  { %v4038_v53 = vmul.f32 %v4036_v43, %v7719_v22  ;;  %v9033_v43 = vld [vmem:[#allocation88_spill] sm:$0xff] }
 0xd03   :  { %v4043_v23 = vadd.f32 %v4042_v45, %v4038_v53  ;;  %v9036_v53 = vld [vmem:[#allocation91_spill] sm:$0xff] }
 0xd04   :  { %v9040_v45 = vld [vmem:[#allocation95_spill] sm:$0xff] }
 0xd24   :  { %v3940_v14 = vpop.f32.mrb[64].mxu1  ;;  %v3981_v13 = vpop.f32.mrb[68].mxu0 }
 0xd25   :  { %v4000_v25 = vadd.f32 %v3992_v54, %v3940_v14  ;;  %v4002_v1 = vadd.f32 %v3994_v8, %v3981_v13  ;;  %v3942_v15 = vpop.f32.mrb[65].mxu1  ;;  %v3983_v0 = vpop.f32.mrb[69].mxu0  ;;  %v4045_v13 = vrot.slane %v4034_v55, 2  ;;  %v9032_v55 = vld [vmem:[#allocation87_spill] sm:$0xff] }
 0xd26   :  { %v4001_v17 = vadd.f32 %v3993_v19, %v3942_v15  ;;  %v4003_v51 = vadd.f32 %v3995_v24, %v3983_v0  ;;  %v3944_v3 = vpop.f32.mrb[66].mxu1  ;;  %v3985_v18 = vpop.f32.mrb[70].mxu0 }
 0xd27   :  { %v4048_v32 = vadd.f32 %v4000_v25, %v6292_v58  ;;  %v3945_v4 = vpop.f32.mrb[67].mxu1  ;;  %v3986_v52 = vpop.f32.mrb[71].mxu0  ;;  %v4050_v30 = vadd.f32 %v4002_v1, %v6307_v21 }
 0xd28   :  { %v4049_v38 = vadd.f32 %v4001_v17, %v6296_v7  ;;  %v4051_v5 = vadd.f32 %v4003_v51, %v6300_v61  ;;  %v9027_v4 = vld [vmem:[#allocation82_spill] sm:$0xff]  ;;  %v9028_v52 = vld [vmem:[#allocation83_spill] sm:$0xff] }
 0xd29   :  { %5291 = vtanh.f32 %v4048_v32  ;;  %v9026_v32 = vld [vmem:[#allocation81_spill] sm:$0xff] }
 0xd2a   :  { %5293 = vtanh.f32 %v4049_v38  ;;  %v9030_v38 = vld [vmem:[#allocation85_spill] sm:$0xff] }
 0xd2b   :  { %5295 = vtanh.f32 %v4051_v5  ;;  %v9031_v5 = vld [vmem:[#allocation86_spill] sm:$0xff] }
 0xd2c   :  { %5297 = vtanh.f32 %v4050_v30  ;;  %v9034_v30 = vld [vmem:[#allocation89_spill] sm:$0xff] }
 0xd2d   :  { %5299 = vtanh.f32 %v4043_v23  ;;  %v9044_v23 = vld [vmem:[#allocation99_spill] sm:$0xff] }
 0xd33   :  { %v5292_v36 = vpop.eup %5291 }
 0xd34   :  { %v4056_v50 = vmul.f32 0.5, %v5292_v36  ;;  %v5294_v39 = vpop.eup %5293  ;;  %v9035_v36 = vld [vmem:[#allocation90_spill] sm:$0xff] }
 0xd35   :  { %v4057_v9 = vmul.f32 0.5, %v5294_v39  ;;  %v5296_v35 = vpop.eup %5295  ;;  %v9039_v39 = vld [vmem:[#allocation94_spill] sm:$0xff] }
 0xd36   :  { %v4059_v49 = vadd.f32 0.5, %v4056_v50  ;;  %v5298_v14 = vpop.eup %5297  ;;  %v9038_v50 = vld [vmem:[#allocation93_spill] sm:$0xff] }
 0xd37   :  { %v4060_v54 = vadd.f32 0.5, %v4057_v9  ;;  %v4058_v22 = vmul.f32 0.5, %v5298_v14  ;;  %v5300_v2 = vpop.eup %5299  ;;  %v9042_v9 = vld [vmem:[#allocation97_spill] sm:$0xff]  ;;  %v9048_v14 = vld [vmem:[#allocation103_spill] sm:$0xff] }
 0xd38   :  { %v4063_v8 = vmul.f32 %v5296_v35, %v4059_v49  ;;  %v4047_v15 = vmul.f32 %v5300_v2, %v4045_v13  ;;  %v9041_v49 = vld [vmem:[#allocation96_spill] sm:$0xff]  ;;  %v9043_v35 = vld [vmem:[#allocation98_spill] sm:$0xff]  ;;  %v5194_v13 = vld [vmem:[#allocation14 + $0x8] sm:$0xff]  }
 0xd39   :  { %v4062_v19 = vmul.f32 %v4060_v54, %v7723_v29  ;;  %v4061_v25 = vadd.f32 0.5, %v4058_v22  ;;  %v9045_v54 = vld [vmem:[#allocation100_spill] sm:$0xff]  ;;  %v9049_v22 = vmov 0.0   ;;  %v5193_v2 = vld [vmem:[#allocation14] sm:$0xff]  }
 0xd3a   :  { %v4068_v51 = vpack.c.bf16 %v4047_v15, %v4047_v15  ;;  %v5197_v15 = vld [vmem:[#allocation14 + $0x20] sm:$0xff]  }
 0xd3b   :  { %v7997_v24 = vadd.f32 %v4063_v8, %v4062_v19  ;;  %v9046_v8 = vld [vmem:[#allocation101_spill] sm:$0xff]  ;;  %v9047_v19 = vld [vmem:[#allocation102_spill] sm:$0xff] }
 0xd3c   :  { %v8004_v18 = vsel %vm6008_vm3, %v4068_v51, 0 }
 0xd3d   :  { %5301 = vtanh.f32 %v7997_v24 }
 0xd47   :  { %v5302_v1 = vpop.eup %5301 }
 0xd48   :  { %v4066_v0 = vmul.f32 %v5302_v1, %v4061_v25  ;;  %v5195_v25 = vld [vmem:[#allocation14 + $0x10] sm:$0xff]   ;;  %v5196_v1 = vld [vmem:[#allocation14 + $0x18] sm:$0xff]  }
 0xd4a   :  { %4067 = vst [vmem:[#allocation16 + $0x6] sm:$0x1] %v4066_v0  ;;  %v4069_v17 = vpack.c.bf16 %v4066_v0, %v4066_v0 }
 0xd4c   :  { %v4071_v3 = vshll.u32 %v4069_v17, 16 }
 0xd4e   :  { %v4075_v29 = vsel %vm6008_vm3, 0, %v4071_v3 }
 0xd4f   :  { %4236 = vmatprep.mubr.bf16.mxu1 %v4075_v29  ;;  %4277 = vmatprep.mubr.bf16.mxu0 %v4075_v29 }
 0xd50   :  { %4237 = vmatmul.mubr.bf16.vlgmr.msra.gmra.mrb[68].mxu1 %v8004_v18  ;;  %4278 = vmatmul.mubr.bf16.vlgmr.msra.gmra.mrb[72].mxu0 %v8004_v18 }
 0xd51   :  { %4287 = vmatpush1.bf16.msra.mxu1 %v7728_v10  ;;  %4328 = vmatpush1.bf16.msra.mxu0 %v7730_v26  ;;  %v9011_v10 = vld [vmem:[#allocation66_spill] sm:$0xff]  ;;  %v9012_v26 = vld [vmem:[#allocation67_spill] sm:$0xff] }
 0xd52   :  { %4318 = vmatprep.mubr.bf16.mxu1 %v4075_v29  ;;  %4359 = vmatprep.mubr.bf16.mxu0 %v4075_v29 }
 0xd53   :  { %4288 = vmatprep.subr.bf16.mxu1 %v7738_v16  ;;  %4329 = vmatprep.subr.bf16.mxu0 %v7740_v57  ;;  %v9013_v16 = vld [vmem:[#allocation68_spill] sm:$0xff]  ;;  %v9014_v57 = vld [vmem:[#allocation69_spill] sm:$0xff] }
 0xd55   :  { %4289 = vmatpush1.bf16.msra.mxu1 %v7744_v12  ;;  %4330 = vmatpush1.bf16.msra.mxu0 %v7746_v34  ;;  %v9015_v12 = vld [vmem:[#allocation70_spill] sm:$0xff]  ;;  %v9016_v34 = vld [vmem:[#allocation71_spill] sm:$0xff] }
 0xd56   :  { %4290 = vmatprep.subr.bf16.mxu1 %v7750_v33  ;;  %4331 = vmatprep.subr.bf16.mxu0 %v7752_v56  ;;  %v9017_v33 = vld [vmem:[#allocation72_spill] sm:$0xff]  ;;  %v9018_v56 = vld [vmem:[#allocation73_spill] sm:$0xff] }
 0xd59   :  { %4291 = vmatpush1.bf16.msra.mxu1 %v7758_v46  ;;  %4332 = vmatpush1.bf16.msra.mxu0 %v7760_v37  ;;  %v9019_v46 = vld [vmem:[#allocation74_spill] sm:$0xff]  ;;  %v9020_v37 = vld [vmem:[#allocation75_spill] sm:$0xff] }
 0xd5a   :  { %4292 = vmatprep.subr.bf16.mxu1 %v7762_v28  ;;  %4333 = vmatprep.subr.bf16.mxu0 %v7764_v40  ;;  %v9021_v28 = vld [vmem:[#allocation76_spill] sm:$0xff]  ;;  %v9022_v40 = vld [vmem:[#allocation77_spill] sm:$0xff] }
 0xd5d   :  { %4293 = vmatpush1.bf16.msra.mxu1 %v7770_v6  ;;  %4334 = vmatpush1.bf16.msra.mxu0 %v7772_v27  ;;  %v9023_v6 = vld [vmem:[#allocation78_spill] sm:$0xff]  ;;  %v9024_v27 = vld [vmem:[#allocation79_spill] sm:$0xff] }
 0xd5e   :  { %4294 = vmatprep.subr.bf16.mxu1 %v7774_v41  ;;  %4335 = vmatprep.subr.bf16.mxu0 %v9010_v63  ;;  %v9025_v41 = vld [vmem:[#allocation80_spill] sm:$0xff] }
 0xd61   :  { %4295 = vmatpush1.bf16.msra.mxu1 %v9011_v10  ;;  %4336 = vmatpush1.bf16.msra.mxu0 %v9012_v26  ;;  %v5198_v26 = vld [vmem:[#allocation14 + $0x28] sm:$0xff]  }
 0xd62   :  { %4296 = vmatprep.subr.bf16.mxu1 %v9013_v16  ;;  %4337 = vmatprep.subr.bf16.mxu0 %v9014_v57 }
 0xd65   :  { %4297 = vmatpush1.bf16.msra.mxu1 %v9015_v12  ;;  %4338 = vmatpush1.bf16.msra.mxu0 %v9016_v34 }
 0xd66   :  { %4298 = vmatprep.subr.bf16.mxu1 %v9017_v33  ;;  %4339 = vmatprep.subr.bf16.mxu0 %v9018_v56 }
 0xd69   :  { %4299 = vmatpush1.bf16.msra.mxu1 %v9019_v46  ;;  %4340 = vmatpush1.bf16.msra.mxu0 %v9020_v37 }
 0xd6a   :  { %4300 = vmatprep.subr.bf16.mxu1 %v9021_v28  ;;  %4341 = vmatprep.subr.bf16.mxu0 %v9022_v40 }
 0xd6d   :  { %4301 = vmatpush1.bf16.msra.mxu1 %v9023_v6  ;;  %4342 = vmatpush1.bf16.msra.mxu0 %v9024_v27 }
 0xd6e   :  { %4302 = vmatprep.subr.bf16.mxu1 %v9025_v41  ;;  %4343 = vmatprep.subr.bf16.mxu0 %v9026_v32 }
 0xd71   :  { %4303 = vmatpush1.bf16.msra.mxu1 %v9027_v4  ;;  %4344 = vmatpush1.bf16.msra.mxu0 %v9028_v52 }
 0xd72   :  { %4304 = vmatprep.subr.bf16.mxu1 %v9029_v20  ;;  %4345 = vmatprep.subr.bf16.mxu0 %v9030_v38 }
 0xd75   :  { %4305 = vmatpush1.bf16.msra.mxu1 %v9031_v5  ;;  %4346 = vmatpush1.bf16.msra.mxu0 %v9032_v55 }
 0xd76   :  { %4306 = vmatprep.subr.bf16.mxu1 %v9033_v43  ;;  %4347 = vmatprep.subr.bf16.mxu0 %v9034_v30 }
 0xd79   :  { %4307 = vmatpush1.bf16.msra.mxu1 %v9035_v36  ;;  %4348 = vmatpush1.bf16.msra.mxu0 %v9036_v53 }
 0xd7a   :  { %4308 = vmatprep.subr.bf16.mxu1 %v9037_v62  ;;  %4349 = vmatprep.subr.bf16.mxu0 %v9038_v50 }
 0xd7d   :  { %4309 = vmatpush1.bf16.msra.mxu1 %v9039_v39  ;;  %4350 = vmatpush1.bf16.msra.mxu0 %v9040_v45 }
 0xd7e   :  { %4310 = vmatprep.subr.bf16.mxu1 %v9041_v49  ;;  %4351 = vmatprep.subr.bf16.mxu0 %v9042_v9 }
 0xd81   :  { %4311 = vmatpush1.bf16.msra.mxu1 %v9043_v35  ;;  %4352 = vmatpush1.bf16.msra.mxu0 %v9044_v23 }
 0xd82   :  { %4312 = vmatprep.subr.bf16.mxu1 %v9045_v54  ;;  %4353 = vmatprep.subr.bf16.mxu0 %v9046_v8  ;;  %v5199_v8 = vld [vmem:[#allocation14 + $0x30] sm:$0xff]  }
 0xd85   :  { %4313 = vmatpush1.bf16.msra.mxu1 %v7890_v47  ;;  %4354 = vmatpush1.bf16.msra.mxu0 %v9047_v19  ;;  %v5190_v47 = vld [vmem:[#allocation13 + $0x28] sm:$0xff]   ;;  %v5200_v19 = vld [vmem:[#allocation14 + $0x38] sm:$0xff]  }
 0xd86   :  { %4314 = vmatprep.subr.bf16.mxu1 %v9048_v14  ;;  %4355 = vmatprep.subr.bf16.mxu0 %v7896_v42  ;;  %v5185_v42 = vld [vmem:[#allocation13] sm:$0xff]  }
 0xd89   :  { %4315 = vmatpush1.bf16.msra.mxu1 %v7902_v11  ;;  %4356 = vmatpush1.bf16.msra.mxu0 %v7904_v60  ;;  %v5187_v11 = vld [vmem:[#allocation13 + $0x10] sm:$0xff]   ;;  %v5188_v60 = vld [vmem:[#allocation13 + $0x18] sm:$0xff]  }
 0xd8a   :  { %4316 = vmatprep.subr.bf16.mxu1 %v7906_v31  ;;  %4357 = vmatprep.subr.bf16.mxu0 %v7908_v44  ;;  %v5186_v44 = vld [vmem:[#allocation13 + $0x8] sm:$0xff]   ;;  %v5189_v31 = vld [vmem:[#allocation13 + $0x20] sm:$0xff]  }
 0xd8d   :  { %4317 = vmatpush1.bf16.msra.mxu1 %v7914_v48  ;;  %4358 = vmatpush1.bf16.msra.mxu0 %v7916_v59  ;;  %v5191_v48 = vld [vmem:[#allocation13 + $0x30] sm:$0xff]   ;;  %v5192_v59 = vld [vmem:[#allocation13 + $0x38] sm:$0xff]  }
 0xd8e   :  { %4942 = vmatprep.subr.bf16.mxu1 %v9049_v22  ;;  %4962 = vmatprep.subr.bf16.mxu0 %v9049_v22 }
 0xd90   :  { %4319 = vmatmul.mubr.bf16.vlgmr.msra.gmra.mrb[72].mxu1 %v8004_v18  ;;  %4360 = vmatmul.mubr.bf16.vlgmr.msra.gmra.mrb[76].mxu0 %v8004_v18 }
 0xd91   :  { %4958 = vmatprep.mubr.msk.bf16.mxu1 %vm5522_vm0, %v9049_v22  ;;  %4978 = vmatprep.mubr.msk.bf16.mxu0 %vm5522_vm0, %v9049_v22 }
 0xd92   :  { %4943 = vmatpush3.bf16.msra.mxu1 %v5185_v42  ;;  %4963 = vmatpush3.bf16.msra.mxu0 %v5193_v2 }
 0xd93   :  { %4944 = vmatprep.subr.bf16.mxu1 %v9049_v22  ;;  %4964 = vmatprep.subr.bf16.mxu0 %v9049_v22 }
 0xd96   :  { %4945 = vmatpush3.bf16.msra.mxu1 %v5186_v44  ;;  %4965 = vmatpush3.bf16.msra.mxu0 %v5194_v13 }
 0xd97   :  { %4946 = vmatprep.subr.bf16.mxu1 %v9049_v22  ;;  %4966 = vmatprep.subr.bf16.mxu0 %v9049_v22 }
 0xd9a   :  { %4947 = vmatpush3.bf16.msra.mxu1 %v5187_v11  ;;  %4967 = vmatpush3.bf16.msra.mxu0 %v5195_v25  ;;  %v9050_v25 = vld [vmem:[#allocation28_spill] sm:$0xff] }
 0xd9b   :  { %4948 = vmatprep.subr.bf16.mxu1 %v9049_v22  ;;  %4968 = vmatprep.subr.bf16.mxu0 %v9049_v22 }
 0xd9e   :  { %4949 = vmatpush3.bf16.msra.mxu1 %v5188_v60  ;;  %4969 = vmatpush3.bf16.msra.mxu0 %v5196_v1 }
 0xd9f   :  { %4950 = vmatprep.subr.bf16.mxu1 %v9049_v22  ;;  %4970 = vmatprep.subr.bf16.mxu0 %v9049_v22 }
 0xda2   :  { %4951 = vmatpush3.bf16.msra.mxu1 %v5189_v31  ;;  %4971 = vmatpush3.bf16.msra.mxu0 %v5197_v15 }
 0xda3   :  { %4952 = vmatprep.subr.bf16.mxu1 %v9049_v22  ;;  %4972 = vmatprep.subr.bf16.mxu0 %v9049_v22 }
 0xda6   :  { %4953 = vmatpush3.bf16.msra.mxu1 %v5190_v47  ;;  %4973 = vmatpush3.bf16.msra.mxu0 %v5198_v26 }
 0xda7   :  { %4954 = vmatprep.subr.bf16.mxu1 %v9049_v22  ;;  %4974 = vmatprep.subr.bf16.mxu0 %v9049_v22 }
 0xdaa   :  { %4955 = vmatpush3.bf16.msra.mxu1 %v5191_v48  ;;  %4975 = vmatpush3.bf16.msra.mxu0 %v5199_v8  ;;  %v4834_v48 = vld [vmem:[%s8149_s15] ss:$0 sm:$0xff] }
 0xdab   :  { %4956 = vmatprep.subr.bf16.mxu1 %v9049_v22  ;;  %4976 = vmatprep.subr.bf16.mxu0 %v9049_v22 }
 0xdae   :  { %4957 = vmatpush3.bf16.msra.mxu1 %v5192_v59  ;;  %4977 = vmatpush3.bf16.msra.mxu0 %v5200_v19 }
 0xe23   :  { %v4238_v0 = vpop.f32.mrb[68].mxu1  ;;  %v4279_v17 = vpop.f32.mrb[72].mxu0 }
 0xe24   :  { %v4240_v51 = vpop.f32.mrb[69].mxu1  ;;  %v4281_v3 = vpop.f32.mrb[73].mxu0  ;;  %v4372_v16 = vrot.slane %v4238_v0, 1  ;;  %v4374_v57 = vrot.slane %v4279_v17, 1 }
 0xe25   :  { %v4242_v29 = vpop.f32.mrb[70].mxu1  ;;  %v4283_v18 = vpop.f32.mrb[74].mxu0  ;;  %v4373_v12 = vrot.slane %v4240_v51, 1  ;;  %v4375_v34 = vrot.slane %v4281_v3, 1 }
 0xe26   :  { %v4243_v63 = vpop.f32.mrb[71].mxu1  ;;  %v4284_v10 = vpop.f32.mrb[75].mxu0 }
 0xe63   :  { %v4320_v33 = vpop.f32.mrb[72].mxu1  ;;  %v4361_v56 = vpop.f32.mrb[76].mxu0 }
 0xe64   :  { %v4380_v46 = vadd.f32 %v4372_v16, %v4320_v33  ;;  %v4382_v37 = vadd.f32 %v4374_v57, %v4361_v56  ;;  %v4322_v28 = vpop.f32.mrb[73].mxu1  ;;  %v4363_v40 = vpop.f32.mrb[77].mxu0 }
 0xe65   :  { %v4381_v6 = vadd.f32 %v4373_v12, %v4322_v28  ;;  %v4383_v27 = vadd.f32 %v4375_v34, %v4363_v40  ;;  %v4324_v41 = vpop.f32.mrb[74].mxu1  ;;  %v4365_v32 = vpop.f32.mrb[78].mxu0 }
 0xe66   :  { %v4384_v4 = vadd.f32 %v4380_v46, %v6292_v58  ;;  %v4325_v52 = vpop.f32.mrb[75].mxu1  ;;  %v4366_v20 = vpop.f32.mrb[79].mxu0  ;;  %v4386_v55 = vadd.f32 %v4382_v37, %v6307_v21 }
 0xe67   :  { %v4385_v38 = vadd.f32 %v4381_v6, %v6296_v7  ;;  %v4387_v5 = vadd.f32 %v4383_v27, %v6300_v61 }
 0xe68   :  { %5303 = vtanh.f32 %v4384_v4 }
 0xe69   :  { %5305 = vtanh.f32 %v4385_v38 }
 0xe6a   :  { %5307 = vtanh.f32 %v4387_v5 }
 0xe6b   :  { %5309 = vtanh.f32 %v4386_v55 }
 0xe72   :  { %v5304_v43 = vpop.eup %5303 }
 0xe73   :  { %v4392_v30 = vmul.f32 0.5, %v5304_v43  ;;  %v5306_v36 = vpop.eup %5305 }
 0xe74   :  { %v4393_v62 = vmul.f32 0.5, %v5306_v36  ;;  %v5308_v50 = vpop.eup %5307 }
 0xe75   :  { %v4395_v53 = vadd.f32 0.5, %v4392_v30  ;;  %v5310_v7 = vpop.eup %5309 }
 0xe76   :  { %v4396_v39 = vadd.f32 0.5, %v4393_v62  ;;  %v4394_v9 = vmul.f32 0.5, %v5310_v7 }
 0xe77   :  { %v4399_v58 = vmul.f32 %v5308_v50, %v4395_v53 }
 0xe78   :  { %v4398_v45 = vmul.f32 %v4396_v39, %v7997_v24  ;;  %v4397_v61 = vadd.f32 0.5, %v4394_v9  ;;  %v4825_v24 = vld [vmem:[%s8147_s13] ss:$0 sm:$0xff] }
 0xe7a   :  { %v4400_v49 = vadd.f32 %v4399_v58, %v4398_v45 }
 0xe7c   :  { %5311 = vtanh.f32 %v4400_v49 }
 0xe86   :  { %v5312_v35 = vpop.eup %5311 }
 0xe87   :  { %v4402_v23 = vmul.f32 %v5312_v35, %v4397_v61 }
 0xe89   :  { %4403 = vst [vmem:[#allocation16 + $0x7] sm:$0x1] %v4402_v23 }
 0xe90   :  { %v4404_v21 = vld [vmem:[#allocation16] sm:$0xff] }
 0xe91   :  { %v4405_v54 = vpack.c.bf16 %v4404_v21, %v4404_v21 }
 0xe93   :  { %4959 = vmatmul.mubr.bf16.vlgmr.msra.gmra.mrb[76].mxu1 %v4405_v54 }
 0xf66   :  { %v4511_v14 = vpop.f32.mrb[76].mxu1 }
 0xf67   :  { %v4512_v42 = vadd.f32 %v4825_v24, %v4511_v14  ;;  %v4960_v44 = vpop.f32.mrb[77].mxu1 }
 0xf68   :  { %v4514_v11 = vpop.f32.mrb[78].mxu1 }
 0xf69   :  { %v4517_v60 = vmax.f32 %v4512_v42, 0.0  ;;  %v4961_v31 = vpop.f32.mrb[79].mxu1 }
 0xf6b   :  { %v4518_v47 = vpack.c.bf16 %v4517_v60, %v4517_v60 }
 0xf6d   :  { %4979 = vmatmul.mubr.bf16.vlgmr.msra.gmra.mrb[80].mxu0 %v4518_v47 }
0x1040   :  { %v4624_v59 = vpop.f32.mrb[80].mxu0 }
0x1041   :  { %v4625_v22 = vadd.f32 %v4834_v48, %v4624_v59  ;;  %v4980_v2 = vpop.f32.mrb[81].mxu0 }
0x1042   :  { %v4627_v13 = vpop.f32.mrb[82].mxu0 }
0x1043   :  { %v4630_v1 = vadd.f32 %v4625_v22, %v9050_v25  ;;  %v4632_v15 = vrot.slane %v4625_v22, 4  ;;  %v4981_v0 = vpop.f32.mrb[83].mxu0 }
0x1045   :  { %4631 = vst [vmem:[%s8150_s16] sm:$0xff] %v4630_v1  ;;  %v4633_v17 = vadd.f32 %v4632_v15, %v4625_v22 }
0x1047   :  { %v4634_v51 = vrot.slane %v4633_v17, 2 }
0x1049   :  { %v4635_v3 = vadd.f32 %v4634_v51, %v4633_v17 }
0x104a   :  { %5456 = shalt.err (!%p5453_p10)
}
0x104b   :  { %s5457_s5 = scalar_lea.hbm %s8151_s17, 128 }
0x104c   :  { %p5458_p11 = scmp.ne.s32.totalorder %s8151_s17, %s5457_s5  ;;  %p5461_p12 = scmp.lt.u32.totalorder %s5457_s5, %s8151_s17 }
0x104e   :  { %p5463_p13 = pnand %p5461_p12, %p5458_p11 }
0x1050   :  { %5466 = shalt.err (!%p5463_p13)
}
0x1051   :  { %4659 = dma.vmem_to_hbm [thread:$0]  %s4657_s7, 128, %s8151_s17, [#allocation7]   ;;  %v4636_v29 = vrot.slane %v4635_v3, 1  ;;  %v9051_v26 = vld [vmem:[#allocation31_spill] sm:$0xff]  ;;  %v9052_v57 = vld [vmem:[#allocation29_spill] sm:$0xff] }
0x1052   :  { %s5526_s3 = smov [#allocation17]  }
0x1053   :  { %v4637_v18 = vadd.f32 %v4636_v29, %v4635_v3  ;;  %s4666_s10 = sshll.u32 %s5526_s3, 4  ;;  %s4667_s10 = int_to_ptr.vmem [resolvable:$true] %s4666_s10 }
0x1054   :  { %s5467_s23 = scalar_lea.vmem %s4667_s10, 128  ;;  %p5472_p1 = scmp.lt.s32.totalorder %s4667_s10, %s4667_s10 }
0x1055   :  { %v4639_v63 = vmul.f32 0.125, %v4637_v18  ;;  %p5468_p0 = scmp.ne.s32.totalorder %s4667_s10, %s5467_s23  ;;  %p5473_p2 = scmp.lt.s32.totalorder %s5467_s23, %s5467_s23 }
0x1057   :  { %4640 = vrot.lane.b32.xlu0 %v4639_v63, %s5504_s2  ;;  %p5474_p3 = por %p5473_p2, %p5472_p1 }
0x1059   :  { %p5475_p4 = pnand %p5474_p3, %p5468_p0 }
0x10c9   :  { %v4641_v10 = vpop.permute.xlu0 %4640 }
0x10ca   :  { %v4645_v16 = vrot.slane %v4641_v10, %v9051_v26 }
0x10cc   :  { %v4646_v12 = vadd.f32 %v4645_v16, %v9052_v57 }
0x10ce   :  { %4647 = vst [vmem:[#allocation17] sm:$0xff] %v4646_v12 }
0x10cf   :  { %5478 = shalt.err (!%p5475_p4)
}
0x10d0   :  { %s9053_s18 = sld [smem:[#allocation107_spill]] }
0x10d6   :  { %s5479_s2 = scalar_lea.hbm %s9053_s18, 128 }
0x10d7   :  { %p5480_p5 = scmp.ne.s32.totalorder %s9053_s18, %s5479_s2  ;;  %p5483_p6 = scmp.lt.u32.totalorder %s5479_s2, %s9053_s18 }
0x10d9   :  { %p5485_p7 = pnand %p5483_p6, %p5480_p5 }
0x10db   :  { %5488 = shalt.err (!%p5485_p7)
}
0x10dc   :  { %4669 = dma.vmem_to_hbm [thread:$0]  %s4667_s10, 128, %s9053_s18, [#allocation18]  }
0x10dd   :  { %5499 = dma.done.wait [#allocation7], 128  }
0x10de   :  { %5500 = vsyncadd [#allocation7], 4294967168 }
0x10df   :  { %5501 = dma.done.wait [#allocation18], 128  }
0x10e0   :  { %5502 = vsyncadd [#allocation18], 4294967168 }
0x10e1   :  { %4678 = vsyncpa [#allocation6], 1 }
0x10e2   :  { %4679 = vsyncpa [#allocation9], 1 }
0x10e3   :  { %4680 = vsyncpa [#allocation12], 1 }
0x10e4   :  { %4681 = vsyncpa [#allocation15], 1 }
0x10e5   :  { %4682 = vsyncpa [#allocation7], 1 }
0x10e6   :  { %4683 = vsyncpa [#allocation18], 1 }
0x10e7   :  { %4684 = vsyncmov [#allocation4] }
0x10ea   :  { %s4685_s11 = vpop.sfrf %4684 }
0x10eb   :  { %p4843_p8 = scmp.ne.s32.totalorder %s4685_s11, 0 }
0x10ed   :  { %4689 = shalt.err (%p4843_p8)  }

</bundles_post_ra>
